<compile_context>
chip_gen: v7x
topology: tpu7x:2x2x1
jax: 0.10.0
libtpu: 0.0.40
codegen_flags: <defaults>
</compile_context>

<pallas_src>
from functools import partial

import jax
import jax.numpy as jnp
from jax.experimental import pallas as pl
from jax.experimental.pallas import tpu as pltpu

K = 3  # 3x3 kernels for both transposed convs

# Polyphase tap tables for a stride-2, padding-1, K=3 transposed conv.
# Along one axis, output index o gets contributions o = 2*h - 1 + kh.
#   Dense input, o = 2*m + t  ->  taps (dm, k) with h = m + dm:
_DENSE_TAPS = {0: ((0, 1),),
               1: ((1, 0), (0, 2))}
#   Phase-separated input (parity u, slab row a), output q = 4*a + qp
#   -> taps (u, da, k) reading slab-parity u at row a + da:
_PHASE_TAPS = {0: ((0, 0, 1),),
               1: ((1, 0, 0), (0, 0, 2)),
               2: ((1, 0, 1),),
               3: ((0, 1, 0), (1, 0, 2))}


def _fused_convtranspose2_relu_kernel(x_ref, w0_ref, b0_ref, w1_ref, b1_ref,
                                      out_ref, y1_ref, *, c0, c1, c2, ah, aw):
    # x_ref  : (c0, ah+1, aw+1) VMEM  -- one zero-padded input image
    # w0_ref : (c0*c1*K*K,) SMEM      -- ConvTranspose2d weights [ci, co, kh, kw]
    # b0_ref : (c1,) SMEM
    # w1_ref : (c1*c2*K*K,) SMEM
    # b1_ref : (c2,) SMEM
    # out_ref: (c2*16, ah, aw) VMEM   -- plane (co*4+qp)*4+rp holds output phase
    #                                    out[co, 4a+qp, 4b+rp] = out_ref[plane, a, b]
    # y1_ref : (4*c1, >=ah+1, >=aw+1) VMEM scratch -- y1 phase slabs,
    #                                    plane (u*2+v)*c1 + c = y1[c, 2a+u, 2b+v]
    y1_ref[...] = jnp.zeros(y1_ref.shape, jnp.float32)

    # ---- layer 1: x -> y1 phases (polyphase transposed conv + bias + ReLU) ----
    # hoisted shifted input windows, shared by all phases & output channels
    xwin = {(dm, dn, ci): x_ref[ci, dm:dm + ah, dn:dn + aw]
            for dm in (0, 1) for dn in (0, 1) for ci in range(c0)}
    for u in (0, 1):
        for v in (0, 1):
            for co in range(c1):
                acc = jnp.zeros((ah, aw), jnp.float32) + b0_ref[co]
                for dm, kh in _DENSE_TAPS[u]:
                    for dn, kw in _DENSE_TAPS[v]:
                        for ci in range(c0):
                            wgt = w0_ref[((ci * c1 + co) * K + kh) * K + kw]
                            acc = acc + xwin[(dm, dn, ci)] * wgt
                y1_ref[(u * 2 + v) * c1 + co, 0:ah, 0:aw] = jnp.maximum(acc, 0.0)

    # ---- layer 2: y1 phases -> 16 composed output phases (+ bias + ReLU) ----
    # hoisted shifted y1 windows (read after all layer-1 stores), reused over co
    ywin = {(u, da, v, db, ci): y1_ref[(u * 2 + v) * c1 + ci,
                                       da:da + ah, db:db + aw]
            for (u, da) in ((0, 0), (0, 1), (1, 0))
            for (v, db) in ((0, 0), (0, 1), (1, 0))
            for ci in range(c1)}
    for qp in range(4):
        for rp in range(4):
            for co in range(c2):
                acc = jnp.zeros((ah, aw), jnp.float32) + b1_ref[co]
                for u, da, kh in _PHASE_TAPS[qp]:
                    for v, db, kw in _PHASE_TAPS[rp]:
                        for ci in range(c1):
                            wgt = w1_ref[((ci * c2 + co) * K + kh) * K + kw]
                            acc = acc + ywin[(u, da, v, db, ci)] * wgt
                out_ref[(co * 4 + qp) * 4 + rp, :, :] = jnp.maximum(acc, 0.0)


def forward(x, params):
    """x: (N, 3, H, W) -> (N, 3, 4H-3, 4W-3); two fused ConvTranspose2d+ReLU."""
    w0f, b0, w1f, b1 = params          # weights pre-flattened at init
    N, C0, H, W = x.shape
    C1, C2 = b0.shape[0], b1.shape[0]
    ah, aw = H, W                      # per-phase (a, b) grid sizes
    ho2, wo2 = 4 * H - 3, 4 * W - 3    # final output spatial dims (61, 61)

    # one trailing zero row/col lets every layer-1 phase be computed on a
    # uniform (ah, aw) grid; out-of-range values only reach cropped outputs.
    xp = jnp.pad(x, ((0, 0), (0, 0), (0, 1), (0, 1)))

    scratch_rows = ((ah + 1 + 7) // 8) * 8
    scratch_cols = ((aw + 1 + 127) // 128) * 128

    kernel = partial(_fused_convtranspose2_relu_kernel,
                     c0=C0, c1=C1, c2=C2, ah=ah, aw=aw)
    o_ph = pl.pallas_call(
        kernel,
        out_shape=jax.ShapeDtypeStruct((N, C2 * 16, ah, aw), jnp.float32),
        grid=(N,),
        in_specs=[
            pl.BlockSpec((None, C0, H + 1, W + 1), lambda n: (n, 0, 0, 0)),
            pl.BlockSpec(memory_space=pltpu.SMEM),
            pl.BlockSpec(memory_space=pltpu.SMEM),
            pl.BlockSpec(memory_space=pltpu.SMEM),
            pl.BlockSpec(memory_space=pltpu.SMEM),
        ],
        out_specs=pl.BlockSpec((None, C2 * 16, ah, aw), lambda n: (n, 0, 0, 0)),
        scratch_shapes=[pltpu.VMEM((4 * C1, scratch_rows, scratch_cols),
                                   jnp.float32)],
        compiler_params=pltpu.CompilerParams(dimension_semantics=("parallel",)),
    )(xp, w0f, b0, w1f, b1)

    # interleave the 16 phases: out[n, co, 4a+qp, 4b+rp] = o_ph[n, (co*4+qp)*4+rp, a, b]
    o = o_ph.reshape(N, C2, 4, 4, ah, aw)
    o = jnp.transpose(o, (0, 1, 4, 2, 5, 3)).reshape(N, C2, 4 * ah, 4 * aw)
    return o[:, :, :ho2, :wo2]


def init_params(key):
    k0, k1, k2, k3 = jax.random.split(key, 4)
    # conv_0 = ConvTranspose2d(3, 2, 3): weight (3, 2, 3, 3), bias (2,)
    w0 = jax.random.normal(k0, (3, 2, K, K), jnp.float32) * 0.2
    b0 = jax.random.normal(k1, (2,), jnp.float32) * 0.1
    # conv_1 = ConvTranspose2d(2, 3, 3): weight (2, 3, 3, 3), bias (3,)
    w1 = jax.random.normal(k2, (2, 3, K, K), jnp.float32) * 0.2
    b1 = jax.random.normal(k3, (3,), jnp.float32) * 0.1
    return w0, b0, w1, b1


def _ref_conv_transpose_relu(x, w_pt, b, *, stride, padding):
    # pure-JAX reference (XLA conv with lhs dilation) for correctness check
    pad = K - 1 - padding
    w_eff = jnp.transpose(w_pt[:, :, ::-1, ::-1], (1, 0, 2, 3))  # (O, I, kh, kw)
    y = jax.lax.conv_general_dilated(
        x, w_eff, window_strides=(1, 1),
        padding=[(pad, pad), (pad, pad)], lhs_dilation=(stride, stride),
        dimension_numbers=("NCHW", "OIHW", "NCHW"))
    return jnp.maximum(y + b[None, :, None, None], 0.0)


if __name__ == "__main__":
    key = jax.random.PRNGKey(0)
    kx, kp = jax.random.split(key)
    w0, b0, w1, b1 = init_params(kp)

    # x: (N=2, C=3, H=16, W=16)  ->  y1: (2, 2, 31, 31)  ->  out: (2, 3, 61, 61)
    x = jax.random.normal(kx, (2, 3, 16, 16), jnp.float32)

    # kernel-ready params precomputed once (no per-call weight reshuffling)
    params = (w0.reshape(-1), b0, w1.reshape(-1), b1)

    fwd = jax.jit(forward)
    out = jax.block_until_ready(fwd(x, params))
    assert out.shape == (2, 3, 61, 61), out.shape

    # correctness check against a pure-JAX/XLA reference
    y1_ref = _ref_conv_transpose_relu(x, w0, b0, stride=2, padding=1)
    out_ref = _ref_conv_transpose_relu(y1_ref, w1, b1, stride=2, padding=1)
    assert jnp.allclose(out, out_ref, atol=1e-4, rtol=1e-4), \
        float(jnp.max(jnp.abs(out - out_ref)))

    print("KERNEL_OK")
</pallas_src>

<mosaic_0001>
module attributes {stable_mosaic.version = 11 : i64} {
  func.func @_fused_convtranspose2_relu_kernel(%arg0: i32, %arg1: memref<1x3x17x17xf32, #tpu.memory_space<vmem>>, %arg2: memref<54xf32, #tpu.memory_space<smem>>, %arg3: memref<2xf32, #tpu.memory_space<smem>>, %arg4: memref<54xf32, #tpu.memory_space<smem>>, %arg5: memref<3xf32, #tpu.memory_space<smem>>, %arg6: memref<1x48x16x16xf32, #tpu.memory_space<vmem>>, %arg7: memref<8x24x128xf32, #tpu.memory_space<vmem>>) attributes {dimension_semantics = [#tpu.dimension_semantics<parallel>], iteration_bounds = array<i64: 2>, scalar_prefetch = 0 : i64, scratch_operands = 1 : i64, tpu.core_type = #tpu.core_type<tc>, window_params = [{transform_indices = @transform_0, window_bounds = array<i64: 1, 3, 17, 17>}, {transform_indices = @transform_1, window_bounds = array<i64: 54>}, {transform_indices = @transform_2, window_bounds = array<i64: 2>}, {transform_indices = @transform_3, window_bounds = array<i64: 54>}, {transform_indices = @transform_4, window_bounds = array<i64: 3>}, {transform_indices = @transform_5, window_bounds = array<i64: 1, 48, 16, 16>}]} {
    %cst = arith.constant 0.000000e+00 : f32
    %0 = vector.broadcast %cst : f32 to vector<8x24x128xf32>
    %c0 = arith.constant 0 : index
    %c0_0 = arith.constant 0 : index
    %c0_1 = arith.constant 0 : index
    %1 = vector.load %arg7[%c0, %c0_0, %c0_1] : memref<8x24x128xf32, #tpu.memory_space<vmem>>, vector<8x24x128xf32>
    tpu.vector_store %arg7[%c0, %c0_0, %c0_1], %0 {strides = array<i32>} : memref<8x24x128xf32, #tpu.memory_space<vmem>>, vector<8x24x128xf32>,
    %c0_2 = arith.constant 0 : index
    %c0_3 = arith.constant 0 : index
    %c0_4 = arith.constant 0 : index
    %c0_5 = arith.constant 0 : index
    %2 = vector.load %arg1[%c0_2, %c0_3, %c0_4, %c0_5] : memref<1x3x17x17xf32, #tpu.memory_space<vmem>>, vector<1x1x16x16xf32>
    %3 = vector.shape_cast %2 : vector<1x1x16x16xf32> to vector<16x16xf32>
    %c0_6 = arith.constant 0 : index
    %c1 = arith.constant 1 : index
    %c0_7 = arith.constant 0 : index
    %c0_8 = arith.constant 0 : index
    %4 = vector.load %arg1[%c0_6, %c1, %c0_7, %c0_8] : memref<1x3x17x17xf32, #tpu.memory_space<vmem>>, vector<1x1x16x16xf32>
    %5 = vector.shape_cast %4 : vector<1x1x16x16xf32> to vector<16x16xf32>
    %c0_9 = arith.constant 0 : index
    %c2 = arith.constant 2 : index
    %c0_10 = arith.constant 0 : index
    %c0_11 = arith.constant 0 : index
    %6 = vector.load %arg1[%c0_9, %c2, %c0_10, %c0_11] : memref<1x3x17x17xf32, #tpu.memory_space<vmem>>, vector<1x1x16x16xf32>
    %7 = vector.shape_cast %6 : vector<1x1x16x16xf32> to vector<16x16xf32>
    %c0_12 = arith.constant 0 : index
    %c0_13 = arith.constant 0 : index
    %c0_14 = arith.constant 0 : index
    %c1_15 = arith.constant 1 : index
    %8 = vector.load %arg1[%c0_12, %c0_13, %c0_14, %c1_15] : memref<1x3x17x17xf32, #tpu.memory_space<vmem>>, vector<1x1x16x16xf32>
    %9 = vector.shape_cast %8 : vector<1x1x16x16xf32> to vector<16x16xf32>
    %c0_16 = arith.constant 0 : index
    %c1_17 = arith.constant 1 : index
    %c0_18 = arith.constant 0 : index
    %c1_19 = arith.constant 1 : index
    %10 = vector.load %arg1[%c0_16, %c1_17, %c0_18, %c1_19] : memref<1x3x17x17xf32, #tpu.memory_space<vmem>>, vector<1x1x16x16xf32>
    %11 = vector.shape_cast %10 : vector<1x1x16x16xf32> to vector<16x16xf32>
    %c0_20 = arith.constant 0 : index
    %c2_21 = arith.constant 2 : index
    %c0_22 = arith.constant 0 : index
    %c1_23 = arith.constant 1 : index
    %12 = vector.load %arg1[%c0_20, %c2_21, %c0_22, %c1_23] : memref<1x3x17x17xf32, #tpu.memory_space<vmem>>, vector<1x1x16x16xf32>
    %13 = vector.shape_cast %12 : vector<1x1x16x16xf32> to vector<16x16xf32>
    %c0_24 = arith.constant 0 : index
    %c0_25 = arith.constant 0 : index
    %c1_26 = arith.constant 1 : index
    %c0_27 = arith.constant 0 : index
    %14 = vector.load %arg1[%c0_24, %c0_25, %c1_26, %c0_27] : memref<1x3x17x17xf32, #tpu.memory_space<vmem>>, vector<1x1x16x16xf32>
    %15 = vector.shape_cast %14 : vector<1x1x16x16xf32> to vector<16x16xf32>
    %c0_28 = arith.constant 0 : index
    %c1_29 = arith.constant 1 : index
    %c1_30 = arith.constant 1 : index
    %c0_31 = arith.constant 0 : index
    %16 = vector.load %arg1[%c0_28, %c1_29, %c1_30, %c0_31] : memref<1x3x17x17xf32, #tpu.memory_space<vmem>>, vector<1x1x16x16xf32>
    %17 = vector.shape_cast %16 : vector<1x1x16x16xf32> to vector<16x16xf32>
    %c0_32 = arith.constant 0 : index
    %c2_33 = arith.constant 2 : index
    %c1_34 = arith.constant 1 : index
    %c0_35 = arith.constant 0 : index
    %18 = vector.load %arg1[%c0_32, %c2_33, %c1_34, %c0_35] : memref<1x3x17x17xf32, #tpu.memory_space<vmem>>, vector<1x1x16x16xf32>
    %19 = vector.shape_cast %18 : vector<1x1x16x16xf32> to vector<16x16xf32>
    %c0_36 = arith.constant 0 : index
    %c0_37 = arith.constant 0 : index
    %c1_38 = arith.constant 1 : index
    %c1_39 = arith.constant 1 : index
    %20 = vector.load %arg1[%c0_36, %c0_37, %c1_38, %c1_39] : memref<1x3x17x17xf32, #tpu.memory_space<vmem>>, vector<1x1x16x16xf32>
    %21 = vector.shape_cast %20 : vector<1x1x16x16xf32> to vector<16x16xf32>
    %c0_40 = arith.constant 0 : index
    %c1_41 = arith.constant 1 : index
    %c1_42 = arith.constant 1 : index
    %c1_43 = arith.constant 1 : index
    %22 = vector.load %arg1[%c0_40, %c1_41, %c1_42, %c1_43] : memref<1x3x17x17xf32, #tpu.memory_space<vmem>>, vector<1x1x16x16xf32>
    %23 = vector.shape_cast %22 : vector<1x1x16x16xf32> to vector<16x16xf32>
    %c0_44 = arith.constant 0 : index
    %c2_45 = arith.constant 2 : index
    %c1_46 = arith.constant 1 : index
    %c1_47 = arith.constant 1 : index
    %24 = vector.load %arg1[%c0_44, %c2_45, %c1_46, %c1_47] : memref<1x3x17x17xf32, #tpu.memory_space<vmem>>, vector<1x1x16x16xf32>
    %25 = vector.shape_cast %24 : vector<1x1x16x16xf32> to vector<16x16xf32>
    %cst_48 = arith.constant 0.000000e+00 : f32
    %26 = vector.broadcast %cst_48 : f32 to vector<16x16xf32>
    %c0_49 = arith.constant 0 : index
    %27 = memref.load %arg3[%c0_49] : memref<2xf32, #tpu.memory_space<smem>>
    %28 = vector.broadcast %27 : f32 to vector<16x16xf32>
    %29 = arith.addf %26, %28 : vector<16x16xf32>
    %c4 = arith.constant 4 : index
    %30 = memref.load %arg2[%c4] : memref<54xf32, #tpu.memory_space<smem>>
    %31 = vector.broadcast %30 : f32 to vector<16x16xf32>
    %32 = arith.mulf %3, %31 : vector<16x16xf32>
    %33 = arith.addf %29, %32 : vector<16x16xf32>
    %c22 = arith.constant 22 : index
    %34 = memref.load %arg2[%c22] : memref<54xf32, #tpu.memory_space<smem>>
    %35 = vector.broadcast %34 : f32 to vector<16x16xf32>
    %36 = arith.mulf %5, %35 : vector<16x16xf32>
    %37 = arith.addf %33, %36 : vector<16x16xf32>
    %c40 = arith.constant 40 : index
    %38 = memref.load %arg2[%c40] : memref<54xf32, #tpu.memory_space<smem>>
    %39 = vector.broadcast %38 : f32 to vector<16x16xf32>
    %40 = arith.mulf %7, %39 : vector<16x16xf32>
    %41 = arith.addf %37, %40 : vector<16x16xf32>
    %cst_50 = arith.constant 0.000000e+00 : f32
    %42 = vector.broadcast %cst_50 : f32 to vector<16x16xf32>
    %43 = arith.maximumf %41, %42 : vector<16x16xf32>
    %c0_51 = arith.constant 0 : index
    %c0_52 = arith.constant 0 : index
    %c0_53 = arith.constant 0 : index
    %44 = vector.load %arg7[%c0_51, %c0_52, %c0_53] : memref<8x24x128xf32, #tpu.memory_space<vmem>>, vector<1x16x16xf32>
    %45 = vector.shape_cast %44 : vector<1x16x16xf32> to vector<16x16xf32>
    %46 = vector.shape_cast %43 : vector<16x16xf32> to vector<1x16x16xf32>
    tpu.vector_store %arg7[%c0_51, %c0_52, %c0_53], %46 {strides = array<i32>} : memref<8x24x128xf32, #tpu.memory_space<vmem>>, vector<1x16x16xf32>,
    %cst_54 = arith.constant 0.000000e+00 : f32
    %47 = vector.broadcast %cst_54 : f32 to vector<16x16xf32>
    %c1_55 = arith.constant 1 : index
    %48 = memref.load %arg3[%c1_55] : memref<2xf32, #tpu.memory_space<smem>>
    %49 = vector.broadcast %48 : f32 to vector<16x16xf32>
    %50 = arith.addf %47, %49 : vector<16x16xf32>
    %c13 = arith.constant 13 : index
    %51 = memref.load %arg2[%c13] : memref<54xf32, #tpu.memory_space<smem>>
    %52 = vector.broadcast %51 : f32 to vector<16x16xf32>
    %53 = arith.mulf %3, %52 : vector<16x16xf32>
    %54 = arith.addf %50, %53 : vector<16x16xf32>
    %c31 = arith.constant 31 : index
    %55 = memref.load %arg2[%c31] : memref<54xf32, #tpu.memory_space<smem>>
    %56 = vector.broadcast %55 : f32 to vector<16x16xf32>
    %57 = arith.mulf %5, %56 : vector<16x16xf32>
    %58 = arith.addf %54, %57 : vector<16x16xf32>
    %c49 = arith.constant 49 : index
    %59 = memref.load %arg2[%c49] : memref<54xf32, #tpu.memory_space<smem>>
    %60 = vector.broadcast %59 : f32 to vector<16x16xf32>
    %61 = arith.mulf %7, %60 : vector<16x16xf32>
    %62 = arith.addf %58, %61 : vector<16x16xf32>
    %cst_56 = arith.constant 0.000000e+00 : f32
    %63 = vector.broadcast %cst_56 : f32 to vector<16x16xf32>
    %64 = arith.maximumf %62, %63 : vector<16x16xf32>
    %c1_57 = arith.constant 1 : index
    %c0_58 = arith.constant 0 : index
    %c0_59 = arith.constant 0 : index
    %65 = vector.load %arg7[%c1_57, %c0_58, %c0_59] : memref<8x24x128xf32, #tpu.memory_space<vmem>>, vector<1x16x16xf32>
    %66 = vector.shape_cast %65 : vector<1x16x16xf32> to vector<16x16xf32>
    %67 = vector.shape_cast %64 : vector<16x16xf32> to vector<1x16x16xf32>
    tpu.vector_store %arg7[%c1_57, %c0_58, %c0_59], %67 {strides = array<i32>} : memref<8x24x128xf32, #tpu.memory_space<vmem>>, vector<1x16x16xf32>,
    %cst_60 = arith.constant 0.000000e+00 : f32
    %68 = vector.broadcast %cst_60 : f32 to vector<16x16xf32>
    %c0_61 = arith.constant 0 : index
    %69 = memref.load %arg3[%c0_61] : memref<2xf32, #tpu.memory_space<smem>>
    %70 = vector.broadcast %69 : f32 to vector<16x16xf32>
    %71 = arith.addf %68, %70 : vector<16x16xf32>
    %c3 = arith.constant 3 : index
    %72 = memref.load %arg2[%c3] : memref<54xf32, #tpu.memory_space<smem>>
    %73 = vector.broadcast %72 : f32 to vector<16x16xf32>
    %74 = arith.mulf %9, %73 : vector<16x16xf32>
    %75 = arith.addf %71, %74 : vector<16x16xf32>
    %c21 = arith.constant 21 : index
    %76 = memref.load %arg2[%c21] : memref<54xf32, #tpu.memory_space<smem>>
    %77 = vector.broadcast %76 : f32 to vector<16x16xf32>
    %78 = arith.mulf %11, %77 : vector<16x16xf32>
    %79 = arith.addf %75, %78 : vector<16x16xf32>
    %c39 = arith.constant 39 : index
    %80 = memref.load %arg2[%c39] : memref<54xf32, #tpu.memory_space<smem>>
    %81 = vector.broadcast %80 : f32 to vector<16x16xf32>
    %82 = arith.mulf %13, %81 : vector<16x16xf32>
    %83 = arith.addf %79, %82 : vector<16x16xf32>
    %c5 = arith.constant 5 : index
    %84 = memref.load %arg2[%c5] : memref<54xf32, #tpu.memory_space<smem>>
    %85 = vector.broadcast %84 : f32 to vector<16x16xf32>
    %86 = arith.mulf %3, %85 : vector<16x16xf32>
    %87 = arith.addf %83, %86 : vector<16x16xf32>
    %c23 = arith.constant 23 : index
    %88 = memref.load %arg2[%c23] : memref<54xf32, #tpu.memory_space<smem>>
    %89 = vector.broadcast %88 : f32 to vector<16x16xf32>
    %90 = arith.mulf %5, %89 : vector<16x16xf32>
    %91 = arith.addf %87, %90 : vector<16x16xf32>
    %c41 = arith.constant 41 : index
    %92 = memref.load %arg2[%c41] : memref<54xf32, #tpu.memory_space<smem>>
    %93 = vector.broadcast %92 : f32 to vector<16x16xf32>
    %94 = arith.mulf %7, %93 : vector<16x16xf32>
    %95 = arith.addf %91, %94 : vector<16x16xf32>
    %cst_62 = arith.constant 0.000000e+00 : f32
    %96 = vector.broadcast %cst_62 : f32 to vector<16x16xf32>
    %97 = arith.maximumf %95, %96 : vector<16x16xf32>
    %c2_63 = arith.constant 2 : index
    %c0_64 = arith.constant 0 : index
    %c0_65 = arith.constant 0 : index
    %98 = vector.load %arg7[%c2_63, %c0_64, %c0_65] : memref<8x24x128xf32, #tpu.memory_space<vmem>>, vector<1x16x16xf32>
    %99 = vector.shape_cast %98 : vector<1x16x16xf32> to vector<16x16xf32>
    %100 = vector.shape_cast %97 : vector<16x16xf32> to vector<1x16x16xf32>
    tpu.vector_store %arg7[%c2_63, %c0_64, %c0_65], %100 {strides = array<i32>} : memref<8x24x128xf32, #tpu.memory_space<vmem>>, vector<1x16x16xf32>,
    %cst_66 = arith.constant 0.000000e+00 : f32
    %101 = vector.broadcast %cst_66 : f32 to vector<16x16xf32>
    %c1_67 = arith.constant 1 : index
    %102 = memref.load %arg3[%c1_67] : memref<2xf32, #tpu.memory_space<smem>>
    %103 = vector.broadcast %102 : f32 to vector<16x16xf32>
    %104 = arith.addf %101, %103 : vector<16x16xf32>
    %c12 = arith.constant 12 : index
    %105 = memref.load %arg2[%c12] : memref<54xf32, #tpu.memory_space<smem>>
    %106 = vector.broadcast %105 : f32 to vector<16x16xf32>
    %107 = arith.mulf %9, %106 : vector<16x16xf32>
    %108 = arith.addf %104, %107 : vector<16x16xf32>
    %c30 = arith.constant 30 : index
    %109 = memref.load %arg2[%c30] : memref<54xf32, #tpu.memory_space<smem>>
    %110 = vector.broadcast %109 : f32 to vector<16x16xf32>
    %111 = arith.mulf %11, %110 : vector<16x16xf32>
    %112 = arith.addf %108, %111 : vector<16x16xf32>
    %c48 = arith.constant 48 : index
    %113 = memref.load %arg2[%c48] : memref<54xf32, #tpu.memory_space<smem>>
    %114 = vector.broadcast %113 : f32 to vector<16x16xf32>
    %115 = arith.mulf %13, %114 : vector<16x16xf32>
    %116 = arith.addf %112, %115 : vector<16x16xf32>
    %c14 = arith.constant 14 : index
    %117 = memref.load %arg2[%c14] : memref<54xf32, #tpu.memory_space<smem>>
    %118 = vector.broadcast %117 : f32 to vector<16x16xf32>
    %119 = arith.mulf %3, %118 : vector<16x16xf32>
    %120 = arith.addf %116, %119 : vector<16x16xf32>
    %c32 = arith.constant 32 : index
    %121 = memref.load %arg2[%c32] : memref<54xf32, #tpu.memory_space<smem>>
    %122 = vector.broadcast %121 : f32 to vector<16x16xf32>
    %123 = arith.mulf %5, %122 : vector<16x16xf32>
    %124 = arith.addf %120, %123 : vector<16x16xf32>
    %c50 = arith.constant 50 : index
    %125 = memref.load %arg2[%c50] : memref<54xf32, #tpu.memory_space<smem>>
    %126 = vector.broadcast %125 : f32 to vector<16x16xf32>
    %127 = arith.mulf %7, %126 : vector<16x16xf32>
    %128 = arith.addf %124, %127 : vector<16x16xf32>
    %cst_68 = arith.constant 0.000000e+00 : f32
    %129 = vector.broadcast %cst_68 : f32 to vector<16x16xf32>
    %130 = arith.maximumf %128, %129 : vector<16x16xf32>
    %c3_69 = arith.constant 3 : index
    %c0_70 = arith.constant 0 : index
    %c0_71 = arith.constant 0 : index
    %131 = vector.load %arg7[%c3_69, %c0_70, %c0_71] : memref<8x24x128xf32, #tpu.memory_space<vmem>>, vector<1x16x16xf32>
    %132 = vector.shape_cast %131 : vector<1x16x16xf32> to vector<16x16xf32>
    %133 = vector.shape_cast %130 : vector<16x16xf32> to vector<1x16x16xf32>
    tpu.vector_store %arg7[%c3_69, %c0_70, %c0_71], %133 {strides = array<i32>} : memref<8x24x128xf32, #tpu.memory_space<vmem>>, vector<1x16x16xf32>,
    %cst_72 = arith.constant 0.000000e+00 : f32
    %134 = vector.broadcast %cst_72 : f32 to vector<16x16xf32>
    %c0_73 = arith.constant 0 : index
    %135 = memref.load %arg3[%c0_73] : memref<2xf32, #tpu.memory_space<smem>>
    %136 = vector.broadcast %135 : f32 to vector<16x16xf32>
    %137 = arith.addf %134, %136 : vector<16x16xf32>
    %c1_74 = arith.constant 1 : index
    %138 = memref.load %arg2[%c1_74] : memref<54xf32, #tpu.memory_space<smem>>
    %139 = vector.broadcast %138 : f32 to vector<16x16xf32>
    %140 = arith.mulf %15, %139 : vector<16x16xf32>
    %141 = arith.addf %137, %140 : vector<16x16xf32>
    %c19 = arith.constant 19 : index
    %142 = memref.load %arg2[%c19] : memref<54xf32, #tpu.memory_space<smem>>
    %143 = vector.broadcast %142 : f32 to vector<16x16xf32>
    %144 = arith.mulf %17, %143 : vector<16x16xf32>
    %145 = arith.addf %141, %144 : vector<16x16xf32>
    %c37 = arith.constant 37 : index
    %146 = memref.load %arg2[%c37] : memref<54xf32, #tpu.memory_space<smem>>
    %147 = vector.broadcast %146 : f32 to vector<16x16xf32>
    %148 = arith.mulf %19, %147 : vector<16x16xf32>
    %149 = arith.addf %145, %148 : vector<16x16xf32>
    %c7 = arith.constant 7 : index
    %150 = memref.load %arg2[%c7] : memref<54xf32, #tpu.memory_space<smem>>
    %151 = vector.broadcast %150 : f32 to vector<16x16xf32>
    %152 = arith.mulf %3, %151 : vector<16x16xf32>
    %153 = arith.addf %149, %152 : vector<16x16xf32>
    %c25 = arith.constant 25 : index
    %154 = memref.load %arg2[%c25] : memref<54xf32, #tpu.memory_space<smem>>
    %155 = vector.broadcast %154 : f32 to vector<16x16xf32>
    %156 = arith.mulf %5, %155 : vector<16x16xf32>
    %157 = arith.addf %153, %156 : vector<16x16xf32>
    %c43 = arith.constant 43 : index
    %158 = memref.load %arg2[%c43] : memref<54xf32, #tpu.memory_space<smem>>
    %159 = vector.broadcast %158 : f32 to vector<16x16xf32>
    %160 = arith.mulf %7, %159 : vector<16x16xf32>
    %161 = arith.addf %157, %160 : vector<16x16xf32>
    %cst_75 = arith.constant 0.000000e+00 : f32
    %162 = vector.broadcast %cst_75 : f32 to vector<16x16xf32>
    %163 = arith.maximumf %161, %162 : vector<16x16xf32>
    %c4_76 = arith.constant 4 : index
    %c0_77 = arith.constant 0 : index
    %c0_78 = arith.constant 0 : index
    %164 = vector.load %arg7[%c4_76, %c0_77, %c0_78] : memref<8x24x128xf32, #tpu.memory_space<vmem>>, vector<1x16x16xf32>
    %165 = vector.shape_cast %164 : vector<1x16x16xf32> to vector<16x16xf32>
    %166 = vector.shape_cast %163 : vector<16x16xf32> to vector<1x16x16xf32>
    tpu.vector_store %arg7[%c4_76, %c0_77, %c0_78], %166 {strides = array<i32>} : memref<8x24x128xf32, #tpu.memory_space<vmem>>, vector<1x16x16xf32>,
    %cst_79 = arith.constant 0.000000e+00 : f32
    %167 = vector.broadcast %cst_79 : f32 to vector<16x16xf32>
    %c1_80 = arith.constant 1 : index
    %168 = memref.load %arg3[%c1_80] : memref<2xf32, #tpu.memory_space<smem>>
    %169 = vector.broadcast %168 : f32 to vector<16x16xf32>
    %170 = arith.addf %167, %169 : vector<16x16xf32>
    %c10 = arith.constant 10 : index
    %171 = memref.load %arg2[%c10] : memref<54xf32, #tpu.memory_space<smem>>
    %172 = vector.broadcast %171 : f32 to vector<16x16xf32>
    %173 = arith.mulf %15, %172 : vector<16x16xf32>
    %174 = arith.addf %170, %173 : vector<16x16xf32>
    %c28 = arith.constant 28 : index
    %175 = memref.load %arg2[%c28] : memref<54xf32, #tpu.memory_space<smem>>
    %176 = vector.broadcast %175 : f32 to vector<16x16xf32>
    %177 = arith.mulf %17, %176 : vector<16x16xf32>
    %178 = arith.addf %174, %177 : vector<16x16xf32>
    %c46 = arith.constant 46 : index
    %179 = memref.load %arg2[%c46] : memref<54xf32, #tpu.memory_space<smem>>
    %180 = vector.broadcast %179 : f32 to vector<16x16xf32>
    %181 = arith.mulf %19, %180 : vector<16x16xf32>
    %182 = arith.addf %178, %181 : vector<16x16xf32>
    %c16 = arith.constant 16 : index
    %183 = memref.load %arg2[%c16] : memref<54xf32, #tpu.memory_space<smem>>
    %184 = vector.broadcast %183 : f32 to vector<16x16xf32>
    %185 = arith.mulf %3, %184 : vector<16x16xf32>
    %186 = arith.addf %182, %185 : vector<16x16xf32>
    %c34 = arith.constant 34 : index
    %187 = memref.load %arg2[%c34] : memref<54xf32, #tpu.memory_space<smem>>
    %188 = vector.broadcast %187 : f32 to vector<16x16xf32>
    %189 = arith.mulf %5, %188 : vector<16x16xf32>
    %190 = arith.addf %186, %189 : vector<16x16xf32>
    %c52 = arith.constant 52 : index
    %191 = memref.load %arg2[%c52] : memref<54xf32, #tpu.memory_space<smem>>
    %192 = vector.broadcast %191 : f32 to vector<16x16xf32>
    %193 = arith.mulf %7, %192 : vector<16x16xf32>
    %194 = arith.addf %190, %193 : vector<16x16xf32>
    %cst_81 = arith.constant 0.000000e+00 : f32
    %195 = vector.broadcast %cst_81 : f32 to vector<16x16xf32>
    %196 = arith.maximumf %194, %195 : vector<16x16xf32>
    %c5_82 = arith.constant 5 : index
    %c0_83 = arith.constant 0 : index
    %c0_84 = arith.constant 0 : index
    %197 = vector.load %arg7[%c5_82, %c0_83, %c0_84] : memref<8x24x128xf32, #tpu.memory_space<vmem>>, vector<1x16x16xf32>
    %198 = vector.shape_cast %197 : vector<1x16x16xf32> to vector<16x16xf32>
    %199 = vector.shape_cast %196 : vector<16x16xf32> to vector<1x16x16xf32>
    tpu.vector_store %arg7[%c5_82, %c0_83, %c0_84], %199 {strides = array<i32>} : memref<8x24x128xf32, #tpu.memory_space<vmem>>, vector<1x16x16xf32>,
    %cst_85 = arith.constant 0.000000e+00 : f32
    %200 = vector.broadcast %cst_85 : f32 to vector<16x16xf32>
    %c0_86 = arith.constant 0 : index
    %201 = memref.load %arg3[%c0_86] : memref<2xf32, #tpu.memory_space<smem>>
    %202 = vector.broadcast %201 : f32 to vector<16x16xf32>
    %203 = arith.addf %200, %202 : vector<16x16xf32>
    %c0_87 = arith.constant 0 : index
    %204 = memref.load %arg2[%c0_87] : memref<54xf32, #tpu.memory_space<smem>>
    %205 = vector.broadcast %204 : f32 to vector<16x16xf32>
    %206 = arith.mulf %21, %205 : vector<16x16xf32>
    %207 = arith.addf %203, %206 : vector<16x16xf32>
    %c18 = arith.constant 18 : index
    %208 = memref.load %arg2[%c18] : memref<54xf32, #tpu.memory_space<smem>>
    %209 = vector.broadcast %208 : f32 to vector<16x16xf32>
    %210 = arith.mulf %23, %209 : vector<16x16xf32>
    %211 = arith.addf %207, %210 : vector<16x16xf32>
    %c36 = arith.constant 36 : index
    %212 = memref.load %arg2[%c36] : memref<54xf32, #tpu.memory_space<smem>>
    %213 = vector.broadcast %212 : f32 to vector<16x16xf32>
    %214 = arith.mulf %25, %213 : vector<16x16xf32>
    %215 = arith.addf %211, %214 : vector<16x16xf32>
    %c2_88 = arith.constant 2 : index
    %216 = memref.load %arg2[%c2_88] : memref<54xf32, #tpu.memory_space<smem>>
    %217 = vector.broadcast %216 : f32 to vector<16x16xf32>
    %218 = arith.mulf %15, %217 : vector<16x16xf32>
    %219 = arith.addf %215, %218 : vector<16x16xf32>
    %c20 = arith.constant 20 : index
    %220 = memref.load %arg2[%c20] : memref<54xf32, #tpu.memory_space<smem>>
    %221 = vector.broadcast %220 : f32 to vector<16x16xf32>
    %222 = arith.mulf %17, %221 : vector<16x16xf32>
    %223 = arith.addf %219, %222 : vector<16x16xf32>
    %c38 = arith.constant 38 : index
    %224 = memref.load %arg2[%c38] : memref<54xf32, #tpu.memory_space<smem>>
    %225 = vector.broadcast %224 : f32 to vector<16x16xf32>
    %226 = arith.mulf %19, %225 : vector<16x16xf32>
    %227 = arith.addf %223, %226 : vector<16x16xf32>
    %c6 = arith.constant 6 : index
    %228 = memref.load %arg2[%c6] : memref<54xf32, #tpu.memory_space<smem>>
    %229 = vector.broadcast %228 : f32 to vector<16x16xf32>
    %230 = arith.mulf %9, %229 : vector<16x16xf32>
    %231 = arith.addf %227, %230 : vector<16x16xf32>
    %c24 = arith.constant 24 : index
    %232 = memref.load %arg2[%c24] : memref<54xf32, #tpu.memory_space<smem>>
    %233 = vector.broadcast %232 : f32 to vector<16x16xf32>
    %234 = arith.mulf %11, %233 : vector<16x16xf32>
    %235 = arith.addf %231, %234 : vector<16x16xf32>
    %c42 = arith.constant 42 : index
    %236 = memref.load %arg2[%c42] : memref<54xf32, #tpu.memory_space<smem>>
    %237 = vector.broadcast %236 : f32 to vector<16x16xf32>
    %238 = arith.mulf %13, %237 : vector<16x16xf32>
    %239 = arith.addf %235, %238 : vector<16x16xf32>
    %c8 = arith.constant 8 : index
    %240 = memref.load %arg2[%c8] : memref<54xf32, #tpu.memory_space<smem>>
    %241 = vector.broadcast %240 : f32 to vector<16x16xf32>
    %242 = arith.mulf %3, %241 : vector<16x16xf32>
    %243 = arith.addf %239, %242 : vector<16x16xf32>
    %c26 = arith.constant 26 : index
    %244 = memref.load %arg2[%c26] : memref<54xf32, #tpu.memory_space<smem>>
    %245 = vector.broadcast %244 : f32 to vector<16x16xf32>
    %246 = arith.mulf %5, %245 : vector<16x16xf32>
    %247 = arith.addf %243, %246 : vector<16x16xf32>
    %c44 = arith.constant 44 : index
    %248 = memref.load %arg2[%c44] : memref<54xf32, #tpu.memory_space<smem>>
    %249 = vector.broadcast %248 : f32 to vector<16x16xf32>
    %250 = arith.mulf %7, %249 : vector<16x16xf32>
    %251 = arith.addf %247, %250 : vector<16x16xf32>
    %cst_89 = arith.constant 0.000000e+00 : f32
    %252 = vector.broadcast %cst_89 : f32 to vector<16x16xf32>
    %253 = arith.maximumf %251, %252 : vector<16x16xf32>
    %c6_90 = arith.constant 6 : index
    %c0_91 = arith.constant 0 : index
    %c0_92 = arith.constant 0 : index
    %254 = vector.load %arg7[%c6_90, %c0_91, %c0_92] : memref<8x24x128xf32, #tpu.memory_space<vmem>>, vector<1x16x16xf32>
    %255 = vector.shape_cast %254 : vector<1x16x16xf32> to vector<16x16xf32>
    %256 = vector.shape_cast %253 : vector<16x16xf32> to vector<1x16x16xf32>
    tpu.vector_store %arg7[%c6_90, %c0_91, %c0_92], %256 {strides = array<i32>} : memref<8x24x128xf32, #tpu.memory_space<vmem>>, vector<1x16x16xf32>,
    %cst_93 = arith.constant 0.000000e+00 : f32
    %257 = vector.broadcast %cst_93 : f32 to vector<16x16xf32>
    %c1_94 = arith.constant 1 : index
    %258 = memref.load %arg3[%c1_94] : memref<2xf32, #tpu.memory_space<smem>>
    %259 = vector.broadcast %258 : f32 to vector<16x16xf32>
    %260 = arith.addf %257, %259 : vector<16x16xf32>
    %c9 = arith.constant 9 : index
    %261 = memref.load %arg2[%c9] : memref<54xf32, #tpu.memory_space<smem>>
    %262 = vector.broadcast %261 : f32 to vector<16x16xf32>
    %263 = arith.mulf %21, %262 : vector<16x16xf32>
    %264 = arith.addf %260, %263 : vector<16x16xf32>
    %c27 = arith.constant 27 : index
    %265 = memref.load %arg2[%c27] : memref<54xf32, #tpu.memory_space<smem>>
    %266 = vector.broadcast %265 : f32 to vector<16x16xf32>
    %267 = arith.mulf %23, %266 : vector<16x16xf32>
    %268 = arith.addf %264, %267 : vector<16x16xf32>
    %c45 = arith.constant 45 : index
    %269 = memref.load %arg2[%c45] : memref<54xf32, #tpu.memory_space<smem>>
    %270 = vector.broadcast %269 : f32 to vector<16x16xf32>
    %271 = arith.mulf %25, %270 : vector<16x16xf32>
    %272 = arith.addf %268, %271 : vector<16x16xf32>
    %c11 = arith.constant 11 : index
    %273 = memref.load %arg2[%c11] : memref<54xf32, #tpu.memory_space<smem>>
    %274 = vector.broadcast %273 : f32 to vector<16x16xf32>
    %275 = arith.mulf %15, %274 : vector<16x16xf32>
    %276 = arith.addf %272, %275 : vector<16x16xf32>
    %c29 = arith.constant 29 : index
    %277 = memref.load %arg2[%c29] : memref<54xf32, #tpu.memory_space<smem>>
    %278 = vector.broadcast %277 : f32 to vector<16x16xf32>
    %279 = arith.mulf %17, %278 : vector<16x16xf32>
    %280 = arith.addf %276, %279 : vector<16x16xf32>
    %c47 = arith.constant 47 : index
    %281 = memref.load %arg2[%c47] : memref<54xf32, #tpu.memory_space<smem>>
    %282 = vector.broadcast %281 : f32 to vector<16x16xf32>
    %283 = arith.mulf %19, %282 : vector<16x16xf32>
    %284 = arith.addf %280, %283 : vector<16x16xf32>
    %c15 = arith.constant 15 : index
    %285 = memref.load %arg2[%c15] : memref<54xf32, #tpu.memory_space<smem>>
    %286 = vector.broadcast %285 : f32 to vector<16x16xf32>
    %287 = arith.mulf %9, %286 : vector<16x16xf32>
    %288 = arith.addf %284, %287 : vector<16x16xf32>
    %c33 = arith.constant 33 : index
    %289 = memref.load %arg2[%c33] : memref<54xf32, #tpu.memory_space<smem>>
    %290 = vector.broadcast %289 : f32 to vector<16x16xf32>
    %291 = arith.mulf %11, %290 : vector<16x16xf32>
    %292 = arith.addf %288, %291 : vector<16x16xf32>
    %c51 = arith.constant 51 : index
    %293 = memref.load %arg2[%c51] : memref<54xf32, #tpu.memory_space<smem>>
    %294 = vector.broadcast %293 : f32 to vector<16x16xf32>
    %295 = arith.mulf %13, %294 : vector<16x16xf32>
    %296 = arith.addf %292, %295 : vector<16x16xf32>
    %c17 = arith.constant 17 : index
    %297 = memref.load %arg2[%c17] : memref<54xf32, #tpu.memory_space<smem>>
    %298 = vector.broadcast %297 : f32 to vector<16x16xf32>
    %299 = arith.mulf %3, %298 : vector<16x16xf32>
    %300 = arith.addf %296, %299 : vector<16x16xf32>
    %c35 = arith.constant 35 : index
    %301 = memref.load %arg2[%c35] : memref<54xf32, #tpu.memory_space<smem>>
    %302 = vector.broadcast %301 : f32 to vector<16x16xf32>
    %303 = arith.mulf %5, %302 : vector<16x16xf32>
    %304 = arith.addf %300, %303 : vector<16x16xf32>
    %c53 = arith.constant 53 : index
    %305 = memref.load %arg2[%c53] : memref<54xf32, #tpu.memory_space<smem>>
    %306 = vector.broadcast %305 : f32 to vector<16x16xf32>
    %307 = arith.mulf %7, %306 : vector<16x16xf32>
    %308 = arith.addf %304, %307 : vector<16x16xf32>
    %cst_95 = arith.constant 0.000000e+00 : f32
    %309 = vector.broadcast %cst_95 : f32 to vector<16x16xf32>
    %310 = arith.maximumf %308, %309 : vector<16x16xf32>
    %c7_96 = arith.constant 7 : index
    %c0_97 = arith.constant 0 : index
    %c0_98 = arith.constant 0 : index
    %311 = vector.load %arg7[%c7_96, %c0_97, %c0_98] : memref<8x24x128xf32, #tpu.memory_space<vmem>>, vector<1x16x16xf32>
    %312 = vector.shape_cast %311 : vector<1x16x16xf32> to vector<16x16xf32>
    %313 = vector.shape_cast %310 : vector<16x16xf32> to vector<1x16x16xf32>
    tpu.vector_store %arg7[%c7_96, %c0_97, %c0_98], %313 {strides = array<i32>} : memref<8x24x128xf32, #tpu.memory_space<vmem>>, vector<1x16x16xf32>,
    %c0_99 = arith.constant 0 : index
    %c0_100 = arith.constant 0 : index
    %c0_101 = arith.constant 0 : index
    %314 = vector.load %arg7[%c0_99, %c0_100, %c0_101] : memref<8x24x128xf32, #tpu.memory_space<vmem>>, vector<1x16x16xf32>
    %315 = vector.shape_cast %314 : vector<1x16x16xf32> to vector<16x16xf32>
    %c1_102 = arith.constant 1 : index
    %c0_103 = arith.constant 0 : index
    %c0_104 = arith.constant 0 : index
    %316 = vector.load %arg7[%c1_102, %c0_103, %c0_104] : memref<8x24x128xf32, #tpu.memory_space<vmem>>, vector<1x16x16xf32>
    %317 = vector.shape_cast %316 : vector<1x16x16xf32> to vector<16x16xf32>
    %c0_105 = arith.constant 0 : index
    %c0_106 = arith.constant 0 : index
    %c1_107 = arith.constant 1 : index
    %318 = vector.load %arg7[%c0_105, %c0_106, %c1_107] : memref<8x24x128xf32, #tpu.memory_space<vmem>>, vector<1x16x16xf32>
    %319 = vector.shape_cast %318 : vector<1x16x16xf32> to vector<16x16xf32>
    %c1_108 = arith.constant 1 : index
    %c0_109 = arith.constant 0 : index
    %c1_110 = arith.constant 1 : index
    %320 = vector.load %arg7[%c1_108, %c0_109, %c1_110] : memref<8x24x128xf32, #tpu.memory_space<vmem>>, vector<1x16x16xf32>
    %321 = vector.shape_cast %320 : vector<1x16x16xf32> to vector<16x16xf32>
    %c2_111 = arith.constant 2 : index
    %c0_112 = arith.constant 0 : index
    %c0_113 = arith.constant 0 : index
    %322 = vector.load %arg7[%c2_111, %c0_112, %c0_113] : memref<8x24x128xf32, #tpu.memory_space<vmem>>, vector<1x16x16xf32>
    %323 = vector.shape_cast %322 : vector<1x16x16xf32> to vector<16x16xf32>
    %c3_114 = arith.constant 3 : index
    %c0_115 = arith.constant 0 : index
    %c0_116 = arith.constant 0 : index
    %324 = vector.load %arg7[%c3_114, %c0_115, %c0_116] : memref<8x24x128xf32, #tpu.memory_space<vmem>>, vector<1x16x16xf32>
    %325 = vector.shape_cast %324 : vector<1x16x16xf32> to vector<16x16xf32>
    %c0_117 = arith.constant 0 : index
    %c1_118 = arith.constant 1 : index
    %c0_119 = arith.constant 0 : index
    %326 = vector.load %arg7[%c0_117, %c1_118, %c0_119] : memref<8x24x128xf32, #tpu.memory_space<vmem>>, vector<1x16x16xf32>
    %327 = vector.shape_cast %326 : vector<1x16x16xf32> to vector<16x16xf32>
    %c1_120 = arith.constant 1 : index
    %c1_121 = arith.constant 1 : index
    %c0_122 = arith.constant 0 : index
    %328 = vector.load %arg7[%c1_120, %c1_121, %c0_122] : memref<8x24x128xf32, #tpu.memory_space<vmem>>, vector<1x16x16xf32>
    %329 = vector.shape_cast %328 : vector<1x16x16xf32> to vector<16x16xf32>
    %c0_123 = arith.constant 0 : index
    %c1_124 = arith.constant 1 : index
    %c1_125 = arith.constant 1 : index
    %330 = vector.load %arg7[%c0_123, %c1_124, %c1_125] : memref<8x24x128xf32, #tpu.memory_space<vmem>>, vector<1x16x16xf32>
    %331 = vector.shape_cast %330 : vector<1x16x16xf32> to vector<16x16xf32>
    %c1_126 = arith.constant 1 : index
    %c1_127 = arith.constant 1 : index
    %c1_128 = arith.constant 1 : index
    %332 = vector.load %arg7[%c1_126, %c1_127, %c1_128] : memref<8x24x128xf32, #tpu.memory_space<vmem>>, vector<1x16x16xf32>
    %333 = vector.shape_cast %332 : vector<1x16x16xf32> to vector<16x16xf32>
    %c2_129 = arith.constant 2 : index
    %c1_130 = arith.constant 1 : index
    %c0_131 = arith.constant 0 : index
    %334 = vector.load %arg7[%c2_129, %c1_130, %c0_131] : memref<8x24x128xf32, #tpu.memory_space<vmem>>, vector<1x16x16xf32>
    %335 = vector.shape_cast %334 : vector<1x16x16xf32> to vector<16x16xf32>
    %c3_132 = arith.constant 3 : index
    %c1_133 = arith.constant 1 : index
    %c0_134 = arith.constant 0 : index
    %336 = vector.load %arg7[%c3_132, %c1_133, %c0_134] : memref<8x24x128xf32, #tpu.memory_space<vmem>>, vector<1x16x16xf32>
    %337 = vector.shape_cast %336 : vector<1x16x16xf32> to vector<16x16xf32>
    %c4_135 = arith.constant 4 : index
    %c0_136 = arith.constant 0 : index
    %c0_137 = arith.constant 0 : index
    %338 = vector.load %arg7[%c4_135, %c0_136, %c0_137] : memref<8x24x128xf32, #tpu.memory_space<vmem>>, vector<1x16x16xf32>
    %339 = vector.shape_cast %338 : vector<1x16x16xf32> to vector<16x16xf32>
    %c5_138 = arith.constant 5 : index
    %c0_139 = arith.constant 0 : index
    %c0_140 = arith.constant 0 : index
    %340 = vector.load %arg7[%c5_138, %c0_139, %c0_140] : memref<8x24x128xf32, #tpu.memory_space<vmem>>, vector<1x16x16xf32>
    %341 = vector.shape_cast %340 : vector<1x16x16xf32> to vector<16x16xf32>
    %c4_141 = arith.constant 4 : index
    %c0_142 = arith.constant 0 : index
    %c1_143 = arith.constant 1 : index
    %342 = vector.load %arg7[%c4_141, %c0_142, %c1_143] : memref<8x24x128xf32, #tpu.memory_space<vmem>>, vector<1x16x16xf32>
    %343 = vector.shape_cast %342 : vector<1x16x16xf32> to vector<16x16xf32>
    %c5_144 = arith.constant 5 : index
    %c0_145 = arith.constant 0 : index
    %c1_146 = arith.constant 1 : index
    %344 = vector.load %arg7[%c5_144, %c0_145, %c1_146] : memref<8x24x128xf32, #tpu.memory_space<vmem>>, vector<1x16x16xf32>
    %345 = vector.shape_cast %344 : vector<1x16x16xf32> to vector<16x16xf32>
    %c6_147 = arith.constant 6 : index
    %c0_148 = arith.constant 0 : index
    %c0_149 = arith.constant 0 : index
    %346 = vector.load %arg7[%c6_147, %c0_148, %c0_149] : memref<8x24x128xf32, #tpu.memory_space<vmem>>, vector<1x16x16xf32>
    %347 = vector.shape_cast %346 : vector<1x16x16xf32> to vector<16x16xf32>
    %c7_150 = arith.constant 7 : index
    %c0_151 = arith.constant 0 : index
    %c0_152 = arith.constant 0 : index
    %348 = vector.load %arg7[%c7_150, %c0_151, %c0_152] : memref<8x24x128xf32, #tpu.memory_space<vmem>>, vector<1x16x16xf32>
    %349 = vector.shape_cast %348 : vector<1x16x16xf32> to vector<16x16xf32>
    %cst_153 = arith.constant 0.000000e+00 : f32
    %350 = vector.broadcast %cst_153 : f32 to vector<16x16xf32>
    %c0_154 = arith.constant 0 : index
    %351 = memref.load %arg5[%c0_154] : memref<3xf32, #tpu.memory_space<smem>>
    %352 = vector.broadcast %351 : f32 to vector<16x16xf32>
    %353 = arith.addf %350, %352 : vector<16x16xf32>
    %c4_155 = arith.constant 4 : index
    %354 = memref.load %arg4[%c4_155] : memref<54xf32, #tpu.memory_space<smem>>
    %355 = vector.broadcast %354 : f32 to vector<16x16xf32>
    %356 = arith.mulf %315, %355 : vector<16x16xf32>
    %357 = arith.addf %353, %356 : vector<16x16xf32>
    %c31_156 = arith.constant 31 : index
    %358 = memref.load %arg4[%c31_156] : memref<54xf32, #tpu.memory_space<smem>>
    %359 = vector.broadcast %358 : f32 to vector<16x16xf32>
    %360 = arith.mulf %317, %359 : vector<16x16xf32>
    %361 = arith.addf %357, %360 : vector<16x16xf32>
    %cst_157 = arith.constant 0.000000e+00 : f32
    %362 = vector.broadcast %cst_157 : f32 to vector<16x16xf32>
    %363 = arith.maximumf %361, %362 : vector<16x16xf32>
    %c0_158 = arith.constant 0 : index
    %c0_159 = arith.constant 0 : index
    %c0_160 = arith.constant 0 : index
    %c0_161 = arith.constant 0 : index
    %364 = vector.load %arg6[%c0_158, %c0_159, %c0_160, %c0_161] : memref<1x48x16x16xf32, #tpu.memory_space<vmem>>, vector<1x1x16x16xf32>
    %365 = vector.shape_cast %364 : vector<1x1x16x16xf32> to vector<16x16xf32>
    %366 = vector.shape_cast %363 : vector<16x16xf32> to vector<1x1x16x16xf32>
    tpu.vector_store %arg6[%c0_158, %c0_159, %c0_160, %c0_161], %366 {strides = array<i32>} : memref<1x48x16x16xf32, #tpu.memory_space<vmem>>, vector<1x1x16x16xf32>,
    %cst_162 = arith.constant 0.000000e+00 : f32
    %367 = vector.broadcast %cst_162 : f32 to vector<16x16xf32>
    %c1_163 = arith.constant 1 : index
    %368 = memref.load %arg5[%c1_163] : memref<3xf32, #tpu.memory_space<smem>>
    %369 = vector.broadcast %368 : f32 to vector<16x16xf32>
    %370 = arith.addf %367, %369 : vector<16x16xf32>
    %c13_164 = arith.constant 13 : index
    %371 = memref.load %arg4[%c13_164] : memref<54xf32, #tpu.memory_space<smem>>
    %372 = vector.broadcast %371 : f32 to vector<16x16xf32>
    %373 = arith.mulf %315, %372 : vector<16x16xf32>
    %374 = arith.addf %370, %373 : vector<16x16xf32>
    %c40_165 = arith.constant 40 : index
    %375 = memref.load %arg4[%c40_165] : memref<54xf32, #tpu.memory_space<smem>>
    %376 = vector.broadcast %375 : f32 to vector<16x16xf32>
    %377 = arith.mulf %317, %376 : vector<16x16xf32>
    %378 = arith.addf %374, %377 : vector<16x16xf32>
    %cst_166 = arith.constant 0.000000e+00 : f32
    %379 = vector.broadcast %cst_166 : f32 to vector<16x16xf32>
    %380 = arith.maximumf %378, %379 : vector<16x16xf32>
    %c0_167 = arith.constant 0 : index
    %c16_168 = arith.constant 16 : index
    %c0_169 = arith.constant 0 : index
    %c0_170 = arith.constant 0 : index
    %381 = vector.load %arg6[%c0_167, %c16_168, %c0_169, %c0_170] : memref<1x48x16x16xf32, #tpu.memory_space<vmem>>, vector<1x1x16x16xf32>
    %382 = vector.shape_cast %381 : vector<1x1x16x16xf32> to vector<16x16xf32>
    %383 = vector.shape_cast %380 : vector<16x16xf32> to vector<1x1x16x16xf32>
    tpu.vector_store %arg6[%c0_167, %c16_168, %c0_169, %c0_170], %383 {strides = array<i32>} : memref<1x48x16x16xf32, #tpu.memory_space<vmem>>, vector<1x1x16x16xf32>,
    %cst_171 = arith.constant 0.000000e+00 : f32
    %384 = vector.broadcast %cst_171 : f32 to vector<16x16xf32>
    %c2_172 = arith.constant 2 : index
    %385 = memref.load %arg5[%c2_172] : memref<3xf32, #tpu.memory_space<smem>>
    %386 = vector.broadcast %385 : f32 to vector<16x16xf32>
    %387 = arith.addf %384, %386 : vector<16x16xf32>
    %c22_173 = arith.constant 22 : index
    %388 = memref.load %arg4[%c22_173] : memref<54xf32, #tpu.memory_space<smem>>
    %389 = vector.broadcast %388 : f32 to vector<16x16xf32>
    %390 = arith.mulf %315, %389 : vector<16x16xf32>
    %391 = arith.addf %387, %390 : vector<16x16xf32>
    %c49_174 = arith.constant 49 : index
    %392 = memref.load %arg4[%c49_174] : memref<54xf32, #tpu.memory_space<smem>>
    %393 = vector.broadcast %392 : f32 to vector<16x16xf32>
    %394 = arith.mulf %317, %393 : vector<16x16xf32>
    %395 = arith.addf %391, %394 : vector<16x16xf32>
    %cst_175 = arith.constant 0.000000e+00 : f32
    %396 = vector.broadcast %cst_175 : f32 to vector<16x16xf32>
    %397 = arith.maximumf %395, %396 : vector<16x16xf32>
    %c0_176 = arith.constant 0 : index
    %c32_177 = arith.constant 32 : index
    %c0_178 = arith.constant 0 : index
    %c0_179 = arith.constant 0 : index
    %398 = vector.load %arg6[%c0_176, %c32_177, %c0_178, %c0_179] : memref<1x48x16x16xf32, #tpu.memory_space<vmem>>, vector<1x1x16x16xf32>
    %399 = vector.shape_cast %398 : vector<1x1x16x16xf32> to vector<16x16xf32>
    %400 = vector.shape_cast %397 : vector<16x16xf32> to vector<1x1x16x16xf32>
    tpu.vector_store %arg6[%c0_176, %c32_177, %c0_178, %c0_179], %400 {strides = array<i32>} : memref<1x48x16x16xf32, #tpu.memory_space<vmem>>, vector<1x1x16x16xf32>,
    %cst_180 = arith.constant 0.000000e+00 : f32
    %401 = vector.broadcast %cst_180 : f32 to vector<16x16xf32>
    %c0_181 = arith.constant 0 : index
    %402 = memref.load %arg5[%c0_181] : memref<3xf32, #tpu.memory_space<smem>>
    %403 = vector.broadcast %402 : f32 to vector<16x16xf32>
    %404 = arith.addf %401, %403 : vector<16x16xf32>
    %c3_182 = arith.constant 3 : index
    %405 = memref.load %arg4[%c3_182] : memref<54xf32, #tpu.memory_space<smem>>
    %406 = vector.broadcast %405 : f32 to vector<16x16xf32>
    %407 = arith.mulf %323, %406 : vector<16x16xf32>
    %408 = arith.addf %404, %407 : vector<16x16xf32>
    %c30_183 = arith.constant 30 : index
    %409 = memref.load %arg4[%c30_183] : memref<54xf32, #tpu.memory_space<smem>>
    %410 = vector.broadcast %409 : f32 to vector<16x16xf32>
    %411 = arith.mulf %325, %410 : vector<16x16xf32>
    %412 = arith.addf %408, %411 : vector<16x16xf32>
    %c5_184 = arith.constant 5 : index
    %413 = memref.load %arg4[%c5_184] : memref<54xf32, #tpu.memory_space<smem>>
    %414 = vector.broadcast %413 : f32 to vector<16x16xf32>
    %415 = arith.mulf %315, %414 : vector<16x16xf32>
    %416 = arith.addf %412, %415 : vector<16x16xf32>
    %c32_185 = arith.constant 32 : index
    %417 = memref.load %arg4[%c32_185] : memref<54xf32, #tpu.memory_space<smem>>
    %418 = vector.broadcast %417 : f32 to vector<16x16xf32>
    %419 = arith.mulf %317, %418 : vector<16x16xf32>
    %420 = arith.addf %416, %419 : vector<16x16xf32>
    %cst_186 = arith.constant 0.000000e+00 : f32
    %421 = vector.broadcast %cst_186 : f32 to vector<16x16xf32>
    %422 = arith.maximumf %420, %421 : vector<16x16xf32>
    %c0_187 = arith.constant 0 : index
    %c1_188 = arith.constant 1 : index
    %c0_189 = arith.constant 0 : index
    %c0_190 = arith.constant 0 : index
    %423 = vector.load %arg6[%c0_187, %c1_188, %c0_189, %c0_190] : memref<1x48x16x16xf32, #tpu.memory_space<vmem>>, vector<1x1x16x16xf32>
    %424 = vector.shape_cast %423 : vector<1x1x16x16xf32> to vector<16x16xf32>
    %425 = vector.shape_cast %422 : vector<16x16xf32> to vector<1x1x16x16xf32>
    tpu.vector_store %arg6[%c0_187, %c1_188, %c0_189, %c0_190], %425 {strides = array<i32>} : memref<1x48x16x16xf32, #tpu.memory_space<vmem>>, vector<1x1x16x16xf32>,
    %cst_191 = arith.constant 0.000000e+00 : f32
    %426 = vector.broadcast %cst_191 : f32 to vector<16x16xf32>
    %c1_192 = arith.constant 1 : index
    %427 = memref.load %arg5[%c1_192] : memref<3xf32, #tpu.memory_space<smem>>
    %428 = vector.broadcast %427 : f32 to vector<16x16xf32>
    %429 = arith.addf %426, %428 : vector<16x16xf32>
    %c12_193 = arith.constant 12 : index
    %430 = memref.load %arg4[%c12_193] : memref<54xf32, #tpu.memory_space<smem>>
    %431 = vector.broadcast %430 : f32 to vector<16x16xf32>
    %432 = arith.mulf %323, %431 : vector<16x16xf32>
    %433 = arith.addf %429, %432 : vector<16x16xf32>
    %c39_194 = arith.constant 39 : index
    %434 = memref.load %arg4[%c39_194] : memref<54xf32, #tpu.memory_space<smem>>
    %435 = vector.broadcast %434 : f32 to vector<16x16xf32>
    %436 = arith.mulf %325, %435 : vector<16x16xf32>
    %437 = arith.addf %433, %436 : vector<16x16xf32>
    %c14_195 = arith.constant 14 : index
    %438 = memref.load %arg4[%c14_195] : memref<54xf32, #tpu.memory_space<smem>>
    %439 = vector.broadcast %438 : f32 to vector<16x16xf32>
    %440 = arith.mulf %315, %439 : vector<16x16xf32>
    %441 = arith.addf %437, %440 : vector<16x16xf32>
    %c41_196 = arith.constant 41 : index
    %442 = memref.load %arg4[%c41_196] : memref<54xf32, #tpu.memory_space<smem>>
    %443 = vector.broadcast %442 : f32 to vector<16x16xf32>
    %444 = arith.mulf %317, %443 : vector<16x16xf32>
    %445 = arith.addf %441, %444 : vector<16x16xf32>
    %cst_197 = arith.constant 0.000000e+00 : f32
    %446 = vector.broadcast %cst_197 : f32 to vector<16x16xf32>
    %447 = arith.maximumf %445, %446 : vector<16x16xf32>
    %c0_198 = arith.constant 0 : index
    %c17_199 = arith.constant 17 : index
    %c0_200 = arith.constant 0 : index
    %c0_201 = arith.constant 0 : index
    %448 = vector.load %arg6[%c0_198, %c17_199, %c0_200, %c0_201] : memref<1x48x16x16xf32, #tpu.memory_space<vmem>>, vector<1x1x16x16xf32>
    %449 = vector.shape_cast %448 : vector<1x1x16x16xf32> to vector<16x16xf32>
    %450 = vector.shape_cast %447 : vector<16x16xf32> to vector<1x1x16x16xf32>
    tpu.vector_store %arg6[%c0_198, %c17_199, %c0_200, %c0_201], %450 {strides = array<i32>} : memref<1x48x16x16xf32, #tpu.memory_space<vmem>>, vector<1x1x16x16xf32>,
    %cst_202 = arith.constant 0.000000e+00 : f32
    %451 = vector.broadcast %cst_202 : f32 to vector<16x16xf32>
    %c2_203 = arith.constant 2 : index
    %452 = memref.load %arg5[%c2_203] : memref<3xf32, #tpu.memory_space<smem>>
    %453 = vector.broadcast %452 : f32 to vector<16x16xf32>
    %454 = arith.addf %451, %453 : vector<16x16xf32>
    %c21_204 = arith.constant 21 : index
    %455 = memref.load %arg4[%c21_204] : memref<54xf32, #tpu.memory_space<smem>>
    %456 = vector.broadcast %455 : f32 to vector<16x16xf32>
    %457 = arith.mulf %323, %456 : vector<16x16xf32>
    %458 = arith.addf %454, %457 : vector<16x16xf32>
    %c48_205 = arith.constant 48 : index
    %459 = memref.load %arg4[%c48_205] : memref<54xf32, #tpu.memory_space<smem>>
    %460 = vector.broadcast %459 : f32 to vector<16x16xf32>
    %461 = arith.mulf %325, %460 : vector<16x16xf32>
    %462 = arith.addf %458, %461 : vector<16x16xf32>
    %c23_206 = arith.constant 23 : index
    %463 = memref.load %arg4[%c23_206] : memref<54xf32, #tpu.memory_space<smem>>
    %464 = vector.broadcast %463 : f32 to vector<16x16xf32>
    %465 = arith.mulf %315, %464 : vector<16x16xf32>
    %466 = arith.addf %462, %465 : vector<16x16xf32>
    %c50_207 = arith.constant 50 : index
    %467 = memref.load %arg4[%c50_207] : memref<54xf32, #tpu.memory_space<smem>>
    %468 = vector.broadcast %467 : f32 to vector<16x16xf32>
    %469 = arith.mulf %317, %468 : vector<16x16xf32>
    %470 = arith.addf %466, %469 : vector<16x16xf32>
    %cst_208 = arith.constant 0.000000e+00 : f32
    %471 = vector.broadcast %cst_208 : f32 to vector<16x16xf32>
    %472 = arith.maximumf %470, %471 : vector<16x16xf32>
    %c0_209 = arith.constant 0 : index
    %c33_210 = arith.constant 33 : index
    %c0_211 = arith.constant 0 : index
    %c0_212 = arith.constant 0 : index
    %473 = vector.load %arg6[%c0_209, %c33_210, %c0_211, %c0_212] : memref<1x48x16x16xf32, #tpu.memory_space<vmem>>, vector<1x1x16x16xf32>
    %474 = vector.shape_cast %473 : vector<1x1x16x16xf32> to vector<16x16xf32>
    %475 = vector.shape_cast %472 : vector<16x16xf32> to vector<1x1x16x16xf32>
    tpu.vector_store %arg6[%c0_209, %c33_210, %c0_211, %c0_212], %475 {strides = array<i32>} : memref<1x48x16x16xf32, #tpu.memory_space<vmem>>, vector<1x1x16x16xf32>,
    %cst_213 = arith.constant 0.000000e+00 : f32
    %476 = vector.broadcast %cst_213 : f32 to vector<16x16xf32>
    %c0_214 = arith.constant 0 : index
    %477 = memref.load %arg5[%c0_214] : memref<3xf32, #tpu.memory_space<smem>>
    %478 = vector.broadcast %477 : f32 to vector<16x16xf32>
    %479 = arith.addf %476, %478 : vector<16x16xf32>
    %c4_215 = arith.constant 4 : index
    %480 = memref.load %arg4[%c4_215] : memref<54xf32, #tpu.memory_space<smem>>
    %481 = vector.broadcast %480 : f32 to vector<16x16xf32>
    %482 = arith.mulf %323, %481 : vector<16x16xf32>
    %483 = arith.addf %479, %482 : vector<16x16xf32>
    %c31_216 = arith.constant 31 : index
    %484 = memref.load %arg4[%c31_216] : memref<54xf32, #tpu.memory_space<smem>>
    %485 = vector.broadcast %484 : f32 to vector<16x16xf32>
    %486 = arith.mulf %325, %485 : vector<16x16xf32>
    %487 = arith.addf %483, %486 : vector<16x16xf32>
    %cst_217 = arith.constant 0.000000e+00 : f32
    %488 = vector.broadcast %cst_217 : f32 to vector<16x16xf32>
    %489 = arith.maximumf %487, %488 : vector<16x16xf32>
    %c0_218 = arith.constant 0 : index
    %c2_219 = arith.constant 2 : index
    %c0_220 = arith.constant 0 : index
    %c0_221 = arith.constant 0 : index
    %490 = vector.load %arg6[%c0_218, %c2_219, %c0_220, %c0_221] : memref<1x48x16x16xf32, #tpu.memory_space<vmem>>, vector<1x1x16x16xf32>
    %491 = vector.shape_cast %490 : vector<1x1x16x16xf32> to vector<16x16xf32>
    %492 = vector.shape_cast %489 : vector<16x16xf32> to vector<1x1x16x16xf32>
    tpu.vector_store %arg6[%c0_218, %c2_219, %c0_220, %c0_221], %492 {strides = array<i32>} : memref<1x48x16x16xf32, #tpu.memory_space<vmem>>, vector<1x1x16x16xf32>,
    %cst_222 = arith.constant 0.000000e+00 : f32
    %493 = vector.broadcast %cst_222 : f32 to vector<16x16xf32>
    %c1_223 = arith.constant 1 : index
    %494 = memref.load %arg5[%c1_223] : memref<3xf32, #tpu.memory_space<smem>>
    %495 = vector.broadcast %494 : f32 to vector<16x16xf32>
    %496 = arith.addf %493, %495 : vector<16x16xf32>
    %c13_224 = arith.constant 13 : index
    %497 = memref.load %arg4[%c13_224] : memref<54xf32, #tpu.memory_space<smem>>
    %498 = vector.broadcast %497 : f32 to vector<16x16xf32>
    %499 = arith.mulf %323, %498 : vector<16x16xf32>
    %500 = arith.addf %496, %499 : vector<16x16xf32>
    %c40_225 = arith.constant 40 : index
    %501 = memref.load %arg4[%c40_225] : memref<54xf32, #tpu.memory_space<smem>>
    %502 = vector.broadcast %501 : f32 to vector<16x16xf32>
    %503 = arith.mulf %325, %502 : vector<16x16xf32>
    %504 = arith.addf %500, %503 : vector<16x16xf32>
    %cst_226 = arith.constant 0.000000e+00 : f32
    %505 = vector.broadcast %cst_226 : f32 to vector<16x16xf32>
    %506 = arith.maximumf %504, %505 : vector<16x16xf32>
    %c0_227 = arith.constant 0 : index
    %c18_228 = arith.constant 18 : index
    %c0_229 = arith.constant 0 : index
    %c0_230 = arith.constant 0 : index
    %507 = vector.load %arg6[%c0_227, %c18_228, %c0_229, %c0_230] : memref<1x48x16x16xf32, #tpu.memory_space<vmem>>, vector<1x1x16x16xf32>
    %508 = vector.shape_cast %507 : vector<1x1x16x16xf32> to vector<16x16xf32>
    %509 = vector.shape_cast %506 : vector<16x16xf32> to vector<1x1x16x16xf32>
    tpu.vector_store %arg6[%c0_227, %c18_228, %c0_229, %c0_230], %509 {strides = array<i32>} : memref<1x48x16x16xf32, #tpu.memory_space<vmem>>, vector<1x1x16x16xf32>,
    %cst_231 = arith.constant 0.000000e+00 : f32
    %510 = vector.broadcast %cst_231 : f32 to vector<16x16xf32>
    %c2_232 = arith.constant 2 : index
    %511 = memref.load %arg5[%c2_232] : memref<3xf32, #tpu.memory_space<smem>>
    %512 = vector.broadcast %511 : f32 to vector<16x16xf32>
    %513 = arith.addf %510, %512 : vector<16x16xf32>
    %c22_233 = arith.constant 22 : index
    %514 = memref.load %arg4[%c22_233] : memref<54xf32, #tpu.memory_space<smem>>
    %515 = vector.broadcast %514 : f32 to vector<16x16xf32>
    %516 = arith.mulf %323, %515 : vector<16x16xf32>
    %517 = arith.addf %513, %516 : vector<16x16xf32>
    %c49_234 = arith.constant 49 : index
    %518 = memref.load %arg4[%c49_234] : memref<54xf32, #tpu.memory_space<smem>>
    %519 = vector.broadcast %518 : f32 to vector<16x16xf32>
    %520 = arith.mulf %325, %519 : vector<16x16xf32>
    %521 = arith.addf %517, %520 : vector<16x16xf32>
    %cst_235 = arith.constant 0.000000e+00 : f32
    %522 = vector.broadcast %cst_235 : f32 to vector<16x16xf32>
    %523 = arith.maximumf %521, %522 : vector<16x16xf32>
    %c0_236 = arith.constant 0 : index
    %c34_237 = arith.constant 34 : index
    %c0_238 = arith.constant 0 : index
    %c0_239 = arith.constant 0 : index
    %524 = vector.load %arg6[%c0_236, %c34_237, %c0_238, %c0_239] : memref<1x48x16x16xf32, #tpu.memory_space<vmem>>, vector<1x1x16x16xf32>
    %525 = vector.shape_cast %524 : vector<1x1x16x16xf32> to vector<16x16xf32>
    %526 = vector.shape_cast %523 : vector<16x16xf32> to vector<1x1x16x16xf32>
    tpu.vector_store %arg6[%c0_236, %c34_237, %c0_238, %c0_239], %526 {strides = array<i32>} : memref<1x48x16x16xf32, #tpu.memory_space<vmem>>, vector<1x1x16x16xf32>,
    %cst_240 = arith.constant 0.000000e+00 : f32
    %527 = vector.broadcast %cst_240 : f32 to vector<16x16xf32>
    %c0_241 = arith.constant 0 : index
    %528 = memref.load %arg5[%c0_241] : memref<3xf32, #tpu.memory_space<smem>>
    %529 = vector.broadcast %528 : f32 to vector<16x16xf32>
    %530 = arith.addf %527, %529 : vector<16x16xf32>
    %c3_242 = arith.constant 3 : index
    %531 = memref.load %arg4[%c3_242] : memref<54xf32, #tpu.memory_space<smem>>
    %532 = vector.broadcast %531 : f32 to vector<16x16xf32>
    %533 = arith.mulf %319, %532 : vector<16x16xf32>
    %534 = arith.addf %530, %533 : vector<16x16xf32>
    %c30_243 = arith.constant 30 : index
    %535 = memref.load %arg4[%c30_243] : memref<54xf32, #tpu.memory_space<smem>>
    %536 = vector.broadcast %535 : f32 to vector<16x16xf32>
    %537 = arith.mulf %321, %536 : vector<16x16xf32>
    %538 = arith.addf %534, %537 : vector<16x16xf32>
    %c5_244 = arith.constant 5 : index
    %539 = memref.load %arg4[%c5_244] : memref<54xf32, #tpu.memory_space<smem>>
    %540 = vector.broadcast %539 : f32 to vector<16x16xf32>
    %541 = arith.mulf %323, %540 : vector<16x16xf32>
    %542 = arith.addf %538, %541 : vector<16x16xf32>
    %c32_245 = arith.constant 32 : index
    %543 = memref.load %arg4[%c32_245] : memref<54xf32, #tpu.memory_space<smem>>
    %544 = vector.broadcast %543 : f32 to vector<16x16xf32>
    %545 = arith.mulf %325, %544 : vector<16x16xf32>
    %546 = arith.addf %542, %545 : vector<16x16xf32>
    %cst_246 = arith.constant 0.000000e+00 : f32
    %547 = vector.broadcast %cst_246 : f32 to vector<16x16xf32>
    %548 = arith.maximumf %546, %547 : vector<16x16xf32>
    %c0_247 = arith.constant 0 : index
    %c3_248 = arith.constant 3 : index
    %c0_249 = arith.constant 0 : index
    %c0_250 = arith.constant 0 : index
    %549 = vector.load %arg6[%c0_247, %c3_248, %c0_249, %c0_250] : memref<1x48x16x16xf32, #tpu.memory_space<vmem>>, vector<1x1x16x16xf32>
    %550 = vector.shape_cast %549 : vector<1x1x16x16xf32> to vector<16x16xf32>
    %551 = vector.shape_cast %548 : vector<16x16xf32> to vector<1x1x16x16xf32>
    tpu.vector_store %arg6[%c0_247, %c3_248, %c0_249, %c0_250], %551 {strides = array<i32>} : memref<1x48x16x16xf32, #tpu.memory_space<vmem>>, vector<1x1x16x16xf32>,
    %cst_251 = arith.constant 0.000000e+00 : f32
    %552 = vector.broadcast %cst_251 : f32 to vector<16x16xf32>
    %c1_252 = arith.constant 1 : index
    %553 = memref.load %arg5[%c1_252] : memref<3xf32, #tpu.memory_space<smem>>
    %554 = vector.broadcast %553 : f32 to vector<16x16xf32>
    %555 = arith.addf %552, %554 : vector<16x16xf32>
    %c12_253 = arith.constant 12 : index
    %556 = memref.load %arg4[%c12_253] : memref<54xf32, #tpu.memory_space<smem>>
    %557 = vector.broadcast %556 : f32 to vector<16x16xf32>
    %558 = arith.mulf %319, %557 : vector<16x16xf32>
    %559 = arith.addf %555, %558 : vector<16x16xf32>
    %c39_254 = arith.constant 39 : index
    %560 = memref.load %arg4[%c39_254] : memref<54xf32, #tpu.memory_space<smem>>
    %561 = vector.broadcast %560 : f32 to vector<16x16xf32>
    %562 = arith.mulf %321, %561 : vector<16x16xf32>
    %563 = arith.addf %559, %562 : vector<16x16xf32>
    %c14_255 = arith.constant 14 : index
    %564 = memref.load %arg4[%c14_255] : memref<54xf32, #tpu.memory_space<smem>>
    %565 = vector.broadcast %564 : f32 to vector<16x16xf32>
    %566 = arith.mulf %323, %565 : vector<16x16xf32>
    %567 = arith.addf %563, %566 : vector<16x16xf32>
    %c41_256 = arith.constant 41 : index
    %568 = memref.load %arg4[%c41_256] : memref<54xf32, #tpu.memory_space<smem>>
    %569 = vector.broadcast %568 : f32 to vector<16x16xf32>
    %570 = arith.mulf %325, %569 : vector<16x16xf32>
    %571 = arith.addf %567, %570 : vector<16x16xf32>
    %cst_257 = arith.constant 0.000000e+00 : f32
    %572 = vector.broadcast %cst_257 : f32 to vector<16x16xf32>
    %573 = arith.maximumf %571, %572 : vector<16x16xf32>
    %c0_258 = arith.constant 0 : index
    %c19_259 = arith.constant 19 : index
    %c0_260 = arith.constant 0 : index
    %c0_261 = arith.constant 0 : index
    %574 = vector.load %arg6[%c0_258, %c19_259, %c0_260, %c0_261] : memref<1x48x16x16xf32, #tpu.memory_space<vmem>>, vector<1x1x16x16xf32>
    %575 = vector.shape_cast %574 : vector<1x1x16x16xf32> to vector<16x16xf32>
    %576 = vector.shape_cast %573 : vector<16x16xf32> to vector<1x1x16x16xf32>
    tpu.vector_store %arg6[%c0_258, %c19_259, %c0_260, %c0_261], %576 {strides = array<i32>} : memref<1x48x16x16xf32, #tpu.memory_space<vmem>>, vector<1x1x16x16xf32>,
    %cst_262 = arith.constant 0.000000e+00 : f32
    %577 = vector.broadcast %cst_262 : f32 to vector<16x16xf32>
    %c2_263 = arith.constant 2 : index
    %578 = memref.load %arg5[%c2_263] : memref<3xf32, #tpu.memory_space<smem>>
    %579 = vector.broadcast %578 : f32 to vector<16x16xf32>
    %580 = arith.addf %577, %579 : vector<16x16xf32>
    %c21_264 = arith.constant 21 : index
    %581 = memref.load %arg4[%c21_264] : memref<54xf32, #tpu.memory_space<smem>>
    %582 = vector.broadcast %581 : f32 to vector<16x16xf32>
    %583 = arith.mulf %319, %582 : vector<16x16xf32>
    %584 = arith.addf %580, %583 : vector<16x16xf32>
    %c48_265 = arith.constant 48 : index
    %585 = memref.load %arg4[%c48_265] : memref<54xf32, #tpu.memory_space<smem>>
    %586 = vector.broadcast %585 : f32 to vector<16x16xf32>
    %587 = arith.mulf %321, %586 : vector<16x16xf32>
    %588 = arith.addf %584, %587 : vector<16x16xf32>
    %c23_266 = arith.constant 23 : index
    %589 = memref.load %arg4[%c23_266] : memref<54xf32, #tpu.memory_space<smem>>
    %590 = vector.broadcast %589 : f32 to vector<16x16xf32>
    %591 = arith.mulf %323, %590 : vector<16x16xf32>
    %592 = arith.addf %588, %591 : vector<16x16xf32>
    %c50_267 = arith.constant 50 : index
    %593 = memref.load %arg4[%c50_267] : memref<54xf32, #tpu.memory_space<smem>>
    %594 = vector.broadcast %593 : f32 to vector<16x16xf32>
    %595 = arith.mulf %325, %594 : vector<16x16xf32>
    %596 = arith.addf %592, %595 : vector<16x16xf32>
    %cst_268 = arith.constant 0.000000e+00 : f32
    %597 = vector.broadcast %cst_268 : f32 to vector<16x16xf32>
    %598 = arith.maximumf %596, %597 : vector<16x16xf32>
    %c0_269 = arith.constant 0 : index
    %c35_270 = arith.constant 35 : index
    %c0_271 = arith.constant 0 : index
    %c0_272 = arith.constant 0 : index
    %599 = vector.load %arg6[%c0_269, %c35_270, %c0_271, %c0_272] : memref<1x48x16x16xf32, #tpu.memory_space<vmem>>, vector<1x1x16x16xf32>
    %600 = vector.shape_cast %599 : vector<1x1x16x16xf32> to vector<16x16xf32>
    %601 = vector.shape_cast %598 : vector<16x16xf32> to vector<1x1x16x16xf32>
    tpu.vector_store %arg6[%c0_269, %c35_270, %c0_271, %c0_272], %601 {strides = array<i32>} : memref<1x48x16x16xf32, #tpu.memory_space<vmem>>, vector<1x1x16x16xf32>,
    %cst_273 = arith.constant 0.000000e+00 : f32
    %602 = vector.broadcast %cst_273 : f32 to vector<16x16xf32>
    %c0_274 = arith.constant 0 : index
    %603 = memref.load %arg5[%c0_274] : memref<3xf32, #tpu.memory_space<smem>>
    %604 = vector.broadcast %603 : f32 to vector<16x16xf32>
    %605 = arith.addf %602, %604 : vector<16x16xf32>
    %c1_275 = arith.constant 1 : index
    %606 = memref.load %arg4[%c1_275] : memref<54xf32, #tpu.memory_space<smem>>
    %607 = vector.broadcast %606 : f32 to vector<16x16xf32>
    %608 = arith.mulf %339, %607 : vector<16x16xf32>
    %609 = arith.addf %605, %608 : vector<16x16xf32>
    %c28_276 = arith.constant 28 : index
    %610 = memref.load %arg4[%c28_276] : memref<54xf32, #tpu.memory_space<smem>>
    %611 = vector.broadcast %610 : f32 to vector<16x16xf32>
    %612 = arith.mulf %341, %611 : vector<16x16xf32>
    %613 = arith.addf %609, %612 : vector<16x16xf32>
    %c7_277 = arith.constant 7 : index
    %614 = memref.load %arg4[%c7_277] : memref<54xf32, #tpu.memory_space<smem>>
    %615 = vector.broadcast %614 : f32 to vector<16x16xf32>
    %616 = arith.mulf %315, %615 : vector<16x16xf32>
    %617 = arith.addf %613, %616 : vector<16x16xf32>
    %c34_278 = arith.constant 34 : index
    %618 = memref.load %arg4[%c34_278] : memref<54xf32, #tpu.memory_space<smem>>
    %619 = vector.broadcast %618 : f32 to vector<16x16xf32>
    %620 = arith.mulf %317, %619 : vector<16x16xf32>
    %621 = arith.addf %617, %620 : vector<16x16xf32>
    %cst_279 = arith.constant 0.000000e+00 : f32
    %622 = vector.broadcast %cst_279 : f32 to vector<16x16xf32>
    %623 = arith.maximumf %621, %622 : vector<16x16xf32>
    %c0_280 = arith.constant 0 : index
    %c4_281 = arith.constant 4 : index
    %c0_282 = arith.constant 0 : index
    %c0_283 = arith.constant 0 : index
    %624 = vector.load %arg6[%c0_280, %c4_281, %c0_282, %c0_283] : memref<1x48x16x16xf32, #tpu.memory_space<vmem>>, vector<1x1x16x16xf32>
    %625 = vector.shape_cast %624 : vector<1x1x16x16xf32> to vector<16x16xf32>
    %626 = vector.shape_cast %623 : vector<16x16xf32> to vector<1x1x16x16xf32>
    tpu.vector_store %arg6[%c0_280, %c4_281, %c0_282, %c0_283], %626 {strides = array<i32>} : memref<1x48x16x16xf32, #tpu.memory_space<vmem>>, vector<1x1x16x16xf32>,
    %cst_284 = arith.constant 0.000000e+00 : f32
    %627 = vector.broadcast %cst_284 : f32 to vector<16x16xf32>
    %c1_285 = arith.constant 1 : index
    %628 = memref.load %arg5[%c1_285] : memref<3xf32, #tpu.memory_space<smem>>
    %629 = vector.broadcast %628 : f32 to vector<16x16xf32>
    %630 = arith.addf %627, %629 : vector<16x16xf32>
    %c10_286 = arith.constant 10 : index
    %631 = memref.load %arg4[%c10_286] : memref<54xf32, #tpu.memory_space<smem>>
    %632 = vector.broadcast %631 : f32 to vector<16x16xf32>
    %633 = arith.mulf %339, %632 : vector<16x16xf32>
    %634 = arith.addf %630, %633 : vector<16x16xf32>
    %c37_287 = arith.constant 37 : index
    %635 = memref.load %arg4[%c37_287] : memref<54xf32, #tpu.memory_space<smem>>
    %636 = vector.broadcast %635 : f32 to vector<16x16xf32>
    %637 = arith.mulf %341, %636 : vector<16x16xf32>
    %638 = arith.addf %634, %637 : vector<16x16xf32>
    %c16_288 = arith.constant 16 : index
    %639 = memref.load %arg4[%c16_288] : memref<54xf32, #tpu.memory_space<smem>>
    %640 = vector.broadcast %639 : f32 to vector<16x16xf32>
    %641 = arith.mulf %315, %640 : vector<16x16xf32>
    %642 = arith.addf %638, %641 : vector<16x16xf32>
    %c43_289 = arith.constant 43 : index
    %643 = memref.load %arg4[%c43_289] : memref<54xf32, #tpu.memory_space<smem>>
    %644 = vector.broadcast %643 : f32 to vector<16x16xf32>
    %645 = arith.mulf %317, %644 : vector<16x16xf32>
    %646 = arith.addf %642, %645 : vector<16x16xf32>
    %cst_290 = arith.constant 0.000000e+00 : f32
    %647 = vector.broadcast %cst_290 : f32 to vector<16x16xf32>
    %648 = arith.maximumf %646, %647 : vector<16x16xf32>
    %c0_291 = arith.constant 0 : index
    %c20_292 = arith.constant 20 : index
    %c0_293 = arith.constant 0 : index
    %c0_294 = arith.constant 0 : index
    %649 = vector.load %arg6[%c0_291, %c20_292, %c0_293, %c0_294] : memref<1x48x16x16xf32, #tpu.memory_space<vmem>>, vector<1x1x16x16xf32>
    %650 = vector.shape_cast %649 : vector<1x1x16x16xf32> to vector<16x16xf32>
    %651 = vector.shape_cast %648 : vector<16x16xf32> to vector<1x1x16x16xf32>
    tpu.vector_store %arg6[%c0_291, %c20_292, %c0_293, %c0_294], %651 {strides = array<i32>} : memref<1x48x16x16xf32, #tpu.memory_space<vmem>>, vector<1x1x16x16xf32>,
    %cst_295 = arith.constant 0.000000e+00 : f32
    %652 = vector.broadcast %cst_295 : f32 to vector<16x16xf32>
    %c2_296 = arith.constant 2 : index
    %653 = memref.load %arg5[%c2_296] : memref<3xf32, #tpu.memory_space<smem>>
    %654 = vector.broadcast %653 : f32 to vector<16x16xf32>
    %655 = arith.addf %652, %654 : vector<16x16xf32>
    %c19_297 = arith.constant 19 : index
    %656 = memref.load %arg4[%c19_297] : memref<54xf32, #tpu.memory_space<smem>>
    %657 = vector.broadcast %656 : f32 to vector<16x16xf32>
    %658 = arith.mulf %339, %657 : vector<16x16xf32>
    %659 = arith.addf %655, %658 : vector<16x16xf32>
    %c46_298 = arith.constant 46 : index
    %660 = memref.load %arg4[%c46_298] : memref<54xf32, #tpu.memory_space<smem>>
    %661 = vector.broadcast %660 : f32 to vector<16x16xf32>
    %662 = arith.mulf %341, %661 : vector<16x16xf32>
    %663 = arith.addf %659, %662 : vector<16x16xf32>
    %c25_299 = arith.constant 25 : index
    %664 = memref.load %arg4[%c25_299] : memref<54xf32, #tpu.memory_space<smem>>
    %665 = vector.broadcast %664 : f32 to vector<16x16xf32>
    %666 = arith.mulf %315, %665 : vector<16x16xf32>
    %667 = arith.addf %663, %666 : vector<16x16xf32>
    %c52_300 = arith.constant 52 : index
    %668 = memref.load %arg4[%c52_300] : memref<54xf32, #tpu.memory_space<smem>>
    %669 = vector.broadcast %668 : f32 to vector<16x16xf32>
    %670 = arith.mulf %317, %669 : vector<16x16xf32>
    %671 = arith.addf %667, %670 : vector<16x16xf32>
    %cst_301 = arith.constant 0.000000e+00 : f32
    %672 = vector.broadcast %cst_301 : f32 to vector<16x16xf32>
    %673 = arith.maximumf %671, %672 : vector<16x16xf32>
    %c0_302 = arith.constant 0 : index
    %c36_303 = arith.constant 36 : index
    %c0_304 = arith.constant 0 : index
    %c0_305 = arith.constant 0 : index
    %674 = vector.load %arg6[%c0_302, %c36_303, %c0_304, %c0_305] : memref<1x48x16x16xf32, #tpu.memory_space<vmem>>, vector<1x1x16x16xf32>
    %675 = vector.shape_cast %674 : vector<1x1x16x16xf32> to vector<16x16xf32>
    %676 = vector.shape_cast %673 : vector<16x16xf32> to vector<1x1x16x16xf32>
    tpu.vector_store %arg6[%c0_302, %c36_303, %c0_304, %c0_305], %676 {strides = array<i32>} : memref<1x48x16x16xf32, #tpu.memory_space<vmem>>, vector<1x1x16x16xf32>,
    %cst_306 = arith.constant 0.000000e+00 : f32
    %677 = vector.broadcast %cst_306 : f32 to vector<16x16xf32>
    %c0_307 = arith.constant 0 : index
    %678 = memref.load %arg5[%c0_307] : memref<3xf32, #tpu.memory_space<smem>>
    %679 = vector.broadcast %678 : f32 to vector<16x16xf32>
    %680 = arith.addf %677, %679 : vector<16x16xf32>
    %c0_308 = arith.constant 0 : index
    %681 = memref.load %arg4[%c0_308] : memref<54xf32, #tpu.memory_space<smem>>
    %682 = vector.broadcast %681 : f32 to vector<16x16xf32>
    %683 = arith.mulf %347, %682 : vector<16x16xf32>
    %684 = arith.addf %680, %683 : vector<16x16xf32>
    %c27_309 = arith.constant 27 : index
    %685 = memref.load %arg4[%c27_309] : memref<54xf32, #tpu.memory_space<smem>>
    %686 = vector.broadcast %685 : f32 to vector<16x16xf32>
    %687 = arith.mulf %349, %686 : vector<16x16xf32>
    %688 = arith.addf %684, %687 : vector<16x16xf32>
    %c2_310 = arith.constant 2 : index
    %689 = memref.load %arg4[%c2_310] : memref<54xf32, #tpu.memory_space<smem>>
    %690 = vector.broadcast %689 : f32 to vector<16x16xf32>
    %691 = arith.mulf %339, %690 : vector<16x16xf32>
    %692 = arith.addf %688, %691 : vector<16x16xf32>
    %c29_311 = arith.constant 29 : index
    %693 = memref.load %arg4[%c29_311] : memref<54xf32, #tpu.memory_space<smem>>
    %694 = vector.broadcast %693 : f32 to vector<16x16xf32>
    %695 = arith.mulf %341, %694 : vector<16x16xf32>
    %696 = arith.addf %692, %695 : vector<16x16xf32>
    %c6_312 = arith.constant 6 : index
    %697 = memref.load %arg4[%c6_312] : memref<54xf32, #tpu.memory_space<smem>>
    %698 = vector.broadcast %697 : f32 to vector<16x16xf32>
    %699 = arith.mulf %323, %698 : vector<16x16xf32>
    %700 = arith.addf %696, %699 : vector<16x16xf32>
    %c33_313 = arith.constant 33 : index
    %701 = memref.load %arg4[%c33_313] : memref<54xf32, #tpu.memory_space<smem>>
    %702 = vector.broadcast %701 : f32 to vector<16x16xf32>
    %703 = arith.mulf %325, %702 : vector<16x16xf32>
    %704 = arith.addf %700, %703 : vector<16x16xf32>
    %c8_314 = arith.constant 8 : index
    %705 = memref.load %arg4[%c8_314] : memref<54xf32, #tpu.memory_space<smem>>
    %706 = vector.broadcast %705 : f32 to vector<16x16xf32>
    %707 = arith.mulf %315, %706 : vector<16x16xf32>
    %708 = arith.addf %704, %707 : vector<16x16xf32>
    %c35_315 = arith.constant 35 : index
    %709 = memref.load %arg4[%c35_315] : memref<54xf32, #tpu.memory_space<smem>>
    %710 = vector.broadcast %709 : f32 to vector<16x16xf32>
    %711 = arith.mulf %317, %710 : vector<16x16xf32>
    %712 = arith.addf %708, %711 : vector<16x16xf32>
    %cst_316 = arith.constant 0.000000e+00 : f32
    %713 = vector.broadcast %cst_316 : f32 to vector<16x16xf32>
    %714 = arith.maximumf %712, %713 : vector<16x16xf32>
    %c0_317 = arith.constant 0 : index
    %c5_318 = arith.constant 5 : index
    %c0_319 = arith.constant 0 : index
    %c0_320 = arith.constant 0 : index
    %715 = vector.load %arg6[%c0_317, %c5_318, %c0_319, %c0_320] : memref<1x48x16x16xf32, #tpu.memory_space<vmem>>, vector<1x1x16x16xf32>
    %716 = vector.shape_cast %715 : vector<1x1x16x16xf32> to vector<16x16xf32>
    %717 = vector.shape_cast %714 : vector<16x16xf32> to vector<1x1x16x16xf32>
    tpu.vector_store %arg6[%c0_317, %c5_318, %c0_319, %c0_320], %717 {strides = array<i32>} : memref<1x48x16x16xf32, #tpu.memory_space<vmem>>, vector<1x1x16x16xf32>,
    %cst_321 = arith.constant 0.000000e+00 : f32
    %718 = vector.broadcast %cst_321 : f32 to vector<16x16xf32>
    %c1_322 = arith.constant 1 : index
    %719 = memref.load %arg5[%c1_322] : memref<3xf32, #tpu.memory_space<smem>>
    %720 = vector.broadcast %719 : f32 to vector<16x16xf32>
    %721 = arith.addf %718, %720 : vector<16x16xf32>
    %c9_323 = arith.constant 9 : index
    %722 = memref.load %arg4[%c9_323] : memref<54xf32, #tpu.memory_space<smem>>
    %723 = vector.broadcast %722 : f32 to vector<16x16xf32>
    %724 = arith.mulf %347, %723 : vector<16x16xf32>
    %725 = arith.addf %721, %724 : vector<16x16xf32>
    %c36_324 = arith.constant 36 : index
    %726 = memref.load %arg4[%c36_324] : memref<54xf32, #tpu.memory_space<smem>>
    %727 = vector.broadcast %726 : f32 to vector<16x16xf32>
    %728 = arith.mulf %349, %727 : vector<16x16xf32>
    %729 = arith.addf %725, %728 : vector<16x16xf32>
    %c11_325 = arith.constant 11 : index
    %730 = memref.load %arg4[%c11_325] : memref<54xf32, #tpu.memory_space<smem>>
    %731 = vector.broadcast %730 : f32 to vector<16x16xf32>
    %732 = arith.mulf %339, %731 : vector<16x16xf32>
    %733 = arith.addf %729, %732 : vector<16x16xf32>
    %c38_326 = arith.constant 38 : index
    %734 = memref.load %arg4[%c38_326] : memref<54xf32, #tpu.memory_space<smem>>
    %735 = vector.broadcast %734 : f32 to vector<16x16xf32>
    %736 = arith.mulf %341, %735 : vector<16x16xf32>
    %737 = arith.addf %733, %736 : vector<16x16xf32>
    %c15_327 = arith.constant 15 : index
    %738 = memref.load %arg4[%c15_327] : memref<54xf32, #tpu.memory_space<smem>>
    %739 = vector.broadcast %738 : f32 to vector<16x16xf32>
    %740 = arith.mulf %323, %739 : vector<16x16xf32>
    %741 = arith.addf %737, %740 : vector<16x16xf32>
    %c42_328 = arith.constant 42 : index
    %742 = memref.load %arg4[%c42_328] : memref<54xf32, #tpu.memory_space<smem>>
    %743 = vector.broadcast %742 : f32 to vector<16x16xf32>
    %744 = arith.mulf %325, %743 : vector<16x16xf32>
    %745 = arith.addf %741, %744 : vector<16x16xf32>
    %c17_329 = arith.constant 17 : index
    %746 = memref.load %arg4[%c17_329] : memref<54xf32, #tpu.memory_space<smem>>
    %747 = vector.broadcast %746 : f32 to vector<16x16xf32>
    %748 = arith.mulf %315, %747 : vector<16x16xf32>
    %749 = arith.addf %745, %748 : vector<16x16xf32>
    %c44_330 = arith.constant 44 : index
    %750 = memref.load %arg4[%c44_330] : memref<54xf32, #tpu.memory_space<smem>>
    %751 = vector.broadcast %750 : f32 to vector<16x16xf32>
    %752 = arith.mulf %317, %751 : vector<16x16xf32>
    %753 = arith.addf %749, %752 : vector<16x16xf32>
    %cst_331 = arith.constant 0.000000e+00 : f32
    %754 = vector.broadcast %cst_331 : f32 to vector<16x16xf32>
    %755 = arith.maximumf %753, %754 : vector<16x16xf32>
    %c0_332 = arith.constant 0 : index
    %c21_333 = arith.constant 21 : index
    %c0_334 = arith.constant 0 : index
    %c0_335 = arith.constant 0 : index
    %756 = vector.load %arg6[%c0_332, %c21_333, %c0_334, %c0_335] : memref<1x48x16x16xf32, #tpu.memory_space<vmem>>, vector<1x1x16x16xf32>
    %757 = vector.shape_cast %756 : vector<1x1x16x16xf32> to vector<16x16xf32>
    %758 = vector.shape_cast %755 : vector<16x16xf32> to vector<1x1x16x16xf32>
    tpu.vector_store %arg6[%c0_332, %c21_333, %c0_334, %c0_335], %758 {strides = array<i32>} : memref<1x48x16x16xf32, #tpu.memory_space<vmem>>, vector<1x1x16x16xf32>,
    %cst_336 = arith.constant 0.000000e+00 : f32
    %759 = vector.broadcast %cst_336 : f32 to vector<16x16xf32>
    %c2_337 = arith.constant 2 : index
    %760 = memref.load %arg5[%c2_337] : memref<3xf32, #tpu.memory_space<smem>>
    %761 = vector.broadcast %760 : f32 to vector<16x16xf32>
    %762 = arith.addf %759, %761 : vector<16x16xf32>
    %c18_338 = arith.constant 18 : index
    %763 = memref.load %arg4[%c18_338] : memref<54xf32, #tpu.memory_space<smem>>
    %764 = vector.broadcast %763 : f32 to vector<16x16xf32>
    %765 = arith.mulf %347, %764 : vector<16x16xf32>
    %766 = arith.addf %762, %765 : vector<16x16xf32>
    %c45_339 = arith.constant 45 : index
    %767 = memref.load %arg4[%c45_339] : memref<54xf32, #tpu.memory_space<smem>>
    %768 = vector.broadcast %767 : f32 to vector<16x16xf32>
    %769 = arith.mulf %349, %768 : vector<16x16xf32>
    %770 = arith.addf %766, %769 : vector<16x16xf32>
    %c20_340 = arith.constant 20 : index
    %771 = memref.load %arg4[%c20_340] : memref<54xf32, #tpu.memory_space<smem>>
    %772 = vector.broadcast %771 : f32 to vector<16x16xf32>
    %773 = arith.mulf %339, %772 : vector<16x16xf32>
    %774 = arith.addf %770, %773 : vector<16x16xf32>
    %c47_341 = arith.constant 47 : index
    %775 = memref.load %arg4[%c47_341] : memref<54xf32, #tpu.memory_space<smem>>
    %776 = vector.broadcast %775 : f32 to vector<16x16xf32>
    %777 = arith.mulf %341, %776 : vector<16x16xf32>
    %778 = arith.addf %774, %777 : vector<16x16xf32>
    %c24_342 = arith.constant 24 : index
    %779 = memref.load %arg4[%c24_342] : memref<54xf32, #tpu.memory_space<smem>>
    %780 = vector.broadcast %779 : f32 to vector<16x16xf32>
    %781 = arith.mulf %323, %780 : vector<16x16xf32>
    %782 = arith.addf %778, %781 : vector<16x16xf32>
    %c51_343 = arith.constant 51 : index
    %783 = memref.load %arg4[%c51_343] : memref<54xf32, #tpu.memory_space<smem>>
    %784 = vector.broadcast %783 : f32 to vector<16x16xf32>
    %785 = arith.mulf %325, %784 : vector<16x16xf32>
    %786 = arith.addf %782, %785 : vector<16x16xf32>
    %c26_344 = arith.constant 26 : index
    %787 = memref.load %arg4[%c26_344] : memref<54xf32, #tpu.memory_space<smem>>
    %788 = vector.broadcast %787 : f32 to vector<16x16xf32>
    %789 = arith.mulf %315, %788 : vector<16x16xf32>
    %790 = arith.addf %786, %789 : vector<16x16xf32>
    %c53_345 = arith.constant 53 : index
    %791 = memref.load %arg4[%c53_345] : memref<54xf32, #tpu.memory_space<smem>>
    %792 = vector.broadcast %791 : f32 to vector<16x16xf32>
    %793 = arith.mulf %317, %792 : vector<16x16xf32>
    %794 = arith.addf %790, %793 : vector<16x16xf32>
    %cst_346 = arith.constant 0.000000e+00 : f32
    %795 = vector.broadcast %cst_346 : f32 to vector<16x16xf32>
    %796 = arith.maximumf %794, %795 : vector<16x16xf32>
    %c0_347 = arith.constant 0 : index
    %c37_348 = arith.constant 37 : index
    %c0_349 = arith.constant 0 : index
    %c0_350 = arith.constant 0 : index
    %797 = vector.load %arg6[%c0_347, %c37_348, %c0_349, %c0_350] : memref<1x48x16x16xf32, #tpu.memory_space<vmem>>, vector<1x1x16x16xf32>
    %798 = vector.shape_cast %797 : vector<1x1x16x16xf32> to vector<16x16xf32>
    %799 = vector.shape_cast %796 : vector<16x16xf32> to vector<1x1x16x16xf32>
    tpu.vector_store %arg6[%c0_347, %c37_348, %c0_349, %c0_350], %799 {strides = array<i32>} : memref<1x48x16x16xf32, #tpu.memory_space<vmem>>, vector<1x1x16x16xf32>,
    %cst_351 = arith.constant 0.000000e+00 : f32
    %800 = vector.broadcast %cst_351 : f32 to vector<16x16xf32>
    %c0_352 = arith.constant 0 : index
    %801 = memref.load %arg5[%c0_352] : memref<3xf32, #tpu.memory_space<smem>>
    %802 = vector.broadcast %801 : f32 to vector<16x16xf32>
    %803 = arith.addf %800, %802 : vector<16x16xf32>
    %c1_353 = arith.constant 1 : index
    %804 = memref.load %arg4[%c1_353] : memref<54xf32, #tpu.memory_space<smem>>
    %805 = vector.broadcast %804 : f32 to vector<16x16xf32>
    %806 = arith.mulf %347, %805 : vector<16x16xf32>
    %807 = arith.addf %803, %806 : vector<16x16xf32>
    %c28_354 = arith.constant 28 : index
    %808 = memref.load %arg4[%c28_354] : memref<54xf32, #tpu.memory_space<smem>>
    %809 = vector.broadcast %808 : f32 to vector<16x16xf32>
    %810 = arith.mulf %349, %809 : vector<16x16xf32>
    %811 = arith.addf %807, %810 : vector<16x16xf32>
    %c7_355 = arith.constant 7 : index
    %812 = memref.load %arg4[%c7_355] : memref<54xf32, #tpu.memory_space<smem>>
    %813 = vector.broadcast %812 : f32 to vector<16x16xf32>
    %814 = arith.mulf %323, %813 : vector<16x16xf32>
    %815 = arith.addf %811, %814 : vector<16x16xf32>
    %c34_356 = arith.constant 34 : index
    %816 = memref.load %arg4[%c34_356] : memref<54xf32, #tpu.memory_space<smem>>
    %817 = vector.broadcast %816 : f32 to vector<16x16xf32>
    %818 = arith.mulf %325, %817 : vector<16x16xf32>
    %819 = arith.addf %815, %818 : vector<16x16xf32>
    %cst_357 = arith.constant 0.000000e+00 : f32
    %820 = vector.broadcast %cst_357 : f32 to vector<16x16xf32>
    %821 = arith.maximumf %819, %820 : vector<16x16xf32>
    %c0_358 = arith.constant 0 : index
    %c6_359 = arith.constant 6 : index
    %c0_360 = arith.constant 0 : index
    %c0_361 = arith.constant 0 : index
    %822 = vector.load %arg6[%c0_358, %c6_359, %c0_360, %c0_361] : memref<1x48x16x16xf32, #tpu.memory_space<vmem>>, vector<1x1x16x16xf32>
    %823 = vector.shape_cast %822 : vector<1x1x16x16xf32> to vector<16x16xf32>
    %824 = vector.shape_cast %821 : vector<16x16xf32> to vector<1x1x16x16xf32>
    tpu.vector_store %arg6[%c0_358, %c6_359, %c0_360, %c0_361], %824 {strides = array<i32>} : memref<1x48x16x16xf32, #tpu.memory_space<vmem>>, vector<1x1x16x16xf32>,
    %cst_362 = arith.constant 0.000000e+00 : f32
    %825 = vector.broadcast %cst_362 : f32 to vector<16x16xf32>
    %c1_363 = arith.constant 1 : index
    %826 = memref.load %arg5[%c1_363] : memref<3xf32, #tpu.memory_space<smem>>
    %827 = vector.broadcast %826 : f32 to vector<16x16xf32>
    %828 = arith.addf %825, %827 : vector<16x16xf32>
    %c10_364 = arith.constant 10 : index
    %829 = memref.load %arg4[%c10_364] : memref<54xf32, #tpu.memory_space<smem>>
    %830 = vector.broadcast %829 : f32 to vector<16x16xf32>
    %831 = arith.mulf %347, %830 : vector<16x16xf32>
    %832 = arith.addf %828, %831 : vector<16x16xf32>
    %c37_365 = arith.constant 37 : index
    %833 = memref.load %arg4[%c37_365] : memref<54xf32, #tpu.memory_space<smem>>
    %834 = vector.broadcast %833 : f32 to vector<16x16xf32>
    %835 = arith.mulf %349, %834 : vector<16x16xf32>
    %836 = arith.addf %832, %835 : vector<16x16xf32>
    %c16_366 = arith.constant 16 : index
    %837 = memref.load %arg4[%c16_366] : memref<54xf32, #tpu.memory_space<smem>>
    %838 = vector.broadcast %837 : f32 to vector<16x16xf32>
    %839 = arith.mulf %323, %838 : vector<16x16xf32>
    %840 = arith.addf %836, %839 : vector<16x16xf32>
    %c43_367 = arith.constant 43 : index
    %841 = memref.load %arg4[%c43_367] : memref<54xf32, #tpu.memory_space<smem>>
    %842 = vector.broadcast %841 : f32 to vector<16x16xf32>
    %843 = arith.mulf %325, %842 : vector<16x16xf32>
    %844 = arith.addf %840, %843 : vector<16x16xf32>
    %cst_368 = arith.constant 0.000000e+00 : f32
    %845 = vector.broadcast %cst_368 : f32 to vector<16x16xf32>
    %846 = arith.maximumf %844, %845 : vector<16x16xf32>
    %c0_369 = arith.constant 0 : index
    %c22_370 = arith.constant 22 : index
    %c0_371 = arith.constant 0 : index
    %c0_372 = arith.constant 0 : index
    %847 = vector.load %arg6[%c0_369, %c22_370, %c0_371, %c0_372] : memref<1x48x16x16xf32, #tpu.memory_space<vmem>>, vector<1x1x16x16xf32>
    %848 = vector.shape_cast %847 : vector<1x1x16x16xf32> to vector<16x16xf32>
    %849 = vector.shape_cast %846 : vector<16x16xf32> to vector<1x1x16x16xf32>
    tpu.vector_store %arg6[%c0_369, %c22_370, %c0_371, %c0_372], %849 {strides = array<i32>} : memref<1x48x16x16xf32, #tpu.memory_space<vmem>>, vector<1x1x16x16xf32>,
    %cst_373 = arith.constant 0.000000e+00 : f32
    %850 = vector.broadcast %cst_373 : f32 to vector<16x16xf32>
    %c2_374 = arith.constant 2 : index
    %851 = memref.load %arg5[%c2_374] : memref<3xf32, #tpu.memory_space<smem>>
    %852 = vector.broadcast %851 : f32 to vector<16x16xf32>
    %853 = arith.addf %850, %852 : vector<16x16xf32>
    %c19_375 = arith.constant 19 : index
    %854 = memref.load %arg4[%c19_375] : memref<54xf32, #tpu.memory_space<smem>>
    %855 = vector.broadcast %854 : f32 to vector<16x16xf32>
    %856 = arith.mulf %347, %855 : vector<16x16xf32>
    %857 = arith.addf %853, %856 : vector<16x16xf32>
    %c46_376 = arith.constant 46 : index
    %858 = memref.load %arg4[%c46_376] : memref<54xf32, #tpu.memory_space<smem>>
    %859 = vector.broadcast %858 : f32 to vector<16x16xf32>
    %860 = arith.mulf %349, %859 : vector<16x16xf32>
    %861 = arith.addf %857, %860 : vector<16x16xf32>
    %c25_377 = arith.constant 25 : index
    %862 = memref.load %arg4[%c25_377] : memref<54xf32, #tpu.memory_space<smem>>
    %863 = vector.broadcast %862 : f32 to vector<16x16xf32>
    %864 = arith.mulf %323, %863 : vector<16x16xf32>
    %865 = arith.addf %861, %864 : vector<16x16xf32>
    %c52_378 = arith.constant 52 : index
    %866 = memref.load %arg4[%c52_378] : memref<54xf32, #tpu.memory_space<smem>>
    %867 = vector.broadcast %866 : f32 to vector<16x16xf32>
    %868 = arith.mulf %325, %867 : vector<16x16xf32>
    %869 = arith.addf %865, %868 : vector<16x16xf32>
    %cst_379 = arith.constant 0.000000e+00 : f32
    %870 = vector.broadcast %cst_379 : f32 to vector<16x16xf32>
    %871 = arith.maximumf %869, %870 : vector<16x16xf32>
    %c0_380 = arith.constant 0 : index
    %c38_381 = arith.constant 38 : index
    %c0_382 = arith.constant 0 : index
    %c0_383 = arith.constant 0 : index
    %872 = vector.load %arg6[%c0_380, %c38_381, %c0_382, %c0_383] : memref<1x48x16x16xf32, #tpu.memory_space<vmem>>, vector<1x1x16x16xf32>
    %873 = vector.shape_cast %872 : vector<1x1x16x16xf32> to vector<16x16xf32>
    %874 = vector.shape_cast %871 : vector<16x16xf32> to vector<1x1x16x16xf32>
    tpu.vector_store %arg6[%c0_380, %c38_381, %c0_382, %c0_383], %874 {strides = array<i32>} : memref<1x48x16x16xf32, #tpu.memory_space<vmem>>, vector<1x1x16x16xf32>,
    %cst_384 = arith.constant 0.000000e+00 : f32
    %875 = vector.broadcast %cst_384 : f32 to vector<16x16xf32>
    %c0_385 = arith.constant 0 : index
    %876 = memref.load %arg5[%c0_385] : memref<3xf32, #tpu.memory_space<smem>>
    %877 = vector.broadcast %876 : f32 to vector<16x16xf32>
    %878 = arith.addf %875, %877 : vector<16x16xf32>
    %c0_386 = arith.constant 0 : index
    %879 = memref.load %arg4[%c0_386] : memref<54xf32, #tpu.memory_space<smem>>
    %880 = vector.broadcast %879 : f32 to vector<16x16xf32>
    %881 = arith.mulf %343, %880 : vector<16x16xf32>
    %882 = arith.addf %878, %881 : vector<16x16xf32>
    %c27_387 = arith.constant 27 : index
    %883 = memref.load %arg4[%c27_387] : memref<54xf32, #tpu.memory_space<smem>>
    %884 = vector.broadcast %883 : f32 to vector<16x16xf32>
    %885 = arith.mulf %345, %884 : vector<16x16xf32>
    %886 = arith.addf %882, %885 : vector<16x16xf32>
    %c2_388 = arith.constant 2 : index
    %887 = memref.load %arg4[%c2_388] : memref<54xf32, #tpu.memory_space<smem>>
    %888 = vector.broadcast %887 : f32 to vector<16x16xf32>
    %889 = arith.mulf %347, %888 : vector<16x16xf32>
    %890 = arith.addf %886, %889 : vector<16x16xf32>
    %c29_389 = arith.constant 29 : index
    %891 = memref.load %arg4[%c29_389] : memref<54xf32, #tpu.memory_space<smem>>
    %892 = vector.broadcast %891 : f32 to vector<16x16xf32>
    %893 = arith.mulf %349, %892 : vector<16x16xf32>
    %894 = arith.addf %890, %893 : vector<16x16xf32>
    %c6_390 = arith.constant 6 : index
    %895 = memref.load %arg4[%c6_390] : memref<54xf32, #tpu.memory_space<smem>>
    %896 = vector.broadcast %895 : f32 to vector<16x16xf32>
    %897 = arith.mulf %319, %896 : vector<16x16xf32>
    %898 = arith.addf %894, %897 : vector<16x16xf32>
    %c33_391 = arith.constant 33 : index
    %899 = memref.load %arg4[%c33_391] : memref<54xf32, #tpu.memory_space<smem>>
    %900 = vector.broadcast %899 : f32 to vector<16x16xf32>
    %901 = arith.mulf %321, %900 : vector<16x16xf32>
    %902 = arith.addf %898, %901 : vector<16x16xf32>
    %c8_392 = arith.constant 8 : index
    %903 = memref.load %arg4[%c8_392] : memref<54xf32, #tpu.memory_space<smem>>
    %904 = vector.broadcast %903 : f32 to vector<16x16xf32>
    %905 = arith.mulf %323, %904 : vector<16x16xf32>
    %906 = arith.addf %902, %905 : vector<16x16xf32>
    %c35_393 = arith.constant 35 : index
    %907 = memref.load %arg4[%c35_393] : memref<54xf32, #tpu.memory_space<smem>>
    %908 = vector.broadcast %907 : f32 to vector<16x16xf32>
    %909 = arith.mulf %325, %908 : vector<16x16xf32>
    %910 = arith.addf %906, %909 : vector<16x16xf32>
    %cst_394 = arith.constant 0.000000e+00 : f32
    %911 = vector.broadcast %cst_394 : f32 to vector<16x16xf32>
    %912 = arith.maximumf %910, %911 : vector<16x16xf32>
    %c0_395 = arith.constant 0 : index
    %c7_396 = arith.constant 7 : index
    %c0_397 = arith.constant 0 : index
    %c0_398 = arith.constant 0 : index
    %913 = vector.load %arg6[%c0_395, %c7_396, %c0_397, %c0_398] : memref<1x48x16x16xf32, #tpu.memory_space<vmem>>, vector<1x1x16x16xf32>
    %914 = vector.shape_cast %913 : vector<1x1x16x16xf32> to vector<16x16xf32>
    %915 = vector.shape_cast %912 : vector<16x16xf32> to vector<1x1x16x16xf32>
    tpu.vector_store %arg6[%c0_395, %c7_396, %c0_397, %c0_398], %915 {strides = array<i32>} : memref<1x48x16x16xf32, #tpu.memory_space<vmem>>, vector<1x1x16x16xf32>,
    %cst_399 = arith.constant 0.000000e+00 : f32
    %916 = vector.broadcast %cst_399 : f32 to vector<16x16xf32>
    %c1_400 = arith.constant 1 : index
    %917 = memref.load %arg5[%c1_400] : memref<3xf32, #tpu.memory_space<smem>>
    %918 = vector.broadcast %917 : f32 to vector<16x16xf32>
    %919 = arith.addf %916, %918 : vector<16x16xf32>
    %c9_401 = arith.constant 9 : index
    %920 = memref.load %arg4[%c9_401] : memref<54xf32, #tpu.memory_space<smem>>
    %921 = vector.broadcast %920 : f32 to vector<16x16xf32>
    %922 = arith.mulf %343, %921 : vector<16x16xf32>
    %923 = arith.addf %919, %922 : vector<16x16xf32>
    %c36_402 = arith.constant 36 : index
    %924 = memref.load %arg4[%c36_402] : memref<54xf32, #tpu.memory_space<smem>>
    %925 = vector.broadcast %924 : f32 to vector<16x16xf32>
    %926 = arith.mulf %345, %925 : vector<16x16xf32>
    %927 = arith.addf %923, %926 : vector<16x16xf32>
    %c11_403 = arith.constant 11 : index
    %928 = memref.load %arg4[%c11_403] : memref<54xf32, #tpu.memory_space<smem>>
    %929 = vector.broadcast %928 : f32 to vector<16x16xf32>
    %930 = arith.mulf %347, %929 : vector<16x16xf32>
    %931 = arith.addf %927, %930 : vector<16x16xf32>
    %c38_404 = arith.constant 38 : index
    %932 = memref.load %arg4[%c38_404] : memref<54xf32, #tpu.memory_space<smem>>
    %933 = vector.broadcast %932 : f32 to vector<16x16xf32>
    %934 = arith.mulf %349, %933 : vector<16x16xf32>
    %935 = arith.addf %931, %934 : vector<16x16xf32>
    %c15_405 = arith.constant 15 : index
    %936 = memref.load %arg4[%c15_405] : memref<54xf32, #tpu.memory_space<smem>>
    %937 = vector.broadcast %936 : f32 to vector<16x16xf32>
    %938 = arith.mulf %319, %937 : vector<16x16xf32>
    %939 = arith.addf %935, %938 : vector<16x16xf32>
    %c42_406 = arith.constant 42 : index
    %940 = memref.load %arg4[%c42_406] : memref<54xf32, #tpu.memory_space<smem>>
    %941 = vector.broadcast %940 : f32 to vector<16x16xf32>
    %942 = arith.mulf %321, %941 : vector<16x16xf32>
    %943 = arith.addf %939, %942 : vector<16x16xf32>
    %c17_407 = arith.constant 17 : index
    %944 = memref.load %arg4[%c17_407] : memref<54xf32, #tpu.memory_space<smem>>
    %945 = vector.broadcast %944 : f32 to vector<16x16xf32>
    %946 = arith.mulf %323, %945 : vector<16x16xf32>
    %947 = arith.addf %943, %946 : vector<16x16xf32>
    %c44_408 = arith.constant 44 : index
    %948 = memref.load %arg4[%c44_408] : memref<54xf32, #tpu.memory_space<smem>>
    %949 = vector.broadcast %948 : f32 to vector<16x16xf32>
    %950 = arith.mulf %325, %949 : vector<16x16xf32>
    %951 = arith.addf %947, %950 : vector<16x16xf32>
    %cst_409 = arith.constant 0.000000e+00 : f32
    %952 = vector.broadcast %cst_409 : f32 to vector<16x16xf32>
    %953 = arith.maximumf %951, %952 : vector<16x16xf32>
    %c0_410 = arith.constant 0 : index
    %c23_411 = arith.constant 23 : index
    %c0_412 = arith.constant 0 : index
    %c0_413 = arith.constant 0 : index
    %954 = vector.load %arg6[%c0_410, %c23_411, %c0_412, %c0_413] : memref<1x48x16x16xf32, #tpu.memory_space<vmem>>, vector<1x1x16x16xf32>
    %955 = vector.shape_cast %954 : vector<1x1x16x16xf32> to vector<16x16xf32>
    %956 = vector.shape_cast %953 : vector<16x16xf32> to vector<1x1x16x16xf32>
    tpu.vector_store %arg6[%c0_410, %c23_411, %c0_412, %c0_413], %956 {strides = array<i32>} : memref<1x48x16x16xf32, #tpu.memory_space<vmem>>, vector<1x1x16x16xf32>,
    %cst_414 = arith.constant 0.000000e+00 : f32
    %957 = vector.broadcast %cst_414 : f32 to vector<16x16xf32>
    %c2_415 = arith.constant 2 : index
    %958 = memref.load %arg5[%c2_415] : memref<3xf32, #tpu.memory_space<smem>>
    %959 = vector.broadcast %958 : f32 to vector<16x16xf32>
    %960 = arith.addf %957, %959 : vector<16x16xf32>
    %c18_416 = arith.constant 18 : index
    %961 = memref.load %arg4[%c18_416] : memref<54xf32, #tpu.memory_space<smem>>
    %962 = vector.broadcast %961 : f32 to vector<16x16xf32>
    %963 = arith.mulf %343, %962 : vector<16x16xf32>
    %964 = arith.addf %960, %963 : vector<16x16xf32>
    %c45_417 = arith.constant 45 : index
    %965 = memref.load %arg4[%c45_417] : memref<54xf32, #tpu.memory_space<smem>>
    %966 = vector.broadcast %965 : f32 to vector<16x16xf32>
    %967 = arith.mulf %345, %966 : vector<16x16xf32>
    %968 = arith.addf %964, %967 : vector<16x16xf32>
    %c20_418 = arith.constant 20 : index
    %969 = memref.load %arg4[%c20_418] : memref<54xf32, #tpu.memory_space<smem>>
    %970 = vector.broadcast %969 : f32 to vector<16x16xf32>
    %971 = arith.mulf %347, %970 : vector<16x16xf32>
    %972 = arith.addf %968, %971 : vector<16x16xf32>
    %c47_419 = arith.constant 47 : index
    %973 = memref.load %arg4[%c47_419] : memref<54xf32, #tpu.memory_space<smem>>
    %974 = vector.broadcast %973 : f32 to vector<16x16xf32>
    %975 = arith.mulf %349, %974 : vector<16x16xf32>
    %976 = arith.addf %972, %975 : vector<16x16xf32>
    %c24_420 = arith.constant 24 : index
    %977 = memref.load %arg4[%c24_420] : memref<54xf32, #tpu.memory_space<smem>>
    %978 = vector.broadcast %977 : f32 to vector<16x16xf32>
    %979 = arith.mulf %319, %978 : vector<16x16xf32>
    %980 = arith.addf %976, %979 : vector<16x16xf32>
    %c51_421 = arith.constant 51 : index
    %981 = memref.load %arg4[%c51_421] : memref<54xf32, #tpu.memory_space<smem>>
    %982 = vector.broadcast %981 : f32 to vector<16x16xf32>
    %983 = arith.mulf %321, %982 : vector<16x16xf32>
    %984 = arith.addf %980, %983 : vector<16x16xf32>
    %c26_422 = arith.constant 26 : index
    %985 = memref.load %arg4[%c26_422] : memref<54xf32, #tpu.memory_space<smem>>
    %986 = vector.broadcast %985 : f32 to vector<16x16xf32>
    %987 = arith.mulf %323, %986 : vector<16x16xf32>
    %988 = arith.addf %984, %987 : vector<16x16xf32>
    %c53_423 = arith.constant 53 : index
    %989 = memref.load %arg4[%c53_423] : memref<54xf32, #tpu.memory_space<smem>>
    %990 = vector.broadcast %989 : f32 to vector<16x16xf32>
    %991 = arith.mulf %325, %990 : vector<16x16xf32>
    %992 = arith.addf %988, %991 : vector<16x16xf32>
    %cst_424 = arith.constant 0.000000e+00 : f32
    %993 = vector.broadcast %cst_424 : f32 to vector<16x16xf32>
    %994 = arith.maximumf %992, %993 : vector<16x16xf32>
    %c0_425 = arith.constant 0 : index
    %c39_426 = arith.constant 39 : index
    %c0_427 = arith.constant 0 : index
    %c0_428 = arith.constant 0 : index
    %995 = vector.load %arg6[%c0_425, %c39_426, %c0_427, %c0_428] : memref<1x48x16x16xf32, #tpu.memory_space<vmem>>, vector<1x1x16x16xf32>
    %996 = vector.shape_cast %995 : vector<1x1x16x16xf32> to vector<16x16xf32>
    %997 = vector.shape_cast %994 : vector<16x16xf32> to vector<1x1x16x16xf32>
    tpu.vector_store %arg6[%c0_425, %c39_426, %c0_427, %c0_428], %997 {strides = array<i32>} : memref<1x48x16x16xf32, #tpu.memory_space<vmem>>, vector<1x1x16x16xf32>,
    %cst_429 = arith.constant 0.000000e+00 : f32
    %998 = vector.broadcast %cst_429 : f32 to vector<16x16xf32>
    %c0_430 = arith.constant 0 : index
    %999 = memref.load %arg5[%c0_430] : memref<3xf32, #tpu.memory_space<smem>>
    %1000 = vector.broadcast %999 : f32 to vector<16x16xf32>
    %1001 = arith.addf %998, %1000 : vector<16x16xf32>
    %c4_431 = arith.constant 4 : index
    %1002 = memref.load %arg4[%c4_431] : memref<54xf32, #tpu.memory_space<smem>>
    %1003 = vector.broadcast %1002 : f32 to vector<16x16xf32>
    %1004 = arith.mulf %339, %1003 : vector<16x16xf32>
    %1005 = arith.addf %1001, %1004 : vector<16x16xf32>
    %c31_432 = arith.constant 31 : index
    %1006 = memref.load %arg4[%c31_432] : memref<54xf32, #tpu.memory_space<smem>>
    %1007 = vector.broadcast %1006 : f32 to vector<16x16xf32>
    %1008 = arith.mulf %341, %1007 : vector<16x16xf32>
    %1009 = arith.addf %1005, %1008 : vector<16x16xf32>
    %cst_433 = arith.constant 0.000000e+00 : f32
    %1010 = vector.broadcast %cst_433 : f32 to vector<16x16xf32>
    %1011 = arith.maximumf %1009, %1010 : vector<16x16xf32>
    %c0_434 = arith.constant 0 : index
    %c8_435 = arith.constant 8 : index
    %c0_436 = arith.constant 0 : index
    %c0_437 = arith.constant 0 : index
    %1012 = vector.load %arg6[%c0_434, %c8_435, %c0_436, %c0_437] : memref<1x48x16x16xf32, #tpu.memory_space<vmem>>, vector<1x1x16x16xf32>
    %1013 = vector.shape_cast %1012 : vector<1x1x16x16xf32> to vector<16x16xf32>
    %1014 = vector.shape_cast %1011 : vector<16x16xf32> to vector<1x1x16x16xf32>
    tpu.vector_store %arg6[%c0_434, %c8_435, %c0_436, %c0_437], %1014 {strides = array<i32>} : memref<1x48x16x16xf32, #tpu.memory_space<vmem>>, vector<1x1x16x16xf32>,
    %cst_438 = arith.constant 0.000000e+00 : f32
    %1015 = vector.broadcast %cst_438 : f32 to vector<16x16xf32>
    %c1_439 = arith.constant 1 : index
    %1016 = memref.load %arg5[%c1_439] : memref<3xf32, #tpu.memory_space<smem>>
    %1017 = vector.broadcast %1016 : f32 to vector<16x16xf32>
    %1018 = arith.addf %1015, %1017 : vector<16x16xf32>
    %c13_440 = arith.constant 13 : index
    %1019 = memref.load %arg4[%c13_440] : memref<54xf32, #tpu.memory_space<smem>>
    %1020 = vector.broadcast %1019 : f32 to vector<16x16xf32>
    %1021 = arith.mulf %339, %1020 : vector<16x16xf32>
    %1022 = arith.addf %1018, %1021 : vector<16x16xf32>
    %c40_441 = arith.constant 40 : index
    %1023 = memref.load %arg4[%c40_441] : memref<54xf32, #tpu.memory_space<smem>>
    %1024 = vector.broadcast %1023 : f32 to vector<16x16xf32>
    %1025 = arith.mulf %341, %1024 : vector<16x16xf32>
    %1026 = arith.addf %1022, %1025 : vector<16x16xf32>
    %cst_442 = arith.constant 0.000000e+00 : f32
    %1027 = vector.broadcast %cst_442 : f32 to vector<16x16xf32>
    %1028 = arith.maximumf %1026, %1027 : vector<16x16xf32>
    %c0_443 = arith.constant 0 : index
    %c24_444 = arith.constant 24 : index
    %c0_445 = arith.constant 0 : index
    %c0_446 = arith.constant 0 : index
    %1029 = vector.load %arg6[%c0_443, %c24_444, %c0_445, %c0_446] : memref<1x48x16x16xf32, #tpu.memory_space<vmem>>, vector<1x1x16x16xf32>
    %1030 = vector.shape_cast %1029 : vector<1x1x16x16xf32> to vector<16x16xf32>
    %1031 = vector.shape_cast %1028 : vector<16x16xf32> to vector<1x1x16x16xf32>
    tpu.vector_store %arg6[%c0_443, %c24_444, %c0_445, %c0_446], %1031 {strides = array<i32>} : memref<1x48x16x16xf32, #tpu.memory_space<vmem>>, vector<1x1x16x16xf32>,
    %cst_447 = arith.constant 0.000000e+00 : f32
    %1032 = vector.broadcast %cst_447 : f32 to vector<16x16xf32>
    %c2_448 = arith.constant 2 : index
    %1033 = memref.load %arg5[%c2_448] : memref<3xf32, #tpu.memory_space<smem>>
    %1034 = vector.broadcast %1033 : f32 to vector<16x16xf32>
    %1035 = arith.addf %1032, %1034 : vector<16x16xf32>
    %c22_449 = arith.constant 22 : index
    %1036 = memref.load %arg4[%c22_449] : memref<54xf32, #tpu.memory_space<smem>>
    %1037 = vector.broadcast %1036 : f32 to vector<16x16xf32>
    %1038 = arith.mulf %339, %1037 : vector<16x16xf32>
    %1039 = arith.addf %1035, %1038 : vector<16x16xf32>
    %c49_450 = arith.constant 49 : index
    %1040 = memref.load %arg4[%c49_450] : memref<54xf32, #tpu.memory_space<smem>>
    %1041 = vector.broadcast %1040 : f32 to vector<16x16xf32>
    %1042 = arith.mulf %341, %1041 : vector<16x16xf32>
    %1043 = arith.addf %1039, %1042 : vector<16x16xf32>
    %cst_451 = arith.constant 0.000000e+00 : f32
    %1044 = vector.broadcast %cst_451 : f32 to vector<16x16xf32>
    %1045 = arith.maximumf %1043, %1044 : vector<16x16xf32>
    %c0_452 = arith.constant 0 : index
    %c40_453 = arith.constant 40 : index
    %c0_454 = arith.constant 0 : index
    %c0_455 = arith.constant 0 : index
    %1046 = vector.load %arg6[%c0_452, %c40_453, %c0_454, %c0_455] : memref<1x48x16x16xf32, #tpu.memory_space<vmem>>, vector<1x1x16x16xf32>
    %1047 = vector.shape_cast %1046 : vector<1x1x16x16xf32> to vector<16x16xf32>
    %1048 = vector.shape_cast %1045 : vector<16x16xf32> to vector<1x1x16x16xf32>
    tpu.vector_store %arg6[%c0_452, %c40_453, %c0_454, %c0_455], %1048 {strides = array<i32>} : memref<1x48x16x16xf32, #tpu.memory_space<vmem>>, vector<1x1x16x16xf32>,
    %cst_456 = arith.constant 0.000000e+00 : f32
    %1049 = vector.broadcast %cst_456 : f32 to vector<16x16xf32>
    %c0_457 = arith.constant 0 : index
    %1050 = memref.load %arg5[%c0_457] : memref<3xf32, #tpu.memory_space<smem>>
    %1051 = vector.broadcast %1050 : f32 to vector<16x16xf32>
    %1052 = arith.addf %1049, %1051 : vector<16x16xf32>
    %c3_458 = arith.constant 3 : index
    %1053 = memref.load %arg4[%c3_458] : memref<54xf32, #tpu.memory_space<smem>>
    %1054 = vector.broadcast %1053 : f32 to vector<16x16xf32>
    %1055 = arith.mulf %347, %1054 : vector<16x16xf32>
    %1056 = arith.addf %1052, %1055 : vector<16x16xf32>
    %c30_459 = arith.constant 30 : index
    %1057 = memref.load %arg4[%c30_459] : memref<54xf32, #tpu.memory_space<smem>>
    %1058 = vector.broadcast %1057 : f32 to vector<16x16xf32>
    %1059 = arith.mulf %349, %1058 : vector<16x16xf32>
    %1060 = arith.addf %1056, %1059 : vector<16x16xf32>
    %c5_460 = arith.constant 5 : index
    %1061 = memref.load %arg4[%c5_460] : memref<54xf32, #tpu.memory_space<smem>>
    %1062 = vector.broadcast %1061 : f32 to vector<16x16xf32>
    %1063 = arith.mulf %339, %1062 : vector<16x16xf32>
    %1064 = arith.addf %1060, %1063 : vector<16x16xf32>
    %c32_461 = arith.constant 32 : index
    %1065 = memref.load %arg4[%c32_461] : memref<54xf32, #tpu.memory_space<smem>>
    %1066 = vector.broadcast %1065 : f32 to vector<16x16xf32>
    %1067 = arith.mulf %341, %1066 : vector<16x16xf32>
    %1068 = arith.addf %1064, %1067 : vector<16x16xf32>
    %cst_462 = arith.constant 0.000000e+00 : f32
    %1069 = vector.broadcast %cst_462 : f32 to vector<16x16xf32>
    %1070 = arith.maximumf %1068, %1069 : vector<16x16xf32>
    %c0_463 = arith.constant 0 : index
    %c9_464 = arith.constant 9 : index
    %c0_465 = arith.constant 0 : index
    %c0_466 = arith.constant 0 : index
    %1071 = vector.load %arg6[%c0_463, %c9_464, %c0_465, %c0_466] : memref<1x48x16x16xf32, #tpu.memory_space<vmem>>, vector<1x1x16x16xf32>
    %1072 = vector.shape_cast %1071 : vector<1x1x16x16xf32> to vector<16x16xf32>
    %1073 = vector.shape_cast %1070 : vector<16x16xf32> to vector<1x1x16x16xf32>
    tpu.vector_store %arg6[%c0_463, %c9_464, %c0_465, %c0_466], %1073 {strides = array<i32>} : memref<1x48x16x16xf32, #tpu.memory_space<vmem>>, vector<1x1x16x16xf32>,
    %cst_467 = arith.constant 0.000000e+00 : f32
    %1074 = vector.broadcast %cst_467 : f32 to vector<16x16xf32>
    %c1_468 = arith.constant 1 : index
    %1075 = memref.load %arg5[%c1_468] : memref<3xf32, #tpu.memory_space<smem>>
    %1076 = vector.broadcast %1075 : f32 to vector<16x16xf32>
    %1077 = arith.addf %1074, %1076 : vector<16x16xf32>
    %c12_469 = arith.constant 12 : index
    %1078 = memref.load %arg4[%c12_469] : memref<54xf32, #tpu.memory_space<smem>>
    %1079 = vector.broadcast %1078 : f32 to vector<16x16xf32>
    %1080 = arith.mulf %347, %1079 : vector<16x16xf32>
    %1081 = arith.addf %1077, %1080 : vector<16x16xf32>
    %c39_470 = arith.constant 39 : index
    %1082 = memref.load %arg4[%c39_470] : memref<54xf32, #tpu.memory_space<smem>>
    %1083 = vector.broadcast %1082 : f32 to vector<16x16xf32>
    %1084 = arith.mulf %349, %1083 : vector<16x16xf32>
    %1085 = arith.addf %1081, %1084 : vector<16x16xf32>
    %c14_471 = arith.constant 14 : index
    %1086 = memref.load %arg4[%c14_471] : memref<54xf32, #tpu.memory_space<smem>>
    %1087 = vector.broadcast %1086 : f32 to vector<16x16xf32>
    %1088 = arith.mulf %339, %1087 : vector<16x16xf32>
    %1089 = arith.addf %1085, %1088 : vector<16x16xf32>
    %c41_472 = arith.constant 41 : index
    %1090 = memref.load %arg4[%c41_472] : memref<54xf32, #tpu.memory_space<smem>>
    %1091 = vector.broadcast %1090 : f32 to vector<16x16xf32>
    %1092 = arith.mulf %341, %1091 : vector<16x16xf32>
    %1093 = arith.addf %1089, %1092 : vector<16x16xf32>
    %cst_473 = arith.constant 0.000000e+00 : f32
    %1094 = vector.broadcast %cst_473 : f32 to vector<16x16xf32>
    %1095 = arith.maximumf %1093, %1094 : vector<16x16xf32>
    %c0_474 = arith.constant 0 : index
    %c25_475 = arith.constant 25 : index
    %c0_476 = arith.constant 0 : index
    %c0_477 = arith.constant 0 : index
    %1096 = vector.load %arg6[%c0_474, %c25_475, %c0_476, %c0_477] : memref<1x48x16x16xf32, #tpu.memory_space<vmem>>, vector<1x1x16x16xf32>
    %1097 = vector.shape_cast %1096 : vector<1x1x16x16xf32> to vector<16x16xf32>
    %1098 = vector.shape_cast %1095 : vector<16x16xf32> to vector<1x1x16x16xf32>
    tpu.vector_store %arg6[%c0_474, %c25_475, %c0_476, %c0_477], %1098 {strides = array<i32>} : memref<1x48x16x16xf32, #tpu.memory_space<vmem>>, vector<1x1x16x16xf32>,
    %cst_478 = arith.constant 0.000000e+00 : f32
    %1099 = vector.broadcast %cst_478 : f32 to vector<16x16xf32>
    %c2_479 = arith.constant 2 : index
    %1100 = memref.load %arg5[%c2_479] : memref<3xf32, #tpu.memory_space<smem>>
    %1101 = vector.broadcast %1100 : f32 to vector<16x16xf32>
    %1102 = arith.addf %1099, %1101 : vector<16x16xf32>
    %c21_480 = arith.constant 21 : index
    %1103 = memref.load %arg4[%c21_480] : memref<54xf32, #tpu.memory_space<smem>>
    %1104 = vector.broadcast %1103 : f32 to vector<16x16xf32>
    %1105 = arith.mulf %347, %1104 : vector<16x16xf32>
    %1106 = arith.addf %1102, %1105 : vector<16x16xf32>
    %c48_481 = arith.constant 48 : index
    %1107 = memref.load %arg4[%c48_481] : memref<54xf32, #tpu.memory_space<smem>>
    %1108 = vector.broadcast %1107 : f32 to vector<16x16xf32>
    %1109 = arith.mulf %349, %1108 : vector<16x16xf32>
    %1110 = arith.addf %1106, %1109 : vector<16x16xf32>
    %c23_482 = arith.constant 23 : index
    %1111 = memref.load %arg4[%c23_482] : memref<54xf32, #tpu.memory_space<smem>>
    %1112 = vector.broadcast %1111 : f32 to vector<16x16xf32>
    %1113 = arith.mulf %339, %1112 : vector<16x16xf32>
    %1114 = arith.addf %1110, %1113 : vector<16x16xf32>
    %c50_483 = arith.constant 50 : index
    %1115 = memref.load %arg4[%c50_483] : memref<54xf32, #tpu.memory_space<smem>>
    %1116 = vector.broadcast %1115 : f32 to vector<16x16xf32>
    %1117 = arith.mulf %341, %1116 : vector<16x16xf32>
    %1118 = arith.addf %1114, %1117 : vector<16x16xf32>
    %cst_484 = arith.constant 0.000000e+00 : f32
    %1119 = vector.broadcast %cst_484 : f32 to vector<16x16xf32>
    %1120 = arith.maximumf %1118, %1119 : vector<16x16xf32>
    %c0_485 = arith.constant 0 : index
    %c41_486 = arith.constant 41 : index
    %c0_487 = arith.constant 0 : index
    %c0_488 = arith.constant 0 : index
    %1121 = vector.load %arg6[%c0_485, %c41_486, %c0_487, %c0_488] : memref<1x48x16x16xf32, #tpu.memory_space<vmem>>, vector<1x1x16x16xf32>
    %1122 = vector.shape_cast %1121 : vector<1x1x16x16xf32> to vector<16x16xf32>
    %1123 = vector.shape_cast %1120 : vector<16x16xf32> to vector<1x1x16x16xf32>
    tpu.vector_store %arg6[%c0_485, %c41_486, %c0_487, %c0_488], %1123 {strides = array<i32>} : memref<1x48x16x16xf32, #tpu.memory_space<vmem>>, vector<1x1x16x16xf32>,
    %cst_489 = arith.constant 0.000000e+00 : f32
    %1124 = vector.broadcast %cst_489 : f32 to vector<16x16xf32>
    %c0_490 = arith.constant 0 : index
    %1125 = memref.load %arg5[%c0_490] : memref<3xf32, #tpu.memory_space<smem>>
    %1126 = vector.broadcast %1125 : f32 to vector<16x16xf32>
    %1127 = arith.addf %1124, %1126 : vector<16x16xf32>
    %c4_491 = arith.constant 4 : index
    %1128 = memref.load %arg4[%c4_491] : memref<54xf32, #tpu.memory_space<smem>>
    %1129 = vector.broadcast %1128 : f32 to vector<16x16xf32>
    %1130 = arith.mulf %347, %1129 : vector<16x16xf32>
    %1131 = arith.addf %1127, %1130 : vector<16x16xf32>
    %c31_492 = arith.constant 31 : index
    %1132 = memref.load %arg4[%c31_492] : memref<54xf32, #tpu.memory_space<smem>>
    %1133 = vector.broadcast %1132 : f32 to vector<16x16xf32>
    %1134 = arith.mulf %349, %1133 : vector<16x16xf32>
    %1135 = arith.addf %1131, %1134 : vector<16x16xf32>
    %cst_493 = arith.constant 0.000000e+00 : f32
    %1136 = vector.broadcast %cst_493 : f32 to vector<16x16xf32>
    %1137 = arith.maximumf %1135, %1136 : vector<16x16xf32>
    %c0_494 = arith.constant 0 : index
    %c10_495 = arith.constant 10 : index
    %c0_496 = arith.constant 0 : index
    %c0_497 = arith.constant 0 : index
    %1138 = vector.load %arg6[%c0_494, %c10_495, %c0_496, %c0_497] : memref<1x48x16x16xf32, #tpu.memory_space<vmem>>, vector<1x1x16x16xf32>
    %1139 = vector.shape_cast %1138 : vector<1x1x16x16xf32> to vector<16x16xf32>
    %1140 = vector.shape_cast %1137 : vector<16x16xf32> to vector<1x1x16x16xf32>
    tpu.vector_store %arg6[%c0_494, %c10_495, %c0_496, %c0_497], %1140 {strides = array<i32>} : memref<1x48x16x16xf32, #tpu.memory_space<vmem>>, vector<1x1x16x16xf32>,
    %cst_498 = arith.constant 0.000000e+00 : f32
    %1141 = vector.broadcast %cst_498 : f32 to vector<16x16xf32>
    %c1_499 = arith.constant 1 : index
    %1142 = memref.load %arg5[%c1_499] : memref<3xf32, #tpu.memory_space<smem>>
    %1143 = vector.broadcast %1142 : f32 to vector<16x16xf32>
    %1144 = arith.addf %1141, %1143 : vector<16x16xf32>
    %c13_500 = arith.constant 13 : index
    %1145 = memref.load %arg4[%c13_500] : memref<54xf32, #tpu.memory_space<smem>>
    %1146 = vector.broadcast %1145 : f32 to vector<16x16xf32>
    %1147 = arith.mulf %347, %1146 : vector<16x16xf32>
    %1148 = arith.addf %1144, %1147 : vector<16x16xf32>
    %c40_501 = arith.constant 40 : index
    %1149 = memref.load %arg4[%c40_501] : memref<54xf32, #tpu.memory_space<smem>>
    %1150 = vector.broadcast %1149 : f32 to vector<16x16xf32>
    %1151 = arith.mulf %349, %1150 : vector<16x16xf32>
    %1152 = arith.addf %1148, %1151 : vector<16x16xf32>
    %cst_502 = arith.constant 0.000000e+00 : f32
    %1153 = vector.broadcast %cst_502 : f32 to vector<16x16xf32>
    %1154 = arith.maximumf %1152, %1153 : vector<16x16xf32>
    %c0_503 = arith.constant 0 : index
    %c26_504 = arith.constant 26 : index
    %c0_505 = arith.constant 0 : index
    %c0_506 = arith.constant 0 : index
    %1155 = vector.load %arg6[%c0_503, %c26_504, %c0_505, %c0_506] : memref<1x48x16x16xf32, #tpu.memory_space<vmem>>, vector<1x1x16x16xf32>
    %1156 = vector.shape_cast %1155 : vector<1x1x16x16xf32> to vector<16x16xf32>
    %1157 = vector.shape_cast %1154 : vector<16x16xf32> to vector<1x1x16x16xf32>
    tpu.vector_store %arg6[%c0_503, %c26_504, %c0_505, %c0_506], %1157 {strides = array<i32>} : memref<1x48x16x16xf32, #tpu.memory_space<vmem>>, vector<1x1x16x16xf32>,
    %cst_507 = arith.constant 0.000000e+00 : f32
    %1158 = vector.broadcast %cst_507 : f32 to vector<16x16xf32>
    %c2_508 = arith.constant 2 : index
    %1159 = memref.load %arg5[%c2_508] : memref<3xf32, #tpu.memory_space<smem>>
    %1160 = vector.broadcast %1159 : f32 to vector<16x16xf32>
    %1161 = arith.addf %1158, %1160 : vector<16x16xf32>
    %c22_509 = arith.constant 22 : index
    %1162 = memref.load %arg4[%c22_509] : memref<54xf32, #tpu.memory_space<smem>>
    %1163 = vector.broadcast %1162 : f32 to vector<16x16xf32>
    %1164 = arith.mulf %347, %1163 : vector<16x16xf32>
    %1165 = arith.addf %1161, %1164 : vector<16x16xf32>
    %c49_510 = arith.constant 49 : index
    %1166 = memref.load %arg4[%c49_510] : memref<54xf32, #tpu.memory_space<smem>>
    %1167 = vector.broadcast %1166 : f32 to vector<16x16xf32>
    %1168 = arith.mulf %349, %1167 : vector<16x16xf32>
    %1169 = arith.addf %1165, %1168 : vector<16x16xf32>
    %cst_511 = arith.constant 0.000000e+00 : f32
    %1170 = vector.broadcast %cst_511 : f32 to vector<16x16xf32>
    %1171 = arith.maximumf %1169, %1170 : vector<16x16xf32>
    %c0_512 = arith.constant 0 : index
    %c42_513 = arith.constant 42 : index
    %c0_514 = arith.constant 0 : index
    %c0_515 = arith.constant 0 : index
    %1172 = vector.load %arg6[%c0_512, %c42_513, %c0_514, %c0_515] : memref<1x48x16x16xf32, #tpu.memory_space<vmem>>, vector<1x1x16x16xf32>
    %1173 = vector.shape_cast %1172 : vector<1x1x16x16xf32> to vector<16x16xf32>
    %1174 = vector.shape_cast %1171 : vector<16x16xf32> to vector<1x1x16x16xf32>
    tpu.vector_store %arg6[%c0_512, %c42_513, %c0_514, %c0_515], %1174 {strides = array<i32>} : memref<1x48x16x16xf32, #tpu.memory_space<vmem>>, vector<1x1x16x16xf32>,
    %cst_516 = arith.constant 0.000000e+00 : f32
    %1175 = vector.broadcast %cst_516 : f32 to vector<16x16xf32>
    %c0_517 = arith.constant 0 : index
    %1176 = memref.load %arg5[%c0_517] : memref<3xf32, #tpu.memory_space<smem>>
    %1177 = vector.broadcast %1176 : f32 to vector<16x16xf32>
    %1178 = arith.addf %1175, %1177 : vector<16x16xf32>
    %c3_518 = arith.constant 3 : index
    %1179 = memref.load %arg4[%c3_518] : memref<54xf32, #tpu.memory_space<smem>>
    %1180 = vector.broadcast %1179 : f32 to vector<16x16xf32>
    %1181 = arith.mulf %343, %1180 : vector<16x16xf32>
    %1182 = arith.addf %1178, %1181 : vector<16x16xf32>
    %c30_519 = arith.constant 30 : index
    %1183 = memref.load %arg4[%c30_519] : memref<54xf32, #tpu.memory_space<smem>>
    %1184 = vector.broadcast %1183 : f32 to vector<16x16xf32>
    %1185 = arith.mulf %345, %1184 : vector<16x16xf32>
    %1186 = arith.addf %1182, %1185 : vector<16x16xf32>
    %c5_520 = arith.constant 5 : index
    %1187 = memref.load %arg4[%c5_520] : memref<54xf32, #tpu.memory_space<smem>>
    %1188 = vector.broadcast %1187 : f32 to vector<16x16xf32>
    %1189 = arith.mulf %347, %1188 : vector<16x16xf32>
    %1190 = arith.addf %1186, %1189 : vector<16x16xf32>
    %c32_521 = arith.constant 32 : index
    %1191 = memref.load %arg4[%c32_521] : memref<54xf32, #tpu.memory_space<smem>>
    %1192 = vector.broadcast %1191 : f32 to vector<16x16xf32>
    %1193 = arith.mulf %349, %1192 : vector<16x16xf32>
    %1194 = arith.addf %1190, %1193 : vector<16x16xf32>
    %cst_522 = arith.constant 0.000000e+00 : f32
    %1195 = vector.broadcast %cst_522 : f32 to vector<16x16xf32>
    %1196 = arith.maximumf %1194, %1195 : vector<16x16xf32>
    %c0_523 = arith.constant 0 : index
    %c11_524 = arith.constant 11 : index
    %c0_525 = arith.constant 0 : index
    %c0_526 = arith.constant 0 : index
    %1197 = vector.load %arg6[%c0_523, %c11_524, %c0_525, %c0_526] : memref<1x48x16x16xf32, #tpu.memory_space<vmem>>, vector<1x1x16x16xf32>
    %1198 = vector.shape_cast %1197 : vector<1x1x16x16xf32> to vector<16x16xf32>
    %1199 = vector.shape_cast %1196 : vector<16x16xf32> to vector<1x1x16x16xf32>
    tpu.vector_store %arg6[%c0_523, %c11_524, %c0_525, %c0_526], %1199 {strides = array<i32>} : memref<1x48x16x16xf32, #tpu.memory_space<vmem>>, vector<1x1x16x16xf32>,
    %cst_527 = arith.constant 0.000000e+00 : f32
    %1200 = vector.broadcast %cst_527 : f32 to vector<16x16xf32>
    %c1_528 = arith.constant 1 : index
    %1201 = memref.load %arg5[%c1_528] : memref<3xf32, #tpu.memory_space<smem>>
    %1202 = vector.broadcast %1201 : f32 to vector<16x16xf32>
    %1203 = arith.addf %1200, %1202 : vector<16x16xf32>
    %c12_529 = arith.constant 12 : index
    %1204 = memref.load %arg4[%c12_529] : memref<54xf32, #tpu.memory_space<smem>>
    %1205 = vector.broadcast %1204 : f32 to vector<16x16xf32>
    %1206 = arith.mulf %343, %1205 : vector<16x16xf32>
    %1207 = arith.addf %1203, %1206 : vector<16x16xf32>
    %c39_530 = arith.constant 39 : index
    %1208 = memref.load %arg4[%c39_530] : memref<54xf32, #tpu.memory_space<smem>>
    %1209 = vector.broadcast %1208 : f32 to vector<16x16xf32>
    %1210 = arith.mulf %345, %1209 : vector<16x16xf32>
    %1211 = arith.addf %1207, %1210 : vector<16x16xf32>
    %c14_531 = arith.constant 14 : index
    %1212 = memref.load %arg4[%c14_531] : memref<54xf32, #tpu.memory_space<smem>>
    %1213 = vector.broadcast %1212 : f32 to vector<16x16xf32>
    %1214 = arith.mulf %347, %1213 : vector<16x16xf32>
    %1215 = arith.addf %1211, %1214 : vector<16x16xf32>
    %c41_532 = arith.constant 41 : index
    %1216 = memref.load %arg4[%c41_532] : memref<54xf32, #tpu.memory_space<smem>>
    %1217 = vector.broadcast %1216 : f32 to vector<16x16xf32>
    %1218 = arith.mulf %349, %1217 : vector<16x16xf32>
    %1219 = arith.addf %1215, %1218 : vector<16x16xf32>
    %cst_533 = arith.constant 0.000000e+00 : f32
    %1220 = vector.broadcast %cst_533 : f32 to vector<16x16xf32>
    %1221 = arith.maximumf %1219, %1220 : vector<16x16xf32>
    %c0_534 = arith.constant 0 : index
    %c27_535 = arith.constant 27 : index
    %c0_536 = arith.constant 0 : index
    %c0_537 = arith.constant 0 : index
    %1222 = vector.load %arg6[%c0_534, %c27_535, %c0_536, %c0_537] : memref<1x48x16x16xf32, #tpu.memory_space<vmem>>, vector<1x1x16x16xf32>
    %1223 = vector.shape_cast %1222 : vector<1x1x16x16xf32> to vector<16x16xf32>
    %1224 = vector.shape_cast %1221 : vector<16x16xf32> to vector<1x1x16x16xf32>
    tpu.vector_store %arg6[%c0_534, %c27_535, %c0_536, %c0_537], %1224 {strides = array<i32>} : memref<1x48x16x16xf32, #tpu.memory_space<vmem>>, vector<1x1x16x16xf32>,
    %cst_538 = arith.constant 0.000000e+00 : f32
    %1225 = vector.broadcast %cst_538 : f32 to vector<16x16xf32>
    %c2_539 = arith.constant 2 : index
    %1226 = memref.load %arg5[%c2_539] : memref<3xf32, #tpu.memory_space<smem>>
    %1227 = vector.broadcast %1226 : f32 to vector<16x16xf32>
    %1228 = arith.addf %1225, %1227 : vector<16x16xf32>
    %c21_540 = arith.constant 21 : index
    %1229 = memref.load %arg4[%c21_540] : memref<54xf32, #tpu.memory_space<smem>>
    %1230 = vector.broadcast %1229 : f32 to vector<16x16xf32>
    %1231 = arith.mulf %343, %1230 : vector<16x16xf32>
    %1232 = arith.addf %1228, %1231 : vector<16x16xf32>
    %c48_541 = arith.constant 48 : index
    %1233 = memref.load %arg4[%c48_541] : memref<54xf32, #tpu.memory_space<smem>>
    %1234 = vector.broadcast %1233 : f32 to vector<16x16xf32>
    %1235 = arith.mulf %345, %1234 : vector<16x16xf32>
    %1236 = arith.addf %1232, %1235 : vector<16x16xf32>
    %c23_542 = arith.constant 23 : index
    %1237 = memref.load %arg4[%c23_542] : memref<54xf32, #tpu.memory_space<smem>>
    %1238 = vector.broadcast %1237 : f32 to vector<16x16xf32>
    %1239 = arith.mulf %347, %1238 : vector<16x16xf32>
    %1240 = arith.addf %1236, %1239 : vector<16x16xf32>
    %c50_543 = arith.constant 50 : index
    %1241 = memref.load %arg4[%c50_543] : memref<54xf32, #tpu.memory_space<smem>>
    %1242 = vector.broadcast %1241 : f32 to vector<16x16xf32>
    %1243 = arith.mulf %349, %1242 : vector<16x16xf32>
    %1244 = arith.addf %1240, %1243 : vector<16x16xf32>
    %cst_544 = arith.constant 0.000000e+00 : f32
    %1245 = vector.broadcast %cst_544 : f32 to vector<16x16xf32>
    %1246 = arith.maximumf %1244, %1245 : vector<16x16xf32>
    %c0_545 = arith.constant 0 : index
    %c43_546 = arith.constant 43 : index
    %c0_547 = arith.constant 0 : index
    %c0_548 = arith.constant 0 : index
    %1247 = vector.load %arg6[%c0_545, %c43_546, %c0_547, %c0_548] : memref<1x48x16x16xf32, #tpu.memory_space<vmem>>, vector<1x1x16x16xf32>
    %1248 = vector.shape_cast %1247 : vector<1x1x16x16xf32> to vector<16x16xf32>
    %1249 = vector.shape_cast %1246 : vector<16x16xf32> to vector<1x1x16x16xf32>
    tpu.vector_store %arg6[%c0_545, %c43_546, %c0_547, %c0_548], %1249 {strides = array<i32>} : memref<1x48x16x16xf32, #tpu.memory_space<vmem>>, vector<1x1x16x16xf32>,
    %cst_549 = arith.constant 0.000000e+00 : f32
    %1250 = vector.broadcast %cst_549 : f32 to vector<16x16xf32>
    %c0_550 = arith.constant 0 : index
    %1251 = memref.load %arg5[%c0_550] : memref<3xf32, #tpu.memory_space<smem>>
    %1252 = vector.broadcast %1251 : f32 to vector<16x16xf32>
    %1253 = arith.addf %1250, %1252 : vector<16x16xf32>
    %c1_551 = arith.constant 1 : index
    %1254 = memref.load %arg4[%c1_551] : memref<54xf32, #tpu.memory_space<smem>>
    %1255 = vector.broadcast %1254 : f32 to vector<16x16xf32>
    %1256 = arith.mulf %327, %1255 : vector<16x16xf32>
    %1257 = arith.addf %1253, %1256 : vector<16x16xf32>
    %c28_552 = arith.constant 28 : index
    %1258 = memref.load %arg4[%c28_552] : memref<54xf32, #tpu.memory_space<smem>>
    %1259 = vector.broadcast %1258 : f32 to vector<16x16xf32>
    %1260 = arith.mulf %329, %1259 : vector<16x16xf32>
    %1261 = arith.addf %1257, %1260 : vector<16x16xf32>
    %c7_553 = arith.constant 7 : index
    %1262 = memref.load %arg4[%c7_553] : memref<54xf32, #tpu.memory_space<smem>>
    %1263 = vector.broadcast %1262 : f32 to vector<16x16xf32>
    %1264 = arith.mulf %339, %1263 : vector<16x16xf32>
    %1265 = arith.addf %1261, %1264 : vector<16x16xf32>
    %c34_554 = arith.constant 34 : index
    %1266 = memref.load %arg4[%c34_554] : memref<54xf32, #tpu.memory_space<smem>>
    %1267 = vector.broadcast %1266 : f32 to vector<16x16xf32>
    %1268 = arith.mulf %341, %1267 : vector<16x16xf32>
    %1269 = arith.addf %1265, %1268 : vector<16x16xf32>
    %cst_555 = arith.constant 0.000000e+00 : f32
    %1270 = vector.broadcast %cst_555 : f32 to vector<16x16xf32>
    %1271 = arith.maximumf %1269, %1270 : vector<16x16xf32>
    %c0_556 = arith.constant 0 : index
    %c12_557 = arith.constant 12 : index
    %c0_558 = arith.constant 0 : index
    %c0_559 = arith.constant 0 : index
    %1272 = vector.load %arg6[%c0_556, %c12_557, %c0_558, %c0_559] : memref<1x48x16x16xf32, #tpu.memory_space<vmem>>, vector<1x1x16x16xf32>
    %1273 = vector.shape_cast %1272 : vector<1x1x16x16xf32> to vector<16x16xf32>
    %1274 = vector.shape_cast %1271 : vector<16x16xf32> to vector<1x1x16x16xf32>
    tpu.vector_store %arg6[%c0_556, %c12_557, %c0_558, %c0_559], %1274 {strides = array<i32>} : memref<1x48x16x16xf32, #tpu.memory_space<vmem>>, vector<1x1x16x16xf32>,
    %cst_560 = arith.constant 0.000000e+00 : f32
    %1275 = vector.broadcast %cst_560 : f32 to vector<16x16xf32>
    %c1_561 = arith.constant 1 : index
    %1276 = memref.load %arg5[%c1_561] : memref<3xf32, #tpu.memory_space<smem>>
    %1277 = vector.broadcast %1276 : f32 to vector<16x16xf32>
    %1278 = arith.addf %1275, %1277 : vector<16x16xf32>
    %c10_562 = arith.constant 10 : index
    %1279 = memref.load %arg4[%c10_562] : memref<54xf32, #tpu.memory_space<smem>>
    %1280 = vector.broadcast %1279 : f32 to vector<16x16xf32>
    %1281 = arith.mulf %327, %1280 : vector<16x16xf32>
    %1282 = arith.addf %1278, %1281 : vector<16x16xf32>
    %c37_563 = arith.constant 37 : index
    %1283 = memref.load %arg4[%c37_563] : memref<54xf32, #tpu.memory_space<smem>>
    %1284 = vector.broadcast %1283 : f32 to vector<16x16xf32>
    %1285 = arith.mulf %329, %1284 : vector<16x16xf32>
    %1286 = arith.addf %1282, %1285 : vector<16x16xf32>
    %c16_564 = arith.constant 16 : index
    %1287 = memref.load %arg4[%c16_564] : memref<54xf32, #tpu.memory_space<smem>>
    %1288 = vector.broadcast %1287 : f32 to vector<16x16xf32>
    %1289 = arith.mulf %339, %1288 : vector<16x16xf32>
    %1290 = arith.addf %1286, %1289 : vector<16x16xf32>
    %c43_565 = arith.constant 43 : index
    %1291 = memref.load %arg4[%c43_565] : memref<54xf32, #tpu.memory_space<smem>>
    %1292 = vector.broadcast %1291 : f32 to vector<16x16xf32>
    %1293 = arith.mulf %341, %1292 : vector<16x16xf32>
    %1294 = arith.addf %1290, %1293 : vector<16x16xf32>
    %cst_566 = arith.constant 0.000000e+00 : f32
    %1295 = vector.broadcast %cst_566 : f32 to vector<16x16xf32>
    %1296 = arith.maximumf %1294, %1295 : vector<16x16xf32>
    %c0_567 = arith.constant 0 : index
    %c28_568 = arith.constant 28 : index
    %c0_569 = arith.constant 0 : index
    %c0_570 = arith.constant 0 : index
    %1297 = vector.load %arg6[%c0_567, %c28_568, %c0_569, %c0_570] : memref<1x48x16x16xf32, #tpu.memory_space<vmem>>, vector<1x1x16x16xf32>
    %1298 = vector.shape_cast %1297 : vector<1x1x16x16xf32> to vector<16x16xf32>
    %1299 = vector.shape_cast %1296 : vector<16x16xf32> to vector<1x1x16x16xf32>
    tpu.vector_store %arg6[%c0_567, %c28_568, %c0_569, %c0_570], %1299 {strides = array<i32>} : memref<1x48x16x16xf32, #tpu.memory_space<vmem>>, vector<1x1x16x16xf32>,
    %cst_571 = arith.constant 0.000000e+00 : f32
    %1300 = vector.broadcast %cst_571 : f32 to vector<16x16xf32>
    %c2_572 = arith.constant 2 : index
    %1301 = memref.load %arg5[%c2_572] : memref<3xf32, #tpu.memory_space<smem>>
    %1302 = vector.broadcast %1301 : f32 to vector<16x16xf32>
    %1303 = arith.addf %1300, %1302 : vector<16x16xf32>
    %c19_573 = arith.constant 19 : index
    %1304 = memref.load %arg4[%c19_573] : memref<54xf32, #tpu.memory_space<smem>>
    %1305 = vector.broadcast %1304 : f32 to vector<16x16xf32>
    %1306 = arith.mulf %327, %1305 : vector<16x16xf32>
    %1307 = arith.addf %1303, %1306 : vector<16x16xf32>
    %c46_574 = arith.constant 46 : index
    %1308 = memref.load %arg4[%c46_574] : memref<54xf32, #tpu.memory_space<smem>>
    %1309 = vector.broadcast %1308 : f32 to vector<16x16xf32>
    %1310 = arith.mulf %329, %1309 : vector<16x16xf32>
    %1311 = arith.addf %1307, %1310 : vector<16x16xf32>
    %c25_575 = arith.constant 25 : index
    %1312 = memref.load %arg4[%c25_575] : memref<54xf32, #tpu.memory_space<smem>>
    %1313 = vector.broadcast %1312 : f32 to vector<16x16xf32>
    %1314 = arith.mulf %339, %1313 : vector<16x16xf32>
    %1315 = arith.addf %1311, %1314 : vector<16x16xf32>
    %c52_576 = arith.constant 52 : index
    %1316 = memref.load %arg4[%c52_576] : memref<54xf32, #tpu.memory_space<smem>>
    %1317 = vector.broadcast %1316 : f32 to vector<16x16xf32>
    %1318 = arith.mulf %341, %1317 : vector<16x16xf32>
    %1319 = arith.addf %1315, %1318 : vector<16x16xf32>
    %cst_577 = arith.constant 0.000000e+00 : f32
    %1320 = vector.broadcast %cst_577 : f32 to vector<16x16xf32>
    %1321 = arith.maximumf %1319, %1320 : vector<16x16xf32>
    %c0_578 = arith.constant 0 : index
    %c44_579 = arith.constant 44 : index
    %c0_580 = arith.constant 0 : index
    %c0_581 = arith.constant 0 : index
    %1322 = vector.load %arg6[%c0_578, %c44_579, %c0_580, %c0_581] : memref<1x48x16x16xf32, #tpu.memory_space<vmem>>, vector<1x1x16x16xf32>
    %1323 = vector.shape_cast %1322 : vector<1x1x16x16xf32> to vector<16x16xf32>
    %1324 = vector.shape_cast %1321 : vector<16x16xf32> to vector<1x1x16x16xf32>
    tpu.vector_store %arg6[%c0_578, %c44_579, %c0_580, %c0_581], %1324 {strides = array<i32>} : memref<1x48x16x16xf32, #tpu.memory_space<vmem>>, vector<1x1x16x16xf32>,
    %cst_582 = arith.constant 0.000000e+00 : f32
    %1325 = vector.broadcast %cst_582 : f32 to vector<16x16xf32>
    %c0_583 = arith.constant 0 : index
    %1326 = memref.load %arg5[%c0_583] : memref<3xf32, #tpu.memory_space<smem>>
    %1327 = vector.broadcast %1326 : f32 to vector<16x16xf32>
    %1328 = arith.addf %1325, %1327 : vector<16x16xf32>
    %c0_584 = arith.constant 0 : index
    %1329 = memref.load %arg4[%c0_584] : memref<54xf32, #tpu.memory_space<smem>>
    %1330 = vector.broadcast %1329 : f32 to vector<16x16xf32>
    %1331 = arith.mulf %335, %1330 : vector<16x16xf32>
    %1332 = arith.addf %1328, %1331 : vector<16x16xf32>
    %c27_585 = arith.constant 27 : index
    %1333 = memref.load %arg4[%c27_585] : memref<54xf32, #tpu.memory_space<smem>>
    %1334 = vector.broadcast %1333 : f32 to vector<16x16xf32>
    %1335 = arith.mulf %337, %1334 : vector<16x16xf32>
    %1336 = arith.addf %1332, %1335 : vector<16x16xf32>
    %c2_586 = arith.constant 2 : index
    %1337 = memref.load %arg4[%c2_586] : memref<54xf32, #tpu.memory_space<smem>>
    %1338 = vector.broadcast %1337 : f32 to vector<16x16xf32>
    %1339 = arith.mulf %327, %1338 : vector<16x16xf32>
    %1340 = arith.addf %1336, %1339 : vector<16x16xf32>
    %c29_587 = arith.constant 29 : index
    %1341 = memref.load %arg4[%c29_587] : memref<54xf32, #tpu.memory_space<smem>>
    %1342 = vector.broadcast %1341 : f32 to vector<16x16xf32>
    %1343 = arith.mulf %329, %1342 : vector<16x16xf32>
    %1344 = arith.addf %1340, %1343 : vector<16x16xf32>
    %c6_588 = arith.constant 6 : index
    %1345 = memref.load %arg4[%c6_588] : memref<54xf32, #tpu.memory_space<smem>>
    %1346 = vector.broadcast %1345 : f32 to vector<16x16xf32>
    %1347 = arith.mulf %347, %1346 : vector<16x16xf32>
    %1348 = arith.addf %1344, %1347 : vector<16x16xf32>
    %c33_589 = arith.constant 33 : index
    %1349 = memref.load %arg4[%c33_589] : memref<54xf32, #tpu.memory_space<smem>>
    %1350 = vector.broadcast %1349 : f32 to vector<16x16xf32>
    %1351 = arith.mulf %349, %1350 : vector<16x16xf32>
    %1352 = arith.addf %1348, %1351 : vector<16x16xf32>
    %c8_590 = arith.constant 8 : index
    %1353 = memref.load %arg4[%c8_590] : memref<54xf32, #tpu.memory_space<smem>>
    %1354 = vector.broadcast %1353 : f32 to vector<16x16xf32>
    %1355 = arith.mulf %339, %1354 : vector<16x16xf32>
    %1356 = arith.addf %1352, %1355 : vector<16x16xf32>
    %c35_591 = arith.constant 35 : index
    %1357 = memref.load %arg4[%c35_591] : memref<54xf32, #tpu.memory_space<smem>>
    %1358 = vector.broadcast %1357 : f32 to vector<16x16xf32>
    %1359 = arith.mulf %341, %1358 : vector<16x16xf32>
    %1360 = arith.addf %1356, %1359 : vector<16x16xf32>
    %cst_592 = arith.constant 0.000000e+00 : f32
    %1361 = vector.broadcast %cst_592 : f32 to vector<16x16xf32>
    %1362 = arith.maximumf %1360, %1361 : vector<16x16xf32>
    %c0_593 = arith.constant 0 : index
    %c13_594 = arith.constant 13 : index
    %c0_595 = arith.constant 0 : index
    %c0_596 = arith.constant 0 : index
    %1363 = vector.load %arg6[%c0_593, %c13_594, %c0_595, %c0_596] : memref<1x48x16x16xf32, #tpu.memory_space<vmem>>, vector<1x1x16x16xf32>
    %1364 = vector.shape_cast %1363 : vector<1x1x16x16xf32> to vector<16x16xf32>
    %1365 = vector.shape_cast %1362 : vector<16x16xf32> to vector<1x1x16x16xf32>
    tpu.vector_store %arg6[%c0_593, %c13_594, %c0_595, %c0_596], %1365 {strides = array<i32>} : memref<1x48x16x16xf32, #tpu.memory_space<vmem>>, vector<1x1x16x16xf32>,
    %cst_597 = arith.constant 0.000000e+00 : f32
    %1366 = vector.broadcast %cst_597 : f32 to vector<16x16xf32>
    %c1_598 = arith.constant 1 : index
    %1367 = memref.load %arg5[%c1_598] : memref<3xf32, #tpu.memory_space<smem>>
    %1368 = vector.broadcast %1367 : f32 to vector<16x16xf32>
    %1369 = arith.addf %1366, %1368 : vector<16x16xf32>
    %c9_599 = arith.constant 9 : index
    %1370 = memref.load %arg4[%c9_599] : memref<54xf32, #tpu.memory_space<smem>>
    %1371 = vector.broadcast %1370 : f32 to vector<16x16xf32>
    %1372 = arith.mulf %335, %1371 : vector<16x16xf32>
    %1373 = arith.addf %1369, %1372 : vector<16x16xf32>
    %c36_600 = arith.constant 36 : index
    %1374 = memref.load %arg4[%c36_600] : memref<54xf32, #tpu.memory_space<smem>>
    %1375 = vector.broadcast %1374 : f32 to vector<16x16xf32>
    %1376 = arith.mulf %337, %1375 : vector<16x16xf32>
    %1377 = arith.addf %1373, %1376 : vector<16x16xf32>
    %c11_601 = arith.constant 11 : index
    %1378 = memref.load %arg4[%c11_601] : memref<54xf32, #tpu.memory_space<smem>>
    %1379 = vector.broadcast %1378 : f32 to vector<16x16xf32>
    %1380 = arith.mulf %327, %1379 : vector<16x16xf32>
    %1381 = arith.addf %1377, %1380 : vector<16x16xf32>
    %c38_602 = arith.constant 38 : index
    %1382 = memref.load %arg4[%c38_602] : memref<54xf32, #tpu.memory_space<smem>>
    %1383 = vector.broadcast %1382 : f32 to vector<16x16xf32>
    %1384 = arith.mulf %329, %1383 : vector<16x16xf32>
    %1385 = arith.addf %1381, %1384 : vector<16x16xf32>
    %c15_603 = arith.constant 15 : index
    %1386 = memref.load %arg4[%c15_603] : memref<54xf32, #tpu.memory_space<smem>>
    %1387 = vector.broadcast %1386 : f32 to vector<16x16xf32>
    %1388 = arith.mulf %347, %1387 : vector<16x16xf32>
    %1389 = arith.addf %1385, %1388 : vector<16x16xf32>
    %c42_604 = arith.constant 42 : index
    %1390 = memref.load %arg4[%c42_604] : memref<54xf32, #tpu.memory_space<smem>>
    %1391 = vector.broadcast %1390 : f32 to vector<16x16xf32>
    %1392 = arith.mulf %349, %1391 : vector<16x16xf32>
    %1393 = arith.addf %1389, %1392 : vector<16x16xf32>
    %c17_605 = arith.constant 17 : index
    %1394 = memref.load %arg4[%c17_605] : memref<54xf32, #tpu.memory_space<smem>>
    %1395 = vector.broadcast %1394 : f32 to vector<16x16xf32>
    %1396 = arith.mulf %339, %1395 : vector<16x16xf32>
    %1397 = arith.addf %1393, %1396 : vector<16x16xf32>
    %c44_606 = arith.constant 44 : index
    %1398 = memref.load %arg4[%c44_606] : memref<54xf32, #tpu.memory_space<smem>>
    %1399 = vector.broadcast %1398 : f32 to vector<16x16xf32>
    %1400 = arith.mulf %341, %1399 : vector<16x16xf32>
    %1401 = arith.addf %1397, %1400 : vector<16x16xf32>
    %cst_607 = arith.constant 0.000000e+00 : f32
    %1402 = vector.broadcast %cst_607 : f32 to vector<16x16xf32>
    %1403 = arith.maximumf %1401, %1402 : vector<16x16xf32>
    %c0_608 = arith.constant 0 : index
    %c29_609 = arith.constant 29 : index
    %c0_610 = arith.constant 0 : index
    %c0_611 = arith.constant 0 : index
    %1404 = vector.load %arg6[%c0_608, %c29_609, %c0_610, %c0_611] : memref<1x48x16x16xf32, #tpu.memory_space<vmem>>, vector<1x1x16x16xf32>
    %1405 = vector.shape_cast %1404 : vector<1x1x16x16xf32> to vector<16x16xf32>
    %1406 = vector.shape_cast %1403 : vector<16x16xf32> to vector<1x1x16x16xf32>
    tpu.vector_store %arg6[%c0_608, %c29_609, %c0_610, %c0_611], %1406 {strides = array<i32>} : memref<1x48x16x16xf32, #tpu.memory_space<vmem>>, vector<1x1x16x16xf32>,
    %cst_612 = arith.constant 0.000000e+00 : f32
    %1407 = vector.broadcast %cst_612 : f32 to vector<16x16xf32>
    %c2_613 = arith.constant 2 : index
    %1408 = memref.load %arg5[%c2_613] : memref<3xf32, #tpu.memory_space<smem>>
    %1409 = vector.broadcast %1408 : f32 to vector<16x16xf32>
    %1410 = arith.addf %1407, %1409 : vector<16x16xf32>
    %c18_614 = arith.constant 18 : index
    %1411 = memref.load %arg4[%c18_614] : memref<54xf32, #tpu.memory_space<smem>>
    %1412 = vector.broadcast %1411 : f32 to vector<16x16xf32>
    %1413 = arith.mulf %335, %1412 : vector<16x16xf32>
    %1414 = arith.addf %1410, %1413 : vector<16x16xf32>
    %c45_615 = arith.constant 45 : index
    %1415 = memref.load %arg4[%c45_615] : memref<54xf32, #tpu.memory_space<smem>>
    %1416 = vector.broadcast %1415 : f32 to vector<16x16xf32>
    %1417 = arith.mulf %337, %1416 : vector<16x16xf32>
    %1418 = arith.addf %1414, %1417 : vector<16x16xf32>
    %c20_616 = arith.constant 20 : index
    %1419 = memref.load %arg4[%c20_616] : memref<54xf32, #tpu.memory_space<smem>>
    %1420 = vector.broadcast %1419 : f32 to vector<16x16xf32>
    %1421 = arith.mulf %327, %1420 : vector<16x16xf32>
    %1422 = arith.addf %1418, %1421 : vector<16x16xf32>
    %c47_617 = arith.constant 47 : index
    %1423 = memref.load %arg4[%c47_617] : memref<54xf32, #tpu.memory_space<smem>>
    %1424 = vector.broadcast %1423 : f32 to vector<16x16xf32>
    %1425 = arith.mulf %329, %1424 : vector<16x16xf32>
    %1426 = arith.addf %1422, %1425 : vector<16x16xf32>
    %c24_618 = arith.constant 24 : index
    %1427 = memref.load %arg4[%c24_618] : memref<54xf32, #tpu.memory_space<smem>>
    %1428 = vector.broadcast %1427 : f32 to vector<16x16xf32>
    %1429 = arith.mulf %347, %1428 : vector<16x16xf32>
    %1430 = arith.addf %1426, %1429 : vector<16x16xf32>
    %c51_619 = arith.constant 51 : index
    %1431 = memref.load %arg4[%c51_619] : memref<54xf32, #tpu.memory_space<smem>>
    %1432 = vector.broadcast %1431 : f32 to vector<16x16xf32>
    %1433 = arith.mulf %349, %1432 : vector<16x16xf32>
    %1434 = arith.addf %1430, %1433 : vector<16x16xf32>
    %c26_620 = arith.constant 26 : index
    %1435 = memref.load %arg4[%c26_620] : memref<54xf32, #tpu.memory_space<smem>>
    %1436 = vector.broadcast %1435 : f32 to vector<16x16xf32>
    %1437 = arith.mulf %339, %1436 : vector<16x16xf32>
    %1438 = arith.addf %1434, %1437 : vector<16x16xf32>
    %c53_621 = arith.constant 53 : index
    %1439 = memref.load %arg4[%c53_621] : memref<54xf32, #tpu.memory_space<smem>>
    %1440 = vector.broadcast %1439 : f32 to vector<16x16xf32>
    %1441 = arith.mulf %341, %1440 : vector<16x16xf32>
    %1442 = arith.addf %1438, %1441 : vector<16x16xf32>
    %cst_622 = arith.constant 0.000000e+00 : f32
    %1443 = vector.broadcast %cst_622 : f32 to vector<16x16xf32>
    %1444 = arith.maximumf %1442, %1443 : vector<16x16xf32>
    %c0_623 = arith.constant 0 : index
    %c45_624 = arith.constant 45 : index
    %c0_625 = arith.constant 0 : index
    %c0_626 = arith.constant 0 : index
    %1445 = vector.load %arg6[%c0_623, %c45_624, %c0_625, %c0_626] : memref<1x48x16x16xf32, #tpu.memory_space<vmem>>, vector<1x1x16x16xf32>
    %1446 = vector.shape_cast %1445 : vector<1x1x16x16xf32> to vector<16x16xf32>
    %1447 = vector.shape_cast %1444 : vector<16x16xf32> to vector<1x1x16x16xf32>
    tpu.vector_store %arg6[%c0_623, %c45_624, %c0_625, %c0_626], %1447 {strides = array<i32>} : memref<1x48x16x16xf32, #tpu.memory_space<vmem>>, vector<1x1x16x16xf32>,
    %cst_627 = arith.constant 0.000000e+00 : f32
    %1448 = vector.broadcast %cst_627 : f32 to vector<16x16xf32>
    %c0_628 = arith.constant 0 : index
    %1449 = memref.load %arg5[%c0_628] : memref<3xf32, #tpu.memory_space<smem>>
    %1450 = vector.broadcast %1449 : f32 to vector<16x16xf32>
    %1451 = arith.addf %1448, %1450 : vector<16x16xf32>
    %c1_629 = arith.constant 1 : index
    %1452 = memref.load %arg4[%c1_629] : memref<54xf32, #tpu.memory_space<smem>>
    %1453 = vector.broadcast %1452 : f32 to vector<16x16xf32>
    %1454 = arith.mulf %335, %1453 : vector<16x16xf32>
    %1455 = arith.addf %1451, %1454 : vector<16x16xf32>
    %c28_630 = arith.constant 28 : index
    %1456 = memref.load %arg4[%c28_630] : memref<54xf32, #tpu.memory_space<smem>>
    %1457 = vector.broadcast %1456 : f32 to vector<16x16xf32>
    %1458 = arith.mulf %337, %1457 : vector<16x16xf32>
    %1459 = arith.addf %1455, %1458 : vector<16x16xf32>
    %c7_631 = arith.constant 7 : index
    %1460 = memref.load %arg4[%c7_631] : memref<54xf32, #tpu.memory_space<smem>>
    %1461 = vector.broadcast %1460 : f32 to vector<16x16xf32>
    %1462 = arith.mulf %347, %1461 : vector<16x16xf32>
    %1463 = arith.addf %1459, %1462 : vector<16x16xf32>
    %c34_632 = arith.constant 34 : index
    %1464 = memref.load %arg4[%c34_632] : memref<54xf32, #tpu.memory_space<smem>>
    %1465 = vector.broadcast %1464 : f32 to vector<16x16xf32>
    %1466 = arith.mulf %349, %1465 : vector<16x16xf32>
    %1467 = arith.addf %1463, %1466 : vector<16x16xf32>
    %cst_633 = arith.constant 0.000000e+00 : f32
    %1468 = vector.broadcast %cst_633 : f32 to vector<16x16xf32>
    %1469 = arith.maximumf %1467, %1468 : vector<16x16xf32>
    %c0_634 = arith.constant 0 : index
    %c14_635 = arith.constant 14 : index
    %c0_636 = arith.constant 0 : index
    %c0_637 = arith.constant 0 : index
    %1470 = vector.load %arg6[%c0_634, %c14_635, %c0_636, %c0_637] : memref<1x48x16x16xf32, #tpu.memory_space<vmem>>, vector<1x1x16x16xf32>
    %1471 = vector.shape_cast %1470 : vector<1x1x16x16xf32> to vector<16x16xf32>
    %1472 = vector.shape_cast %1469 : vector<16x16xf32> to vector<1x1x16x16xf32>
    tpu.vector_store %arg6[%c0_634, %c14_635, %c0_636, %c0_637], %1472 {strides = array<i32>} : memref<1x48x16x16xf32, #tpu.memory_space<vmem>>, vector<1x1x16x16xf32>,
    %cst_638 = arith.constant 0.000000e+00 : f32
    %1473 = vector.broadcast %cst_638 : f32 to vector<16x16xf32>
    %c1_639 = arith.constant 1 : index
    %1474 = memref.load %arg5[%c1_639] : memref<3xf32, #tpu.memory_space<smem>>
    %1475 = vector.broadcast %1474 : f32 to vector<16x16xf32>
    %1476 = arith.addf %1473, %1475 : vector<16x16xf32>
    %c10_640 = arith.constant 10 : index
    %1477 = memref.load %arg4[%c10_640] : memref<54xf32, #tpu.memory_space<smem>>
    %1478 = vector.broadcast %1477 : f32 to vector<16x16xf32>
    %1479 = arith.mulf %335, %1478 : vector<16x16xf32>
    %1480 = arith.addf %1476, %1479 : vector<16x16xf32>
    %c37_641 = arith.constant 37 : index
    %1481 = memref.load %arg4[%c37_641] : memref<54xf32, #tpu.memory_space<smem>>
    %1482 = vector.broadcast %1481 : f32 to vector<16x16xf32>
    %1483 = arith.mulf %337, %1482 : vector<16x16xf32>
    %1484 = arith.addf %1480, %1483 : vector<16x16xf32>
    %c16_642 = arith.constant 16 : index
    %1485 = memref.load %arg4[%c16_642] : memref<54xf32, #tpu.memory_space<smem>>
    %1486 = vector.broadcast %1485 : f32 to vector<16x16xf32>
    %1487 = arith.mulf %347, %1486 : vector<16x16xf32>
    %1488 = arith.addf %1484, %1487 : vector<16x16xf32>
    %c43_643 = arith.constant 43 : index
    %1489 = memref.load %arg4[%c43_643] : memref<54xf32, #tpu.memory_space<smem>>
    %1490 = vector.broadcast %1489 : f32 to vector<16x16xf32>
    %1491 = arith.mulf %349, %1490 : vector<16x16xf32>
    %1492 = arith.addf %1488, %1491 : vector<16x16xf32>
    %cst_644 = arith.constant 0.000000e+00 : f32
    %1493 = vector.broadcast %cst_644 : f32 to vector<16x16xf32>
    %1494 = arith.maximumf %1492, %1493 : vector<16x16xf32>
    %c0_645 = arith.constant 0 : index
    %c30_646 = arith.constant 30 : index
    %c0_647 = arith.constant 0 : index
    %c0_648 = arith.constant 0 : index
    %1495 = vector.load %arg6[%c0_645, %c30_646, %c0_647, %c0_648] : memref<1x48x16x16xf32, #tpu.memory_space<vmem>>, vector<1x1x16x16xf32>
    %1496 = vector.shape_cast %1495 : vector<1x1x16x16xf32> to vector<16x16xf32>
    %1497 = vector.shape_cast %1494 : vector<16x16xf32> to vector<1x1x16x16xf32>
    tpu.vector_store %arg6[%c0_645, %c30_646, %c0_647, %c0_648], %1497 {strides = array<i32>} : memref<1x48x16x16xf32, #tpu.memory_space<vmem>>, vector<1x1x16x16xf32>,
    %cst_649 = arith.constant 0.000000e+00 : f32
    %1498 = vector.broadcast %cst_649 : f32 to vector<16x16xf32>
    %c2_650 = arith.constant 2 : index
    %1499 = memref.load %arg5[%c2_650] : memref<3xf32, #tpu.memory_space<smem>>
    %1500 = vector.broadcast %1499 : f32 to vector<16x16xf32>
    %1501 = arith.addf %1498, %1500 : vector<16x16xf32>
    %c19_651 = arith.constant 19 : index
    %1502 = memref.load %arg4[%c19_651] : memref<54xf32, #tpu.memory_space<smem>>
    %1503 = vector.broadcast %1502 : f32 to vector<16x16xf32>
    %1504 = arith.mulf %335, %1503 : vector<16x16xf32>
    %1505 = arith.addf %1501, %1504 : vector<16x16xf32>
    %c46_652 = arith.constant 46 : index
    %1506 = memref.load %arg4[%c46_652] : memref<54xf32, #tpu.memory_space<smem>>
    %1507 = vector.broadcast %1506 : f32 to vector<16x16xf32>
    %1508 = arith.mulf %337, %1507 : vector<16x16xf32>
    %1509 = arith.addf %1505, %1508 : vector<16x16xf32>
    %c25_653 = arith.constant 25 : index
    %1510 = memref.load %arg4[%c25_653] : memref<54xf32, #tpu.memory_space<smem>>
    %1511 = vector.broadcast %1510 : f32 to vector<16x16xf32>
    %1512 = arith.mulf %347, %1511 : vector<16x16xf32>
    %1513 = arith.addf %1509, %1512 : vector<16x16xf32>
    %c52_654 = arith.constant 52 : index
    %1514 = memref.load %arg4[%c52_654] : memref<54xf32, #tpu.memory_space<smem>>
    %1515 = vector.broadcast %1514 : f32 to vector<16x16xf32>
    %1516 = arith.mulf %349, %1515 : vector<16x16xf32>
    %1517 = arith.addf %1513, %1516 : vector<16x16xf32>
    %cst_655 = arith.constant 0.000000e+00 : f32
    %1518 = vector.broadcast %cst_655 : f32 to vector<16x16xf32>
    %1519 = arith.maximumf %1517, %1518 : vector<16x16xf32>
    %c0_656 = arith.constant 0 : index
    %c46_657 = arith.constant 46 : index
    %c0_658 = arith.constant 0 : index
    %c0_659 = arith.constant 0 : index
    %1520 = vector.load %arg6[%c0_656, %c46_657, %c0_658, %c0_659] : memref<1x48x16x16xf32, #tpu.memory_space<vmem>>, vector<1x1x16x16xf32>
    %1521 = vector.shape_cast %1520 : vector<1x1x16x16xf32> to vector<16x16xf32>
    %1522 = vector.shape_cast %1519 : vector<16x16xf32> to vector<1x1x16x16xf32>
    tpu.vector_store %arg6[%c0_656, %c46_657, %c0_658, %c0_659], %1522 {strides = array<i32>} : memref<1x48x16x16xf32, #tpu.memory_space<vmem>>, vector<1x1x16x16xf32>,
    %cst_660 = arith.constant 0.000000e+00 : f32
    %1523 = vector.broadcast %cst_660 : f32 to vector<16x16xf32>
    %c0_661 = arith.constant 0 : index
    %1524 = memref.load %arg5[%c0_661] : memref<3xf32, #tpu.memory_space<smem>>
    %1525 = vector.broadcast %1524 : f32 to vector<16x16xf32>
    %1526 = arith.addf %1523, %1525 : vector<16x16xf32>
    %c0_662 = arith.constant 0 : index
    %1527 = memref.load %arg4[%c0_662] : memref<54xf32, #tpu.memory_space<smem>>
    %1528 = vector.broadcast %1527 : f32 to vector<16x16xf32>
    %1529 = arith.mulf %331, %1528 : vector<16x16xf32>
    %1530 = arith.addf %1526, %1529 : vector<16x16xf32>
    %c27_663 = arith.constant 27 : index
    %1531 = memref.load %arg4[%c27_663] : memref<54xf32, #tpu.memory_space<smem>>
    %1532 = vector.broadcast %1531 : f32 to vector<16x16xf32>
    %1533 = arith.mulf %333, %1532 : vector<16x16xf32>
    %1534 = arith.addf %1530, %1533 : vector<16x16xf32>
    %c2_664 = arith.constant 2 : index
    %1535 = memref.load %arg4[%c2_664] : memref<54xf32, #tpu.memory_space<smem>>
    %1536 = vector.broadcast %1535 : f32 to vector<16x16xf32>
    %1537 = arith.mulf %335, %1536 : vector<16x16xf32>
    %1538 = arith.addf %1534, %1537 : vector<16x16xf32>
    %c29_665 = arith.constant 29 : index
    %1539 = memref.load %arg4[%c29_665] : memref<54xf32, #tpu.memory_space<smem>>
    %1540 = vector.broadcast %1539 : f32 to vector<16x16xf32>
    %1541 = arith.mulf %337, %1540 : vector<16x16xf32>
    %1542 = arith.addf %1538, %1541 : vector<16x16xf32>
    %c6_666 = arith.constant 6 : index
    %1543 = memref.load %arg4[%c6_666] : memref<54xf32, #tpu.memory_space<smem>>
    %1544 = vector.broadcast %1543 : f32 to vector<16x16xf32>
    %1545 = arith.mulf %343, %1544 : vector<16x16xf32>
    %1546 = arith.addf %1542, %1545 : vector<16x16xf32>
    %c33_667 = arith.constant 33 : index
    %1547 = memref.load %arg4[%c33_667] : memref<54xf32, #tpu.memory_space<smem>>
    %1548 = vector.broadcast %1547 : f32 to vector<16x16xf32>
    %1549 = arith.mulf %345, %1548 : vector<16x16xf32>
    %1550 = arith.addf %1546, %1549 : vector<16x16xf32>
    %c8_668 = arith.constant 8 : index
    %1551 = memref.load %arg4[%c8_668] : memref<54xf32, #tpu.memory_space<smem>>
    %1552 = vector.broadcast %1551 : f32 to vector<16x16xf32>
    %1553 = arith.mulf %347, %1552 : vector<16x16xf32>
    %1554 = arith.addf %1550, %1553 : vector<16x16xf32>
    %c35_669 = arith.constant 35 : index
    %1555 = memref.load %arg4[%c35_669] : memref<54xf32, #tpu.memory_space<smem>>
    %1556 = vector.broadcast %1555 : f32 to vector<16x16xf32>
    %1557 = arith.mulf %349, %1556 : vector<16x16xf32>
    %1558 = arith.addf %1554, %1557 : vector<16x16xf32>
    %cst_670 = arith.constant 0.000000e+00 : f32
    %1559 = vector.broadcast %cst_670 : f32 to vector<16x16xf32>
    %1560 = arith.maximumf %1558, %1559 : vector<16x16xf32>
    %c0_671 = arith.constant 0 : index
    %c15_672 = arith.constant 15 : index
    %c0_673 = arith.constant 0 : index
    %c0_674 = arith.constant 0 : index
    %1561 = vector.load %arg6[%c0_671, %c15_672, %c0_673, %c0_674] : memref<1x48x16x16xf32, #tpu.memory_space<vmem>>, vector<1x1x16x16xf32>
    %1562 = vector.shape_cast %1561 : vector<1x1x16x16xf32> to vector<16x16xf32>
    %1563 = vector.shape_cast %1560 : vector<16x16xf32> to vector<1x1x16x16xf32>
    tpu.vector_store %arg6[%c0_671, %c15_672, %c0_673, %c0_674], %1563 {strides = array<i32>} : memref<1x48x16x16xf32, #tpu.memory_space<vmem>>, vector<1x1x16x16xf32>,
    %cst_675 = arith.constant 0.000000e+00 : f32
    %1564 = vector.broadcast %cst_675 : f32 to vector<16x16xf32>
    %c1_676 = arith.constant 1 : index
    %1565 = memref.load %arg5[%c1_676] : memref<3xf32, #tpu.memory_space<smem>>
    %1566 = vector.broadcast %1565 : f32 to vector<16x16xf32>
    %1567 = arith.addf %1564, %1566 : vector<16x16xf32>
    %c9_677 = arith.constant 9 : index
    %1568 = memref.load %arg4[%c9_677] : memref<54xf32, #tpu.memory_space<smem>>
    %1569 = vector.broadcast %1568 : f32 to vector<16x16xf32>
    %1570 = arith.mulf %331, %1569 : vector<16x16xf32>
    %1571 = arith.addf %1567, %1570 : vector<16x16xf32>
    %c36_678 = arith.constant 36 : index
    %1572 = memref.load %arg4[%c36_678] : memref<54xf32, #tpu.memory_space<smem>>
    %1573 = vector.broadcast %1572 : f32 to vector<16x16xf32>
    %1574 = arith.mulf %333, %1573 : vector<16x16xf32>
    %1575 = arith.addf %1571, %1574 : vector<16x16xf32>
    %c11_679 = arith.constant 11 : index
    %1576 = memref.load %arg4[%c11_679] : memref<54xf32, #tpu.memory_space<smem>>
    %1577 = vector.broadcast %1576 : f32 to vector<16x16xf32>
    %1578 = arith.mulf %335, %1577 : vector<16x16xf32>
    %1579 = arith.addf %1575, %1578 : vector<16x16xf32>
    %c38_680 = arith.constant 38 : index
    %1580 = memref.load %arg4[%c38_680] : memref<54xf32, #tpu.memory_space<smem>>
    %1581 = vector.broadcast %1580 : f32 to vector<16x16xf32>
    %1582 = arith.mulf %337, %1581 : vector<16x16xf32>
    %1583 = arith.addf %1579, %1582 : vector<16x16xf32>
    %c15_681 = arith.constant 15 : index
    %1584 = memref.load %arg4[%c15_681] : memref<54xf32, #tpu.memory_space<smem>>
    %1585 = vector.broadcast %1584 : f32 to vector<16x16xf32>
    %1586 = arith.mulf %343, %1585 : vector<16x16xf32>
    %1587 = arith.addf %1583, %1586 : vector<16x16xf32>
    %c42_682 = arith.constant 42 : index
    %1588 = memref.load %arg4[%c42_682] : memref<54xf32, #tpu.memory_space<smem>>
    %1589 = vector.broadcast %1588 : f32 to vector<16x16xf32>
    %1590 = arith.mulf %345, %1589 : vector<16x16xf32>
    %1591 = arith.addf %1587, %1590 : vector<16x16xf32>
    %c17_683 = arith.constant 17 : index
    %1592 = memref.load %arg4[%c17_683] : memref<54xf32, #tpu.memory_space<smem>>
    %1593 = vector.broadcast %1592 : f32 to vector<16x16xf32>
    %1594 = arith.mulf %347, %1593 : vector<16x16xf32>
    %1595 = arith.addf %1591, %1594 : vector<16x16xf32>
    %c44_684 = arith.constant 44 : index
    %1596 = memref.load %arg4[%c44_684] : memref<54xf32, #tpu.memory_space<smem>>
    %1597 = vector.broadcast %1596 : f32 to vector<16x16xf32>
    %1598 = arith.mulf %349, %1597 : vector<16x16xf32>
    %1599 = arith.addf %1595, %1598 : vector<16x16xf32>
    %cst_685 = arith.constant 0.000000e+00 : f32
    %1600 = vector.broadcast %cst_685 : f32 to vector<16x16xf32>
    %1601 = arith.maximumf %1599, %1600 : vector<16x16xf32>
    %c0_686 = arith.constant 0 : index
    %c31_687 = arith.constant 31 : index
    %c0_688 = arith.constant 0 : index
    %c0_689 = arith.constant 0 : index
    %1602 = vector.load %arg6[%c0_686, %c31_687, %c0_688, %c0_689] : memref<1x48x16x16xf32, #tpu.memory_space<vmem>>, vector<1x1x16x16xf32>
    %1603 = vector.shape_cast %1602 : vector<1x1x16x16xf32> to vector<16x16xf32>
    %1604 = vector.shape_cast %1601 : vector<16x16xf32> to vector<1x1x16x16xf32>
    tpu.vector_store %arg6[%c0_686, %c31_687, %c0_688, %c0_689], %1604 {strides = array<i32>} : memref<1x48x16x16xf32, #tpu.memory_space<vmem>>, vector<1x1x16x16xf32>,
    %cst_690 = arith.constant 0.000000e+00 : f32
    %1605 = vector.broadcast %cst_690 : f32 to vector<16x16xf32>
    %c2_691 = arith.constant 2 : index
    %1606 = memref.load %arg5[%c2_691] : memref<3xf32, #tpu.memory_space<smem>>
    %1607 = vector.broadcast %1606 : f32 to vector<16x16xf32>
    %1608 = arith.addf %1605, %1607 : vector<16x16xf32>
    %c18_692 = arith.constant 18 : index
    %1609 = memref.load %arg4[%c18_692] : memref<54xf32, #tpu.memory_space<smem>>
    %1610 = vector.broadcast %1609 : f32 to vector<16x16xf32>
    %1611 = arith.mulf %331, %1610 : vector<16x16xf32>
    %1612 = arith.addf %1608, %1611 : vector<16x16xf32>
    %c45_693 = arith.constant 45 : index
    %1613 = memref.load %arg4[%c45_693] : memref<54xf32, #tpu.memory_space<smem>>
    %1614 = vector.broadcast %1613 : f32 to vector<16x16xf32>
    %1615 = arith.mulf %333, %1614 : vector<16x16xf32>
    %1616 = arith.addf %1612, %1615 : vector<16x16xf32>
    %c20_694 = arith.constant 20 : index
    %1617 = memref.load %arg4[%c20_694] : memref<54xf32, #tpu.memory_space<smem>>
    %1618 = vector.broadcast %1617 : f32 to vector<16x16xf32>
    %1619 = arith.mulf %335, %1618 : vector<16x16xf32>
    %1620 = arith.addf %1616, %1619 : vector<16x16xf32>
    %c47_695 = arith.constant 47 : index
    %1621 = memref.load %arg4[%c47_695] : memref<54xf32, #tpu.memory_space<smem>>
    %1622 = vector.broadcast %1621 : f32 to vector<16x16xf32>
    %1623 = arith.mulf %337, %1622 : vector<16x16xf32>
    %1624 = arith.addf %1620, %1623 : vector<16x16xf32>
    %c24_696 = arith.constant 24 : index
    %1625 = memref.load %arg4[%c24_696] : memref<54xf32, #tpu.memory_space<smem>>
    %1626 = vector.broadcast %1625 : f32 to vector<16x16xf32>
    %1627 = arith.mulf %343, %1626 : vector<16x16xf32>
    %1628 = arith.addf %1624, %1627 : vector<16x16xf32>
    %c51_697 = arith.constant 51 : index
    %1629 = memref.load %arg4[%c51_697] : memref<54xf32, #tpu.memory_space<smem>>
    %1630 = vector.broadcast %1629 : f32 to vector<16x16xf32>
    %1631 = arith.mulf %345, %1630 : vector<16x16xf32>
    %1632 = arith.addf %1628, %1631 : vector<16x16xf32>
    %c26_698 = arith.constant 26 : index
    %1633 = memref.load %arg4[%c26_698] : memref<54xf32, #tpu.memory_space<smem>>
    %1634 = vector.broadcast %1633 : f32 to vector<16x16xf32>
    %1635 = arith.mulf %347, %1634 : vector<16x16xf32>
    %1636 = arith.addf %1632, %1635 : vector<16x16xf32>
    %c53_699 = arith.constant 53 : index
    %1637 = memref.load %arg4[%c53_699] : memref<54xf32, #tpu.memory_space<smem>>
    %1638 = vector.broadcast %1637 : f32 to vector<16x16xf32>
    %1639 = arith.mulf %349, %1638 : vector<16x16xf32>
    %1640 = arith.addf %1636, %1639 : vector<16x16xf32>
    %cst_700 = arith.constant 0.000000e+00 : f32
    %1641 = vector.broadcast %cst_700 : f32 to vector<16x16xf32>
    %1642 = arith.maximumf %1640, %1641 : vector<16x16xf32>
    %c0_701 = arith.constant 0 : index
    %c47_702 = arith.constant 47 : index
    %c0_703 = arith.constant 0 : index
    %c0_704 = arith.constant 0 : index
    %1643 = vector.load %arg6[%c0_701, %c47_702, %c0_703, %c0_704] : memref<1x48x16x16xf32, #tpu.memory_space<vmem>>, vector<1x1x16x16xf32>
    %1644 = vector.shape_cast %1643 : vector<1x1x16x16xf32> to vector<16x16xf32>
    %1645 = vector.shape_cast %1642 : vector<16x16xf32> to vector<1x1x16x16xf32>
    tpu.vector_store %arg6[%c0_701, %c47_702, %c0_703, %c0_704], %1645 {strides = array<i32>} : memref<1x48x16x16xf32, #tpu.memory_space<vmem>>, vector<1x1x16x16xf32>,
    return
  }
  func.func @transform_0(%arg0: i32) -> (i32, i32, i32, i32) {
    %c0_i32 = arith.constant 0 : i32
    %c0_i32_0 = arith.constant 0 : i32
    %c0_i32_1 = arith.constant 0 : i32
    %c0_i32_2 = arith.constant 0 : i32
    return %arg0, %c0_i32, %c0_i32_0, %c0_i32_1 : i32, i32, i32, i32
  }
  func.func @transform_1(%arg0: i32) -> i32 {
    %c0_i32 = arith.constant 0 : i32
    %c0_i32_0 = arith.constant 0 : i32
    return %c0_i32 : i32
  }
  func.func @transform_2(%arg0: i32) -> i32 {
    %c0_i32 = arith.constant 0 : i32
    %c0_i32_0 = arith.constant 0 : i32
    return %c0_i32 : i32
  }
  func.func @transform_3(%arg0: i32) -> i32 {
    %c0_i32 = arith.constant 0 : i32
    %c0_i32_0 = arith.constant 0 : i32
    return %c0_i32 : i32
  }
  func.func @transform_4(%arg0: i32) -> i32 {
    %c0_i32 = arith.constant 0 : i32
    %c0_i32_0 = arith.constant 0 : i32
    return %c0_i32 : i32
  }
  func.func @transform_5(%arg0: i32) -> (i32, i32, i32, i32) {
    %c0_i32 = arith.constant 0 : i32
    %c0_i32_0 = arith.constant 0 : i32
    %c0_i32_1 = arith.constant 0 : i32
    %c0_i32_2 = arith.constant 0 : i32
    return %arg0, %c0_i32, %c0_i32_0, %c0_i32_1 : i32, i32, i32, i32
  }
}

</mosaic_0001>

<bundles_post_ra>
// kernel: forward.1
= control target key start
LH: loop header
LB: loop body
LE: loop exit
PB: predicated region body
PF: predicated region fallthrough
CT: control target
= control target key end

     0   :  { %s6803_s0 = inlined_call_operand.vmem [shape: f32[2,3,17,17], index: 0, kind: input, shape index: {}]   ;;  %s6804_s1 = inlined_call_operand.hbm [shape: f32[54], index: 1, kind: input, shape index: {}]   ;;  %s6805_s2 = inlined_call_operand.hbm [shape: f32[2], index: 2, kind: input, shape index: {}]   ;;  %s6806_s3 = inlined_call_operand.hbm [shape: f32[54], index: 3, kind: input, shape index: {}]   ;;  %s6807_s4 = inlined_call_operand.hbm [shape: f32[3], index: 4, kind: input, shape index: {}]   ;;  %s6808_s5 = inlined_call_operand.vmem [shape: f32[2,48,16,16], index: 5, kind: output, shape index: {}]  }
   0x1   :  { %6936 = sst [smem:[#allocation137_spill]] %s6803_s0 }
   0x2   :  { %6937 = sst [smem:[#allocation138_spill]] %s6804_s1 }
   0x3   :  { %6938 = sst [smem:[#allocation139_spill]] %s6805_s2 }
   0x4   :  { %6939 = sst [smem:[#allocation140_spill]] %s6806_s3 }
   0x5   :  { %6940 = sst [smem:[#allocation141_spill]] %s6807_s4 }
   0x6   :  { %6941 = sst [smem:[#allocation142_spill]] %s6808_s5 }
   0x7   :  { %10 = vsyncpa [#allocation4], 0 }
   0x8   :  { %11 = vsyncpa [#allocation6], 0 }
   0x9   :  { %12 = vsyncpa [#allocation9], 0  ;;  %s3658_s18 = smov 0  }
   0xa LB: > { %6942 = sst [smem:[#allocation13_spill]] %s3619_s18  ;;  %s3664_s19 = sadd.s32 4294967295, %s3619_s18   ;;  %s3619_s18 = sphi %s3658_s18, %s18_s18  }
   0xb   : > { %p3056_p0 = scmp.ge.s32.totalorder %s3619_s18, 1  ;;  %p159_p1 = scmp.lt.s32.totalorder %s3619_s18, 3 }
   0xc   : > { %p3505_p3 = scmp.eq.s32.totalorder %s3664_s19, 0  ;;  %s6945_s2 = sld [smem:[#allocation139_spill]] }
   0xd   : > { %p3668_p2 = pnand %p3056_p0, %p159_p1 }
   0xf   : > { %p3492_p4 = pneg %p3668_p2 }
  0x11   : > { %p3677_p5 = pnand %p3505_p3, %p3492_p4 }
  0x12   : > { %s3549_s24 = scalar_lea.hbm %s6945_s2, 16 }
  0x13   : > { %p3550_p6 = scmp.ne.s32.totalorder %s6945_s2, %s3549_s24  ;;  %p3551_p7 = pneg %p3677_p5 }
  0x14   : > { %p3556_p10 = scmp.lt.u32.totalorder %s3549_s24, %s6945_s2 }
  0x15   : > { %p3552_p8 = pnand %p3551_p7, %p3550_p6 }
  0x17   : > { %p3553_p9 = pneg %p3552_p8 }
  0x19   : > { %p3558_p11 = pnand %p3556_p10, %p3553_p9 }
  0x1b   : > { %3561 = shalt.err (!%p3558_p11)
}
  0x1c   : > { %s3621_s29 = smov [#allocation5]   ;;  %s6946_s1 = sld [smem:[#allocation138_spill]] }
  0x1d   : > { %3498 = dma.hbm_to_smem (!%p3677_p5), %s6945_s2, 16, %s3621_s29, [#allocation6]  }
  0x22   : > { %s3562_s9 = scalar_lea.hbm %s6946_s1, 16 }
  0x23   : > { %p3563_p12 = scmp.ne.s32.totalorder %s6946_s1, %s3562_s9  ;;  %p3569_p1 = scmp.lt.u32.totalorder %s3562_s9, %s6946_s1 }
  0x25   : > { %p3565_p13 = pnand %p3563_p12, %p3551_p7 }
  0x27   : > { %p3566_p0 = pneg %p3565_p13 }
  0x29   : > { %p3571_p4 = pnand %p3569_p1, %p3566_p0 }
  0x2b   : > { %3574 = shalt.err (!%p3571_p4)
}
  0x2c   : > { %s3622_s14 = smov [#allocation3]   ;;  %s6947_s3 = sld [smem:[#allocation140_spill]] }
  0x2d   : > { %3495 = dma.hbm_to_smem (!%p3677_p5), %s6946_s1, 16, %s3622_s14, [#allocation4]  }
  0x32   : > { %s3575_s23 = scalar_lea.hbm %s6947_s3, 16 }
  0x33   : > { %p3576_p6 = scmp.ne.s32.totalorder %s6947_s3, %s3575_s23  ;;  %p3582_p10 = scmp.lt.u32.totalorder %s3575_s23, %s6947_s3 }
  0x35   : > { %p3578_p8 = pnand %p3576_p6, %p3551_p7 }
  0x37   : > { %p3579_p9 = pneg %p3578_p8 }
  0x39   : > { %p3584_p11 = pnand %p3582_p10, %p3579_p9 }
  0x3b   : > { %3587 = shalt.err (!%p3584_p11)
}
  0x3c   : > { %s3623_s28 = smov [#allocation7]   ;;  %s6948_s4 = sld [smem:[#allocation141_spill]] }
  0x3d   : > { %3501 = dma.hbm_to_smem (!%p3677_p5), %s6947_s3, 16, %s3623_s28, [#allocation6]  }
  0x42   : > { %s3588_s8 = scalar_lea.hbm %s6948_s4, 16 }
  0x43   : > { %p3589_p12 = scmp.ne.s32.totalorder %s6948_s4, %s3588_s8  ;;  %p3595_p1 = scmp.lt.u32.totalorder %s3588_s8, %s6948_s4 }
  0x45   : > { %p3591_p13 = pnand %p3589_p12, %p3551_p7 }
  0x47   : > { %p3592_p0 = pneg %p3591_p13 }
  0x49   : > { %p3597_p4 = pnand %p3595_p1, %p3592_p0 }
  0x4b   : > { %3600 = shalt.err (!%p3597_p4)
}
  0x4c   : > { %s3624_s13 = smov [#allocation8]   ;;  %218 = sbr.rel (%p3668_p2) target bundleno = 848 (0x350), region = 40 }
  0x4d   : > { %3504 = dma.hbm_to_smem (!%p3677_p5), %s6948_s4, 16, %s3624_s13, [#allocation9]  }
  0x53   : > { %3606 = dma.done.wait (%p3505_p3), [#allocation4], 16  }
  0x54   : > { %3608 = vsyncadd (%p3505_p3), [#allocation4], 4294967280 }
  0x55   : > { %3610 = dma.done.wait (%p3505_p3), [#allocation6], 32  }
  0x56   : > { %3612 = vsyncadd (%p3505_p3), [#allocation6], 4294967264 }
  0x57   : > { %3614 = dma.done.wait (%p3505_p3), [#allocation9], 16  }
  0x58   : > { %3616 = vsyncadd (%p3505_p3), [#allocation9], 4294967280 }
  0x59   : > { %236 = sfence }
  0x5a   : > { %p259_p2 = scmp.lt.s32.totalorder %s3664_s19, 1  ;;  %v3625_v0 = vmov 0.0   ;;  %s3766_s20 = sld [smem:[#allocation5]]  ;;  %vm330_vm0 = vcmask 130048  }
  0x5b   : > { %281 = vst [vmem:[#allocation2 + $0x60] sm:$0xff] %v3625_v0  ;;  %282 = vst [vmem:[#allocation2 + $0x68] sm:$0xff] %v3625_v0  ;;  %s3768_s21 = sld [smem:[#allocation3 + $0x1]]  ;;  %s3098_s16 = sld [smem:[#allocation3 + $0x13]] }
  0x5c   : > { %284 = vst [vmem:[#allocation2 + $0x78] sm:$0xff] %v3625_v0  ;;  %285 = vst [vmem:[#allocation2 + $0x80] sm:$0xff] %v3625_v0  ;;  %s7348_s19 = smov (!%p259_p2, %s3664_s19), 1  ;;  %s3775_s17 = sld [smem:[#allocation3 + $0x25]] }
  0x5d   : > { %269 = vst [vmem:[#allocation2] sm:$0xff] %v3625_v0  ;;  %270 = vst [vmem:[#allocation2 + $0x8] sm:$0xff] %v3625_v0  ;;  %s3474_s22 = smul.u32 72, %s7348_s19  ;;  %s3778_s23 = sld [smem:[#allocation3 + $0x7]] }
  0x5e   : > { %271 = vst [vmem:[#allocation2 + $0x10] sm:$0xff] %v3625_v0  ;;  %272 = vst [vmem:[#allocation2 + $0x18] sm:$0xff] %v3625_v0  ;;  %s6949_s0 = sld [smem:[#allocation137_spill]]  ;;  %s3785_s27 = sld [smem:[#allocation3 + $0x19]] }
  0x5f   : > { %273 = vst [vmem:[#allocation2 + $0x20] sm:$0xff] %v3625_v0  ;;  %274 = vst [vmem:[#allocation2 + $0x28] sm:$0xff] %v3625_v0  ;;  %s3787_s28 = sld [smem:[#allocation3 + $0x2b]]  ;;  %s3796_s29 = sld [smem:[#allocation5 + $0x1]] }
  0x60   : > { %275 = vst [vmem:[#allocation2 + $0x30] sm:$0xff] %v3625_v0  ;;  %276 = vst [vmem:[#allocation2 + $0x38] sm:$0xff] %v3625_v0  ;;  %s3798_s30 = sld [smem:[#allocation3 + $0xa]]  ;;  %s3807_s6 = sld [smem:[#allocation3 + $0x1c]]  ;;  %v3813_v9 = vstv %s3766_s20 }
  0x61   : > { %277 = vst [vmem:[#allocation2 + $0x40] sm:$0xff] %v3625_v0  ;;  %278 = vst [vmem:[#allocation2 + $0x48] sm:$0xff] %v3625_v0  ;;  %v515_v3 = vstv %s3768_s21  ;;  %v521_v7 = vstv %s3098_s16  ;;  %s3809_s7 = sld [smem:[#allocation3 + $0x2e]]  ;;  %s3819_s8 = sld [smem:[#allocation3 + $0x2]] }
  0x62   : > { %279 = vst [vmem:[#allocation2 + $0x50] sm:$0xff] %v3625_v0  ;;  %280 = vst [vmem:[#allocation2 + $0x58] sm:$0xff] %v3625_v0  ;;  %v527_v12 = vstv %s3775_s17  ;;  %s3825_s9 = sld [smem:[#allocation3 + $0x10]]  ;;  %s3827_s10 = sld [smem:[#allocation3 + $0x22]] }
  0x63   : > { %287 = vst [vmem:[#allocation2 + $0x90] sm:$0xff] %v3625_v0  ;;  %288 = vst [vmem:[#allocation2 + $0x98] sm:$0xff] %v3625_v0  ;;  %v533_v19 = vstv %s3778_s23  ;;  %s3834_s11 = sld [smem:[#allocation3 + $0x34]]  ;;  %s3860_s12 = sld [smem:[#allocation3 + $0x5]] }
  0x64   : > { %290 = vst [vmem:[#allocation2 + $0xa8] sm:$0xff] %v3625_v0  ;;  %291 = vst [vmem:[#allocation2 + $0xb0] sm:$0xff] %v3625_v0  ;;  %s3783_s26 = scalar_lea.vmem %s6949_s0, %s3474_s22  ;;  %v539_v23 = vstv %s3785_s27  ;;  %s3862_s13 = sld [smem:[#allocation3 + $0x14]] }
  0x65   : > { %v3790_v1 = vld [vmem:[%s3783_s26 + $0x1] sm:$0xff]  ;;  %v3793_v2 = vld [vmem:[%s3783_s26 + $0x9] sm:$0xff]  ;;  %v3801_v4 = vld [vmem:[%s3783_s26 + $0x19] sm:$0xff]  ;;  %v545_v28 = vstv %s3787_s28  ;;  %s3881_s14 = sld [smem:[#allocation3 + $0xb]]  ;;  %s6811_s15 = smov 1  }
  0x66   : > { %v3804_v5 = vld [vmem:[%s3783_s26 + $0x21] sm:$0xff]  ;;  %v517_v6 = vmul.f32 %v515_v3, %v3793_v2  ;;  %v516_v8 = vmul.f32 %v515_v3, %v3790_v1  ;;  %v522_v10 = vmul.f32 %v3801_v4, %v521_v7  ;;  %v3823_v15 = vld [vmem:[%s3783_s26 + $0x39] sm:$0xff]  ;;  %v3830_v16 = vld [vmem:[%s3783_s26 + $0x31] sm:$0xff]  ;;  %v559_v21 = vstv %s3798_s30  ;;  %s3888_s20 = sld [smem:[#allocation3 + $0x26]]  ;;  %s3898_s21 = sld [smem:[#allocation8]] }
  0x67   : > { %v523_v11 = vmul.f32 %v3804_v5, %v521_v7  ;;  %v529_v18 = vmul.f32 %v3823_v15, %v527_v12  ;;  %v528_v20 = vmul.f32 %v3830_v16, %v527_v12  ;;  %v561_v24 = vmul.f32 %v559_v21, %v3793_v2  ;;  %v3843_v27 = vld [vmem:[%s3783_s26] sm:$0xff]  ;;  %v3851_v31 = vld [vmem:[%s3783_s26 + $0x8] sm:$0xff]  ;;  %v3857_v36 = vld [vmem:[%s3783_s26 + $0x18] sm:$0xff]  ;;  %s3902_s16 = sld [smem:[#allocation3 + $0x1d]]  ;;  %s3904_s17 = sld [smem:[#allocation7 + $0x4]] }
  0x68   : > { %v519_v13 = vadd.f32 %v517_v6, %v3813_v9  ;;  %v518_v14 = vadd.f32 %v516_v8, %v3813_v9  ;;  %v565_v25 = vstv %s3807_s6  ;;  %v571_v26 = vstv %s3809_s7  ;;  %v3866_v39 = vld [vmem:[%s3783_s26 + $0x20] sm:$0xff]  ;;  %v3869_v40 = vld [vmem:[%s3783_s26 + $0x30] sm:$0xff]  ;;  %s3906_s22 = sld [smem:[#allocation7 + $0x1f]]  ;;  %s3909_s23 = sld [smem:[#allocation7 + $0xd]] }
  0x69   : > { %v3847_v29 = vstv %s3796_s29  ;;  %v567_v30 = vmul.f32 %v3804_v5, %v565_v25  ;;  %v534_v32 = vmul.f32 %v533_v19, %v3843_v27  ;;  %v573_v35 = vmul.f32 %v3823_v15, %v571_v26  ;;  %v3874_v45 = vld [vmem:[%s3783_s26 + $0x38] sm:$0xff]  ;;  %s3911_s24 = sld [smem:[#allocation7 + $0x16]]  ;;  %s3918_s25 = sld [smem:[#allocation8 + $0x1]] }
  0x6a   : > { %v525_v17 = vadd.f32 %v523_v11, %v519_v13  ;;  %v524_v22 = vadd.f32 %v522_v10, %v518_v14  ;;  %v563_v34 = vadd.f32 %v561_v24, %v3847_v29  ;;  %v535_v37 = vmul.f32 %v533_v19, %v3851_v31  ;;  %s3920_s26 = sld [smem:[#allocation7 + $0x28]]  ;;  %s3925_s27 = sld [smem:[#allocation8 + $0x2]] }
  0x6b   : > { %v621_v38 = vstv %s3819_s8  ;;  %v540_v42 = vmul.f32 %v3857_v36, %v539_v23  ;;  %v541_v46 = vmul.f32 %v3866_v39, %v539_v23  ;;  %v546_v47 = vmul.f32 %v3869_v40, %v545_v28  ;;  %s3929_s28 = sld [smem:[#allocation3 + $0x2f]]  ;;  %s3931_s29 = sld [smem:[#allocation7 + $0x31]] }
  0x6c   : > { %v531_v33 = vadd.f32 %v529_v18, %v525_v17  ;;  %v530_v41 = vadd.f32 %v528_v20, %v524_v22  ;;  %v569_v43 = vadd.f32 %v567_v30, %v563_v34  ;;  %v622_v44 = vmul.f32 %v621_v38, %v3790_v1  ;;  %s3939_s30 = sld [smem:[#allocation3 + $0x8]]  ;;  %s3958_s6 = sld [smem:[#allocation3 + $0x17]] }
  0x6d   : > { %v577_v48 = vstv %s3825_s9  ;;  %v583_v49 = vstv %s3827_s10  ;;  %v547_v51 = vmul.f32 %v3874_v45, %v545_v28  ;;  %v589_v53 = vstv %s3834_s11  ;;  %s3977_s7 = sld [smem:[#allocation3]]  ;;  %s3987_s8 = sld [smem:[#allocation3 + $0x12]] }
  0x6e   : > { %v536_v50 = vadd.f32 %v534_v32, %v530_v41  ;;  %v575_v52 = vadd.f32 %v573_v35, %v569_v43  ;;  %v623_v54 = vmul.f32 %v621_v38, %v3793_v2  ;;  %626 = vrot.lane.b32.xlu1 %v622_v44, %s6811_s15  ;;  %v537_v55 = vadd.f32 %v535_v37, %v531_v33  ;;  %s3999_s9 = sld [smem:[#allocation3 + $0x24]]  ;;  %s3475_s10 = smul.u32 768, %s7348_s19 }
  0x6f   : > { %v566_v56 = vmul.f32 %v3801_v4, %v565_v25  ;;  %v560_v58 = vmul.f32 %v559_v21, %v3790_v1  ;;  %v579_v60 = vmul.f32 %v577_v48, %v3851_v31  ;;  %v585_v61 = vmul.f32 %v3866_v39, %v583_v49  ;;  %s4009_s11 = sld [smem:[#allocation3 + $0xe]]  ;;  %s6950_s5 = sld [smem:[#allocation142_spill]] }
  0x70   : > { %v542_v57 = vadd.f32 %v540_v42, %v536_v50  ;;  %v543_v59 = vadd.f32 %v541_v46, %v537_v55  ;;  %v572_v62 = vmul.f32 %v3830_v16, %v571_v26  ;;  %v591_v3 = vmul.f32 %v3874_v45, %v589_v53  ;;  %s4185_s19 = sld [smem:[#allocation3 + $0x2a]]  ;;  %s4336_s0 = sld [smem:[#allocation7 + $0x21]] }
  0x71   : > { %v562_v0 = vadd.f32 %v560_v58, %v3847_v29  ;;  %v581_v7 = vadd.f32 %v579_v60, %v575_v52  ;;  %v381_v8 = vstv %s3860_s12  ;;  %v635_v10 = vstv %s3862_s13  ;;  %s4192_s12 = sld [smem:[#allocation3 + $0x21]]  ;;  %s4338_s1 = sld [smem:[#allocation7 + $0x2a]] }
  0x72   : > { %v548_v63 = vadd.f32 %v546_v47, %v542_v57  ;;  %v549_v6 = vadd.f32 %v547_v51, %v543_v59  ;;  %628 = vrot.lane.b32.xlu1 %v623_v54, %s6811_s15  ;;  %v578_v13 = vmul.f32 %v577_v48, %v3843_v27  ;;  %v382_v14 = vmul.f32 %v381_v8, %v3843_v27  ;;  %s4340_s2 = sld [smem:[#allocation7 + $0x33]]  ;;  %s4342_s3 = sld [smem:[#allocation7 + $0x22]] }
  0x73   : > { %v568_v12 = vadd.f32 %v566_v56, %v562_v0  ;;  %v587_v18 = vadd.f32 %v585_v61, %v581_v7  ;;  %v637_v19 = vmul.f32 %v3804_v5, %v635_v10  ;;  %v584_v21 = vmul.f32 %v3857_v36, %v583_v49  ;;  %s4344_s4 = sld [smem:[#allocation7 + $0x2b]]  ;;  %s4348_s18 = sld [smem:[#allocation7 + $0x1c]] }
  0x74   : > { %v550_v11 = vmax.f32 %v548_v63, 0.0  ;;  %v551_v17 = vmax.f32 %v549_v6, 0.0  ;;  %v383_v22 = vmul.f32 %v381_v8, %v3851_v31  ;;  %386 = vrot.lane.b32.xlu0 %v382_v14, %s6811_s15  ;;  %v757_v23 = vstv %s3881_s14  ;;  %s4026_s14 = sld [smem:[#allocation3 + $0x1a]] }
  0x75   : > { %v574_v20 = vadd.f32 %v572_v62, %v568_v12  ;;  %v593_v24 = vadd.f32 %v591_v3, %v587_v18  ;;  %v759_v25 = vmul.f32 %v757_v23, %v3793_v2  ;;  %v590_v28 = vmul.f32 %v3869_v40, %v589_v53  ;;  %s4020_s13 = scalar_lea.vmem %s6950_s5, %s3475_s10  ;;  %s4174_s10 = sld [smem:[#allocation3 + $0x18]] }
  0x76   : > { %553 = vst.msk [vmem:[#allocation2 + $0x60] sm:$0xff] %vm330_vm0, %v550_v11  ;;  %554 = vst.msk [vmem:[#allocation2 + $0x68] sm:$0xff] %vm330_vm0, %v551_v17  ;;  %642 = vrot.lane.b32.xlu1 %v637_v19, %s6811_s15  ;;  %v649_v30 = vstv %s3888_s20  ;;  %v636_v34 = vmul.f32 %v3801_v4, %v635_v10  ;;  %v771_v38 = vstv %s3902_s16  ;;  %v3942_v41 = vstv %s3898_s21  ;;  %6951 = sst [smem:[#allocation14_spill]] %s4020_s13  ;;  %s4035_s21 = sld [smem:[#allocation3 + $0x1b]] }
  0x77   : > { %v580_v26 = vadd.f32 %v578_v13, %v574_v20  ;;  %v595_v32 = vmax.f32 %v593_v24, 0.0  ;;  %v651_v35 = vmul.f32 %v3823_v15, %v649_v30  ;;  %v3945_v42 = vstv %s3904_s17  ;;  %s4033_s20 = sld [smem:[#allocation3 + $0x9]]  ;;  %s4047_s16 = sld [smem:[#allocation3 + $0x2d]] }
  0x78   : > { %388 = vrot.lane.b32.xlu0 %v383_v22, %s6811_s15  ;;  %v1936_v43 = vstv %s3906_s22  ;;  %v3949_v44 = vstv %s3909_s23  ;;  %v3952_v46 = vstv %s3911_s24  ;;  %v758_v49 = vmul.f32 %v757_v23, %v3790_v1  ;;  %s4054_s17 = sld [smem:[#allocation3 + $0x11]]  ;;  %s4092_s23 = sld [smem:[#allocation3 + $0x20]] }
  0x79   : > { %v586_v33 = vadd.f32 %v584_v21, %v580_v26  ;;  %598 = vst.msk [vmem:[#allocation2 + $0x80] sm:$0xff] %vm330_vm0, %v595_v32  ;;  %v773_v53 = vmul.f32 %v3804_v5, %v771_v38  ;;  %v3969_v54 = vstv %s3918_s25  ;;  %v1956_v55 = vstv %s3920_s26  ;;  %s4073_s22 = sld [smem:[#allocation3 + $0x29]]  ;;  %s3120_s24 = sld [smem:[#allocation3 + $0x2c]] }
  0x7a   : > { %764 = vrot.lane.b32.xlu1 %v759_v25, %s6811_s15  ;;  %v3973_v56 = vstv %s3925_s27  ;;  %v785_v57 = vstv %s3929_s28  ;;  %v3980_v58 = vstv %s3931_s29  ;;  %v650_v7 = vmul.f32 %v3830_v16, %v649_v30  ;;  %s3132_s25 = sld [smem:[#allocation3 + $0x23]]  ;;  %s3096_s26 = sld [smem:[#allocation3 + $0x32]] }
  0x7b   : > { %v592_v37 = vadd.f32 %v590_v28, %v586_v33  ;;  %v787_v12 = vmul.f32 %v3823_v15, %v785_v57  ;;  %v681_v13 = vstv %s3939_s30  ;;  %v772_v19 = vmul.f32 %v3801_v4, %v771_v38  ;;  %s3133_s27 = sld [smem:[#allocation3 + $0x35]]  ;;  %s3084_s28 = sld [smem:[#allocation3 + $0x3]] }
  0x7c   : > { %640 = vrot.lane.b32.xlu0 %v636_v34, %s6811_s15  ;;  %v395_v23 = vstv %s3958_s6  ;;  %v683_v30 = vmul.f32 %v681_v13, %v3851_v31  ;;  %v609_v38 = vstv %s3987_s8  ;;  %s3085_s29 = sld [smem:[#allocation3 + $0x15]]  ;;  %s3086_s30 = sld [smem:[#allocation3 + $0x27]] }
  0x7d   : > { %v594_v47 = vmax.f32 %v592_v37, 0.0  ;;  %v3954_v48 = vld [vmem:[#allocation2 + $0x68] sm:$0xff]  ;;  %v3982_v59 = vld [vmem:[#allocation2 + $0x60] sm:$0xff]  ;;  %v786_v37 = vmul.f32 %v3830_v16, %v785_v57  ;;  %s4158_s6 = sld [smem:[#allocation3 + $0xc]]  ;;  %s4168_s8 = sld [smem:[#allocation3 + $0x1e]] }
  0x7e   : > { %v1932_v50 = vmul.f32 %v3945_v42, %v3954_v48  ;;  %v1952_v51 = vmul.f32 %v3949_v44, %v3954_v48  ;;  %v1972_v52 = vmul.f32 %v3952_v46, %v3954_v48  ;;  %656 = vrot.lane.b32.xlu1 %v651_v35, %s6811_s15  ;;  %v1931_v0 = vmul.f32 %v3945_v42, %v3982_v59  ;;  %6954 = sst [smem:[#allocation17_spill]] %s4338_s1  ;;  %s4352_s1 = sld [smem:[#allocation7 + $0x25]] }
  0x7f   : > { %597 = vst.msk [vmem:[#allocation2 + $0x78] sm:$0xff] %vm330_vm0, %v594_v47  ;;  %v1951_v3 = vmul.f32 %v3949_v44, %v3982_v59  ;;  %v1971_v6 = vmul.f32 %v3952_v46, %v3982_v59  ;;  %v603_v35 = vstv %s3977_s7  ;;  %s4163_s7 = sld [smem:[#allocation3 + $0x6]]  ;;  %6955 = sst [smem:[#allocation18_spill]] %s4340_s2 }
  0x80   : > { %v1934_v60 = vadd.f32 %v1932_v50, %v3942_v41  ;;  %v1954_v61 = vadd.f32 %v1952_v51, %v3969_v54  ;;  %v1974_v62 = vadd.f32 %v1972_v52, %v3973_v56  ;;  %v3989_v63 = vld [vmem:[#allocation2 + $0x80] sm:$0xff]  ;;  %762 = vrot.lane.b32.xlu0 %v758_v49, %s6811_s15  ;;  %v1933_v20 = vadd.f32 %v1931_v0, %v3942_v41  ;;  %6956 = sst [smem:[#allocation19_spill]] %s4342_s3  ;;  %s4346_s5 = sld [smem:[#allocation7 + $0x34]] }
  0x81   : > { %v1938_v8 = vmul.f32 %v1936_v43, %v3989_v63  ;;  %v1958_v10 = vmul.f32 %v1956_v55, %v3989_v63  ;;  %v1978_v11 = vmul.f32 %v3980_v58, %v3989_v63  ;;  %v1953_v21 = vadd.f32 %v1951_v3, %v3969_v54  ;;  %6958 = sst [smem:[#allocation21_spill]] %s4348_s18  ;;  %s4354_s2 = sld [smem:[#allocation7 + $0xd]] }
  0x82   : > { %778 = vrot.lane.b32.xlu1 %v773_v53, %s6811_s15  ;;  %v1973_v22 = vadd.f32 %v1971_v6, %v3973_v56  ;;  %v615_v50 = vstv %s3999_s9  ;;  %v397_v51 = vmul.f32 %v3866_v39, %v395_v23  ;;  %v610_v52 = vmul.f32 %v3801_v4, %v609_v38  ;;  %s4172_s9 = sld [smem:[#allocation3 + $0xf]]  ;;  %s4356_s3 = sld [smem:[#allocation7 + $0x16]] }
  0x83   : > { %v1940_v14 = vadd.f32 %v1938_v8, %v1934_v60  ;;  %v1960_v17 = vadd.f32 %v1958_v10, %v1954_v61  ;;  %v1980_v18 = vadd.f32 %v1978_v11, %v1974_v62  ;;  %v604_v53 = vmul.f32 %v603_v35, %v3790_v1  ;;  %s4361_s18 = sld [smem:[#allocation7 + $0x20]] }
  0x84   : > { %654 = vrot.lane.b32.xlu0 %v650_v7, %s6811_s15  ;;  %v457_v61 = vstv %s4009_s11  ;;  %v616_v62 = vmul.f32 %v3830_v16, %v615_v50  ;;  %v605_v3 = vmul.f32 %v603_v35, %v3793_v2  ;;  %v682_v6 = vmul.f32 %v681_v13, %v3843_v27  ;;  %s4179_s11 = sld [smem:[#allocation3 + $0x30]]  ;;  %6960 = sst [smem:[#allocation23_spill]] %s4352_s1 }
  0x85   : > { %v1942_v25 = vmax.f32 %v1940_v14, 0.0  ;;  %v1962_v26 = vmax.f32 %v1960_v17, 0.0  ;;  %v1982_v28 = vmax.f32 %v1980_v18, 0.0  ;;  %v606_v0 = vadd.f32 %v604_v53, %v3813_v9  ;;  %s4365_s1 = sld [smem:[#allocation7 + $0x32]] }
  0x86   : > { %v4022_v24 = vld [vmem:[#allocation2 + $0x78] sm:$0xff]  ;;  %792 = vrot.lane.b32.xlu1 %v787_v12, %s6811_s15  ;;  %v611_v7 = vmul.f32 %v3804_v5, %v609_v38  ;;  %v459_v8 = vmul.f32 %v457_v61, %v3851_v31  ;;  %v607_v11 = vadd.f32 %v605_v3, %v3813_v9  ;;  %v617_v12 = vmul.f32 %v3823_v15, %v615_v50  ;;  %6957 = sst [smem:[#allocation20_spill]] %s4346_s5  ;;  %s4359_s5 = sld [smem:[#allocation7 + $0x2e]] }
  0x87   : > { %v1937_v32 = vmul.f32 %v1936_v43, %v4022_v24  ;;  %v1957_v33 = vmul.f32 %v1956_v55, %v4022_v24  ;;  %v1977_v34 = vmul.f32 %v3980_v58, %v4022_v24  ;;  %3305 = vst.msk [vmem:[%s4020_s13 + $0x88] sm:$0xff] %vm330_vm0, %v1942_v25  ;;  %3310 = vst.msk [vmem:[%s4020_s13 + $0x188] sm:$0xff] %vm330_vm0, %v1962_v26  ;;  %v695_v14 = vstv %s4026_s14  ;;  %s4203_s14 = sld [smem:[#allocation3 + $0x33]] }
  0x88   : > { %3315 = vst.msk [vmem:[%s4020_s13 + $0x288] sm:$0xff] %vm330_vm0, %v1982_v28  ;;  %776 = vrot.lane.b32.xlu0 %v772_v19, %s6811_s15  ;;  %v612_v10 = vadd.f32 %v610_v52, %v606_v0  ;;  %v739_v17 = vstv %s4033_s20  ;;  %v745_v18 = vstv %s4035_s21  ;;  %v613_v13 = vadd.f32 %v611_v7, %v607_v11  ;;  %s6809_s20 = smov 127   ;;  %s4252_s21 = sld [smem:[#allocation5]] }
  0x89   : > { %v1939_v43 = vadd.f32 %v1937_v32, %v1933_v20  ;;  %v1959_v47 = vadd.f32 %v1957_v33, %v1953_v21  ;;  %v1979_v49 = vadd.f32 %v1977_v34, %v1973_v22  ;;  %v741_v20 = vmul.f32 %v739_v17, %v3793_v2  ;;  %6962 = sst [smem:[#allocation25_spill]] %s4361_s18  ;;  %s4379_s18 = sld [smem:[#allocation7 + $0x8]] }
  0x8a   : > { %688 = vrot.lane.b32.xlu1 %v683_v30, %s6811_s15  ;;  %v4077_v19 = vadd.f32 %v616_v62, %v612_v10  ;;  %v396_v21 = vmul.f32 %v3857_v36, %v395_v23  ;;  %v747_v22 = vmul.f32 %v3804_v5, %v745_v18  ;;  %v751_v25 = vstv %s4047_s16  ;;  %s4254_s16 = sld [smem:[#allocation3 + $0x4]] }
  0x8b   : > { %v1941_v55 = vmax.f32 %v1939_v43, 0.0  ;;  %v1961_v57 = vmax.f32 %v1959_v47, 0.0  ;;  %v1981_v60 = vmax.f32 %v1979_v49, 0.0  ;;  %v740_v26 = vmul.f32 %v739_v17, %v3790_v1 }
  0x8c   : > { %790 = vrot.lane.b32.xlu0 %v786_v37, %s6811_s15  ;;  %v697_v28 = vmul.f32 %v3866_v39, %v695_v14  ;;  %v4087_v30 = vadd.f32 %v617_v12, %v613_v13  ;;  %v743_v32 = vadd.f32 %v741_v20, %v3847_v29  ;;  %v753_v2 = vmul.f32 %v3823_v15, %v751_v25  ;;  %6961 = sst [smem:[#allocation24_spill]] %s4359_s5  ;;  %s4377_s5 = sld [smem:[#allocation7 + $0x31]] }
  0x8d   : > { %3304 = vst.msk [vmem:[%s4020_s13 + $0x80] sm:$0xff] %vm330_vm0, %v1941_v55  ;;  %3309 = vst.msk [vmem:[%s4020_s13 + $0x180] sm:$0xff] %vm330_vm0, %v1961_v57  ;;  %v817_v33 = vstv %s4054_s17  ;;  %v742_v23 = vadd.f32 %v740_v26, %v3847_v29  ;;  %v746_v5 = vmul.f32 %v3801_v4, %v745_v18  ;;  %v752_v1 = vmul.f32 %v3830_v16, %v751_v25  ;;  %s4256_s17 = sld [smem:[#allocation3 + $0x16]] }
  0x8e   : > { %3314 = vst.msk [vmem:[%s4020_s13 + $0x280] sm:$0xff] %vm330_vm0, %v1981_v60  ;;  %402 = vrot.lane.b32.xlu1 %v397_v51, %s6811_s15  ;;  %v749_v34 = vadd.f32 %v747_v22, %v743_v32  ;;  %v458_v35 = vmul.f32 %v457_v61, %v3843_v27  ;;  %v819_v15 = vmul.f32 %v817_v33, %v3851_v31  ;;  %v409_v43 = vstv %s4073_s22  ;;  %s4258_s22 = sld [smem:[#allocation3 + $0x28]]  ;;  %s4350_s13 = sld [smem:[#allocation7 + $0x4]] }
  0x8f   : > { %v748_v37 = vadd.f32 %v746_v5, %v742_v23  ;;  %v696_v4 = vmul.f32 %v3857_v36, %v695_v14  ;;  %v411_v16 = vmul.f32 %v3874_v45, %v409_v43  ;;  %v471_v49 = vstv %s4092_s23  ;;  %s4260_s23 = sld [smem:[#allocation5 + $0x1]] }
  0x90   : > { %686 = vrot.lane.b32.xlu0 %v682_v6, %s6811_s15  ;;  %v4101_v38 = vadd.f32 %v753_v2, %v749_v34  ;;  %v818_v50 = vmul.f32 %v817_v33, %v3843_v27  ;;  %v473_v51 = vmul.f32 %v3866_v39, %v471_v49  ;;  %v709_v52 = vstv %s3120_s24  ;;  %s4262_s24 = sld [smem:[#allocation3 + $0xd]] }
  0x91   : > { %v4104_v47 = vadd.f32 %v752_v1, %v748_v37  ;;  %v410_v53 = vmul.f32 %v3869_v40, %v409_v43  ;;  %v711_v55 = vmul.f32 %v3874_v45, %v709_v52  ;;  %v831_v57 = vstv %s3132_s25  ;;  %s4264_s25 = sld [smem:[#allocation3 + $0x1f]] }
  0x92   : > { %464 = vrot.lane.b32.xlu1 %v459_v8, %s6811_s15  ;;  %v472_v60 = vmul.f32 %v3857_v36, %v471_v49  ;;  %v833_v61 = vmul.f32 %v3866_v39, %v831_v57  ;;  %v485_v62 = vstv %s3096_s26  ;;  %v710_v0 = vmul.f32 %v3869_v40, %v709_v52  ;;  %s4266_s26 = sld [smem:[#allocation3 + $0x31]] }
  0x93   : > { %v487_v3 = vmul.f32 %v3874_v45, %v485_v62  ;;  %v845_v6 = vstv %s3133_s27  ;;  %v832_v7 = vmul.f32 %v3857_v36, %v831_v57  ;;  %v486_v10 = vmul.f32 %v3869_v40, %v485_v62  ;;  %s4282_s27 = sld [smem:[#allocation7 + $0x3]] }
  0x94   : > { %400 = vrot.lane.b32.xlu0 %v396_v21, %s6811_s15  ;;  %v847_v8 = vmul.f32 %v3874_v45, %v845_v6  ;;  %v846_v11 = vmul.f32 %v3869_v40, %v845_v6  ;;  %v363_v33 = vstv %s3084_s28  ;;  %v369_v34 = vstv %s3085_s29  ;;  %s4284_s28 = sld [smem:[#allocation7 + $0xc]]  ;;  %s4286_s29 = sld [smem:[#allocation7 + $0x15]] }
  0x95   : > { %v365_v5 = vmul.f32 %v363_v33, %v3851_v31  ;;  %v364_v43 = vmul.f32 %v363_v33, %v3843_v27  ;;  %v370_v52 = vmul.f32 %v3857_v36, %v369_v34  ;;  %6959 = sst [smem:[#allocation22_spill]] %s4350_s13 }
  0x96   : > { %702 = vrot.lane.b32.xlu1 %v697_v28, %s6811_s15  ;;  %s4363_s13 = sld [smem:[#allocation7 + $0x29]] }
  0x97   : > { %v367_v37 = vadd.f32 %v3813_v9, %v365_v5 }
  0x98   : > { %462 = vrot.lane.b32.xlu0 %v458_v35, %s6811_s15 }
  0x9a   : > { %824 = vrot.lane.b32.xlu1 %v819_v15, %s6811_s15  ;;  %v371_v15 = vmul.f32 %v3866_v39, %v369_v34 }
  0x9c   : > { %700 = vrot.lane.b32.xlu0 %v696_v4, %s6811_s15 }
  0x9e   : > { %416 = vrot.lane.b32.xlu1 %v411_v16, %s6811_s15  ;;  %v375_v16 = vstv %s3086_s30  ;;  %s4288_s30 = sld [smem:[#allocation7 + $0x6]] }
  0x9f   : > { %v376_v62 = vmul.f32 %v3869_v40, %v375_v16 }
  0xa0   : > { %822 = vrot.lane.b32.xlu0 %v818_v50, %s6811_s15  ;;  %v373_v50 = vadd.f32 %v371_v15, %v367_v37 }
  0xa2   : > { %478 = vrot.lane.b32.xlu1 %v473_v51, %s6811_s15  ;;  %v377_v51 = vmul.f32 %v3874_v45, %v375_v16  ;;  %v669_v16 = vstv %s4174_s10  ;;  %s4299_s10 = sld [smem:[#allocation7 + $0x19]] }
  0xa4   : > { %414 = vrot.lane.b32.xlu0 %v410_v53, %s6811_s15  ;;  %v366_v53 = vadd.f32 %v3813_v9, %v364_v43  ;;  %v663_v9 = vstv %s4163_s7  ;;  %v799_v43 = vstv %s4172_s9  ;;  %s4292_s7 = sld [smem:[#allocation7 + $0x18]] }
  0xa5   : > { %v665_v15 = vmul.f32 %v663_v9, %v3851_v31  ;;  %s4296_s9 = sld [smem:[#allocation7 + $0x10]] }
  0xa6   : > { %716 = vrot.lane.b32.xlu1 %v711_v55, %s6811_s15 }
  0xa8   : > { %476 = vrot.lane.b32.xlu0 %v472_v60, %s6811_s15  ;;  %v379_v60 = vadd.f32 %v377_v51, %v373_v50 }
  0xaa   : > { %838 = vrot.lane.b32.xlu1 %v833_v61, %s6811_s15  ;;  %v439_v61 = vstv %s4158_s6  ;;  %s4290_s6 = sld [smem:[#allocation7 + $0xf]]  ;;  %6953 = sst [smem:[#allocation16_spill]] %s4292_s7 }
  0xab   : > { %s6968_s7 = sld [smem:[#allocation19_spill]] }
  0xac   : > { %714 = vrot.lane.b32.xlu0 %v710_v0, %s6811_s15  ;;  %v372_v0 = vadd.f32 %v370_v52, %v366_v53  ;;  %v451_v53 = vstv %s4179_s11  ;;  %s4301_s11 = sld [smem:[#allocation7 + $0x5]] }
  0xae   : > { %492 = vrot.lane.b32.xlu1 %v487_v3, %s6811_s15  ;;  %v378_v33 = vadd.f32 %v376_v62, %v372_v0 }
  0xb0   : > { %836 = vrot.lane.b32.xlu0 %v832_v7, %s6811_s15  ;;  %6952 = sst [smem:[#allocation15_spill]] %s4290_s6 }
  0xb1   : > { %s6972_s6 = sld [smem:[#allocation23_spill]] }
  0xb2   : > { %852 = vrot.lane.b32.xlu1 %v847_v8, %s6811_s15 }
  0xb4   : > { %490 = vrot.lane.b32.xlu0 %v486_v10, %s6811_s15  ;;  %v445_v10 = vstv %s4168_s8  ;;  %s4294_s8 = sld [smem:[#allocation7 + $0x7]] }
  0xb5   : > { %v447_v50 = vmul.f32 %v3866_v39, %v445_v10 }
  0xb8   : > { %850 = vrot.lane.b32.xlu0 %v846_v11, %s6811_s15  ;;  %v441_v11 = vmul.f32 %v439_v61, %v3851_v31  ;;  %s4334_s15 = sld [smem:[#allocation7 + $0x28]] }
  0xba   : > { %v443_v51 = vadd.f32 %v3847_v29, %v441_v11 }
  0xe0   : > { %v4137_v12 = vpop.permute.xlu1 %626 }
  0xe4   : > { %v629_v14 = vpop.permute.xlu1 %628 }
  0xe5   : > { %v633_v7 = vadd.f32 %v629_v14, %v4087_v30 }
  0xe6   : > { %v4139_v17 = vpop.permute.xlu0 %386 }
  0xe8   : > { %v643_v18 = vpop.permute.xlu1 %642 }
  0xe9   : > { %v647_v5 = vadd.f32 %v643_v18, %v633_v7  ;;  %v632_v7 = vadd.f32 %v4137_v12, %v4077_v19  ;;  %v805_v19 = vstv %s4192_s12  ;;  %v664_v12 = vmul.f32 %v663_v9, %v3843_v27  ;;  %s4305_s12 = sld [smem:[#allocation7 + $0xa]] }
  0xea   : > { %v389_v13 = vpop.permute.xlu0 %388 }
  0xeb   : > { %v393_v8 = vadd.f32 %v389_v13, %v379_v60  ;;  %v671_v60 = vmul.f32 %v3866_v39, %v669_v16 }
  0xec   : > { %v765_v20 = vpop.permute.xlu1 %764 }
  0xed   : > { %v769_v14 = vadd.f32 %v765_v20, %v4101_v38  ;;  %v392_v38 = vadd.f32 %v4139_v17, %v378_v33  ;;  %v675_v20 = vstv %s4185_s19  ;;  %s4303_s19 = sld [smem:[#allocation7 + $0x1]] }
  0xee   : > { %v4141_v21 = vpop.permute.xlu0 %640  ;;  %v677_v17 = vmul.f32 %v3874_v45, %v675_v20 }
  0xf0   : > { %v657_v22 = vpop.permute.xlu1 %656 }
  0xf1   : > { %v661_v13 = vadd.f32 %v657_v22, %v647_v5  ;;  %v440_v22 = vmul.f32 %v439_v61, %v3843_v27  ;;  %v453_v5 = vmul.f32 %v3874_v45, %v451_v53  ;;  %v446_v61 = vmul.f32 %v3857_v36, %v445_v10 }
  0xf2   : > { %v4143_v25 = vpop.permute.xlu0 %762  ;;  %v800_v10 = vmul.f32 %v799_v43, %v3843_v27 }
  0xf3   : > { %v667_v11 = vadd.f32 %v665_v15, %v661_v13 }
  0xf4   : > { %v779_v26 = vpop.permute.xlu1 %778 }
  0xf5   : > { %v783_v18 = vadd.f32 %v779_v26, %v769_v14 }
  0xf6   : > { %v4145_v28 = vpop.permute.xlu0 %654 }
  0xf8   : > { %v4147_v32 = vpop.permute.xlu1 %792 }
  0xf9   : > { %v797_v26 = vadd.f32 %v4147_v32, %v783_v18  ;;  %v768_v32 = vadd.f32 %v4143_v25, %v4104_v47  ;;  %v807_v18 = vmul.f32 %v3866_v39, %v805_v19 }
  0xfa   : > { %v4149_v2 = vpop.permute.xlu0 %776 }
  0xfb   : > { %v782_v9 = vadd.f32 %v4149_v2, %v768_v32 }
  0xfc   : > { %v4151_v23 = vpop.permute.xlu1 %688 }
  0xfe   : > { %v4154_v1 = vpop.permute.xlu0 %790 }
 0x100   : > { %v403_v35 = vpop.permute.xlu1 %402 }
 0x101   : > { %v407_v34 = vadd.f32 %v403_v35, %v393_v8  ;;  %v801_v35 = vmul.f32 %v799_v43, %v3851_v31 }
 0x102   : > { %v4161_v4 = vpop.permute.xlu0 %686 }
 0x104   : > { %v4165_v49 = vpop.permute.xlu1 %464 }
 0x106   : > { %v401_v55 = vpop.permute.xlu0 %400 }
 0x107   : > { %v406_v14 = vadd.f32 %v401_v55, %v392_v38  ;;  %v673_v55 = vadd.f32 %v671_v60, %v667_v11  ;;  %v670_v38 = vmul.f32 %v3857_v36, %v669_v16  ;;  %v676_v16 = vmul.f32 %v3869_v40, %v675_v20 }
 0x108   : > { %v4176_v57 = vpop.permute.xlu1 %702 }
 0x109   : > { %v679_v60 = vadd.f32 %v677_v17, %v673_v55 }
 0x10a   : > { %v4182_v3 = vpop.permute.xlu0 %462 }
 0x10b   : > { %v693_v43 = vadd.f32 %v4151_v23, %v679_v60  ;;  %v323_v60 = vstv %s4258_s22  ;;  %s4319_s22 = sld [smem:[#allocation7 + $0xe]] }
 0x10c   : > { %v4187_v6 = vpop.permute.xlu1 %824 }
 0x10e   : > { %v4194_v37 = vpop.permute.xlu0 %700 }
 0x110   : > { %v417_v30 = vpop.permute.xlu1 %416 }
 0x111   : > { %v421_v52 = vadd.f32 %v417_v30, %v407_v34  ;;  %v449_v34 = vadd.f32 %v447_v50, %v443_v51  ;;  %v646_v30 = vadd.f32 %v4141_v21, %v632_v7  ;;  %v442_v50 = vadd.f32 %v3847_v29, %v440_v22 }
 0x112   : > { %v4207_v62 = vpop.permute.xlu0 %822  ;;  %v803_v21 = vadd.f32 %v801_v35, %v797_v26  ;;  %v452_v22 = vmul.f32 %v3869_v40, %v451_v53  ;;  %v806_v53 = vmul.f32 %v3857_v36, %v805_v19 }
 0x113   : > { %v423_v0 = vmax.f32 %v421_v52, 0.0  ;;  %v660_v15 = vadd.f32 %v4145_v28, %v646_v30  ;;  %v455_v52 = vadd.f32 %v453_v5, %v449_v34  ;;  %v796_v28 = vadd.f32 %v4154_v1, %v782_v9 }
 0x114   : > { %v479_v8 = vpop.permute.xlu1 %478  ;;  %v448_v29 = vadd.f32 %v446_v61, %v442_v50  ;;  %v809_v2 = vadd.f32 %v807_v18, %v803_v21  ;;  %v707_v61 = vadd.f32 %v4176_v57, %v693_v43  ;;  %v337_v43 = vstv %s4262_s24  ;;  %s4325_s24 = sld [smem:[#allocation7 + $0x1e]] }
 0x115   : > { %428 = vrot.lane.b32.xlu1 %v423_v0, %s6809_s20  ;;  %v811_v0 = vstv %s4203_s14  ;;  %v666_v25 = vadd.f32 %v664_v12, %v660_v15  ;;  %v469_v11 = vadd.f32 %v4165_v49, %v455_v52  ;;  %v802_v30 = vadd.f32 %v800_v10, %v796_v28  ;;  %s4310_s14 = sld [smem:[#allocation8]] }
 0x116   : > { %v415_v33 = vpop.permute.xlu0 %414  ;;  %v813_v26 = vmul.f32 %v3874_v45, %v811_v0 }
 0x117   : > { %v420_v13 = vadd.f32 %v415_v33, %v406_v14  ;;  %v483_v5 = vadd.f32 %v479_v8, %v469_v11  ;;  %v672_v1 = vadd.f32 %v670_v38, %v666_v25  ;;  %v454_v14 = vadd.f32 %v452_v22, %v448_v29 }
 0x118   : > { %v717_v51 = vpop.permute.xlu1 %716  ;;  %v815_v17 = vadd.f32 %v813_v26, %v809_v2  ;;  %v808_v8 = vadd.f32 %v806_v53, %v802_v30  ;;  %v311_v29 = vstv %s4254_s16  ;;  %v325_v2 = vmul.f32 %v3874_v45, %v323_v60  ;;  %s4314_s16 = sld [smem:[#allocation8 + $0x1]] }
 0x119   : > { %v422_v7 = vmax.f32 %v420_v13, 0.0  ;;  %v721_v32 = vadd.f32 %v717_v51, %v707_v61  ;;  %v678_v23 = vadd.f32 %v676_v16, %v672_v1  ;;  %v468_v20 = vadd.f32 %v4182_v3, %v454_v14 }
 0x11a   : > { %v477_v47 = vpop.permute.xlu0 %476  ;;  %v829_v49 = vadd.f32 %v4187_v6, %v815_v17  ;;  %v812_v13 = vmul.f32 %v3869_v40, %v811_v0  ;;  %v313_v22 = vmul.f32 %v311_v29, %v3851_v31  ;;  %v334_v26 = vstv %s4260_s23  ;;  %s4321_s23 = sld [smem:[#allocation7 + $0x17]] }
 0x11b   : > { %426 = vrot.lane.b32.xlu0 %v422_v7, %s6809_s20  ;;  %v692_v19 = vadd.f32 %v4161_v4, %v678_v23  ;;  %v482_v57 = vadd.f32 %v477_v47, %v468_v20  ;;  %v723_v52 = vmax.f32 %v721_v32, 0.0  ;;  %v349_v30 = vstv %s4266_s26  ;;  %s4329_s26 = sld [smem:[#allocation7 + $0x30]] }
 0x11c   : > { %v839_v35 = vpop.permute.xlu1 %838  ;;  %v814_v51 = vadd.f32 %v812_v13, %v808_v8 }
 0x11d   : > { %v843_v55 = vadd.f32 %v839_v35, %v829_v49  ;;  %v706_v6 = vadd.f32 %v4194_v37, %v692_v19  ;;  %v317_v35 = vstv %s4256_s17  ;;  %v312_v49 = vmul.f32 %v311_v29, %v3843_v27  ;;  %s4316_s17 = sld [smem:[#allocation8 + $0x2]] }
 0x11e   : > { %v715_v34 = vpop.permute.xlu0 %714  ;;  %v828_v3 = vadd.f32 %v4207_v62, %v814_v51  ;;  %v308_v62 = vstv %s4252_s21  ;;  %v319_v11 = vmul.f32 %v3866_v39, %v317_v35  ;;  %s4312_s21 = sld [smem:[#allocation7 + $0x13]]  ;;  %v4369_v19 = vstv %s4282_s27  ;;  %s4387_s27 = sld [smem:[#allocation7]] }
 0x11f   : > { %v720_v10 = vadd.f32 %v715_v34, %v706_v6  ;;  %v315_v16 = vadd.f32 %v313_v22, %v308_v62  ;;  %v343_v34 = vstv %s4264_s25  ;;  %v314_v32 = vadd.f32 %v312_v49, %v308_v62  ;;  %s4327_s25 = sld [smem:[#allocation7 + $0x27]] }
 0x120   : > { %v493_v12 = vpop.permute.xlu1 %492  ;;  %v345_v1 = vmul.f32 %v3866_v39, %v343_v34  ;;  %v344_v23 = vmul.f32 %v3857_v36, %v343_v34  ;;  %v4385_v51 = vstv %s4294_s8  ;;  %s4405_s8 = sld [smem:[#allocation7 + $0x2]]  ;;  %v4430_v62 = vstv %s4319_s22  ;;  %s4451_s22 = sld [smem:[#allocation7 + $0x1b]] }
 0x121   : > { %v497_v33 = vadd.f32 %v493_v12, %v483_v5  ;;  %v722_v4 = vmax.f32 %v720_v10, 0.0  ;;  %v339_v5 = vmul.f32 %v337_v43, %v3851_v31  ;;  %v321_v14 = vadd.f32 %v319_v11, %v315_v16  ;;  %6963 = vst [vmem:[#allocation26_spill] sm:$0xff] %v4385_v51  ;;  %6969 = vst [vmem:[#allocation29_spill] sm:$0xff] %v4430_v62 }
 0x122   : > { %v837_v15 = vpop.permute.xlu0 %836  ;;  %v351_v12 = vmul.f32 %v3874_v45, %v349_v30  ;;  %v318_v45 = vmul.f32 %v3857_v36, %v317_v35  ;;  %v4398_v10 = vstv %s4301_s11  ;;  %v4433_v29 = vstv %s4321_s23  ;;  %s4453_s23 = sld [smem:[#allocation7 + $0x1a]]  ;;  %s4479_s11 = sld [smem:[#allocation7 + $0x1d]] }
 0x123   : > { %v499_v50 = vmax.f32 %v497_v33, 0.0  ;;  %v842_v28 = vadd.f32 %v837_v15, %v828_v3  ;;  %v341_v53 = vadd.f32 %v339_v5, %v334_v26  ;;  %v327_v61 = vadd.f32 %v325_v2, %v321_v14 }
 0x124   : > { %v853_v21 = vpop.permute.xlu1 %852  ;;  %v338_v15 = vmul.f32 %v337_v43, %v3843_v27  ;;  %v320_v20 = vadd.f32 %v318_v45, %v314_v32  ;;  %v350_v27 = vmul.f32 %v3869_v40, %v349_v30  ;;  %v4395_v3 = vstv %s4299_s10  ;;  %s4419_s10 = sld [smem:[#allocation7 + $0x23]] }
 0x125   : > { %504 = vrot.lane.b32.xlu1 %v499_v50, %s6809_s20  ;;  %v857_v9 = vadd.f32 %v853_v21, %v843_v55  ;;  %v347_v17 = vadd.f32 %v345_v1, %v341_v53  ;;  %v329_v33 = vmax.f32 %v327_v61, 0.0  ;;  %v324_v50 = vmul.f32 %v3869_v40, %v323_v60  ;;  %6965 = vst [vmem:[#allocation28_spill] sm:$0xff] %v4395_v3 }
 0x126   : > { %v491_v18 = vpop.permute.xlu0 %490  ;;  %v340_v8 = vadd.f32 %v338_v15, %v334_v26  ;;  %v4440_v22 = vstv %s4327_s25  ;;  %v4443_v35 = vstv %s4329_s26  ;;  %v4449_v11 = vstv %s4334_s15  ;;  %s6976_s25 = sld [smem:[#allocation25_spill]]  ;;  %s4477_s15 = sld [smem:[#allocation7 + $0x2d]] }
 0x127   : > { %v496_v7 = vadd.f32 %v491_v18, %v482_v57  ;;  %v859_v38 = vmax.f32 %v857_v9, 0.0  ;;  %v353_v31 = vadd.f32 %v351_v12, %v347_v17  ;;  %332 = vst.msk [vmem:[#allocation2 + $0x8] sm:$0xff] %vm330_vm0, %v329_v33  ;;  %v326_v36 = vadd.f32 %v324_v50, %v320_v20  ;;  %s4461_s26 = sld [smem:[#allocation7 + $0x24]] }
 0x128   : > { %v346_v13 = vadd.f32 %v344_v23, %v340_v8  ;;  %v4372_v57 = vstv %s4284_s28  ;;  %s4389_s28 = sld [smem:[#allocation7 + $0x9]]  ;;  %v4459_v16 = vstv %s6968_s7  ;;  %v4466_v5 = vstv %s4344_s4  ;;  %s4487_s4 = sld [smem:[#allocation7 + $0x26]] }
 0x129   : > { %728 = vrot.lane.b32.xlu1 %v723_v52, %s6809_s20  ;;  %v498_v0 = vmax.f32 %v496_v7, 0.0  ;;  %v355_v39 = vmax.f32 %v353_v31, 0.0  ;;  %v328_v40 = vmax.f32 %v326_v36, 0.0  ;;  %v4375_v52 = vstv %s4286_s29  ;;  %s4403_s29 = sld [smem:[#allocation7 + $0x12]]  ;;  %6975 = vst [vmem:[#allocation30_spill] sm:$0xff] %v4459_v16  ;;  %6977 = vst [vmem:[#allocation31_spill] sm:$0xff] %v4466_v5 }
 0x12a   : > { %v851_v25 = vpop.permute.xlu0 %850  ;;  %v352_v21 = vadd.f32 %v350_v27, %v346_v13  ;;  %v4392_v7 = vstv %s4296_s9  ;;  %s6966_s9 = sld [smem:[#allocation17_spill]]  ;;  %v4475_v1 = vstv %s6972_s6  ;;  %s4489_s7 = sld [smem:[#allocation7 + $0x2f]]  ;;  %v4493_v17 = vmul.f32 %v4398_v10, %v3954_v48 }
 0x12b   : > { %502 = vrot.lane.b32.xlu0 %v498_v0, %s6809_s20  ;;  %v856_v47 = vadd.f32 %v851_v25, %v842_v28  ;;  %358 = vst.msk [vmem:[#allocation2 + $0x20] sm:$0xff] %vm330_vm0, %v355_v39  ;;  %331 = vst.msk [vmem:[#allocation2] sm:$0xff] %vm330_vm0, %v328_v40  ;;  %v4401_v0 = vstv %s4303_s19  ;;  %v4411_v25 = vstv %s4314_s16  ;;  %v4414_v28 = vstv %s4305_s12  ;;  %s4421_s19 = sld [smem:[#allocation7 + $0xb]]  ;;  %s6970_s12 = sld [smem:[#allocation20_spill]] }
 0x12c   : > { %v354_v55 = vmax.f32 %v352_v21, 0.0  ;;  %6964 = vst [vmem:[#allocation27_spill] sm:$0xff] %v4392_v7  ;;  %s4437_s16 = sld [smem:[#allocation7 + $0x11]]  ;;  %6980 = vst [vmem:[#allocation34_spill] sm:$0xff] %v4493_v17  ;;  %v4496_v33 = vstv %s6976_s25  ;;  %v4499_v31 = vstv %s4363_s13  ;;  %v4502_v39 = vstv %s4365_s1  ;;  %s4504_s6 = sld [smem:[#allocation7 + $0x2c]] }
 0x12d   : > { %864 = vrot.lane.b32.xlu1 %v859_v38, %s6809_s20  ;;  %v858_v37 = vmax.f32 %v856_v47, 0.0  ;;  %v4408_v38 = vstv %s4310_s14  ;;  %v4424_v47 = vstv %s4325_s24  ;;  %s4435_s14 = sld [smem:[#allocation7 + $0x14]]  ;;  %s6974_s24 = sld [smem:[#allocation24_spill]]  ;;  %6981 = vst [vmem:[#allocation35_spill] sm:$0xff] %v4502_v39  ;;  %v4510_v45 = vmul.f32 %v4496_v33, %v3989_v63 }
 0x12e   : > { %357 = vst.msk [vmem:[#allocation2 + $0x18] sm:$0xff] %vm330_vm0, %v354_v55  ;;  %v4514_v49 = vmul.f32 %v4430_v62, %v3954_v48  ;;  %v4518_v32 = vmul.f32 %v4499_v31, %v3989_v63  ;;  %v4522_v15 = vmul.f32 %v4433_v29, %v3954_v48  ;;  %v4526_v50 = vmul.f32 %v4502_v39, %v3989_v63  ;;  %v4579_v6 = vld [vmem:[#allocation2 + $0x8] sm:$0xff]  ;;  %s7042_s1 = sld [smem:[#allocation15_spill]]  ;;  %s7082_s13 = sld [smem:[#allocation14_spill]] }
 0x12f   : > { %726 = vrot.lane.b32.xlu0 %v722_v4, %s6809_s20  ;;  %v4417_v4 = vstv %s4312_s21  ;;  %s6971_s21 = sld [smem:[#allocation21_spill]]  ;;  %6982 = vst [vmem:[#allocation36_spill] sm:$0xff] %v4510_v45  ;;  %v4529_v23 = vstv %s4377_s5  ;;  %v4532_v20 = vstv %s4379_s18  ;;  %v4539_v27 = vmul.f32 %v4398_v10, %v3982_v59  ;;  %7002 = vst [vmem:[#allocation56_spill] sm:$0xff] %v4579_v6  ;;  %s7043_s5 = sld [smem:[#allocation16_spill]] }
 0x130   : > { %6983 = vst [vmem:[#allocation37_spill] sm:$0xff] %v4514_v49  ;;  %6984 = vst [vmem:[#allocation38_spill] sm:$0xff] %v4518_v32  ;;  %v4535_v8 = vstv %s4387_s27  ;;  %v4542_v36 = vstv %s4389_s28  ;;  %v4545_v13 = vstv %s4403_s29  ;;  %v4548_v40 = vstv %s4405_s8  ;;  %s7057_s18 = smov 1   ;;  %s5361_s27 = sld [smem:[#allocation7 + $0x4]] }
 0x131   : > { %v4469_v34 = vstv %s6970_s12  ;;  %s4506_s12 = sld [smem:[#allocation7 + $0x35]]  ;;  %6985 = vst [vmem:[#allocation39_spill] sm:$0xff] %v4522_v15  ;;  %6986 = vst [vmem:[#allocation40_spill] sm:$0xff] %v4526_v50  ;;  %v4552_v21 = vmul.f32 %v4496_v33, %v4022_v24  ;;  %v4556_v55 = vmul.f32 %v4430_v62, %v3982_v59  ;;  %v4560_v43 = vmul.f32 %v4499_v31, %v4022_v24  ;;  %s5370_s28 = sld [smem:[#allocation7 + $0x1f]] }
 0x132   : > { %6978 = vst [vmem:[#allocation32_spill] sm:$0xff] %v4469_v34  ;;  %6987 = vst [vmem:[#allocation41_spill] sm:$0xff] %v4529_v23  ;;  %v4564_v12 = vmul.f32 %v4433_v29, %v3982_v59  ;;  %v4568_v53 = vmul.f32 %v4502_v39, %v4022_v24  ;;  %v4571_v14 = vstv %s4419_s10  ;;  %v4574_v26 = vstv %s4421_s19  ;;  %v871_v17 = vld [vmem:[#allocation2] sm:$0xff]  ;;  %s5378_s29 = sld [smem:[#allocation7 + $0xd]]  ;;  %s5386_s8 = sld [smem:[#allocation7 + $0x28]] }
 0x133   : > { %862 = vrot.lane.b32.xlu0 %v858_v37, %s6809_s20  ;;  %s4331_s20 = sld [smem:[#allocation7 + $0x1f]]  ;;  %v4427_v37 = vstv %s4316_s17  ;;  %s6973_s17 = sld [smem:[#allocation22_spill]]  ;;  %v4485_v61 = vstv %s6974_s24  ;;  %6988 = vst [vmem:[#allocation42_spill] sm:$0xff] %v4532_v20  ;;  %6989 = vst [vmem:[#allocation43_spill] sm:$0xff] %v4535_v8  ;;  %v4582_v18 = vstv %s4435_s14  ;;  %v4635_v45 = vmul.f32 %v4433_v29, %v4579_v6 }
 0x134   : > { %6979 = vst [vmem:[#allocation33_spill] sm:$0xff] %v4485_v61  ;;  %6990 = vst [vmem:[#allocation44_spill] sm:$0xff] %v4539_v27  ;;  %v4600_v27 = vstv %s4477_s15  ;;  %v4603_v23 = vstv %s4479_s11  ;;  %v4606_v50 = vstv %s4487_s4  ;;  %v4609_v32 = vstv %s4489_s7  ;;  %v4649_v61 = vld [vmem:[#allocation2 + $0x68] sm:$0xff]  ;;  %s5518_s10 = sld [smem:[#allocation7 + $0x3]]  ;;  %s5537_s11 = sld [smem:[#allocation7 + $0x1]] }
 0x135   : > { %v4472_v30 = vstv %s6971_s21  ;;  %6991 = vst [vmem:[#allocation45_spill] sm:$0xff] %v4542_v36  ;;  %6992 = vst [vmem:[#allocation46_spill] sm:$0xff] %v4545_v13  ;;  %v4612_v15 = vstv %s4504_s6  ;;  %s5539_s19 = sld [smem:[#allocation7 + $0x1c]]  ;;  %s5556_s14 = sld [smem:[#allocation7 + $0x7]] }
 0x136   : > { %6993 = vst [vmem:[#allocation47_spill] sm:$0xff] %v4548_v40  ;;  %6994 = vst [vmem:[#allocation48_spill] sm:$0xff] %v4552_v21  ;;  %v4591_v21 = vstv %s4453_s23  ;;  %s5558_s21 = sld [smem:[#allocation7 + $0x22]]  ;;  %s5593_s23 = sld [smem:[#allocation7 + $0x2b]] }
 0x137   : > { %6995 = vst [vmem:[#allocation49_spill] sm:$0xff] %v4556_v55  ;;  %6996 = vst [vmem:[#allocation50_spill] sm:$0xff] %v4560_v43  ;;  %v4588_v43 = vstv %s4437_s16  ;;  %v4597_v55 = vstv %s4461_s26  ;;  %s5572_s16 = sld [smem:[#allocation7 + $0xa]]  ;;  %s5601_s24 = sld [smem:[#allocation7 + $0x13]] }
 0x138   : > { %6997 = vst [vmem:[#allocation51_spill] sm:$0xff] %v4564_v12  ;;  %6998 = vst [vmem:[#allocation52_spill] sm:$0xff] %v4568_v53  ;;  %v4585_v12 = vstv %s4451_s22  ;;  %v4593_v53 = vld [vmem:[#allocation2 + $0x20] sm:$0xff]  ;;  %s5583_s22 = sld [smem:[#allocation7 + $0x10]]  ;;  %s5603_s25 = sld [smem:[#allocation7 + $0x2e]] }
 0x139   : > { %v4446_v60 = vstv %s4331_s20  ;;  %s4463_s20 = sld [smem:[#allocation7 + $0x5]]  ;;  %6999 = vst [vmem:[#allocation53_spill] sm:$0xff] %v4571_v14  ;;  %7000 = vst [vmem:[#allocation54_spill] sm:$0xff] %v4574_v26  ;;  %s5610_s26 = sld [smem:[#allocation7 + $0x19]] }
 0x13a   : > { %7003 = vst [vmem:[#allocation57_spill] sm:$0xff] %v4582_v18  ;;  %7004 = vst [vmem:[#allocation58_spill] sm:$0xff] %v4585_v12  ;;  %v4615_v12 = vstv %s4506_s12  ;;  %s5623_s15 = sld [smem:[#allocation7 + $0x1e]]  ;;  %s5882_s4 = sld [smem:[#allocation7 + $0x17]] }
 0x13b   : > { %7005 = vst [vmem:[#allocation59_spill] sm:$0xff] %v4588_v43  ;;  %7006 = vst [vmem:[#allocation60_spill] sm:$0xff] %v4591_v21  ;;  %s5903_s7 = sld [smem:[#allocation7 + $0xc]]  ;;  %s5916_s6 = sld [smem:[#allocation7 + $0x8]] }
 0x13c   : > { %7007 = vst [vmem:[#allocation61_spill] sm:$0xff] %v4593_v53  ;;  %7008 = vst [vmem:[#allocation62_spill] sm:$0xff] %v4597_v55  ;;  %v4631_v55 = vmul.f32 %v4499_v31, %v4593_v53  ;;  %s5931_s12 = sld [smem:[#allocation7 + $0x20]] }
 0x13d   : > { %7009 = vst [vmem:[#allocation63_spill] sm:$0xff] %v4600_v27  ;;  %7010 = vst [vmem:[#allocation64_spill] sm:$0xff] %v4603_v23  ;;  %v4627_v27 = vmul.f32 %v4430_v62, %v4579_v6 }
 0x13e   : > { %7011 = vst [vmem:[#allocation65_spill] sm:$0xff] %v4606_v50  ;;  %7012 = vst [vmem:[#allocation66_spill] sm:$0xff] %v4609_v32 }
 0x13f   : > { %v4577_v2 = vstv %s4463_s20  ;;  %7013 = vst [vmem:[#allocation67_spill] sm:$0xff] %v4612_v15  ;;  %7014 = vst [vmem:[#allocation68_spill] sm:$0xff] %v4615_v12  ;;  %s5613_s20 = sld [smem:[#allocation7 + $0x34]] }
 0x140   : > { %7001 = vst [vmem:[#allocation55_spill] sm:$0xff] %v4577_v2  ;;  %v4619_v49 = vmul.f32 %v4577_v2, %v4579_v6  ;;  %7017 = vst [vmem:[#allocation71_spill] sm:$0xff] %v4627_v27  ;;  %v4647_v27 = vmul.f32 %v4603_v23, %v3989_v63 }
 0x141   : > { %7018 = vst [vmem:[#allocation72_spill] sm:$0xff] %v4631_v55  ;;  %7019 = vst [vmem:[#allocation73_spill] sm:$0xff] %v4635_v45  ;;  %v4653_v55 = vmul.f32 %v4649_v61, %v4574_v26  ;;  %v4657_v45 = vmul.f32 %v4532_v20, %v4579_v6 }
 0x142   : > { %7015 = vst [vmem:[#allocation69_spill] sm:$0xff] %v4619_v49  ;;  %v4639_v49 = vmul.f32 %v4502_v39, %v4593_v53  ;;  %7022 = vst [vmem:[#allocation76_spill] sm:$0xff] %v4647_v27  ;;  %v4669_v27 = vmul.f32 %v4609_v32, %v3989_v63 }
 0x143   : > { %7023 = vst [vmem:[#allocation77_spill] sm:$0xff] %v4649_v61  ;;  %7024 = vst [vmem:[#allocation78_spill] sm:$0xff] %v4653_v55  ;;  %v4677_v55 = vmul.f32 %v4588_v43, %v4579_v6 }
 0x144   : > { %7020 = vst [vmem:[#allocation74_spill] sm:$0xff] %v4639_v49  ;;  %7025 = vst [vmem:[#allocation79_spill] sm:$0xff] %v4657_v45  ;;  %v4661_v49 = vmul.f32 %v4606_v50, %v3989_v63  ;;  %v4681_v45 = vmul.f32 %v4548_v40, %v3982_v59  ;;  %v4688_v63 = vmul.f32 %v4612_v15, %v4593_v53 }
 0x145   : > { %7028 = vst [vmem:[#allocation82_spill] sm:$0xff] %v4669_v27  ;;  %7030 = vst [vmem:[#allocation84_spill] sm:$0xff] %v4677_v55  ;;  %v4692_v27 = vmul.f32 %v4591_v21, %v4579_v6  ;;  %v4700_v55 = vmul.f32 %v4574_v26, %v3982_v59  ;;  %v4717_v59 = vmul.f32 %v4430_v62, %v871_v17 }
 0x146   : > { %7026 = vst [vmem:[#allocation80_spill] sm:$0xff] %v4661_v49  ;;  %7031 = vst [vmem:[#allocation85_spill] sm:$0xff] %v4681_v45  ;;  %v4684_v49 = vmul.f32 %v4577_v2, %v871_v17  ;;  %v4707_v2 = vmul.f32 %v4615_v12, %v4593_v53 }
 0x147   : > { %7033 = vst [vmem:[#allocation87_spill] sm:$0xff] %v4688_v63  ;;  %7034 = vst [vmem:[#allocation88_spill] sm:$0xff] %v4692_v27  ;;  %v3529_v27 = vld [vmem:[#allocation2 + $0x60] sm:$0xff]  ;;  %v873_v63 = vld [vmem:[#allocation2 + $0x18] sm:$0xff] }
 0x148   : > { %7032 = vst [vmem:[#allocation86_spill] sm:$0xff] %v4684_v49  ;;  %7036 = vst [vmem:[#allocation90_spill] sm:$0xff] %v4700_v55  ;;  %v4711_v49 = vmul.f32 %v4606_v50, %v4022_v24  ;;  %v4744_v12 = vmul.f32 %v4496_v33, %v873_v63  ;;  %v4747_v15 = vmul.f32 %v4499_v31, %v873_v63 }
 0x149   : > { %7038 = vst [vmem:[#allocation92_spill] sm:$0xff] %v4707_v2  ;;  %7041 = vst [vmem:[#allocation95_spill] sm:$0xff] %v4717_v59  ;;  %v4733_v59 = vmul.f32 %v4609_v32, %v4022_v24  ;;  %v4750_v21 = vmul.f32 %v4502_v39, %v873_v63 }
 0x14a   : > { %7039 = vst [vmem:[#allocation93_spill] sm:$0xff] %v4711_v49  ;;  %7048 = vst [vmem:[#allocation99_spill] sm:$0xff] %v4744_v12 }
 0x14b   : > { %7044 = vst [vmem:[#allocation96_spill] sm:$0xff] %v4733_v59  ;;  %7049 = vst [vmem:[#allocation100_spill] sm:$0xff] %v4747_v15 }
 0x14c   : > { %7050 = vst [vmem:[#allocation101_spill] sm:$0xff] %v4750_v21 }
 0x187   : > { %v429_v9 = vpop.permute.xlu1 %428 }
 0x188   : > { %434 = vst.msk [vmem:[#allocation2 + $0x38] sm:$0xff] %vm330_vm0, %v429_v9  ;;  %v4623_v9 = vmul.f32 %v4496_v33, %v4593_v53 }
 0x18a   : > { %7016 = vst [vmem:[#allocation70_spill] sm:$0xff] %v4623_v9  ;;  %v4643_v9 = vmul.f32 %v4548_v40, %v3954_v48  ;;  %v4665_v48 = vmul.f32 %v4649_v61, %v4582_v18  ;;  %v4736_v61 = vmul.f32 %v4433_v29, %v871_v17 }
 0x18c   : > { %7021 = vst [vmem:[#allocation75_spill] sm:$0xff] %v4643_v9  ;;  %7027 = vst [vmem:[#allocation81_spill] sm:$0xff] %v4665_v48  ;;  %v4673_v9 = vmul.f32 %v4571_v14, %v4593_v53  ;;  %v7046_v53 = vstv %s4288_s30 }
 0x18d   : > { %v427_v48 = vpop.permute.xlu0 %426  ;;  %7045 = vst [vmem:[#allocation97_spill] sm:$0xff] %v4736_v61 }
 0x18e   : > { %7029 = vst [vmem:[#allocation83_spill] sm:$0xff] %v4673_v9  ;;  %v4696_v9 = vmul.f32 %v4603_v23, %v4022_v24  ;;  %433 = vst.msk [vmem:[#allocation2 + $0x30] sm:$0xff] %vm330_vm0, %v427_v48 }
 0x18f   : > { %v4702_v45 = vld [vmem:[#allocation2 + $0x38] sm:$0xff] }
 0x190   : > { %7035 = vst [vmem:[#allocation89_spill] sm:$0xff] %v4696_v9  ;;  %7037 = vst [vmem:[#allocation91_spill] sm:$0xff] %v4702_v45  ;;  %v4714_v9 = vmul.f32 %v3529_v27, %v4582_v18  ;;  %v960_v48 = vmul.f32 %v4369_v19, %v4702_v45  ;;  %v992_v55 = vmul.f32 %v4372_v57, %v4702_v45  ;;  %v4766_v12 = vld [vmem:[#allocation2 + $0x39] sm:$0xff] }
 0x191   : > { %v1024_v2 = vmul.f32 %v4375_v52, %v4702_v45  ;;  %v1056_v49 = vmul.f32 %v3945_v42, %v4702_v45  ;;  %v1076_v27 = vmul.f32 %v3949_v44, %v4702_v45  ;;  %v4741_v6 = vmul.f32 %v7046_v53, %v4702_v45  ;;  %7053 = vst [vmem:[#allocation103_spill] sm:$0xff] %v4766_v12 }
 0x192   : > { %7040 = vst [vmem:[#allocation94_spill] sm:$0xff] %v4714_v9  ;;  %v1096_v9 = vmul.f32 %v3952_v46, %v4702_v45  ;;  %v4753_v43 = vadd.f32 %v3942_v41, %v960_v48  ;;  %v4756_v24 = vadd.f32 %v3969_v54, %v992_v55  ;;  %v7051_v53 = vstv %s7042_s1 }
 0x193   : > { %7047 = vst [vmem:[#allocation98_spill] sm:$0xff] %v4741_v6  ;;  %v4759_v17 = vadd.f32 %v3973_v56, %v1024_v2  ;;  %v4764_v61 = vmul.f32 %v7051_v53, %v4702_v45  ;;  %v4769_v15 = vadd.f32 %v3942_v41, %v1056_v49  ;;  %v4772_v63 = vadd.f32 %v3969_v54, %v1076_v27 }
 0x194   : > { %v4775_v48 = vadd.f32 %v3973_v56, %v1096_v9  ;;  %v1128_v55 = vmul.f32 %v4398_v10, %v4702_v45  ;;  %v7054_v2 = vstv %s7043_s5  ;;  %v4786_v53 = vmul.f32 %v4385_v51, %v4702_v45 }
 0x195   : > { %7052 = vst [vmem:[#allocation102_spill] sm:$0xff] %v4764_v61  ;;  %v4782_v21 = vmul.f32 %v7054_v2, %v4702_v45  ;;  %v4790_v49 = vmul.f32 %v4392_v7, %v4702_v45  ;;  %v4794_v27 = vmul.f32 %v4395_v3, %v4702_v45  ;;  %v4796_v9 = vld [vmem:[#allocation2 + $0x30] sm:$0xff]  ;;  %v4801_v2 = vmul.f32 %v4430_v62, %v4702_v45 }
 0x196   : > { %7056 = vst [vmem:[#allocation105_spill] sm:$0xff] %v4796_v9  ;;  %1133 = vrot.lane.b32.xlu1 %v1128_v55, %s7057_s18  ;;  %v4805_v59 = vmul.f32 %v4433_v29, %v4702_v45  ;;  %v2412_v61 = vmul.f32 %v4535_v8, %v4766_v12  ;;  %v959_v6 = vmul.f32 %v4369_v19, %v4796_v9 }
 0x197   : > { %7055 = vst [vmem:[#allocation104_spill] sm:$0xff] %v4782_v21  ;;  %7058 = vst [vmem:[#allocation106_spill] sm:$0xff] %v4801_v2  ;;  %v4809_v21 = vmul.f32 %v4532_v20, %v4702_v45  ;;  %v991_v55 = vmul.f32 %v4372_v57, %v4796_v9  ;;  %v1023_v32 = vmul.f32 %v4375_v52, %v4796_v9  ;;  %v505_v23 = vpop.permute.xlu1 %504  ;;  %v4837_v2 = vld [vmem:[#allocation2 + $0x31] sm:$0xff] }
 0x198   : > { %7059 = vst [vmem:[#allocation107_spill] sm:$0xff] %v4805_v59  ;;  %v1055_v50 = vmul.f32 %v3945_v42, %v4796_v9  ;;  %v1075_v45 = vmul.f32 %v3949_v44, %v4796_v9  ;;  %510 = vst.msk [vmem:[#allocation2 + $0x50] sm:$0xff] %vm330_vm0, %v505_v23  ;;  %v2468_v18 = vmul.f32 %v4542_v36, %v4766_v12  ;;  %v7062_v59 = vstv %s4288_s30  ;;  %s5221_s30 = sld [smem:[#allocation8 + $0x1]] }
 0x199   : > { %7060 = vst [vmem:[#allocation108_spill] sm:$0xff] %v4809_v21  ;;  %v1095_v21 = vmul.f32 %v3952_v46, %v4796_v9  ;;  %v4830_v26 = vmul.f32 %v4545_v13, %v4766_v12  ;;  %v4835_v42 = vmul.f32 %v7062_v59, %v4796_v9  ;;  %7064 = vst [vmem:[#allocation111_spill] sm:$0xff] %v4837_v2 }
 0x19a   : > { %v4841_v44 = vmul.f32 %v4401_v0, %v4766_v12  ;;  %v4845_v46 = vmul.f32 %v4414_v28, %v4766_v12  ;;  %v4849_v23 = vmul.f32 %v4417_v4, %v4766_v12  ;;  %v4852_v14 = vadd.f32 %v3942_v41, %v959_v6 }
 0x19b   : > { %7061 = vst [vmem:[#allocation109_spill] sm:$0xff] %v4830_v26  ;;  %7063 = vst [vmem:[#allocation110_spill] sm:$0xff] %v4835_v42  ;;  %v4855_v59 = vadd.f32 %v3969_v54, %v991_v55  ;;  %v4858_v42 = vadd.f32 %v3973_v56, %v1023_v32  ;;  %v7068_v26 = vstv %s7042_s1  ;;  %v4866_v39 = vadd.f32 %v3942_v41, %v1055_v50  ;;  %v729_v55 = vpop.permute.xlu1 %728  ;;  %s5933_s1 = sld [smem:[#allocation7 + $0x27]] }
 0x19c   : > { %7065 = vst [vmem:[#allocation112_spill] sm:$0xff] %v4841_v44  ;;  %7066 = vst [vmem:[#allocation113_spill] sm:$0xff] %v4845_v46  ;;  %v4863_v44 = vmul.f32 %v7068_v26, %v4796_v9  ;;  %v4869_v46 = vadd.f32 %v3969_v54, %v1075_v45  ;;  %v4872_v12 = vadd.f32 %v3973_v56, %v1095_v21  ;;  %v7070_v32 = vstv %s7043_s5  ;;  %s5937_s5 = sld [smem:[#allocation7 + $0x29]] }
 0x19d   : > { %7067 = vst [vmem:[#allocation114_spill] sm:$0xff] %v4849_v23  ;;  %v1127_v6 = vmul.f32 %v4398_v10, %v4796_v9  ;;  %v4879_v23 = vmul.f32 %v7070_v32, %v4796_v9  ;;  %v4883_v26 = vmul.f32 %v4385_v51, %v4796_v9  ;;  %v4887_v41 = vmul.f32 %v4392_v7, %v4796_v9  ;;  %v503_v21 = vpop.permute.xlu0 %502 }
 0x19e   : > { %7069 = vst [vmem:[#allocation115_spill] sm:$0xff] %v4863_v44  ;;  %734 = vst.msk [vmem:[#allocation2 + $0x98] sm:$0xff] %vm330_vm0, %v729_v55  ;;  %v2411_v54 = vmul.f32 %v4535_v8, %v4837_v2  ;;  %v4894_v56 = vmul.f32 %v4395_v3, %v4796_v9  ;;  %v2467_v10 = vmul.f32 %v4542_v36, %v4837_v2  ;;  %v7086_v3 = vstv %s6966_s9 }
 0x19f   : > { %7071 = vst [vmem:[#allocation116_spill] sm:$0xff] %v4879_v23  ;;  %1131 = vrot.lane.b32.xlu0 %v1127_v6, %s7057_s18  ;;  %v2523_v45 = vmul.f32 %v4545_v13, %v4837_v2  ;;  %v2579_v50 = vmul.f32 %v4401_v0, %v4837_v2  ;;  %v2611_v32 = vmul.f32 %v4414_v28, %v4837_v2  ;;  %v4914_v44 = vld [vmem:[#allocation2 + $0x50] sm:$0xff]  ;;  %509 = vst.msk [vmem:[#allocation2 + $0x48] sm:$0xff] %vm330_vm0, %v503_v21  ;;  %v865_v13 = vpop.permute.xlu1 %864 }
 0x1a0   : > { %v4904_v55 = vadd.f32 %v2411_v54, %v4408_v38  ;;  %v4909_v23 = vadd.f32 %v2412_v61, %v4408_v38  ;;  %v4912_v6 = vadd.f32 %v2468_v18, %v4411_v25  ;;  %v4919_v36 = vmul.f32 %v4430_v62, %v4796_v9  ;;  %870 = vst.msk [vmem:[#allocation2 + $0xb0] sm:$0xff] %vm330_vm0, %v865_v13 }
 0x1a1   : > { %v4923_v54 = vmul.f32 %v4433_v29, %v4796_v9  ;;  %v4926_v8 = vadd.f32 %v2467_v10, %v4411_v25  ;;  %v4929_v61 = vadd.f32 %v2523_v45, %v4427_v37  ;;  %v966_v18 = vmul.f32 %v4424_v47, %v4914_v44 }
 0x1a2   : > { %7072 = vst [vmem:[#allocation117_spill] sm:$0xff] %v4904_v55  ;;  %7073 = vst [vmem:[#allocation118_spill] sm:$0xff] %v4909_v23  ;;  %v998_v21 = vmul.f32 %v4440_v22, %v4914_v44  ;;  %v1062_v62 = vmul.f32 %v4446_v60, %v4914_v44  ;;  %v4940_v29 = vmul.f32 %v4532_v20, %v4796_v9  ;;  %v727_v9 = vpop.permute.xlu0 %726 }
 0x1a3   : > { %7074 = vst [vmem:[#allocation119_spill] sm:$0xff] %v4912_v6  ;;  %7075 = vst [vmem:[#allocation120_spill] sm:$0xff] %v4919_v36  ;;  %v1082_v10 = vmul.f32 %v4449_v11, %v4914_v44  ;;  %v1102_v45 = vmul.f32 %v3980_v58, %v4914_v44  ;;  %v4956_v13 = vmul.f32 %v4443_v35, %v4914_v44  ;;  %v7104_v36 = vld [vmem:[#allocation37_spill] sm:$0xff] }
 0x1a4   : > { %7076 = vst [vmem:[#allocation121_spill] sm:$0xff] %v4923_v54  ;;  %7077 = vst [vmem:[#allocation122_spill] sm:$0xff] %v4926_v8  ;;  %v4952_v54 = vmul.f32 %v4417_v4, %v4837_v2  ;;  %v1064_v20 = vadd.f32 %v1062_v62, %v4769_v15  ;;  %v4963_v8 = vadd.f32 %v2611_v32, %v4411_v25 }
 0x1a5   : > { %7078 = vst [vmem:[#allocation123_spill] sm:$0xff] %v4929_v61  ;;  %7079 = vst [vmem:[#allocation124_spill] sm:$0xff] %v4940_v29  ;;  %v4948_v61 = vmul.f32 %v4548_v40, %v4837_v2  ;;  %v4960_v29 = vadd.f32 %v2579_v50, %v4408_v38  ;;  %v1104_v55 = vadd.f32 %v1102_v45, %v4775_v48  ;;  %v7084_v2 = vstv %s4336_s0  ;;  %v4977_v62 = vld [vmem:[#allocation2 + $0x98] sm:$0xff] }
 0x1a6   : > { %7083 = vst [vmem:[#allocation127_spill] sm:$0xff] %v4963_v8  ;;  %v4970_v40 = vmul.f32 %v7084_v2, %v4914_v44  ;;  %v4975_v7 = vmul.f32 %v7086_v3, %v4914_v44  ;;  %7088 = vst [vmem:[#allocation130_spill] sm:$0xff] %v4977_v62  ;;  %v4981_v15 = vadd.f32 %v966_v18, %v4753_v43  ;;  %v1066_v48 = vmax.f32 %v1064_v20, 0.0  ;;  %v5000_v43 = vld [vmem:[#allocation2 + $0x48] sm:$0xff]  ;;  %v863_v18 = vpop.permute.xlu0 %862 }
 0x1a7   : > { %7080 = vst [vmem:[#allocation125_spill] sm:$0xff] %v4948_v61  ;;  %7081 = vst [vmem:[#allocation126_spill] sm:$0xff] %v4960_v29  ;;  %v1084_v61 = vadd.f32 %v1082_v10, %v4772_v63  ;;  %v4984_v63 = vadd.f32 %v998_v21, %v4756_v24  ;;  %v4988_v2 = vmul.f32 %v4459_v16, %v4914_v44  ;;  %v1106_v3 = vmax.f32 %v1104_v55, 0.0 }
 0x1a8   : > { %7085 = vst [vmem:[#allocation128_spill] sm:$0xff] %v4970_v40  ;;  %7087 = vst [vmem:[#allocation129_spill] sm:$0xff] %v4975_v7  ;;  %v4992_v32 = vmul.f32 %v4466_v5, %v4914_v44  ;;  %v1548_v20 = vmul.f32 %v4401_v0, %v4977_v62  ;;  %v1580_v24 = vmul.f32 %v4414_v28, %v4977_v62 }
 0x1a9   : > { %733 = vst.msk [vmem:[#allocation2 + $0x90] sm:$0xff] %vm330_vm0, %v727_v9  ;;  %7089 = vst [vmem:[#allocation131_spill] sm:$0xff] %v4981_v15  ;;  %v1086_v50 = vmax.f32 %v1084_v61, 0.0  ;;  %v4996_v9 = vmul.f32 %v4469_v34, %v4914_v44  ;;  %v1612_v55 = vmul.f32 %v4417_v4, %v4977_v62  ;;  %v1992_v61 = vmul.f32 %v4369_v19, %v4977_v62 }
 0x1aa   : > { %7090 = vst [vmem:[#allocation132_spill] sm:$0xff] %v4984_v63  ;;  %3169 = vst.msk [vmem:[%s7082_s13 + $0x28] sm:$0xff] %vm330_vm0, %v1066_v48  ;;  %v965_v21 = vmul.f32 %v4424_v47, %v5000_v43  ;;  %v997_v10 = vmul.f32 %v4440_v22, %v5000_v43  ;;  %v1029_v45 = vmul.f32 %v4443_v35, %v5000_v43 }
 0x1ab   : > { %3174 = vst.msk [vmem:[%s7082_s13 + $0x128] sm:$0xff] %vm330_vm0, %v1086_v50  ;;  %3179 = vst.msk [vmem:[%s7082_s13 + $0x228] sm:$0xff] %vm330_vm0, %v1106_v3  ;;  %v1061_v48 = vmul.f32 %v4446_v60, %v5000_v43  ;;  %v1081_v7 = vmul.f32 %v4449_v11, %v5000_v43  ;;  %v1101_v50 = vmul.f32 %v3980_v58, %v5000_v43 }
 0x1ac   : > { %869 = vst.msk [vmem:[#allocation2 + $0xa8] sm:$0xff] %vm330_vm0, %v863_v18  ;;  %v2024_v3 = vmul.f32 %v4372_v57, %v4977_v62  ;;  %v2056_v40 = vmul.f32 %v4375_v52, %v4977_v62  ;;  %v5032_v63 = vadd.f32 %v965_v21, %v4852_v14  ;;  %v5035_v15 = vadd.f32 %v997_v10, %v4855_v59 }
 0x1ad   : > { %v5038_v18 = vadd.f32 %v1029_v45, %v4858_v42  ;;  %v1063_v8 = vadd.f32 %v1061_v48, %v4866_v39  ;;  %v1083_v58 = vadd.f32 %v1081_v7, %v4869_v46  ;;  %v1103_v29 = vadd.f32 %v1101_v50, %v4872_v12 }
 0x1ae   : > { %7091 = vst [vmem:[#allocation133_spill] sm:$0xff] %v5032_v63  ;;  %7092 = vst [vmem:[#allocation134_spill] sm:$0xff] %v5035_v15  ;;  %v5045_v6 = vmul.f32 %v4459_v16, %v5000_v43  ;;  %v1550_v14 = vadd.f32 %v1548_v20, %v4408_v38  ;;  %v5050_v42 = vmul.f32 %v4466_v5, %v5000_v43  ;;  %v7095_v48 = vstv %s6973_s17 }
 0x1af   : > { %7093 = vst [vmem:[#allocation135_spill] sm:$0xff] %v5038_v18  ;;  %v1065_v59 = vmax.f32 %v1063_v8, 0.0  ;;  %v5054_v7 = vmul.f32 %v4469_v34, %v5000_v43  ;;  %v1582_v12 = vadd.f32 %v1580_v24, %v4411_v25  ;;  %v1085_v46 = vmax.f32 %v1083_v58, 0.0 }
 0x1b0   : > { %v5057_v39 = vld [vmem:[#allocation2 + $0x90] sm:$0xff]  ;;  %v1105_v21 = vmax.f32 %v1103_v29, 0.0  ;;  %v1614_v10 = vadd.f32 %v1612_v55, %v4427_v37  ;;  %v1994_v20 = vadd.f32 %v1992_v61, %v4408_v38  ;;  %v2026_v8 = vadd.f32 %v2024_v3, %v4411_v25 }
 0x1b1   : > { %7094 = vst [vmem:[#allocation136_spill] sm:$0xff] %v5057_v39  ;;  %3168 = vst.msk [vmem:[%s7082_s13 + $0x20] sm:$0xff] %vm330_vm0, %v1065_v59  ;;  %v2058_v45 = vadd.f32 %v2056_v40, %v4427_v37  ;;  %v2088_v50 = vmul.f32 %v7095_v48, %v4977_v62  ;;  %v7096_v18 = vstv %s4354_s2  ;;  %v7097_v29 = vstv %s4356_s3 }
 0x1b2   : > { %v2108_v24 = vmul.f32 %v7096_v18, %v4977_v62  ;;  %3173 = vst.msk [vmem:[%s7082_s13 + $0x120] sm:$0xff] %vm330_vm0, %v1085_v46  ;;  %3178 = vst.msk [vmem:[%s7082_s13 + $0x220] sm:$0xff] %vm330_vm0, %v1105_v21  ;;  %v2128_v55 = vmul.f32 %v7097_v29, %v4977_v62  ;;  %v1547_v61 = vmul.f32 %v4401_v0, %v5057_v39  ;;  %v5090_v21 = vld [vmem:[#allocation2 + $0xb0] sm:$0xff] }
 0x1b3   : > { %v1579_v40 = vmul.f32 %v4414_v28, %v5057_v39  ;;  %v1611_v3 = vmul.f32 %v4417_v4, %v5057_v39  ;;  %v2090_v18 = vadd.f32 %v2088_v50, %v4408_v38  ;;  %v1991_v59 = vmul.f32 %v4369_v19, %v5057_v39 }
 0x1b4   : > { %v2110_v58 = vadd.f32 %v2108_v24, %v4411_v25  ;;  %v2023_v46 = vmul.f32 %v4372_v57, %v5057_v39  ;;  %v5093_v0 = vadd.f32 %v2128_v55, %v4427_v37  ;;  %v5096_v28 = vadd.f32 %v1547_v61, %v4408_v38 }
 0x1b5   : > { %v5099_v4 = vadd.f32 %v1579_v40, %v4411_v25  ;;  %v5102_v48 = vadd.f32 %v1611_v3, %v4427_v37  ;;  %v5105_v50 = vadd.f32 %v1991_v59, %v4408_v38  ;;  %v2055_v57 = vmul.f32 %v4375_v52, %v5057_v39 }
 0x1b6   : > { %v5108_v19 = vadd.f32 %v2023_v46, %v4411_v25  ;;  %v7098_v24 = vstv %s6973_s17  ;;  %v7099_v55 = vstv %s4354_s2  ;;  %v7100_v40 = vstv %s4356_s3  ;;  %s5204_s2 = sld [smem:[#allocation8]]  ;;  %s7114_s3 = sld [smem:[#allocation18_spill]] }
 0x1b7   : > { %v2087_v29 = vmul.f32 %v7098_v24, %v5057_v39  ;;  %v2107_v61 = vmul.f32 %v7099_v55, %v5057_v39  ;;  %v2127_v15 = vmul.f32 %v7100_v40, %v5057_v39  ;;  %v1554_v3 = vmul.f32 %v4472_v30, %v5090_v21  ;;  %v7101_v24 = vld [vmem:[#allocation33_spill] sm:$0xff]  ;;  %s5581_s17 = sld [smem:[#allocation7 + $0x25]] }
 0x1b8   : > { %v1586_v59 = vmul.f32 %v4475_v1, %v5090_v21  ;;  %v5126_v46 = vadd.f32 %v2055_v57, %v4427_v37  ;;  %v1618_v63 = vmul.f32 %v7101_v24, %v5090_v21  ;;  %v1998_v55 = vmul.f32 %v4424_v47, %v5090_v21 }
 0x1b9   : > { %v5129_v52 = vadd.f32 %v2087_v29, %v4408_v38  ;;  %v5136_v40 = vadd.f32 %v2107_v61, %v4411_v25  ;;  %v5139_v39 = vadd.f32 %v2127_v15, %v4427_v37  ;;  %v1556_v34 = vadd.f32 %v1554_v3, %v1550_v14 }
 0x1ba   : > { %v1588_v5 = vadd.f32 %v1586_v59, %v1582_v12  ;;  %v1620_v16 = vadd.f32 %v1618_v63, %v1614_v10  ;;  %v2000_v57 = vadd.f32 %v1998_v55, %v1994_v20  ;;  %v2030_v29 = vmul.f32 %v4440_v22, %v5090_v21  ;;  %v7102_v63 = vld [vmem:[#allocation34_spill] sm:$0xff] }
 0x1bb   : > { %v2062_v51 = vmul.f32 %v4443_v35, %v5090_v21  ;;  %v1562_v62 = vadd.f32 %v4786_v53, %v1556_v34  ;;  %v2094_v61 = vmul.f32 %v4446_v60, %v5090_v21  ;;  %v2114_v15 = vmul.f32 %v4449_v11, %v5090_v21 }
 0x1bc   : > { %v1594_v23 = vadd.f32 %v4790_v49, %v1588_v5  ;;  %v1626_v14 = vadd.f32 %v4794_v27, %v1620_v16  ;;  %v2006_v12 = vadd.f32 %v7102_v63, %v2000_v57  ;;  %v2032_v10 = vadd.f32 %v2030_v29, %v2026_v8  ;;  %v7103_v49 = vld [vmem:[#allocation36_spill] sm:$0xff]  ;;  %v7105_v27 = vld [vmem:[#allocation39_spill] sm:$0xff] }
 0x1bd   : > { %v2064_v20 = vadd.f32 %v2062_v51, %v2058_v45  ;;  %v1568_v3 = vadd.f32 %v4988_v2, %v1562_v62  ;;  %v2096_v34 = vadd.f32 %v2094_v61, %v2090_v18  ;;  %v2116_v5 = vadd.f32 %v2114_v15, %v2110_v58  ;;  %v5159_v8 = vld [vmem:[#allocation2 + $0xa8] sm:$0xff]  ;;  %v7106_v18 = vld [vmem:[#allocation38_spill] sm:$0xff] }
 0x1be   : > { %v1600_v59 = vadd.f32 %v4992_v32, %v1594_v23  ;;  %v1632_v53 = vadd.f32 %v4996_v9, %v1626_v14  ;;  %v2012_v55 = vadd.f32 %v7103_v49, %v2006_v12  ;;  %v2038_v16 = vadd.f32 %v7104_v36, %v2032_v10  ;;  %v7107_v9 = vld [vmem:[#allocation40_spill] sm:$0xff]  ;;  %v7108_v36 = vld [vmem:[#allocation41_spill] sm:$0xff] }
 0x1bf   : > { %v2070_v57 = vadd.f32 %v7105_v27, %v2064_v20  ;;  %v1570_v51 = vmax.f32 %v1568_v3, 0.0  ;;  %v2098_v23 = vmax.f32 %v2096_v34, 0.0  ;;  %v2118_v2 = vmax.f32 %v2116_v5, 0.0 }
 0x1c0   : > { %v1602_v62 = vmax.f32 %v1600_v59, 0.0  ;;  %v1634_v32 = vmax.f32 %v1632_v53, 0.0  ;;  %v2014_v45 = vmax.f32 %v2012_v55, 0.0  ;;  %v2044_v58 = vadd.f32 %v7106_v18, %v2038_v16  ;;  %v7109_v16 = vld [vmem:[#allocation44_spill] sm:$0xff] }
 0x1c1   : > { %v2076_v29 = vadd.f32 %v7107_v9, %v2070_v57  ;;  %3256 = vst.msk [vmem:[%s7082_s13 + $0x68] sm:$0xff] %vm330_vm0, %v1570_v51  ;;  %3339 = vst.msk [vmem:[%s7082_s13 + $0xa8] sm:$0xff] %vm330_vm0, %v2098_v23  ;;  %v2134_v61 = vmul.f32 %v7108_v36, %v5090_v21  ;;  %v1553_v15 = vmul.f32 %v4472_v30, %v5159_v8  ;;  %v7111_v51 = vld [vmem:[#allocation48_spill] sm:$0xff]  ;;  %v7112_v23 = vld [vmem:[#allocation50_spill] sm:$0xff] }
 0x1c2   : > { %3263 = vst.msk [vmem:[%s7082_s13 + $0x168] sm:$0xff] %vm330_vm0, %v1602_v62  ;;  %3344 = vst.msk [vmem:[%s7082_s13 + $0x1a8] sm:$0xff] %vm330_vm0, %v2118_v2  ;;  %v1585_v14 = vmul.f32 %v4475_v1, %v5159_v8  ;;  %v1617_v63 = vmul.f32 %v7101_v24, %v5159_v8  ;;  %v2046_v12 = vmax.f32 %v2044_v58, 0.0  ;;  %v1997_v20 = vmul.f32 %v4424_v47, %v5159_v8  ;;  %v7113_v2 = vld [vmem:[#allocation51_spill] sm:$0xff]  ;;  %v7115_v58 = vld [vmem:[#allocation52_spill] sm:$0xff] }
 0x1c3   : > { %3270 = vst.msk [vmem:[%s7082_s13 + $0x268] sm:$0xff] %vm330_vm0, %v1634_v32  ;;  %3321 = vst.msk [vmem:[%s7082_s13 + $0x98] sm:$0xff] %vm330_vm0, %v2014_v45  ;;  %v2078_v10 = vmax.f32 %v2076_v29, 0.0  ;;  %v2029_v3 = vmul.f32 %v4440_v22, %v5159_v8  ;;  %v2136_v59 = vadd.f32 %v2134_v61, %v5093_v0  ;;  %v1555_v34 = vadd.f32 %v1553_v15, %v5096_v28 }
 0x1c4   : > { %v1587_v5 = vadd.f32 %v1585_v14, %v5099_v4  ;;  %v1619_v53 = vadd.f32 %v1617_v63, %v5102_v48  ;;  %3328 = vst.msk [vmem:[%s7082_s13 + $0x198] sm:$0xff] %vm330_vm0, %v2046_v12  ;;  %v1999_v49 = vadd.f32 %v1997_v20, %v5105_v50  ;;  %v2061_v22 = vmul.f32 %v4443_v35, %v5159_v8  ;;  %v7110_v50 = vld [vmem:[#allocation49_spill] sm:$0xff] }
 0x1c5   : > { %3335 = vst.msk [vmem:[%s7082_s13 + $0x298] sm:$0xff] %vm330_vm0, %v2078_v10  ;;  %v2031_v47 = vadd.f32 %v2029_v3, %v5108_v19  ;;  %v2093_v0 = vmul.f32 %v4446_v60, %v5159_v8  ;;  %v2138_v28 = vmax.f32 %v2136_v59, 0.0  ;;  %v1561_v4 = vadd.f32 %v4883_v26, %v1555_v34 }
 0x1c6   : > { %v1593_v48 = vadd.f32 %v4887_v41, %v1587_v5  ;;  %v1625_v55 = vadd.f32 %v4894_v56, %v1619_v53  ;;  %v2005_v27 = vadd.f32 %v7109_v16, %v1999_v49  ;;  %v2063_v19 = vadd.f32 %v2061_v22, %v5126_v46  ;;  %v5273_v53 = vld [vmem:[#allocation2 + $0x51] sm:$0xff]  ;;  %v7120_v22 = vld [vmem:[#allocation35_spill] sm:$0xff] }
 0x1c7   : > { %v2037_v57 = vadd.f32 %v7110_v50, %v2031_v47  ;;  %v2095_v35 = vadd.f32 %v2093_v0, %v5129_v52  ;;  %3349 = vst.msk [vmem:[%s7082_s13 + $0x2a8] sm:$0xff] %vm330_vm0, %v2138_v28  ;;  %v1567_v60 = vadd.f32 %v5045_v6, %v1561_v4  ;;  %v2113_v56 = vmul.f32 %v4449_v11, %v5159_v8  ;;  %v7121_v28 = vld [vmem:[#allocation109_spill] sm:$0xff]  ;;  %v7123_v50 = vld [vmem:[#allocation112_spill] sm:$0xff] }
 0x1c8   : > { %v1599_v26 = vadd.f32 %v5050_v42, %v1593_v48  ;;  %v1631_v41 = vadd.f32 %v5054_v7, %v1625_v55  ;;  %v2011_v62 = vadd.f32 %v7111_v51, %v2005_v27  ;;  %v2069_v52 = vadd.f32 %v7113_v2, %v2063_v19  ;;  %v7122_v55 = vld [vmem:[#allocation53_spill] sm:$0xff]  ;;  %v7127_v51 = vld [vmem:[#allocation106_spill] sm:$0xff] }
 0x1c9   : > { %v2043_v46 = vadd.f32 %v7112_v23, %v2037_v57  ;;  %v2097_v32 = vmax.f32 %v2095_v35, 0.0  ;;  %v1569_v45 = vmax.f32 %v1567_v60, 0.0  ;;  %v2115_v42 = vadd.f32 %v2113_v56, %v5136_v40  ;;  %v7124_v19 = vld [vmem:[#allocation113_spill] sm:$0xff]  ;;  %v7125_v60 = vld [vmem:[#allocation114_spill] sm:$0xff] }
 0x1ca   : > { %v1601_v6 = vmax.f32 %v1599_v26, 0.0  ;;  %v1633_v18 = vmax.f32 %v1631_v41, 0.0  ;;  %v2013_v11 = vmax.f32 %v2011_v62, 0.0  ;;  %v2075_v9 = vadd.f32 %v7115_v58, %v2069_v52  ;;  %v7126_v41 = vld [vmem:[#allocation58_spill] sm:$0xff] }
 0x1cb   : > { %v2045_v7 = vmax.f32 %v2043_v46, 0.0  ;;  %3338 = vst.msk [vmem:[%s7082_s13 + $0xa0] sm:$0xff] %vm330_vm0, %v2097_v32  ;;  %v2133_v29 = vmul.f32 %v7108_v36, %v5159_v8  ;;  %v5230_v61 = vadd.f32 %v4956_v13, %v4759_v17  ;;  %3255 = vst.msk [vmem:[%s7082_s13 + $0x60] sm:$0xff] %vm330_vm0, %v1569_v45  ;;  %v2117_v40 = vmax.f32 %v2115_v42, 0.0  ;;  %v7129_v62 = vld [vmem:[#allocation62_spill] sm:$0xff] }
 0x1cc   : > { %3262 = vst.msk [vmem:[%s7082_s13 + $0x160] sm:$0xff] %vm330_vm0, %v1601_v6  ;;  %3269 = vst.msk [vmem:[%s7082_s13 + $0x260] sm:$0xff] %vm330_vm0, %v1633_v18  ;;  %v1142_v15 = vmul.f32 %v4496_v33, %v4914_v44  ;;  %v1141_v14 = vmul.f32 %v4496_v33, %v5000_v43  ;;  %v7116_v63 = vstv %s7114_s3  ;;  %v7117_v17 = vstv %s4336_s0  ;;  %s5278_s0 = sld [smem:[#allocation8 + $0x2]]  ;;  %v7133_v32 = vld [vmem:[#allocation130_spill] sm:$0xff]  ;;  %s5959_s3 = sld [smem:[#allocation7 + $0x15]] }
 0x1cd   : > { %v5245_v12 = vmul.f32 %v7116_v63, %v4914_v44  ;;  %v5250_v13 = vmul.f32 %v7117_v17, %v5000_v43  ;;  %3320 = vst.msk [vmem:[%s7082_s13 + $0x90] sm:$0xff] %vm330_vm0, %v2013_v11  ;;  %3327 = vst.msk [vmem:[%s7082_s13 + $0x190] sm:$0xff] %vm330_vm0, %v2045_v7  ;;  %v2077_v10 = vmax.f32 %v2075_v9, 0.0  ;;  %v2135_v20 = vadd.f32 %v2133_v29, %v5139_v39  ;;  %v7134_v45 = vld [vmem:[#allocation26_spill] sm:$0xff]  ;;  %v7136_v7 = vld [vmem:[#allocation119_spill] sm:$0xff] }
 0x1ce   : > { %v7118_v3 = vstv %s6966_s9  ;;  %v7119_v33 = vmov %v7116_v63  ;;  %3343 = vst.msk [vmem:[%s7082_s13 + $0x1a0] sm:$0xff] %vm330_vm0, %v2117_v40  ;;  %1147 = vrot.lane.b32.xlu1 %v1142_v15, %s7057_s18  ;;  %1145 = vrot.lane.b32.xlu0 %v1141_v14, %s7057_s18  ;;  %v1198_v5 = vmul.f32 %v4499_v31, %v4914_v44  ;;  %v1197_v47 = vmul.f32 %v4499_v31, %v5000_v43  ;;  %v7135_v18 = vld [vmem:[#allocation30_spill] sm:$0xff]  ;;  %v7139_v40 = vld [vmem:[#allocation27_spill] sm:$0xff]  ;;  %s5429_s9 = sld [smem:[#allocation7 + $0x16]] }
 0x1cf   : > { %v5260_v59 = vmul.f32 %v7118_v3, %v5000_v43  ;;  %v5265_v34 = vmul.f32 %v7119_v33, %v5000_v43  ;;  %v5276_v39 = vstv %s5204_s2  ;;  %3334 = vst.msk [vmem:[%s7082_s13 + $0x290] sm:$0xff] %vm330_vm0, %v2077_v10  ;;  %v2137_v49 = vmax.f32 %v2135_v20, 0.0  ;;  %v5345_v14 = vld [vmem:[#allocation2 + $0x49] sm:$0xff]  ;;  %s5947_s2 = sld [smem:[#allocation7 + $0x32]] }
 0x1d0   : > { %v5286_v0 = vmul.f32 %v7120_v22, %v4914_v44  ;;  %v2526_v4 = vadd.f32 %v7121_v28, %v4427_v37  ;;  %v5292_v48 = vmul.f32 %v7120_v22, %v5000_v43  ;;  %v5296_v16 = vmul.f32 %v7122_v55, %v4914_v44  ;;  %v7140_v17 = vld [vmem:[#allocation31_spill] sm:$0xff]  ;;  %v7141_v3 = vld [vmem:[#allocation28_spill] sm:$0xff] }
 0x1d1   : > { %v5300_v27 = vmul.f32 %v7122_v55, %v5000_v43  ;;  %v5304_v31 = vadd.f32 %v4952_v54, %v4427_v37  ;;  %3348 = vst.msk [vmem:[%s7082_s13 + $0x2a0] sm:$0xff] %vm330_vm0, %v2137_v49  ;;  %v2582_v57 = vadd.f32 %v7123_v50, %v4408_v38  ;;  %v2614_v35 = vadd.f32 %v7124_v19, %v4411_v25  ;;  %v7128_v54 = vld [vmem:[#allocation120_spill] sm:$0xff]  ;;  %v7130_v38 = vld [vmem:[#allocation63_spill] sm:$0xff] }
 0x1d2   : > { %v2646_v26 = vadd.f32 %v7125_v60, %v4427_v37  ;;  %v2418_v56 = vmul.f32 %v7126_v41, %v5273_v53  ;;  %1189 = vrot.lane.b32.xlu1 %v7127_v51, %s7057_s18  ;;  %1187 = vrot.lane.b32.xlu0 %v7128_v54, %s7057_s18  ;;  %v2474_v23 = vmul.f32 %v7129_v62, %v5273_v53  ;;  %v5327_v2 = vstv %s5221_s30  ;;  %v7131_v37 = vld [vmem:[#allocation118_spill] sm:$0xff]  ;;  %v7142_v49 = vld [vmem:[#allocation103_spill] sm:$0xff]  ;;  %v7144_v50 = vld [vmem:[#allocation32_spill] sm:$0xff]  ;;  %s5988_s30 = sld [smem:[#allocation7 + $0x23]] }
 0x1d3   : > { %v2530_v46 = vmul.f32 %v7130_v38, %v5273_v53  ;;  %v2586_v25 = vmul.f32 %v4472_v30, %v5273_v53  ;;  %v2592_v6 = vmul.f32 %v7134_v45, %v7133_v32  ;;  %v2598_v42 = vmul.f32 %v7135_v18, %v5090_v21  ;;  %v7143_v22 = vld [vmem:[#allocation47_spill] sm:$0xff] }
 0x1d4   : > { %v5330_v52 = vadd.f32 %v2418_v56, %v7131_v37  ;;  %v2618_v11 = vmul.f32 %v4475_v1, %v5273_v53  ;;  %v5339_v58 = vadd.f32 %v2474_v23, %v7136_v7  ;;  %v2624_v15 = vmul.f32 %v7139_v40, %v7133_v32  ;;  %v7152_v7 = vld [vmem:[#allocation54_spill] sm:$0xff] }
 0x1d5   : > { %v5341_v9 = vadd.f32 %v2530_v46, %v2526_v4  ;;  %v2588_v29 = vadd.f32 %v2586_v25, %v2582_v57  ;;  %v2630_v10 = vmul.f32 %v7140_v17, %v5090_v21  ;;  %v2650_v20 = vmul.f32 %v7101_v24, %v5273_v53  ;;  %v7145_v25 = vld [vmem:[#allocation117_spill] sm:$0xff] }
 0x1d6   : > { %7132 = vst [vmem:[#allocation33_spill] sm:$0xff] %v5330_v52  ;;  %7137 = vst [vmem:[#allocation34_spill] sm:$0xff] %v5339_v58  ;;  %v2620_v63 = vadd.f32 %v2618_v11, %v2614_v35  ;;  %v2656_v33 = vmul.f32 %v7141_v3, %v7133_v32  ;;  %1203 = vrot.lane.b32.xlu1 %v1198_v5, %s7057_s18  ;;  %1201 = vrot.lane.b32.xlu0 %v1197_v47, %s7057_s18  ;;  %v5364_v19 = vstv %s5278_s0  ;;  %s5990_s0 = sld [smem:[#allocation7 + $0x2]] }
 0x1d7   : > { %7138 = vst [vmem:[#allocation36_spill] sm:$0xff] %v5341_v9  ;;  %v5357_v28 = vmul.f32 %v7143_v22, %v7142_v49  ;;  %v2594_v4 = vadd.f32 %v2592_v6, %v2588_v29  ;;  %v2662_v57 = vmul.f32 %v7144_v50, %v5090_v21  ;;  %v2652_v60 = vadd.f32 %v2650_v20, %v2646_v26  ;;  %v7147_v6 = vld [vmem:[#allocation122_spill] sm:$0xff] }
 0x1d8   : > { %v2626_v35 = vadd.f32 %v2624_v15, %v2620_v63  ;;  %v2417_v56 = vmul.f32 %v7126_v41, %v5345_v14  ;;  %v2473_v5 = vmul.f32 %v7129_v62, %v5345_v14  ;;  %v2529_v51 = vmul.f32 %v7130_v38, %v5345_v14  ;;  %v7153_v63 = vld [vmem:[#allocation123_spill] sm:$0xff]  ;;  %v7155_v20 = vld [vmem:[#allocation126_spill] sm:$0xff] }
 0x1d9   : > { %v2600_v47 = vadd.f32 %v2598_v42, %v2594_v4  ;;  %v2585_v54 = vmul.f32 %v4472_v30, %v5345_v14  ;;  %v2617_v23 = vmul.f32 %v4475_v1, %v5345_v14  ;;  %v2658_v46 = vadd.f32 %v2656_v33, %v2652_v60  ;;  %v7149_v42 = vld [vmem:[#allocation107_spill] sm:$0xff]  ;;  %v7150_v30 = vld [vmem:[#allocation121_spill] sm:$0xff] }
 0x1da   : > { %v2632_v26 = vadd.f32 %v2630_v10, %v2626_v35  ;;  %v5381_v37 = vadd.f32 %v2417_v56, %v7145_v25  ;;  %v5384_v11 = vadd.f32 %v2473_v5, %v7147_v6  ;;  %1245 = vrot.lane.b32.xlu1 %v7149_v42, %s7057_s18  ;;  %1243 = vrot.lane.b32.xlu0 %v7150_v30, %s7057_s18  ;;  %v7151_v1 = vld [vmem:[#allocation111_spill] sm:$0xff]  ;;  %v7157_v25 = vld [vmem:[#allocation136_spill] sm:$0xff]  ;;  %v7181_v58 = vstv %s5386_s8 }
 0x1db   : > { %v5394_v29 = vmul.f32 %v7152_v7, %v7151_v1  ;;  %v2602_v15 = vmax.f32 %v2600_v47, 0.0  ;;  %v5397_v10 = vadd.f32 %v2529_v51, %v7153_v63  ;;  %v2587_v33 = vadd.f32 %v2585_v54, %v7155_v20  ;;  %v7156_v60 = vld [vmem:[#allocation127_spill] sm:$0xff] }
 0x1dc   : > { %7146 = vst [vmem:[#allocation37_spill] sm:$0xff] %v5381_v37  ;;  %7148 = vst [vmem:[#allocation39_spill] sm:$0xff] %v5384_v11  ;;  %v2634_v4 = vmax.f32 %v2632_v26, 0.0  ;;  %v2664_v35 = vadd.f32 %v2662_v57, %v2658_v46  ;;  %v2619_v56 = vadd.f32 %v2617_v23, %v7156_v60  ;;  %v2649_v5 = vmul.f32 %v7101_v24, %v5345_v14  ;;  %v7159_v46 = vld [vmem:[#allocation64_spill] sm:$0xff] }
 0x1dd   : > { %7154 = vst [vmem:[#allocation38_spill] sm:$0xff] %v5397_v10  ;;  %3426 = vst.msk [vmem:[%s7082_s13 + $0xe8] sm:$0xff] %vm330_vm0, %v2602_v15  ;;  %v2591_v6 = vmul.f32 %v7134_v45, %v7157_v25  ;;  %v2597_v47 = vmul.f32 %v7135_v18, %v5159_v8  ;;  %v2623_v51 = vmul.f32 %v7139_v40, %v7157_v25  ;;  %v6894_v26 = vstv %s5370_s28  ;;  %v7162_v60 = vld [vmem:[#allocation124_spill] sm:$0xff] }
 0x1de   : > { %v2629_v57 = vmul.f32 %v7140_v17, %v5159_v8  ;;  %3433 = vst.msk [vmem:[%s7082_s13 + $0x1e8] sm:$0xff] %vm330_vm0, %v2634_v4  ;;  %v2666_v24 = vmax.f32 %v2664_v35, 0.0  ;;  %v2651_v54 = vadd.f32 %v2649_v5, %v5304_v31  ;;  %v2655_v23 = vmul.f32 %v7141_v3, %v7157_v25  ;;  %1259 = vrot.lane.b32.xlu1 %v5286_v0, %s7057_s18  ;;  %v7158_v3 = vld [vmem:[#allocation57_spill] sm:$0xff]  ;;  %v7161_v35 = vld [vmem:[#allocation108_spill] sm:$0xff] }
 0x1df   : > { %v2661_v45 = vmul.f32 %v7144_v50, %v5159_v8  ;;  %1257 = vrot.lane.b32.xlu0 %v5292_v48, %s7057_s18  ;;  %v5426_v18 = vmul.f32 %v7152_v7, %v7142_v49  ;;  %v2593_v40 = vadd.f32 %v2591_v6, %v2587_v33  ;;  %v2625_v31 = vadd.f32 %v2623_v51, %v2619_v56 }
 0x1e0   : > { %v6893_v17 = vstv %s5361_s27  ;;  %v5433_v50 = vmul.f32 %v7158_v3, %v7151_v1  ;;  %v5437_v0 = vmul.f32 %v7158_v3, %v7142_v49  ;;  %3440 = vst.msk [vmem:[%s7082_s13 + $0x2e8] sm:$0xff] %vm330_vm0, %v2666_v24  ;;  %v2657_v48 = vadd.f32 %v2655_v23, %v2651_v54  ;;  %v7160_v49 = vld [vmem:[#allocation65_spill] sm:$0xff]  ;;  %v7164_v54 = vld [vmem:[#allocation91_spill] sm:$0xff] }
 0x1e1   : > { %v5444_v42 = vmul.f32 %v7159_v46, %v5273_v53  ;;  %v2599_v30 = vadd.f32 %v2597_v47, %v2593_v40  ;;  %v2631_v15 = vadd.f32 %v2629_v57, %v2625_v31  ;;  %v5449_v1 = vmul.f32 %v7159_v46, %v5345_v14  ;;  %v7163_v47 = vld [vmem:[#allocation66_spill] sm:$0xff]  ;;  %v7165_v23 = vld [vmem:[#allocation59_spill] sm:$0xff]  ;;  %v7166_v40 = vld [vmem:[#allocation105_spill] sm:$0xff] }
 0x1e2   : > { %v2663_v20 = vadd.f32 %v2661_v45, %v2657_v48  ;;  %v5453_v33 = vmul.f32 %v7160_v49, %v5273_v53  ;;  %1701 = vrot.lane.b32.xlu1 %v7161_v35, %s7057_s18  ;;  %v5462_v6 = vmul.f32 %v7160_v49, %v5345_v14  ;;  %v5466_v51 = vmul.f32 %v7163_v47, %v5273_v53  ;;  %v7167_v53 = vld [vmem:[#allocation60_spill] sm:$0xff] }
 0x1e3   : > { %1699 = vrot.lane.b32.xlu0 %v7162_v60, %s7057_s18  ;;  %v2601_v56 = vmax.f32 %v2599_v30, 0.0  ;;  %v2633_v5 = vmax.f32 %v2631_v15, 0.0  ;;  %v5470_v24 = vmul.f32 %v7163_v47, %v5345_v14  ;;  %v5474_v45 = vmul.f32 %v7165_v23, %v7164_v54  ;;  %v7168_v30 = vld [vmem:[#allocation67_spill] sm:$0xff]  ;;  %v7169_v35 = vld [vmem:[#allocation68_spill] sm:$0xff] }
 0x1e4   : > { %v2665_v57 = vmax.f32 %v2663_v20, 0.0  ;;  %v5478_v31 = vmul.f32 %v7165_v23, %v7166_v40  ;;  %v5486_v48 = vmul.f32 %v7167_v53, %v7164_v54  ;;  %v5490_v14 = vmul.f32 %v7167_v53, %v7166_v40  ;;  %v7178_v40 = vld [vmem:[#allocation56_spill] sm:$0xff] }
 0x1e5   : > { %3425 = vst.msk [vmem:[%s7082_s13 + $0xe0] sm:$0xff] %vm330_vm0, %v2601_v56  ;;  %3432 = vst.msk [vmem:[%s7082_s13 + $0x1e0] sm:$0xff] %vm330_vm0, %v2633_v5  ;;  %v5494_v15 = vmul.f32 %v7168_v30, %v4914_v44  ;;  %v5498_v20 = vmul.f32 %v7168_v30, %v5000_v43  ;;  %v5504_v60 = vmul.f32 %v7169_v35, %v4914_v44  ;;  %v7182_v10 = vstv %s5429_s9  ;;  %v7191_v53 = vld [vmem:[#allocation72_spill] sm:$0xff] }
 0x1e6   : > { %3439 = vst.msk [vmem:[%s7082_s13 + $0x2e0] sm:$0xff] %vm330_vm0, %v2665_v57  ;;  %v5508_v56 = vmul.f32 %v7169_v35, %v5000_v43  ;;  %v5512_v5 = vmul.f32 %v7143_v22, %v7133_v32  ;;  %v5516_v54 = vmul.f32 %v7143_v22, %v7157_v25  ;;  %1715 = vrot.lane.b32.xlu1 %v5296_v16, %s7057_s18  ;;  %v7179_v57 = vld [vmem:[#allocation61_spill] sm:$0xff] }
 0x1e7   : > { %1713 = vrot.lane.b32.xlu0 %v5300_v27, %s7057_s18  ;;  %v5526_v44 = vmul.f32 %v7159_v46, %v5090_v21  ;;  %v5530_v43 = vmul.f32 %v7159_v46, %v5159_v8  ;;  %v5534_v22 = vmul.f32 %v7152_v7, %v7133_v32  ;;  %v5543_v16 = vmul.f32 %v7152_v7, %v7157_v25 }
 0x1e8   : > { %7170 = vst [vmem:[#allocation40_spill] sm:$0xff] %v5512_v5  ;;  %7171 = vst [vmem:[#allocation41_spill] sm:$0xff] %v5516_v54  ;;  %v5547_v27 = vmul.f32 %v7158_v3, %v7157_v25  ;;  %v5551_v46 = vmul.f32 %v7160_v49, %v5159_v8  ;;  %v901_v4 = vmul.f32 %v6893_v17, %v7178_v40  ;;  %v7180_v7 = vstv %s5378_s29 }
 0x1e9   : > { %7172 = vst [vmem:[#allocation44_spill] sm:$0xff] %v5526_v44  ;;  %7173 = vst [vmem:[#allocation49_spill] sm:$0xff] %v5530_v43  ;;  %v907_v63 = vmul.f32 %v6894_v26, %v7179_v57  ;;  %v920_v9 = vmul.f32 %v7180_v7, %v7178_v40  ;;  %v926_v52 = vmul.f32 %v7181_v58, %v7179_v57  ;;  %v7185_v26 = vld [vmem:[#allocation132_spill] sm:$0xff]  ;;  %v7187_v58 = vld [vmem:[#allocation125_spill] sm:$0xff]  ;;  %v5708_v43 = vstv %s5613_s20  ;;  %s6156_s20 = sld [smem:[#allocation7]] }
 0x1ea   : > { %7174 = vst [vmem:[#allocation48_spill] sm:$0xff] %v5534_v22  ;;  %7175 = vst [vmem:[#allocation50_spill] sm:$0xff] %v5543_v16  ;;  %v940_v11 = vmul.f32 %v7182_v10, %v7178_v40  ;;  %v903_v17 = vadd.f32 %v901_v4, %v5276_v39  ;;  %v946_v37 = vmul.f32 %v7108_v36, %v7179_v57  ;;  %v7186_v22 = vld [vmem:[#allocation71_spill] sm:$0xff]  ;;  %2691 = vrot.lane.b32.xlu1 %v7187_v58, %s7057_s18  ;;  %v7188_v7 = vld [vmem:[#allocation73_spill] sm:$0xff] }
 0x1eb   : > { %7176 = vst [vmem:[#allocation51_spill] sm:$0xff] %v5547_v27  ;;  %7177 = vst [vmem:[#allocation52_spill] sm:$0xff] %v5551_v46  ;;  %v7183_v46 = vld [vmem:[#allocation131_spill] sm:$0xff]  ;;  %v7184_v27 = vld [vmem:[#allocation69_spill] sm:$0xff]  ;;  %v1006_v35 = vadd.f32 %v7186_v22, %v7185_v26  ;;  %2693 = vrot.lane.b32.xlu0 %v5357_v28, %s7057_s18  ;;  %v922_v10 = vadd.f32 %v920_v9, %v5327_v2  ;;  %v5597_v26 = vmul.f32 %v7160_v49, %v5090_v21 }
 0x1ec   : > { %v974_v16 = vadd.f32 %v7184_v27, %v7183_v46  ;;  %v942_v4 = vadd.f32 %v940_v11, %v5364_v19  ;;  %v1038_v27 = vadd.f32 %v7188_v7, %v5230_v61  ;;  %v909_v22 = vadd.f32 %v907_v63, %v903_v17  ;;  %v7190_v46 = vld [vmem:[#allocation70_spill] sm:$0xff]  ;;  %v7197_v7 = vld [vmem:[#allocation77_spill] sm:$0xff]  ;;  %7203 = vst [vmem:[#allocation118_spill] sm:$0xff] %v5708_v43  ;;  %v7204_v44 = vld [vmem:[#allocation43_spill] sm:$0xff] }
 0x1ed   : > { %7189 = vst [vmem:[#allocation35_spill] sm:$0xff] %v5597_v26  ;;  %v1012_v30 = vadd.f32 %v7191_v53, %v1006_v35  ;;  %v5607_v9 = vmul.f32 %v7158_v3, %v7133_v32  ;;  %v928_v61 = vadd.f32 %v926_v52, %v922_v10  ;;  %v7193_v11 = vld [vmem:[#allocation74_spill] sm:$0xff]  ;;  %v6898_v35 = vstv %s5518_s10 }
 0x1ee   : > { %v980_v58 = vadd.f32 %v7190_v46, %v974_v16  ;;  %v948_v28 = vadd.f32 %v946_v37, %v942_v4  ;;  %v1044_v49 = vadd.f32 %v7193_v11, %v1038_v27  ;;  %v911_v17 = vmax.f32 %v909_v22, 0.0  ;;  %2787 = vrot.lane.b32.xlu1 %v5394_v29, %s7057_s18  ;;  %v5656_v22 = vld [vmem:[#allocation2 + $0x80] sm:$0xff] }
 0x1ef   : > { %7192 = vst [vmem:[#allocation109_spill] sm:$0xff] %v5607_v9  ;;  %v1014_v53 = vmax.f32 %v1012_v30, 0.0  ;;  %2789 = vrot.lane.b32.xlu0 %v5426_v18, %s7057_s18  ;;  %v5621_v52 = vmul.f32 %v7163_v47, %v5090_v21  ;;  %v930_v37 = vmax.f32 %v928_v61, 0.0  ;;  %v5632_v29 = vstv %s5537_s11  ;;  %7198 = vst [vmem:[#allocation58_spill] sm:$0xff] %v5656_v22  ;;  %s6043_s11 = sld [smem:[#allocation7 + $0x26]] }
 0x1f0   : > { %v982_v63 = vmax.f32 %v980_v58, 0.0  ;;  %v950_v3 = vmax.f32 %v948_v28, 0.0  ;;  %v1046_v30 = vmax.f32 %v1044_v49, 0.0  ;;  %913 = vst.msk [vmem:[%s7082_s13 + $0x8] sm:$0xff] %vm330_vm0, %v911_v17  ;;  %v5635_v18 = vstv %s5539_s19  ;;  %s6045_s19 = sld [smem:[#allocation7 + $0x14]] }
 0x1f1   : > { %7194 = vst [vmem:[#allocation112_spill] sm:$0xff] %v5621_v52  ;;  %3158 = vst.msk [vmem:[%s7082_s13 + $0x118] sm:$0xff] %vm330_vm0, %v1014_v53  ;;  %v5638_v16 = vstv %s5556_s14  ;;  %v5641_v10 = vstv %s5558_s21  ;;  %v5652_v4 = vmul.f32 %v6898_v35, %v7178_v40  ;;  %v1284_v27 = vmul.f32 %v7197_v7, %v5632_v29  ;;  %v5685_v53 = vld [vmem:[#allocation2 + $0x8] sm:$0xff]  ;;  %s6058_s14 = sld [smem:[#allocation7 + $0x21]]  ;;  %s6060_s21 = sld [smem:[#allocation7 + $0xf]] }
 0x1f2   : > { %3151 = vst.msk [vmem:[%s7082_s13 + $0x18] sm:$0xff] %vm330_vm0, %v982_v63  ;;  %7195 = vst [vmem:[#allocation113_spill] sm:$0xff] %v5638_v16  ;;  %v1290_v46 = vmul.f32 %v5656_v22, %v5635_v18  ;;  %v1296_v58 = vmul.f32 %v5638_v16, %v7178_v40  ;;  %v1302_v61 = vmul.f32 %v5641_v10, %v7179_v57  ;;  %v5665_v28 = vstv %s5572_s16  ;;  %s6072_s16 = sld [smem:[#allocation7 + $0x2a]] }
 0x1f3   : > { %7196 = vst [vmem:[#allocation114_spill] sm:$0xff] %v5641_v10  ;;  %3140 = vst.msk [vmem:[%s7082_s13 + $0x108] sm:$0xff] %vm330_vm0, %v930_v37  ;;  %v5668_v11 = vstv %s5581_s17  ;;  %v5671_v49 = vstv %s5583_s22  ;;  %2883 = vrot.lane.b32.xlu1 %v5433_v50, %s7057_s18  ;;  %v1286_v40 = vadd.f32 %v1284_v27, %v5276_v39  ;;  %v1316_v17 = vmul.f32 %v7197_v7, %v5665_v28  ;;  %v5689_v37 = vld [vmem:[#allocation2 + $0x20] sm:$0xff]  ;;  %v7205_v10 = vld [vmem:[#allocation45_spill] sm:$0xff]  ;;  %s6074_s17 = sld [smem:[#allocation7 + $0x11]]  ;;  %s6093_s22 = sld [smem:[#allocation7 + $0x2f]] }
 0x1f4   : > { %3145 = vst.msk [vmem:[%s7082_s13 + $0x208] sm:$0xff] %vm330_vm0, %v950_v3  ;;  %3165 = vst.msk [vmem:[%s7082_s13 + $0x218] sm:$0xff] %vm330_vm0, %v1046_v30  ;;  %2885 = vrot.lane.b32.xlu0 %v5437_v0, %s7057_s18  ;;  %v1322_v57 = vmul.f32 %v5656_v22, %v5668_v11  ;;  %v5683_v63 = vstv %s5593_s23  ;;  %v1328_v50 = vmul.f32 %v5685_v53, %v5671_v49  ;;  %s6095_s23 = sld [smem:[#allocation7 + $0x18]] }
 0x1f5   : > { %7199 = vst [vmem:[#allocation106_spill] sm:$0xff] %v5671_v49  ;;  %7200 = vst [vmem:[#allocation120_spill] sm:$0xff] %v5683_v63  ;;  %v1334_v0 = vmul.f32 %v5689_v37, %v5683_v63  ;;  %v5694_v3 = vstv %s5601_s24  ;;  %v5697_v30 = vstv %s5603_s25  ;;  %v1292_v27 = vadd.f32 %v1290_v46, %v1286_v40  ;;  %s6110_s24 = sld [smem:[#allocation7 + $0x33]]  ;;  %s6112_s25 = sld [smem:[#allocation7 + $0x1a]] }
 0x1f6   : > { %7201 = vst [vmem:[#allocation62_spill] sm:$0xff] %v5697_v30  ;;  %v1318_v35 = vadd.f32 %v1316_v17, %v5327_v2  ;;  %v1348_v52 = vmul.f32 %v7197_v7, %v5694_v3  ;;  %v1354_v9 = vmul.f32 %v5656_v22, %v5697_v30  ;;  %v5705_v26 = vstv %s5610_s26  ;;  %s6126_s26 = sld [smem:[#allocation8]] }
 0x1f7   : > { %7202 = vst [vmem:[#allocation63_spill] sm:$0xff] %v5705_v26  ;;  %v1380_v23 = vmul.f32 %v7204_v44, %v7133_v32  ;;  %v1386_v55 = vmul.f32 %v7126_v41, %v5090_v21  ;;  %2707 = vrot.lane.b32.xlu1 %v5444_v42, %s7057_s18  ;;  %v1120_v7 = vstv %s5623_s15  ;;  %v1298_v46 = vadd.f32 %v1296_v58, %v1292_v27  ;;  %v7206_v58 = vld [vmem:[#allocation46_spill] sm:$0xff]  ;;  %s6202_s15 = sld [smem:[#allocation7 + $0x1b]] }
 0x1f8   : > { %2705 = vrot.lane.b32.xlu0 %v5449_v1, %s7057_s18  ;;  %v1324_v40 = vadd.f32 %v1322_v57, %v1318_v35  ;;  %v1350_v17 = vadd.f32 %v1348_v52, %v5364_v19  ;;  %v1360_v22 = vmul.f32 %v5685_v53, %v5705_v26  ;;  %v1366_v63 = vmul.f32 %v5689_v37, %v5708_v43 }
 0x1f9   : > { %v1382_v49 = vadd.f32 %v1380_v23, %v5276_v39  ;;  %v1436_v54 = vmul.f32 %v7205_v10, %v7133_v32  ;;  %v1304_v42 = vadd.f32 %v1302_v61, %v1298_v46  ;;  %v1442_v1 = vmul.f32 %v7129_v62, %v5090_v21  ;;  %v5744_v46 = vld [vmem:[#allocation2 + $0x78] sm:$0xff] }
 0x1fa   : > { %v1330_v5 = vadd.f32 %v1328_v50, %v1324_v40  ;;  %v1356_v16 = vadd.f32 %v1354_v9, %v1350_v17  ;;  %v1492_v57 = vmul.f32 %v7206_v58, %v7133_v32  ;;  %v1498_v27 = vmul.f32 %v7130_v38, %v5090_v21  ;;  %v5738_v50 = vld [vmem:[#allocation2 + $0x60] sm:$0xff]  ;;  %v7208_v40 = vld [vmem:[#allocation76_spill] sm:$0xff] }
 0x1fb   : > { %v1388_v35 = vadd.f32 %v1386_v55, %v1382_v49  ;;  %v1438_v52 = vadd.f32 %v1436_v54, %v5327_v2  ;;  %2803 = vrot.lane.b32.xlu1 %v5453_v33, %s7057_s18  ;;  %v1306_v23 = vmax.f32 %v1304_v42, 0.0  ;;  %v1283_v55 = vmul.f32 %v5738_v50, %v5632_v29  ;;  %v7207_v54 = vld [vmem:[#allocation75_spill] sm:$0xff]  ;;  %v7209_v42 = vld [vmem:[#allocation78_spill] sm:$0xff] }
 0x1fc   : > { %2801 = vrot.lane.b32.xlu0 %v5462_v6, %s7057_s18  ;;  %v1336_v9 = vadd.f32 %v1334_v0, %v1330_v5  ;;  %v1362_v61 = vadd.f32 %v1360_v22, %v1356_v16  ;;  %v1494_v21 = vadd.f32 %v1492_v57, %v5364_v19  ;;  %v1289_v33 = vmul.f32 %v5744_v46, %v5635_v18 }
 0x1fd   : > { %v1394_v49 = vadd.f32 %v7207_v54, %v1388_v35  ;;  %v1444_v32 = vadd.f32 %v1442_v1, %v1438_v52  ;;  %3205 = vst.msk [vmem:[%s7082_s13 + $0x48] sm:$0xff] %vm330_vm0, %v1306_v23  ;;  %v1285_v16 = vadd.f32 %v1283_v55, %v5276_v39  ;;  %v1315_v22 = vmul.f32 %v5738_v50, %v5665_v28  ;;  %v7211_v23 = vld [vmem:[#allocation80_spill] sm:$0xff] }
 0x1fe   : > { %v1338_v6 = vmax.f32 %v1336_v9, 0.0  ;;  %v1368_v5 = vadd.f32 %v1366_v63, %v1362_v61  ;;  %v5755_v0 = vmul.f32 %v7163_v47, %v5159_v8  ;;  %v1500_v35 = vadd.f32 %v1498_v27, %v1494_v21  ;;  %v7210_v27 = vld [vmem:[#allocation98_spill] sm:$0xff]  ;;  %v7213_v21 = vld [vmem:[#allocation128_spill] sm:$0xff] }
 0x1ff   : > { %v1400_v17 = vadd.f32 %v7208_v40, %v1394_v49  ;;  %v1450_v1 = vadd.f32 %v7209_v42, %v1444_v32  ;;  %2899 = vrot.lane.b32.xlu1 %v5466_v51, %s7057_s18  ;;  %v5765_v63 = vadd.f32 %v5652_v4, %v5276_v39  ;;  %v5770_v52 = vmul.f32 %v5689_v37, %v1120_v7  ;;  %v7216_v42 = vld [vmem:[#allocation79_spill] sm:$0xff] }
 0x200   : > { %2897 = vrot.lane.b32.xlu0 %v5470_v24, %s7057_s18  ;;  %3212 = vst.msk [vmem:[%s7082_s13 + $0x148] sm:$0xff] %vm330_vm0, %v1338_v6  ;;  %v1370_v47 = vmax.f32 %v1368_v5, 0.0  ;;  %v5776_v57 = vmul.f32 %v5744_v46, %v5668_v11  ;;  %v7212_v24 = vld [vmem:[#allocation81_spill] sm:$0xff]  ;;  %v5781_v55 = vadd.f32 %v1289_v33, %v1285_v16  ;;  %v1317_v4 = vadd.f32 %v1315_v22, %v5327_v2  ;;  %v7214_v5 = vld [vmem:[#allocation102_spill] sm:$0xff] }
 0x201   : > { %v1406_v51 = vadd.f32 %v7210_v27, %v1400_v17  ;;  %v1456_v9 = vadd.f32 %v7211_v23, %v1450_v1  ;;  %v1506_v61 = vadd.f32 %v7212_v24, %v1500_v35  ;;  %v1347_v54 = vmul.f32 %v5738_v50, %v5694_v3  ;;  %v7215_v17 = vld [vmem:[#allocation82_spill] sm:$0xff]  ;;  %v7217_v35 = vld [vmem:[#allocation129_spill] sm:$0xff]  ;;  %v7218_v27 = vld [vmem:[#allocation104_spill] sm:$0xff] }
 0x202   : > { %3219 = vst.msk [vmem:[%s7082_s13 + $0x248] sm:$0xff] %vm330_vm0, %v1370_v47  ;;  %v1379_v49 = vmul.f32 %v7204_v44, %v7157_v25  ;;  %v1385_v32 = vmul.f32 %v7126_v41, %v5159_v8  ;;  %v1435_v16 = vmul.f32 %v7205_v10, %v7157_v25  ;;  %v1353_v44 = vmul.f32 %v5744_v46, %v5697_v30 }
 0x203   : > { %v1412_v6 = vadd.f32 %v7213_v21, %v1406_v51  ;;  %v1462_v40 = vadd.f32 %v7214_v5, %v1456_v9  ;;  %v1512_v33 = vadd.f32 %v7215_v17, %v1506_v61  ;;  %1797 = vrot.lane.b32.xlu1 %v5474_v45, %s7057_s18  ;;  %v1441_v22 = vmul.f32 %v7129_v62, %v5159_v8  ;;  %v5814_v9 = vld [vmem:[#allocation2] sm:$0xff]  ;;  %v7220_v61 = vld [vmem:[#allocation83_spill] sm:$0xff]  ;;  %v7221_v21 = vld [vmem:[#allocation84_spill] sm:$0xff] }
 0x204   : > { %1795 = vrot.lane.b32.xlu0 %v5478_v31, %s7057_s18  ;;  %v1381_v41 = vadd.f32 %v1379_v49, %v5276_v39  ;;  %v1437_v51 = vadd.f32 %v1435_v16, %v5327_v2  ;;  %v1491_v31 = vmul.f32 %v7206_v58, %v7157_v25  ;;  %v1497_v23 = vmul.f32 %v7130_v38, %v5159_v8  ;;  %v7222_v8 = vld [vmem:[#allocation85_spill] sm:$0xff]  ;;  %v7223_v17 = vld [vmem:[#allocation87_spill] sm:$0xff]  ;;  %v7224_v16 = vld [vmem:[#allocation88_spill] sm:$0xff] }
 0x205   : > { %v1418_v1 = vadd.f32 %v7216_v42, %v1412_v6  ;;  %v1468_v47 = vadd.f32 %v7217_v35, %v1462_v40  ;;  %v1518_v10 = vadd.f32 %v7218_v27, %v1512_v33  ;;  %v7219_v24 = vstv %s5361_s27  ;;  %v7226_v42 = vld [vmem:[#allocation89_spill] sm:$0xff]  ;;  %s5999_s27 = sld [smem:[#allocation7 + $0x30]] }
 0x206   : > { %v1387_v45 = vadd.f32 %v1385_v32, %v1381_v41  ;;  %v900_v62 = vmul.f32 %v5814_v9, %v7219_v24  ;;  %v1443_v32 = vadd.f32 %v1441_v22, %v1437_v51  ;;  %v1493_v25 = vadd.f32 %v1491_v31, %v5364_v19  ;;  %v7225_v41 = vld [vmem:[#allocation90_spill] sm:$0xff]  ;;  %v5833_v35 = vld [vmem:[#allocation2 + $0x18] sm:$0xff] }
 0x207   : > { %v1424_v49 = vadd.f32 %v7220_v61, %v1418_v1  ;;  %v1474_v6 = vadd.f32 %v7221_v21, %v1468_v47  ;;  %v1524_v5 = vadd.f32 %v5245_v12, %v1518_v10  ;;  %1893 = vrot.lane.b32.xlu1 %v5486_v48, %s7057_s18  ;;  %7227 = vst [vmem:[#allocation130_spill] sm:$0xff] %v5833_v35  ;;  %v7229_v27 = vstv %s5378_s29  ;;  %v7231_v24 = vld [vmem:[#allocation93_spill] sm:$0xff]  ;;  %v7233_v21 = vld [vmem:[#allocation94_spill] sm:$0xff]  ;;  %s6010_s29 = sld [smem:[#allocation7 + $0x35]] }
 0x208   : > { %1891 = vrot.lane.b32.xlu0 %v5490_v14, %s7057_s18  ;;  %v1393_v38 = vadd.f32 %v7222_v8, %v1387_v45  ;;  %v902_v58 = vadd.f32 %v900_v62, %v5276_v39  ;;  %v1449_v22 = vadd.f32 %v7225_v41, %v1443_v32  ;;  %v1499_v1 = vadd.f32 %v1497_v23, %v1493_v25  ;;  %v7230_v45 = vld [vmem:[#allocation92_spill] sm:$0xff]  ;;  %v7234_v8 = vld [vmem:[#allocation110_spill] sm:$0xff] }
 0x209   : > { %v1426_v40 = vmax.f32 %v1424_v49, 0.0  ;;  %v1480_v33 = vadd.f32 %v7223_v17, %v1474_v6  ;;  %v1530_v12 = vadd.f32 %v7224_v16, %v1524_v5  ;;  %v7228_v14 = vstv %s5370_s28  ;;  %v7237_v16 = vld [vmem:[#allocation96_spill] sm:$0xff]  ;;  %s6001_s28 = sld [smem:[#allocation7 + $0x2c]] }
 0x20a   : > { %v1399_v48 = vadd.f32 %v7226_v42, %v1393_v38  ;;  %v906_v47 = vmul.f32 %v5833_v35, %v7228_v14  ;;  %v919_v10 = vmul.f32 %v5814_v9, %v7229_v27  ;;  %v1455_v62 = vadd.f32 %v7231_v24, %v1449_v22  ;;  %v7238_v42 = vld [vmem:[#allocation133_spill] sm:$0xff]  ;;  %v7240_v14 = vld [vmem:[#allocation116_spill] sm:$0xff]  ;;  %v7242_v27 = vld [vmem:[#allocation95_spill] sm:$0xff] }
 0x20b   : > { %3228 = vst.msk [vmem:[%s7082_s13 + $0x58] sm:$0xff] %vm330_vm0, %v1426_v40  ;;  %v1482_v51 = vmax.f32 %v1480_v33, 0.0  ;;  %v1536_v31 = vadd.f32 %v7230_v45, %v1530_v12  ;;  %v7232_v61 = vstv %s5386_s8  ;;  %1811 = vrot.lane.b32.xlu1 %v5494_v15, %s7057_s18  ;;  %v1349_v49 = vadd.f32 %v1347_v54, %v5364_v19  ;;  %v7236_v15 = vld [vmem:[#allocation115_spill] sm:$0xff]  ;;  %s6012_s8 = sld [smem:[#allocation7 + $0xb]] }
 0x20c   : > { %v925_v23 = vmul.f32 %v5833_v35, %v7232_v61  ;;  %1809 = vrot.lane.b32.xlu0 %v5498_v20, %s7057_s18  ;;  %v1505_v6 = vadd.f32 %v7233_v21, %v1499_v1  ;;  %v908_v5 = vadd.f32 %v906_v47, %v902_v58  ;;  %v1405_v38 = vadd.f32 %v7234_v8, %v1399_v48  ;;  %v7239_v48 = vld [vmem:[#allocation86_spill] sm:$0xff]  ;;  %v7245_v24 = vld [vmem:[#allocation99_spill] sm:$0xff]  ;;  %v7248_v8 = vld [vmem:[#allocation113_spill] sm:$0xff] }
 0x20d   : > { %3239 = vst.msk [vmem:[%s7082_s13 + $0x158] sm:$0xff] %vm330_vm0, %v1482_v51  ;;  %v1538_v32 = vmax.f32 %v1536_v31, 0.0  ;;  %v921_v25 = vadd.f32 %v919_v10, %v5327_v2  ;;  %v7235_v40 = vstv %s5429_s9  ;;  %v1461_v33 = vadd.f32 %v7236_v15, %v1455_v62  ;;  %v7244_v10 = vld [vmem:[#allocation97_spill] sm:$0xff]  ;;  %v7252_v15 = vld [vmem:[#allocation114_spill] sm:$0xff]  ;;  %s6024_s9 = sld [smem:[#allocation7 + $0x1d]] }
 0x20e   : > { %v939_v17 = vmul.f32 %v5814_v9, %v7235_v40  ;;  %v1511_v20 = vadd.f32 %v7237_v16, %v1505_v6  ;;  %v910_v12 = vmax.f32 %v908_v5, 0.0  ;;  %v945_v54 = vmul.f32 %v5833_v35, %v7108_v36  ;;  %v7241_v36 = vld [vmem:[#allocation134_spill] sm:$0xff]  ;;  %v7247_v6 = vld [vmem:[#allocation101_spill] sm:$0xff] }
 0x20f   : > { %3250 = vst.msk [vmem:[%s7082_s13 + $0x258] sm:$0xff] %vm330_vm0, %v1538_v32  ;;  %v1323_v58 = vadd.f32 %v5776_v57, %v1317_v4  ;;  %v927_v41 = vadd.f32 %v925_v23, %v921_v25  ;;  %v973_v1 = vadd.f32 %v7239_v48, %v7238_v42  ;;  %1907 = vrot.lane.b32.xlu1 %v5504_v60, %s7057_s18  ;;  %v7243_v4 = vld [vmem:[#allocation135_spill] sm:$0xff]  ;;  %v7246_v23 = vld [vmem:[#allocation100_spill] sm:$0xff]  ;;  %v7255_v48 = vld [vmem:[#allocation42_spill] sm:$0xff] }
 0x210   : > { %v941_v22 = vadd.f32 %v939_v17, %v5364_v19  ;;  %1905 = vrot.lane.b32.xlu0 %v5508_v56, %s7057_s18  ;;  %v1517_v47 = vadd.f32 %v7240_v14, %v1511_v20  ;;  %912 = vst.msk [vmem:[%s7082_s13] sm:$0xff] %vm330_vm0, %v910_v12  ;;  %v1005_v57 = vadd.f32 %v7242_v27, %v7241_v36  ;;  %v7251_v17 = vstv %s5518_s10  ;;  %v7253_v20 = vld [vmem:[#allocation106_spill] sm:$0xff]  ;;  %v7256_v14 = vld [vmem:[#allocation53_spill] sm:$0xff]  ;;  %s6026_s10 = sld [smem:[#allocation7 + $0x6]] }
 0x211   : > { %v1037_v51 = vadd.f32 %v7244_v10, %v7243_v4  ;;  %v1355_v45 = vadd.f32 %v1353_v44, %v1349_v49  ;;  %v929_v31 = vmax.f32 %v927_v41, 0.0  ;;  %v979_v62 = vadd.f32 %v7245_v24, %v973_v1  ;;  %v7257_v4 = vld [vmem:[#allocation59_spill] sm:$0xff]  ;;  %v7258_v10 = vld [vmem:[#allocation44_spill] sm:$0xff] }
 0x212   : > { %v947_v60 = vadd.f32 %v945_v54, %v941_v22  ;;  %v1411_v56 = vadd.f32 %v5250_v13, %v1405_v38  ;;  %v1467_v61 = vadd.f32 %v5260_v59, %v1461_v33  ;;  %v1011_v21 = vadd.f32 %v7246_v23, %v1005_v57  ;;  %v7249_v13 = vld [vmem:[#allocation40_spill] sm:$0xff]  ;;  %v7250_v59 = vld [vmem:[#allocation41_spill] sm:$0xff]  ;;  %v7260_v24 = vld [vmem:[#allocation67_spill] sm:$0xff] }
 0x213   : > { %v1043_v5 = vadd.f32 %v7247_v6, %v1037_v51  ;;  %v1523_v32 = vadd.f32 %v5265_v34, %v1517_v47  ;;  %3139 = vst.msk [vmem:[%s7082_s13 + $0x100] sm:$0xff] %vm330_vm0, %v929_v31  ;;  %v981_v49 = vmax.f32 %v979_v62, 0.0  ;;  %v1295_v25 = vmul.f32 %v5814_v9, %v7248_v8  ;;  %1661 = vrot.lane.b32.xlu1 %v7249_v13, %s7057_s18  ;;  %v7254_v54 = vld [vmem:[#allocation120_spill] sm:$0xff]  ;;  %v7259_v51 = vld [vmem:[#allocation49_spill] sm:$0xff] }
 0x214   : > { %v949_v44 = vmax.f32 %v947_v60, 0.0  ;;  %1659 = vrot.lane.b32.xlu0 %v7250_v59, %s7057_s18  ;;  %v1013_v38 = vmax.f32 %v1011_v21, 0.0  ;;  %v1115_v34 = vmul.f32 %v5814_v9, %v7251_v17  ;;  %v1301_v33 = vmul.f32 %v5833_v35, %v7252_v15  ;;  %v7263_v13 = vld [vmem:[#allocation60_spill] sm:$0xff] }
 0x215   : > { %v1045_v40 = vmax.f32 %v1043_v5, 0.0  ;;  %3150 = vst.msk [vmem:[%s7082_s13 + $0x10] sm:$0xff] %vm330_vm0, %v981_v49  ;;  %v1297_v16 = vadd.f32 %v1295_v25, %v5781_v55  ;;  %v1327_v12 = vmul.f32 %v5814_v9, %v7253_v20  ;;  %v1333_v41 = vmul.f32 %v5833_v35, %v7254_v54  ;;  %v5949_v5 = vld [vmem:[#allocation2 + $0x98] sm:$0xff]  ;;  %v7264_v59 = vld [vmem:[#allocation68_spill] sm:$0xff] }
 0x216   : > { %3144 = vst.msk [vmem:[%s7082_s13 + $0x200] sm:$0xff] %vm330_vm0, %v949_v44  ;;  %v1359_v22 = vmul.f32 %v5814_v9, %v5705_v26  ;;  %3157 = vst.msk [vmem:[%s7082_s13 + $0x110] sm:$0xff] %vm330_vm0, %v1013_v38  ;;  %v1121_v42 = vmul.f32 %v5833_v35, %v1120_v7  ;;  %v1365_v55 = vmul.f32 %v5833_v35, %v5708_v43  ;;  %v7262_v44 = vld [vmem:[#allocation55_spill] sm:$0xff] }
 0x217   : > { %3164 = vst.msk [vmem:[%s7082_s13 + $0x210] sm:$0xff] %vm330_vm0, %v1045_v40  ;;  %v1415_v1 = vmul.f32 %v5814_v9, %v7255_v48  ;;  %v1421_v47 = vmul.f32 %v5833_v35, %v7256_v14  ;;  %v1303_v36 = vadd.f32 %v1301_v33, %v1297_v16  ;;  %v1329_v27 = vadd.f32 %v1327_v12, %v1323_v58  ;;  %v7265_v33 = vld [vmem:[#allocation48_spill] sm:$0xff]  ;;  %v7266_v16 = vld [vmem:[#allocation50_spill] sm:$0xff]  ;;  %v1134_v12 = vpop.permute.xlu1 %1133 }
 0x218   : > { %v1361_v57 = vadd.f32 %v1359_v22, %v1355_v45  ;;  %v1471_v7 = vmul.f32 %v5814_v9, %v7257_v4  ;;  %1675 = vrot.lane.b32.xlu1 %v7258_v10, %s7057_s18  ;;  %1673 = vrot.lane.b32.xlu0 %v7259_v51, %s7057_s18  ;;  %v1117_v31 = vadd.f32 %v1115_v34, %v5276_v39  ;;  %v2270_v58 = vstv %s5882_s4  ;;  %s6382_s4 = sld [smem:[#allocation8 + $0x1]] }
 0x219   : > { %v1417_v60 = vadd.f32 %v1415_v1, %v1411_v56  ;;  %v1477_v62 = vmul.f32 %v5833_v35, %v7260_v24  ;;  %v1305_v45 = vmax.f32 %v1303_v36, 0.0  ;;  %v1335_v23 = vadd.f32 %v1333_v41, %v1329_v27  ;;  %7261 = vst [vmem:[#allocation26_spill] sm:$0xff] %v5949_v5  ;;  %v7267_v1 = vld [vmem:[#allocation29_spill] sm:$0xff]  ;;  %v7270_v24 = vld [vmem:[#allocation51_spill] sm:$0xff] }
 0x21a   : > { %v1367_v21 = vadd.f32 %v1365_v55, %v1361_v57  ;;  %v1473_v6 = vadd.f32 %v1471_v7, %v1467_v61  ;;  %v5953_v49 = vmul.f32 %v5949_v5, %v7262_v44  ;;  %v1527_v56 = vmul.f32 %v5814_v9, %v7263_v13  ;;  %v5970_v55 = vld [vmem:[#allocation2 + $0x90] sm:$0xff] }
 0x21b   : > { %v1423_v25 = vadd.f32 %v1421_v47, %v1417_v60  ;;  %v1533_v38 = vmul.f32 %v5833_v35, %v7264_v59  ;;  %v1124_v40 = vadd.f32 %v5770_v52, %v5765_v63  ;;  %3204 = vst.msk [vmem:[%s7082_s13 + $0x40] sm:$0xff] %vm330_vm0, %v1305_v45  ;;  %v1337_v61 = vmax.f32 %v1335_v23, 0.0  ;;  %v1132_v47 = vpop.permute.xlu0 %1131 }
 0x21c   : > { %v1369_v17 = vmax.f32 %v1367_v21, 0.0  ;;  %v1479_v34 = vadd.f32 %v1477_v62, %v1473_v6  ;;  %1757 = vrot.lane.b32.xlu1 %v7265_v33, %s7057_s18  ;;  %1755 = vrot.lane.b32.xlu0 %v7266_v16, %s7057_s18  ;;  %v1123_v41 = vadd.f32 %v1121_v42, %v1117_v31  ;;  %v1529_v63 = vadd.f32 %v1527_v56, %v1523_v32  ;;  %v7271_v62 = vld [vmem:[#allocation52_spill] sm:$0xff]  ;;  %v7274_v16 = vld [vmem:[#allocation35_spill] sm:$0xff] }
 0x21d   : > { %v1425_v22 = vmax.f32 %v1423_v25, 0.0  ;;  %v1170_v52 = vstv %s5903_s7  ;;  %v5974_v48 = vmul.f32 %v5970_v55, %v7262_v44  ;;  %v5978_v14 = vmul.f32 %v5949_v5, %v7267_v1  ;;  %3211 = vst.msk [vmem:[%s7082_s13 + $0x140] sm:$0xff] %vm330_vm0, %v1337_v61  ;;  %s6384_s7 = sld [smem:[#allocation7 + $0x9]] }
 0x21e   : > { %v5982_v42 = vmul.f32 %v5970_v55, %v7267_v1  ;;  %3218 = vst.msk [vmem:[%s7082_s13 + $0x240] sm:$0xff] %vm330_vm0, %v1369_v17  ;;  %v1481_v32 = vmax.f32 %v1479_v34, 0.0  ;;  %v1535_v36 = vadd.f32 %v1533_v38, %v1529_v63  ;;  %v5995_v27 = vstv %s5916_s6  ;;  %s6393_s6 = sld [smem:[#allocation7 + $0x24]] }
 0x21f   : > { %3227 = vst.msk [vmem:[%s7082_s13 + $0x50] sm:$0xff] %vm330_vm0, %v1425_v22  ;;  %7268 = vst [vmem:[#allocation30_spill] sm:$0xff] %v5995_v27  ;;  %v2172_v57 = vstv %s5931_s12  ;;  %v1176_v7 = vstv %s5933_s1  ;;  %v6003_v10 = vadd.f32 %v1134_v12, %v1124_v40  ;;  %v1172_v51 = vmul.f32 %v5685_v53, %v1170_v52  ;;  %v7275_v12 = vld [vmem:[#allocation109_spill] sm:$0xff]  ;;  %v6085_v22 = vld [vmem:[#allocation2 + $0xa8] sm:$0xff]  ;;  %s6415_s12 = sld [smem:[#allocation7 + $0x12]]  ;;  %s6448_s1 = sld [smem:[#allocation7 + $0x2d]] }
 0x220   : > { %3238 = vst.msk [vmem:[%s7082_s13 + $0x150] sm:$0xff] %vm330_vm0, %v1481_v32  ;;  %v1171_v31 = vmul.f32 %v5814_v9, %v1170_v52  ;;  %v2228_v60 = vstv %s5937_s5  ;;  %1851 = vrot.lane.b32.xlu1 %v7270_v24, %s7057_s18  ;;  %1769 = vrot.lane.b32.xlu0 %v7271_v62, %s7057_s18  ;;  %v6018_v45 = vadd.f32 %v1132_v47, %v1123_v41  ;;  %v1537_v23 = vmax.f32 %v1535_v36, 0.0  ;;  %v6080_v41 = vld [vmem:[#allocation2 + $0xb0] sm:$0xff]  ;;  %s6459_s5 = sld [smem:[#allocation8 + $0x2]] }
 0x221   : > { %7269 = vst [vmem:[#allocation119_spill] sm:$0xff] %v6003_v10  ;;  %v6021_v21 = vmul.f32 %v5949_v5, %v2270_v58  ;;  %v2284_v6 = vstv %s5947_s2  ;;  %v6029_v44 = vmul.f32 %v5970_v55, %v2270_v58  ;;  %v6033_v25 = vmul.f32 %v5949_v5, %v5995_v27  ;;  %7276 = vst [vmem:[#allocation28_spill] sm:$0xff] %v6080_v41  ;;  %v7289_v62 = vld [vmem:[#allocation112_spill] sm:$0xff]  ;;  %s3350_s2 = sld [smem:[#allocation7 + $0x3]] }
 0x222   : > { %7272 = vst [vmem:[#allocation27_spill] sm:$0xff] %v6018_v45  ;;  %v6037_v56 = vmul.f32 %v5970_v55, %v5995_v27  ;;  %v6041_v59 = vmul.f32 %v5949_v5, %v7257_v4  ;;  %3249 = vst.msk [vmem:[%s7082_s13 + $0x250] sm:$0xff] %vm330_vm0, %v1537_v23  ;;  %v6051_v58 = vmul.f32 %v5970_v55, %v7257_v4  ;;  %v6056_v61 = vstv %s5959_s3  ;;  %s3351_s3 = sld [smem:[#allocation7 + $0x1e]] }
 0x223   : > { %v1174_v38 = vadd.f32 %v1172_v51, %v5327_v2  ;;  %v1178_v40 = vmul.f32 %v5689_v37, %v1176_v7  ;;  %7273 = vst [vmem:[#allocation31_spill] sm:$0xff] %v6056_v61  ;;  %v6064_v17 = vmul.f32 %v5949_v5, %v7263_v13  ;;  %v6068_v34 = vmul.f32 %v5970_v55, %v7263_v13 }
 0x224   : > { %v1173_v4 = vadd.f32 %v1171_v31, %v5327_v2  ;;  %v1177_v33 = vmul.f32 %v5833_v35, %v1176_v7  ;;  %1771 = vrot.lane.b32.xlu1 %v7274_v16, %s7057_s18  ;;  %1853 = vrot.lane.b32.xlu0 %v7275_v12, %s7057_s18  ;;  %v6083_v13 = vmul.f32 %v6080_v41, %v2172_v57  ;;  %v6117_v7 = vstv %s5999_s27 }
 0x225   : > { %v6088_v63 = vmul.f32 %v6085_v22, %v2172_v57  ;;  %v6091_v52 = vmul.f32 %v6080_v41, %v2228_v60  ;;  %v6098_v1 = vmul.f32 %v6085_v22, %v2228_v60  ;;  %v6101_v47 = vmul.f32 %v6080_v41, %v2284_v6 }
 0x226   : > { %7277 = vst [vmem:[#allocation103_spill] sm:$0xff] %v6083_v13  ;;  %v6104_v32 = vmul.f32 %v6085_v22, %v2284_v6  ;;  %v6108_v36 = vmul.f32 %v5685_v53, %v6056_v61  ;;  %v6114_v57 = vadd.f32 %v1178_v40, %v1174_v38  ;;  %v6121_v51 = vmul.f32 %v5814_v9, %v6056_v61 }
 0x227   : > { %7278 = vst [vmem:[#allocation47_spill] sm:$0xff] %v6088_v63  ;;  %7279 = vst [vmem:[#allocation32_spill] sm:$0xff] %v6091_v52  ;;  %v6124_v31 = vstv %s5988_s30  ;;  %v6128_v53 = vadd.f32 %v1177_v33, %v1173_v4  ;;  %v6131_v60 = vstv %s6001_s28  ;;  %v6135_v24 = vmul.f32 %v5738_v50, %v7248_v8  ;;  %v6217_v52 = vld [vmem:[#allocation2 + $0x19] sm:$0xff]  ;;  %s3357_s30 = sld [smem:[#allocation7 + $0xc]] }
 0x228   : > { %7280 = vst [vmem:[#allocation117_spill] sm:$0xff] %v6098_v1  ;;  %7281 = vst [vmem:[#allocation122_spill] sm:$0xff] %v6101_v47  ;;  %v6139_v9 = vmul.f32 %v5744_v46, %v7252_v15  ;;  %1867 = vrot.lane.b32.xlu1 %v7289_v62, %s7057_s18  ;;  %1865 = vrot.lane.b32.xlu0 %v5755_v0, %s7057_s18  ;;  %v6146_v23 = vstv %s6010_s29  ;;  %v2359_v6 = vmul.f32 %v5738_v50, %v7253_v20  ;;  %v6204_v47 = vld [vmem:[#allocation2 + $0x1] sm:$0xff] }
 0x229   : > { %7282 = vst [vmem:[#allocation107_spill] sm:$0xff] %v6104_v32  ;;  %7283 = vst [vmem:[#allocation121_spill] sm:$0xff] %v6108_v36  ;;  %v6152_v38 = vmul.f32 %v5744_v46, %v7254_v54  ;;  %v2391_v40 = vmul.f32 %v5738_v50, %v5705_v26  ;;  %v6160_v0 = vmul.f32 %v5744_v46, %v5708_v43  ;;  %v6165_v16 = vstv %s6026_s10  ;;  %v7297_v26 = vld [vmem:[#allocation37_spill] sm:$0xff] }
 0x22a   : > { %7284 = vst [vmem:[#allocation111_spill] sm:$0xff] %v6114_v57  ;;  %7285 = vst [vmem:[#allocation54_spill] sm:$0xff] %v6121_v51  ;;  %v6168_v12 = vstv %s6058_s14  ;;  %v6172_v62 = vmul.f32 %v5738_v50, %v5995_v27  ;;  %v6176_v61 = vmul.f32 %v5744_v46, %v6124_v31  ;;  %v6181_v4 = vstv %s6060_s21 }
 0x22b   : > { %7286 = vst [vmem:[#allocation123_spill] sm:$0xff] %v6124_v31  ;;  %7287 = vst [vmem:[#allocation126_spill] sm:$0xff] %v6128_v53  ;;  %v6184_v33 = vstv %s6072_s16  ;;  %v6913_v45 = vstv %s6074_s17  ;;  %v6198_v53 = vmul.f32 %v5744_v46, %v6131_v60  ;;  %v6210_v1 = vstv %s6110_s24 }
 0x22c   : > { %7288 = vst [vmem:[#allocation127_spill] sm:$0xff] %v6131_v60  ;;  %7290 = vst [vmem:[#allocation136_spill] sm:$0xff] %v6146_v23  ;;  %2165 = vrot.lane.b32.xlu1 %v5953_v49, %s7057_s18  ;;  %2163 = vrot.lane.b32.xlu0 %v5974_v48, %s7057_s18  ;;  %v6194_v10 = vmul.f32 %v5738_v50, %v6913_v45  ;;  %v6207_v49 = vstv %s6095_s23  ;;  %v6215_v45 = vmul.f32 %v5744_v46, %v6146_v23 }
 0x22d   : > { %7291 = vst [vmem:[#allocation57_spill] sm:$0xff] %v6168_v12  ;;  %7292 = vst [vmem:[#allocation64_spill] sm:$0xff] %v6181_v4  ;;  %v6220_v57 = vstv %s6126_s26  ;;  %v2315_v32 = vmul.f32 %v5632_v29, %v6204_v47  ;;  %v2321_v27 = vmul.f32 %v5635_v18, %v6217_v52  ;;  %v2347_v60 = vmul.f32 %v5665_v28, %v6204_v47 }
 0x22e   : > { %7293 = vst [vmem:[#allocation65_spill] sm:$0xff] %v6184_v33  ;;  %7294 = vst [vmem:[#allocation108_spill] sm:$0xff] %v6215_v45  ;;  %v2353_v48 = vmul.f32 %v5668_v11, %v6217_v52  ;;  %v2379_v46 = vmul.f32 %v5694_v3, %v6204_v47  ;;  %v2385_v23 = vmul.f32 %v5697_v30, %v6217_v52  ;;  %v7295_v5 = vstv %s5990_s0 }
 0x22f   : > { %v2423_v41 = vmul.f32 %v7295_v5, %v6204_v47  ;;  %v6242_v31 = vstv %s6156_s20  ;;  %v2317_v43 = vadd.f32 %v2315_v32, %v5276_v39  ;;  %v2349_v63 = vadd.f32 %v2347_v60, %v5327_v2 }
 0x230   : > { %2221 = vrot.lane.b32.xlu1 %v5978_v14, %s7057_s18  ;;  %2219 = vrot.lane.b32.xlu0 %v5982_v42, %s7057_s18  ;;  %v7296_v13 = vstv %s6024_s9  ;;  %v2381_v36 = vadd.f32 %v2379_v46, %v5364_v19  ;;  %v2435_v14 = vmul.f32 %v5970_v55, %v6165_v16  ;;  %v2441_v42 = vmul.f32 %v6085_v22, %v6168_v12 }
 0x231   : > { %v2429_v51 = vmul.f32 %v7296_v13, %v6217_v52  ;;  %v2425_v5 = vadd.f32 %v2423_v41, %v7297_v26  ;;  %v2323_v35 = vadd.f32 %v2321_v27, %v2317_v43  ;;  %v2355_v45 = vadd.f32 %v2353_v48, %v2349_v63 }
 0x232   : > { %v7298_v32 = vstv %s6012_s8  ;;  %v7299_v30 = vstv %s6043_s11  ;;  %v2387_v54 = vadd.f32 %v2385_v23, %v2381_v36  ;;  %v2491_v26 = vmul.f32 %v5970_v55, %v6181_v4 }
 0x233   : > { %v2479_v60 = vmul.f32 %v7298_v32, %v6204_v47  ;;  %v2485_v13 = vmul.f32 %v7299_v30, %v6217_v52  ;;  %v2431_v46 = vadd.f32 %v2429_v51, %v2425_v5  ;;  %v2497_v41 = vmul.f32 %v6085_v22, %v6184_v33  ;;  %v7300_v30 = vld [vmem:[#allocation39_spill] sm:$0xff] }
 0x234   : > { %2277 = vrot.lane.b32.xlu1 %v6021_v21, %s7057_s18  ;;  %2275 = vrot.lane.b32.xlu0 %v6029_v44, %s7057_s18  ;;  %v6270_v43 = vstv %s6202_s15  ;;  %v2329_v27 = vadd.f32 %v6135_v24, %v2323_v35  ;;  %v2361_v63 = vadd.f32 %v2359_v6, %v2355_v45  ;;  %v2393_v51 = vadd.f32 %v2391_v40, %v2387_v54  ;;  %v7303_v54 = vld [vmem:[#allocation38_spill] sm:$0xff] }
 0x235   : > { %v2481_v36 = vadd.f32 %v2479_v60, %v7300_v30  ;;  %v2437_v23 = vadd.f32 %v2435_v14, %v2431_v46  ;;  %v7301_v48 = vstv %s6045_s19  ;;  %v7302_v32 = vstv %s6093_s22  ;;  %v6316_v30 = vld [vmem:[#allocation2 + $0x68] sm:$0xff] }
 0x236   : > { %v2535_v5 = vmul.f32 %v7301_v48, %v6204_v47  ;;  %v2541_v33 = vmul.f32 %v7302_v32, %v6217_v52  ;;  %v2335_v21 = vadd.f32 %v6139_v9, %v2329_v27  ;;  %v2367_v4 = vadd.f32 %v6152_v38, %v2361_v63 }
 0x237   : > { %v2487_v44 = vadd.f32 %v2485_v13, %v2481_v36  ;;  %v2547_v12 = vmul.f32 %v5970_v55, %v6207_v49  ;;  %v2399_v35 = vadd.f32 %v6160_v0, %v2393_v51  ;;  %v2443_v45 = vadd.f32 %v2441_v42, %v2437_v23  ;;  %v6297_v13 = vld [vmem:[#allocation2 + $0x9] sm:$0xff] }
 0x238   : > { %v2537_v24 = vadd.f32 %v2535_v5, %v7303_v54  ;;  %v2553_v6 = vmul.f32 %v6085_v22, %v6210_v1  ;;  %2733 = vrot.lane.b32.xlu1 %v6033_v25, %s7057_s18  ;;  %2731 = vrot.lane.b32.xlu0 %v6037_v56, %s7057_s18  ;;  %v2337_v9 = vmax.f32 %v2335_v21, 0.0  ;;  %v2369_v38 = vmax.f32 %v2367_v4, 0.0  ;;  %v6299_v25 = vld [vmem:[#allocation2 + $0x21] sm:$0xff]  ;;  %v7308_v21 = vld [vmem:[#allocation108_spill] sm:$0xff] }
 0x239   : > { %v2493_v55 = vadd.f32 %v2491_v26, %v2487_v44  ;;  %v2675_v40 = vmul.f32 %v6242_v31, %v6204_v47  ;;  %v2401_v0 = vmax.f32 %v2399_v35, 0.0  ;;  %v2449_v14 = vadd.f32 %v6172_v62, %v2443_v45 }
 0x23a   : > { %v2543_v42 = vadd.f32 %v2541_v33, %v2537_v24  ;;  %v2681_v60 = vmul.f32 %v6270_v43, %v6217_v52  ;;  %3374 = vst.msk [vmem:[%s7082_s13 + $0xc0] sm:$0xff] %vm330_vm0, %v2337_v9  ;;  %3381 = vst.msk [vmem:[%s7082_s13 + $0x1c0] sm:$0xff] %vm330_vm0, %v2369_v38  ;;  %v2316_v46 = vmul.f32 %v5632_v29, %v6297_v13  ;;  %v7304_v62 = vstv %s6112_s25  ;;  %v7311_v9 = vld [vmem:[#allocation63_spill] sm:$0xff] }
 0x23b   : > { %v2499_v56 = vadd.f32 %v2497_v41, %v2493_v55  ;;  %v2677_v4 = vadd.f32 %v2675_v40, %v6220_v57  ;;  %v2322_v33 = vmul.f32 %v5635_v18, %v6299_v25  ;;  %v2559_v26 = vmul.f32 %v5738_v50, %v7304_v62  ;;  %3388 = vst.msk [vmem:[%s7082_s13 + $0x2c0] sm:$0xff] %vm330_vm0, %v2401_v0  ;;  %v7313_v0 = vld [vmem:[#allocation121_spill] sm:$0xff] }
 0x23c   : > { %v2455_v27 = vadd.f32 %v6176_v61, %v2449_v14  ;;  %v2549_v63 = vadd.f32 %v2547_v12, %v2543_v42  ;;  %v2328_v41 = vmul.f32 %v6316_v30, %v7248_v8  ;;  %2829 = vrot.lane.b32.xlu1 %v6041_v59, %s7057_s18  ;;  %2827 = vrot.lane.b32.xlu0 %v6051_v58, %s7057_s18  ;;  %v7309_v35 = vstv %s5990_s0  ;;  %v7314_v42 = vld [vmem:[#allocation54_spill] sm:$0xff]  ;;  %s3358_s0 = sld [smem:[#allocation7 + $0x27]] }
 0x23d   : > { %v2505_v29 = vadd.f32 %v6194_v10, %v2499_v56  ;;  %v6325_v18 = vadd.f32 %v2681_v60, %v2677_v4  ;;  %v2318_v50 = vadd.f32 %v2316_v46, %v5276_v39  ;;  %v2348_v36 = vmul.f32 %v5665_v28, %v6297_v13  ;;  %v7305_v10 = vld [vmem:[#allocation58_spill] sm:$0xff]  ;;  %v7315_v46 = vld [vmem:[#allocation103_spill] sm:$0xff] }
 0x23e   : > { %v2457_v61 = vmax.f32 %v2455_v27, 0.0  ;;  %v2555_v12 = vadd.f32 %v2553_v6, %v2549_v63  ;;  %v2354_v8 = vmul.f32 %v5668_v11, %v6299_v25  ;;  %v6334_v59 = vmul.f32 %v5689_v37, %v6117_v7  ;;  %v7317_v27 = vld [vmem:[#allocation118_spill] sm:$0xff]  ;;  %v7318_v63 = vld [vmem:[#allocation33_spill] sm:$0xff] }
 0x23f   : > { %v2511_v58 = vadd.f32 %v6198_v53, %v2505_v29  ;;  %v2324_v51 = vadd.f32 %v2322_v33, %v2318_v50  ;;  %v2334_v23 = vmul.f32 %v7305_v10, %v7252_v15  ;;  %v2350_v48 = vadd.f32 %v2348_v36, %v5327_v2  ;;  %v7306_v53 = vld [vmem:[#allocation120_spill] sm:$0xff]  ;;  %v7307_v2 = vld [vmem:[#allocation62_spill] sm:$0xff]  ;;  %v7316_v33 = vld [vmem:[#allocation47_spill] sm:$0xff] }
 0x240   : > { %3397 = vst.msk [vmem:[%s7082_s13 + $0xd0] sm:$0xff] %vm330_vm0, %v2457_v61  ;;  %v2561_v39 = vadd.f32 %v2559_v26, %v2555_v12  ;;  %v2360_v28 = vmul.f32 %v6316_v30, %v7253_v20  ;;  %v2380_v11 = vmul.f32 %v5694_v3, %v6297_v13  ;;  %2925 = vrot.lane.b32.xlu1 %v6064_v17, %s7057_s18  ;;  %v6359_v45 = vpop.permute.xlu1 %1147  ;;  %v6361_v54 = vpop.permute.xlu0 %1145  ;;  %v7312_v55 = vstv %s6024_s9  ;;  %v7319_v29 = vld [vmem:[#allocation123_spill] sm:$0xff]  ;;  %v7320_v50 = vld [vmem:[#allocation28_spill] sm:$0xff]  ;;  %v7321_v36 = vld [vmem:[#allocation26_spill] sm:$0xff] }
 0x241   : > { %2923 = vrot.lane.b32.xlu0 %v6068_v34, %s7057_s18  ;;  %v2513_v37 = vmax.f32 %v2511_v58, 0.0  ;;  %v2330_v15 = vadd.f32 %v2328_v41, %v2324_v51  ;;  %v2366_v5 = vmul.f32 %v7305_v10, %v7306_v53  ;;  %v2386_v32 = vmul.f32 %v7307_v2, %v6299_v25  ;;  %v7310_v34 = vld [vmem:[#allocation130_spill] sm:$0xff]  ;;  %v7322_v58 = vld [vmem:[#allocation57_spill] sm:$0xff]  ;;  %v7325_v2 = vld [vmem:[#allocation127_spill] sm:$0xff] }
 0x242   : > { %v2567_v20 = vadd.f32 %v7308_v21, %v2561_v39  ;;  %v2356_v44 = vadd.f32 %v2354_v8, %v2350_v48  ;;  %v2382_v3 = vadd.f32 %v2380_v11, %v5364_v19  ;;  %v2424_v17 = vmul.f32 %v7309_v35, %v6297_v13  ;;  %v7328_v35 = vld [vmem:[#allocation117_spill] sm:$0xff] }
 0x243   : > { %v6365_v24 = vmul.f32 %v7310_v34, %v6117_v7  ;;  %3408 = vst.msk [vmem:[%s7082_s13 + $0x1d0] sm:$0xff] %vm330_vm0, %v2513_v37  ;;  %v2336_v6 = vadd.f32 %v2334_v23, %v2330_v15  ;;  %v2392_v38 = vmul.f32 %v6316_v30, %v7311_v9  ;;  %v2430_v40 = vmul.f32 %v7312_v55, %v6299_v25  ;;  %v7330_v55 = vld [vmem:[#allocation64_spill] sm:$0xff] }
 0x244   : > { %v6376_v14 = vadd.f32 %v7313_v0, %v5364_v19  ;;  %v6380_v60 = vadd.f32 %v7314_v42, %v5364_v19  ;;  %v2569_v56 = vmax.f32 %v2567_v20, 0.0  ;;  %v2362_v4 = vadd.f32 %v2360_v28, %v2356_v44  ;;  %2179 = vrot.lane.b32.xlu1 %v7315_v46, %s7057_s18  ;;  %v6403_v23 = vpop.permute.xlu1 %1189  ;;  %v6405_v39 = vpop.permute.xlu0 %1187  ;;  %v7326_v20 = vld [vmem:[#allocation30_spill] sm:$0xff]  ;;  %v7331_v0 = vld [vmem:[#allocation65_spill] sm:$0xff] }
 0x245   : > { %2177 = vrot.lane.b32.xlu0 %v7316_v33, %s7057_s18  ;;  %v2338_v62 = vmax.f32 %v2336_v6, 0.0  ;;  %v2388_v26 = vadd.f32 %v2386_v32, %v2382_v3  ;;  %v2398_v19 = vmul.f32 %v7305_v10, %v7317_v27  ;;  %v2426_v41 = vadd.f32 %v2424_v17, %v7318_v63  ;;  %v7327_v3 = vld [vmem:[#allocation32_spill] sm:$0xff]  ;;  %v7329_v6 = vld [vmem:[#allocation34_spill] sm:$0xff] }
 0x246   : > { %v2742_v61 = vmul.f32 %v7320_v50, %v7319_v29  ;;  %3419 = vst.msk [vmem:[%s7082_s13 + $0x2d0] sm:$0xff] %vm330_vm0, %v2569_v56  ;;  %v2368_v12 = vadd.f32 %v2366_v5, %v2362_v4  ;;  %v2436_v8 = vmul.f32 %v7321_v36, %v6165_v16  ;;  %v2442_v51 = vmul.f32 %v7320_v50, %v7322_v58 }
 0x247   : > { %3375 = vst.msk [vmem:[%s7082_s13 + $0xc8] sm:$0xff] %vm330_vm0, %v2338_v62  ;;  %v2394_v48 = vadd.f32 %v2392_v38, %v2388_v26  ;;  %v2432_v28 = vadd.f32 %v2430_v40, %v2426_v41  ;;  %v7323_v11 = vstv %s6012_s8  ;;  %v7324_v15 = vstv %s6043_s11 }
 0x248   : > { %v2480_v37 = vmul.f32 %v7323_v11, %v6297_v13  ;;  %v2486_v53 = vmul.f32 %v7324_v15, %v6299_v25  ;;  %v2741_v5 = vmul.f32 %v6085_v22, %v7319_v29  ;;  %v6421_v32 = vmul.f32 %v7320_v50, %v7325_v2  ;;  %2235 = vrot.lane.b32.xlu1 %v7327_v3, %s7057_s18  ;;  %v6441_v46 = vpop.permute.xlu1 %1203  ;;  %v6443_v33 = vpop.permute.xlu0 %1201 }
 0x249   : > { %v2370_v21 = vmax.f32 %v2368_v12, 0.0  ;;  %v2448_v44 = vmul.f32 %v6316_v30, %v7326_v20  ;;  %2233 = vrot.lane.b32.xlu0 %v7328_v35, %s7057_s18  ;;  %v2400_v17 = vadd.f32 %v2398_v19, %v2394_v48  ;;  %v2438_v34 = vadd.f32 %v2436_v8, %v2432_v28  ;;  %v7335_v28 = vld [vmem:[#allocation122_spill] sm:$0xff] }
 0x24a   : > { %v2482_v9 = vadd.f32 %v2480_v37, %v7329_v6  ;;  %v2454_v38 = vmul.f32 %v7305_v10, %v7319_v29  ;;  %v2492_v40 = vmul.f32 %v7321_v36, %v7330_v55  ;;  %v2498_v42 = vmul.f32 %v7320_v50, %v7331_v0  ;;  %v7334_v29 = vld [vmem:[#allocation36_spill] sm:$0xff] }
 0x24b   : > { %3382 = vst.msk [vmem:[%s7082_s13 + $0x1c8] sm:$0xff] %vm330_vm0, %v2370_v21  ;;  %v7332_v56 = vstv %s6045_s19  ;;  %v2402_v62 = vmax.f32 %v2400_v17, 0.0  ;;  %v2444_v26 = vadd.f32 %v2442_v51, %v2438_v34  ;;  %v7333_v19 = vstv %s6093_s22  ;;  %v7336_v51 = vld [vmem:[#allocation107_spill] sm:$0xff] }
 0x24c   : > { %v2536_v4 = vmul.f32 %v7332_v56, %v6297_v13  ;;  %v2488_v27 = vadd.f32 %v2486_v53, %v2482_v9  ;;  %v2542_v63 = vmul.f32 %v7333_v19, %v6299_v25  ;;  %v2837_v41 = vmul.f32 %v6085_v22, %v7325_v2  ;;  %2291 = vrot.lane.b32.xlu1 %v7335_v28, %s7057_s18  ;;  %v6479_v34 = vpop.permute.xlu1 %1245  ;;  %v6481_v6 = vpop.permute.xlu0 %1243 }
 0x24d   : > { %v6454_v8 = vstv %s6382_s4  ;;  %v6457_v48 = vstv %s6384_s7  ;;  %2289 = vrot.lane.b32.xlu0 %v7336_v51, %s7057_s18  ;;  %3389 = vst.msk [vmem:[%s7082_s13 + $0x2c8] sm:$0xff] %vm330_vm0, %v2402_v62  ;;  %v2450_v11 = vadd.f32 %v2448_v44, %v2444_v26  ;;  %v2510_v20 = vmul.f32 %v7305_v10, %v7325_v2 }
 0x24e   : > { %v2538_v12 = vadd.f32 %v2536_v4, %v7334_v29  ;;  %v2494_v37 = vadd.f32 %v2492_v40, %v2488_v27  ;;  %v7337_v15 = vstv %s6074_s17  ;;  %v6471_v21 = vstv %s6393_s6 }
 0x24f   : > { %v2504_v53 = vmul.f32 %v6316_v30, %v7337_v15  ;;  %v2548_v35 = vmul.f32 %v7321_v36, %v6207_v49  ;;  %v2554_v17 = vmul.f32 %v7320_v50, %v6210_v1  ;;  %v2456_v44 = vadd.f32 %v2454_v38, %v2450_v11  ;;  %v7339_v36 = vld [vmem:[#allocation136_spill] sm:$0xff] }
 0x250   : > { %v2544_v3 = vadd.f32 %v2542_v63, %v2538_v12  ;;  %v2500_v9 = vadd.f32 %v2498_v42, %v2494_v37  ;;  %v2676_v40 = vmul.f32 %v6242_v31, %v6297_v13  ;;  %v6486_v56 = vstv %s6415_s12  ;;  %2747 = vrot.lane.b32.xlu1 %v2742_v61, %s7057_s18  ;;  %v1260_v28 = vpop.permute.xlu1 %1259 }
 0x251   : > { %v7338_v2 = vstv %s6112_s25  ;;  %v2566_v26 = vmul.f32 %v7305_v10, %v7339_v36  ;;  %v2682_v27 = vmul.f32 %v6270_v43, %v6299_v25  ;;  %2745 = vrot.lane.b32.xlu0 %v2741_v5, %s7057_s18  ;;  %v2458_v38 = vmax.f32 %v2456_v44, 0.0  ;;  %v1258_v5 = vpop.permute.xlu0 %1257 }
 0x252   : > { %v2550_v4 = vadd.f32 %v2548_v35, %v2544_v3  ;;  %v2560_v62 = vmul.f32 %v6316_v30, %v7338_v2  ;;  %v2506_v42 = vadd.f32 %v2504_v53, %v2500_v9  ;;  %v2678_v19 = vadd.f32 %v2676_v40, %v6220_v57 }
 0x253   : > { %v2771_v63 = vmul.f32 %v6457_v48, %v6204_v47  ;;  %v2777_v10 = vmul.f32 %v6471_v21, %v6217_v52  ;;  %v2772_v12 = vmul.f32 %v6457_v48, %v6297_v13  ;;  %v2778_v61 = vmul.f32 %v6471_v21, %v6299_v25  ;;  %3398 = vst.msk [vmem:[%s7082_s13 + $0xd8] sm:$0xff] %vm330_vm0, %v2458_v38  ;;  %v7341_v38 = vld [vmem:[#allocation27_spill] sm:$0xff] }
 0x254   : > { %v2556_v29 = vadd.f32 %v2554_v17, %v2550_v4  ;;  %v2512_v51 = vadd.f32 %v2510_v20, %v2506_v42  ;;  %v2684_v11 = vadd.f32 %v2682_v27, %v2678_v19  ;;  %v6510_v15 = vstv %s6448_s1  ;;  %2843 = vrot.lane.b32.xlu1 %v6421_v32, %s7057_s18 }
 0x255   : > { %v2773_v37 = vadd.f32 %v2771_v63, %v6454_v8  ;;  %v2934_v53 = vmul.f32 %v7320_v50, %v7339_v36  ;;  %v2774_v35 = vadd.f32 %v2772_v12, %v6454_v8  ;;  %v6516_v17 = vstv %s6459_s5  ;;  %2841 = vrot.lane.b32.xlu0 %v2837_v41, %s7057_s18  ;;  %v7340_v50 = vld [vmem:[#allocation119_spill] sm:$0xff]  ;;  %v6531_v41 = vpop.permute.xlu1 %1701  ;;  %v6533_v42 = vpop.permute.xlu0 %1699  ;;  %v7343_v63 = vld [vmem:[#allocation126_spill] sm:$0xff] }
 0x256   : > { %v2562_v3 = vadd.f32 %v2560_v62, %v2556_v29  ;;  %v2514_v20 = vmax.f32 %v2512_v51, 0.0  ;;  %v2867_v9 = vmul.f32 %v6486_v56, %v6204_v47  ;;  %v2873_v40 = vmul.f32 %v6510_v15, %v6217_v52 }
 0x257   : > { %v2779_v44 = vadd.f32 %v2777_v10, %v2773_v37  ;;  %v1152_v4 = vadd.f32 %v6359_v45, %v7340_v50  ;;  %v2933_v2 = vmul.f32 %v6085_v22, %v7339_v36  ;;  %v2780_v27 = vadd.f32 %v2778_v61, %v2774_v35  ;;  %v7342_v45 = vld [vmem:[#allocation111_spill] sm:$0xff] }
 0x258   : > { %v2568_v62 = vadd.f32 %v2566_v26, %v2562_v3  ;;  %v1151_v32 = vadd.f32 %v6361_v54, %v7341_v38  ;;  %3409 = vst.msk [vmem:[%s7082_s13 + $0x1d8] sm:$0xff] %vm330_vm0, %v2514_v20  ;;  %v2869_v52 = vadd.f32 %v2867_v9, %v6516_v17  ;;  %v2868_v47 = vmul.f32 %v6486_v56, %v6297_v13 }
 0x259   : > { %v2874_v22 = vmul.f32 %v6510_v15, %v6299_v25  ;;  %v1194_v36 = vadd.f32 %v6403_v23, %v7342_v45  ;;  %v1236_v54 = vadd.f32 %v6334_v59, %v6376_v14  ;;  %v1235_v26 = vadd.f32 %v6365_v24, %v6380_v60  ;;  %2939 = vrot.lane.b32.xlu1 %v2934_v53, %s7057_s18  ;;  %v6557_v24 = vpop.permute.xlu1 %1715  ;;  %v6559_v60 = vpop.permute.xlu0 %1713  ;;  %v6580_v45 = vld [vmem:[#allocation2 + $0x78] sm:$0xff] }
 0x25a   : > { %v2570_v19 = vmax.f32 %v2568_v62, 0.0  ;;  %v1193_v29 = vadd.f32 %v6405_v39, %v7343_v63  ;;  %2937 = vrot.lane.b32.xlu0 %v2933_v2, %s7057_s18  ;;  %v2875_v13 = vadd.f32 %v2873_v40, %v2869_v52  ;;  %v2870_v25 = vadd.f32 %v2868_v47, %v6516_v17  ;;  %s7344_s18 = smov 127   ;;  %v6576_v47 = vld [vmem:[#allocation2 + $0x80] sm:$0xff] }
 0x25b   : > { %v1154_v10 = vmax.f32 %v1152_v4, 0.0  ;;  %v1153_v23 = vmax.f32 %v1151_v32, 0.0  ;;  %v1208_v59 = vadd.f32 %v6441_v46, %v1194_v36  ;;  %v1250_v12 = vadd.f32 %v6479_v34, %v1236_v54 }
 0x25c   : > { %3420 = vst.msk [vmem:[%s7082_s13 + $0x2d8] sm:$0xff] %vm330_vm0, %v2570_v19  ;;  %v1207_v14 = vadd.f32 %v6443_v33, %v1193_v29  ;;  %v2876_v39 = vadd.f32 %v2874_v22, %v2870_v25  ;;  %v1249_v61 = vadd.f32 %v6481_v6, %v1235_v26  ;;  %v2722_v22 = vmul.f32 %v6576_v47, %v7322_v58 }
 0x25d   : > { %1159 = vrot.lane.b32.xlu1 %v1154_v10, %s7344_s18  ;;  %v1210_v51 = vmax.f32 %v1208_v59, 0.0  ;;  %v1264_v53 = vadd.f32 %v1260_v28, %v1250_v12  ;;  %v2692_v46 = vpop.permute.xlu1 %2691  ;;  %v2694_v35 = vpop.permute.xlu0 %2693  ;;  %v2721_v36 = vmul.f32 %v6580_v45, %v7322_v58  ;;  %v2812_v19 = vmul.f32 %v6316_v30, %v7330_v55 }
 0x25e   : > { %1157 = vrot.lane.b32.xlu0 %v1153_v23, %s7344_s18  ;;  %v1209_v37 = vmax.f32 %v1207_v14, 0.0  ;;  %v1263_v3 = vadd.f32 %v1258_v5, %v1249_v61  ;;  %v2697_v33 = vadd.f32 %v2692_v46, %v6325_v18  ;;  %v2698_v20 = vadd.f32 %v2694_v35, %v2684_v11  ;;  %v6572_v11 = vld [vmem:[#allocation2 + $0x60] sm:$0xff] }
 0x25f   : > { %v1266_v34 = vmax.f32 %v1264_v53, 0.0  ;;  %v2716_v18 = vmul.f32 %v6316_v30, %v6165_v16  ;;  %v2715_v38 = vmul.f32 %v6572_v11, %v6165_v16  ;;  %v2811_v63 = vmul.f32 %v6572_v11, %v7330_v55 }
 0x260   : > { %v1265_v9 = vmax.f32 %v1263_v3, 0.0  ;;  %v2818_v25 = vmul.f32 %v6576_v47, %v7331_v0  ;;  %v2817_v10 = vmul.f32 %v6580_v45, %v7331_v0  ;;  %v2914_v46 = vmul.f32 %v6576_v47, %v6210_v1 }
 0x261   : > { %1215 = vrot.lane.b32.xlu1 %v1210_v51, %s7344_s18  ;;  %v2788_v6 = vpop.permute.xlu1 %2787  ;;  %v2790_v40 = vpop.permute.xlu0 %2789  ;;  %v2908_v51 = vmul.f32 %v6316_v30, %v6207_v49  ;;  %v2913_v35 = vmul.f32 %v6580_v45, %v6210_v1 }
 0x262   : > { %1213 = vrot.lane.b32.xlu0 %v1209_v37, %s7344_s18  ;;  %v2793_v50 = vadd.f32 %v2788_v6, %v2779_v44  ;;  %v2794_v4 = vadd.f32 %v2790_v40, %v2780_v27  ;;  %v2907_v37 = vmul.f32 %v6572_v11, %v6207_v49 }
 0x265   : > { %1271 = vrot.lane.b32.xlu1 %v1266_v34, %s7344_s18  ;;  %v2884_v28 = vpop.permute.xlu1 %2883 }
 0x266   : > { %1269 = vrot.lane.b32.xlu0 %v1265_v9, %s7344_s18  ;;  %v2886_v5 = vpop.permute.xlu0 %2885  ;;  %v2889_v2 = vadd.f32 %v2884_v28, %v2875_v13 }
 0x267   : > { %v2890_v62 = vadd.f32 %v2886_v5, %v2876_v39 }
 0x269   : > { %v2708_v32 = vpop.permute.xlu1 %2707 }
 0x26a   : > { %v2706_v52 = vpop.permute.xlu0 %2705  ;;  %v2712_v44 = vadd.f32 %v2708_v32, %v2698_v20 }
 0x26b   : > { %v2711_v27 = vadd.f32 %v2706_v52, %v2697_v33 }
 0x26c   : > { %v2718_v54 = vadd.f32 %v2716_v18, %v2712_v44 }
 0x26d   : > { %v2717_v26 = vadd.f32 %v2715_v38, %v2711_v27  ;;  %v2804_v29 = vpop.permute.xlu1 %2803  ;;  %v1650_v27 = vmul.f32 %v6576_v47, %v6270_v43 }
 0x26e   : > { %v2802_v13 = vpop.permute.xlu0 %2801  ;;  %v2808_v23 = vadd.f32 %v2804_v29, %v2794_v4  ;;  %v6592_v14 = vadd.f32 %v2722_v22, %v2718_v54 }
 0x26f   : > { %v2807_v59 = vadd.f32 %v2802_v13, %v2793_v50  ;;  %v6594_v39 = vadd.f32 %v2721_v36, %v2717_v26  ;;  %v1649_v36 = vmul.f32 %v6580_v45, %v6270_v43  ;;  %v1740_v43 = vmul.f32 %v6316_v30, %v6457_v48 }
 0x270   : > { %v2814_v12 = vadd.f32 %v2812_v19, %v2808_v23  ;;  %v3546_v23 = vld [vmem:[#allocation2] sm:$0xff] }
 0x271   : > { %v2813_v61 = vadd.f32 %v2811_v63, %v2807_v59  ;;  %v2900_v53 = vpop.permute.xlu1 %2899  ;;  %v1739_v63 = vmul.f32 %v6572_v11, %v6457_v48  ;;  %v1683_v59 = vmul.f32 %v3546_v23, %v6165_v16  ;;  %v1746_v48 = vmul.f32 %v6576_v47, %v6471_v21 }
 0x272   : > { %v2898_v3 = vpop.permute.xlu0 %2897  ;;  %v2904_v33 = vadd.f32 %v2900_v53, %v2890_v62  ;;  %v6604_v34 = vadd.f32 %v2818_v25, %v2814_v12  ;;  %v1643_v62 = vmul.f32 %v6572_v11, %v6242_v31  ;;  %v3545_v25 = vld [vmem:[#allocation2 + $0x8] sm:$0xff] }
 0x273   : > { %v2903_v20 = vadd.f32 %v2898_v3, %v2889_v2  ;;  %v6606_v9 = vadd.f32 %v2817_v10, %v2813_v61  ;;  %v1644_v2 = vmul.f32 %v6316_v30, %v6242_v31  ;;  %v1684_v10 = vmul.f32 %v3545_v25, %v6165_v16 }
 0x274   : > { %v2910_v6 = vadd.f32 %v2908_v51, %v2904_v33  ;;  %v1645_v22 = vadd.f32 %v6220_v57, %v1643_v62  ;;  %v1741_v51 = vadd.f32 %v6454_v8, %v1739_v63 }
 0x275   : > { %v2909_v40 = vadd.f32 %v2907_v37, %v2903_v20  ;;  %v6608_v50 = vpop.permute.xlu1 %1797  ;;  %v1646_v44 = vadd.f32 %v6220_v57, %v1644_v2  ;;  %v1745_v37 = vmul.f32 %v6580_v45, %v6471_v21  ;;  %v1835_v2 = vmul.f32 %v6572_v11, %v6486_v56 }
 0x276   : > { %v6610_v4 = vpop.permute.xlu0 %1795  ;;  %v6612_v28 = vadd.f32 %v2914_v46, %v2910_v6  ;;  %v1651_v31 = vadd.f32 %v1649_v36, %v1645_v22  ;;  %v3547_v46 = vld [vmem:[#allocation2 + $0x20] sm:$0xff]  ;;  %v3548_v6 = vld [vmem:[#allocation2 + $0x18] sm:$0xff]  ;;  %v1836_v22 = vmul.f32 %v6316_v30, %v6486_v56  ;;  %v1779_v21 = vmul.f32 %v3546_v23, %v7330_v55 }
 0x277   : > { %v6614_v5 = vadd.f32 %v2913_v35, %v2909_v40  ;;  %v1652_v19 = vadd.f32 %v1650_v27, %v1646_v44  ;;  %v1690_v35 = vmul.f32 %v3547_v46, %v7322_v58  ;;  %v1689_v16 = vmul.f32 %v3548_v6, %v7322_v58 }
 0x278   : > { %v1742_v40 = vadd.f32 %v6454_v8, %v1740_v43  ;;  %v1747_v27 = vadd.f32 %v1745_v37, %v1741_v51  ;;  %v1841_v58 = vmul.f32 %v6580_v45, %v6510_v15 }
 0x279   : > { %v6616_v18 = vpop.permute.xlu1 %1893 }
 0x27a   : > { %v6618_v38 = vpop.permute.xlu0 %1891 }
 0x27d   : > { %v6624_v32 = vpop.permute.xlu1 %1811 }
 0x27e   : > { %v6626_v52 = vpop.permute.xlu0 %1809 }
 0x281   : > { %v6634_v54 = vpop.permute.xlu1 %1907 }
 0x282   : > { %v6636_v26 = vpop.permute.xlu0 %1905 }
 0x285   : > { %v1662_v29 = vpop.permute.xlu1 %1661 }
 0x286   : > { %v1660_v13 = vpop.permute.xlu0 %1659  ;;  %v1666_v12 = vadd.f32 %v1662_v29, %v1652_v19  ;;  %v1748_v29 = vadd.f32 %v1746_v48, %v1742_v40 }
 0x287   : > { %v1665_v61 = vadd.f32 %v1660_v13, %v1651_v31  ;;  %v1837_v13 = vadd.f32 %v6516_v17, %v1835_v2  ;;  %v1786_v2 = vmul.f32 %v3547_v46, %v7331_v0 }
 0x28a   : > { %v1676_v53 = vpop.permute.xlu1 %1675  ;;  %v1674_v3 = vpop.permute.xlu0 %1673 }
 0x28b   : > { %v1680_v33 = vadd.f32 %v1676_v53, %v1666_v12  ;;  %v1679_v20 = vadd.f32 %v1674_v3, %v1665_v61  ;;  %v1838_v12 = vadd.f32 %v6516_v17, %v1836_v22  ;;  %v1785_v53 = vmul.f32 %v3548_v6, %v7331_v0 }
 0x28d   : > { %v1686_v62 = vadd.f32 %v1684_v10, %v1680_v33  ;;  %v1685_v44 = vadd.f32 %v1683_v59, %v1679_v20  ;;  %v1842_v10 = vmul.f32 %v6576_v47, %v6510_v15  ;;  %v1780_v15 = vmul.f32 %v3545_v25, %v7330_v55 }
 0x28e   : > { %v1758_v36 = vpop.permute.xlu1 %1757  ;;  %v1756_v19 = vpop.permute.xlu0 %1755  ;;  %v1882_v55 = vmul.f32 %v3547_v46, %v6210_v1 }
 0x28f   : > { %v1692_v31 = vadd.f32 %v1690_v35, %v1686_v62  ;;  %v1691_v63 = vadd.f32 %v1689_v16, %v1685_v44  ;;  %v1761_v56 = vadd.f32 %v1756_v19, %v1747_v27  ;;  %v1762_v33 = vadd.f32 %v1758_v36, %v1748_v29 }
 0x290   : > { %v1876_v44 = vmul.f32 %v3545_v25, %v6207_v49 }
 0x291   : > { %v1706_v59 = vadd.f32 %v6531_v41, %v1692_v31  ;;  %v1705_v43 = vadd.f32 %v6533_v42, %v1691_v63  ;;  %v1843_v41 = vadd.f32 %v1841_v58, %v1837_v13  ;;  %v1844_v42 = vadd.f32 %v1842_v10, %v1838_v12 }
 0x292   : > { %v1852_v61 = vpop.permute.xlu1 %1851  ;;  %v1770_v51 = vpop.permute.xlu0 %1769  ;;  %v1881_v63 = vmul.f32 %v3548_v6, %v6210_v1  ;;  %v2146_v12 = vstv %s3350_s2 }
 0x293   : > { %v1775_v37 = vadd.f32 %v1770_v51, %v1761_v56  ;;  %v6667_v3 = vadd.f32 %v6557_v24, %v1706_v59  ;;  %v6670_v35 = vadd.f32 %v6559_v60, %v1705_v43  ;;  %v1875_v24 = vmul.f32 %v3546_v23, %v6207_v49 }
 0x294   : > { %v1857_v27 = vadd.f32 %v1852_v61, %v1843_v41  ;;  %v2208_v41 = vstv %s3358_s0 }
 0x295   : > { %v1781_v20 = vadd.f32 %v1779_v21, %v1775_v37  ;;  %v2152_v37 = vstv %s3351_s3 }
 0x296   : > { %v1772_v16 = vpop.permute.xlu1 %1771  ;;  %v1854_v40 = vpop.permute.xlu0 %1853 }
 0x297   : > { %v1787_v48 = vadd.f32 %v1785_v53, %v1781_v20  ;;  %v1776_v62 = vadd.f32 %v1772_v16, %v1762_v33  ;;  %v1858_v19 = vadd.f32 %v1854_v40, %v1844_v42  ;;  %v2154_v33 = vmul.f32 %v6576_v47, %v2152_v37 }
 0x299   : > { %v1801_v60 = vadd.f32 %v6610_v4, %v1787_v48  ;;  %v1782_v22 = vadd.f32 %v1780_v15, %v1776_v62  ;;  %v2209_v62 = vmul.f32 %v6580_v45, %v2208_v41 }
 0x29a   : > { %v1868_v36 = vpop.permute.xlu1 %1867  ;;  %v1866_v31 = vpop.permute.xlu0 %1865 }
 0x29b   : > { %v1788_v58 = vadd.f32 %v1786_v2, %v1782_v22  ;;  %v1872_v29 = vadd.f32 %v1868_v36, %v1858_v19  ;;  %v1871_v13 = vadd.f32 %v1866_v31, %v1857_v27  ;;  %v6680_v0 = vadd.f32 %v6626_v52, %v1801_v60 }
 0x29c   : > { %v2210_v2 = vmul.f32 %v6576_v47, %v2208_v41 }
 0x29d   : > { %v1802_v25 = vadd.f32 %v6608_v50, %v1788_v58  ;;  %v1878_v49 = vadd.f32 %v1876_v44, %v1872_v29  ;;  %v1877_v23 = vadd.f32 %v1875_v24, %v1871_v13  ;;  %v7345_v44 = vld [vmem:[#allocation31_spill] sm:$0xff] }
 0x29e   : > { %v2166_v4 = vpop.permute.xlu1 %2165  ;;  %v2164_v21 = vpop.permute.xlu0 %2163  ;;  %v2260_v24 = vmul.f32 %v6316_v30, %v7345_v44  ;;  %v2259_v27 = vmul.f32 %v6572_v11, %v7345_v44 }
 0x29f   : > { %v1884_v10 = vadd.f32 %v1882_v55, %v1878_v49  ;;  %v1883_v59 = vadd.f32 %v1881_v63, %v1877_v23  ;;  %v6684_v46 = vadd.f32 %v6624_v32, %v1802_v25  ;;  %v2148_v32 = vmul.f32 %v6316_v30, %v2146_v12 }
 0x2a0   : > { %v2262_v31 = vadd.f32 %v6516_v17, %v2260_v24  ;;  %v2266_v63 = vmul.f32 %v6576_v47, %v6117_v7 }
 0x2a1   : > { %v1898_v1 = vadd.f32 %v6616_v18, %v1884_v10  ;;  %v1897_v6 = vadd.f32 %v6618_v38, %v1883_v59  ;;  %v2147_v18 = vmul.f32 %v6572_v11, %v2146_v12  ;;  %v2202_v38 = vstv %s3357_s30 }
 0x2a2   : > { %v2222_v52 = vpop.permute.xlu1 %2221  ;;  %v2220_v43 = vpop.permute.xlu0 %2219  ;;  %v2204_v42 = vmul.f32 %v6316_v30, %v2202_v38  ;;  %v2203_v16 = vmul.f32 %v6572_v11, %v2202_v38  ;;  %v2261_v30 = vadd.f32 %v6516_v17, %v2259_v27  ;;  %v2265_v11 = vmul.f32 %v6580_v45, %v6117_v7 }
 0x2a3   : > { %v6689_v50 = vadd.f32 %v6634_v54, %v1898_v1  ;;  %v6692_v56 = vadd.f32 %v6636_v26, %v1897_v6  ;;  %v2153_v54 = vmul.f32 %v6580_v45, %v2152_v37  ;;  %v2150_v26 = vadd.f32 %v6220_v57, %v2148_v32 }
 0x2a4   : > { %v2149_v20 = vadd.f32 %v6220_v57, %v2147_v18  ;;  %v2206_v57 = vadd.f32 %v6454_v8, %v2204_v42  ;;  %v2205_v19 = vadd.f32 %v6454_v8, %v2203_v16  ;;  %v2268_v59 = vadd.f32 %v2266_v63, %v2262_v31 }
 0x2a5   : > { %v2156_v60 = vadd.f32 %v2154_v33, %v2150_v26  ;;  %v2267_v1 = vadd.f32 %v2265_v11, %v2261_v30  ;;  %v1818_v31 = vmax.f32 %v6684_v46, 0.0  ;;  %v1817_v63 = vmax.f32 %v6680_v0, 0.0 }
 0x2a6   : > { %v2278_v61 = vpop.permute.xlu1 %2277  ;;  %v2276_v51 = vpop.permute.xlu0 %2275  ;;  %v2155_v22 = vadd.f32 %v2153_v54, %v2149_v20  ;;  %v2212_v13 = vadd.f32 %v2210_v2, %v2206_v57  ;;  %v2211_v25 = vadd.f32 %v2209_v62, %v2205_v19 }
 0x2a7   : > { %v2170_v58 = vadd.f32 %v2166_v4, %v2156_v60  ;;  %v2282_v7 = vadd.f32 %v2278_v61, %v2268_v59  ;;  %v2281_v45 = vadd.f32 %v2276_v51, %v2267_v1 }
 0x2a8   : > { %v2169_v29 = vadd.f32 %v2164_v21, %v2155_v22  ;;  %v2226_v6 = vadd.f32 %v2222_v52, %v2212_v13  ;;  %v2225_v12 = vadd.f32 %v2220_v43, %v2211_v25 }
 0x2aa   : > { %v2734_v53 = vpop.permute.xlu1 %2733  ;;  %v2732_v15 = vpop.permute.xlu0 %2731 }
 0x2ab   : > { %v2738_v52 = vadd.f32 %v2734_v53, %v6592_v14  ;;  %v2737_v43 = vadd.f32 %v2732_v15, %v6594_v39 }
 0x2ae   : > { %v2830_v40 = vpop.permute.xlu1 %2829  ;;  %v2828_v48 = vpop.permute.xlu0 %2827 }
 0x2af   : > { %v2834_v62 = vadd.f32 %v2830_v40, %v6604_v34  ;;  %v2833_v44 = vadd.f32 %v2828_v48, %v6606_v9  ;;  %v1722_v34 = vmax.f32 %v6667_v3, 0.0  ;;  %v1721_v9 = vmax.f32 %v6670_v35, 0.0 }
 0x2b2   : > { %v6710_v55 = vpop.permute.xlu1 %2925 }
 0x2b3   : > { %v6712_v36 = vpop.permute.xlu0 %2923  ;;  %v2930_v35 = vadd.f32 %v6710_v55, %v6612_v28 }
 0x2b4   : > { %v2929_v11 = vadd.f32 %v6712_v36, %v6614_v5 }
 0x2b6   : > { %v2180_v49 = vpop.permute.xlu1 %2179 }
 0x2b7   : > { %v2178_v8 = vpop.permute.xlu0 %2177  ;;  %v2184_v23 = vadd.f32 %v2180_v49, %v2170_v58  ;;  %v1914_v58 = vmax.f32 %v6689_v50, 0.0 }
 0x2b8   : > { %v2183_v10 = vadd.f32 %v2178_v8, %v2169_v29  ;;  %v1913_v29 = vmax.f32 %v6692_v56, 0.0 }
 0x2b9   : > { %v2186_v32 = vmax.f32 %v2184_v23, 0.0 }
 0x2ba   : > { %v2185_v37 = vmax.f32 %v2183_v10, 0.0  ;;  %v2236_v47 = vpop.permute.xlu1 %2235 }
 0x2bb   : > { %v2234_v18 = vpop.permute.xlu0 %2233  ;;  %v2240_v17 = vadd.f32 %v2236_v47, %v2226_v6  ;;  %2191 = vrot.lane.b32.xlu1 %v2186_v32, %s7344_s18 }
 0x2bc   : > { %v2239_v38 = vadd.f32 %v2234_v18, %v2225_v12  ;;  %2189 = vrot.lane.b32.xlu0 %v2185_v37, %s7344_s18 }
 0x2bd   : > { %v2242_v4 = vmax.f32 %v2240_v17, 0.0 }
 0x2be   : > { %v2241_v21 = vmax.f32 %v2239_v38, 0.0  ;;  %v2292_v33 = vpop.permute.xlu1 %2291 }
 0x2bf   : > { %v2290_v54 = vpop.permute.xlu0 %2289  ;;  %v2296_v41 = vadd.f32 %v2292_v33, %v2282_v7  ;;  %2247 = vrot.lane.b32.xlu1 %v2242_v4, %s7344_s18 }
 0x2c0   : > { %v2295_v26 = vadd.f32 %v2290_v54, %v2281_v45  ;;  %2245 = vrot.lane.b32.xlu0 %v2241_v21, %s7344_s18 }
 0x2c1   : > { %v2298_v20 = vmax.f32 %v2296_v41, 0.0 }
 0x2c2   : > { %v2297_v42 = vmax.f32 %v2295_v26, 0.0  ;;  %v2748_v16 = vpop.permute.xlu1 %2747 }
 0x2c3   : > { %v2746_v2 = vpop.permute.xlu0 %2745  ;;  %v2752_v61 = vadd.f32 %v2748_v16, %v2738_v52  ;;  %2303 = vrot.lane.b32.xlu1 %v2298_v20, %s7344_s18 }
 0x2c4   : > { %v2751_v51 = vadd.f32 %v2746_v2, %v2737_v43  ;;  %2301 = vrot.lane.b32.xlu0 %v2297_v42, %s7344_s18 }
 0x2c5   : > { %v2754_v24 = vmax.f32 %v2752_v61, 0.0 }
 0x2c6   : > { %v2753_v27 = vmax.f32 %v2751_v51, 0.0  ;;  %v2844_v60 = vpop.permute.xlu1 %2843 }
 0x2c7   : > { %v2842_v14 = vpop.permute.xlu0 %2841  ;;  %v2848_v39 = vadd.f32 %v2844_v60, %v2834_v62  ;;  %2759 = vrot.lane.b32.xlu1 %v2754_v24, %s7344_s18 }
 0x2c8   : > { %v2847_v53 = vadd.f32 %v2842_v14, %v2833_v44  ;;  %2757 = vrot.lane.b32.xlu0 %v2753_v27, %s7344_s18 }
 0x2c9   : > { %v2850_v15 = vmax.f32 %v2848_v39, 0.0 }
 0x2ca   : > { %v2849_v22 = vmax.f32 %v2847_v53, 0.0 }
 0x2cb   : > { %v2940_v57 = vpop.permute.xlu1 %2939  ;;  %2855 = vrot.lane.b32.xlu1 %v2850_v15, %s7344_s18 }
 0x2cc   : > { %v2938_v19 = vpop.permute.xlu0 %2937  ;;  %2853 = vrot.lane.b32.xlu0 %v2849_v22, %s7344_s18  ;;  %v2944_v46 = vadd.f32 %v2940_v57, %v2930_v35 }
 0x2cd   : > { %v2943_v0 = vadd.f32 %v2938_v19, %v2929_v11 }
 0x2ce   : > { %v2946_v5 = vmax.f32 %v2944_v46, 0.0 }
 0x2cf   : > { %v1160_v40 = vpop.permute.xlu1 %1159  ;;  %1727 = vrot.lane.b32.xlu1 %v1722_v34, %s7344_s18  ;;  %v2945_v36 = vmax.f32 %v2943_v0, 0.0 }
 0x2d0   : > { %v1158_v48 = vpop.permute.xlu0 %1157  ;;  %3185 = vst.msk [vmem:[%s7082_s13 + $0x38] sm:$0xff] %vm330_vm0, %v1160_v40  ;;  %1725 = vrot.lane.b32.xlu0 %v1721_v9, %s7344_s18 }
 0x2d1   : > { %3184 = vst.msk [vmem:[%s7082_s13 + $0x30] sm:$0xff] %vm330_vm0, %v1158_v48 }
 0x2d3   : > { %v1216_v30 = vpop.permute.xlu1 %1215  ;;  %1823 = vrot.lane.b32.xlu1 %v1818_v31, %s7344_s18 }
 0x2d4   : > { %v1214_v3 = vpop.permute.xlu0 %1213  ;;  %3192 = vst.msk [vmem:[%s7082_s13 + $0x138] sm:$0xff] %vm330_vm0, %v1216_v30  ;;  %1821 = vrot.lane.b32.xlu0 %v1817_v63, %s7344_s18 }
 0x2d5   : > { %3191 = vst.msk [vmem:[%s7082_s13 + $0x130] sm:$0xff] %vm330_vm0, %v1214_v3 }
 0x2d7   : > { %v1272_v28 = vpop.permute.xlu1 %1271  ;;  %1919 = vrot.lane.b32.xlu1 %v1914_v58, %s7344_s18 }
 0x2d8   : > { %v1270_v55 = vpop.permute.xlu0 %1269  ;;  %3199 = vst.msk [vmem:[%s7082_s13 + $0x238] sm:$0xff] %vm330_vm0, %v1272_v28  ;;  %1917 = vrot.lane.b32.xlu0 %v1913_v29, %s7344_s18 }
 0x2d9   : > { %3198 = vst.msk [vmem:[%s7082_s13 + $0x230] sm:$0xff] %vm330_vm0, %v1270_v55 }
 0x2db   : > { %2951 = vrot.lane.b32.xlu1 %v2946_v5, %s7344_s18 }
 0x2dc   : > { %2949 = vrot.lane.b32.xlu0 %v2945_v36, %s7344_s18 }
 0x32d   : > { %v2192_v50 = vpop.permute.xlu1 %2191 }
 0x32e   : > { %v2190_v56 = vpop.permute.xlu0 %2189  ;;  %3355 = vst.msk [vmem:[%s7082_s13 + $0xb8] sm:$0xff] %vm330_vm0, %v2192_v50 }
 0x32f   : > { %3354 = vst.msk [vmem:[%s7082_s13 + $0xb0] sm:$0xff] %vm330_vm0, %v2190_v56 }
 0x331   : > { %v2248_v13 = vpop.permute.xlu1 %2247 }
 0x332   : > { %v2246_v25 = vpop.permute.xlu0 %2245  ;;  %3362 = vst.msk [vmem:[%s7082_s13 + $0x1b8] sm:$0xff] %vm330_vm0, %v2248_v13 }
 0x333   : > { %3361 = vst.msk [vmem:[%s7082_s13 + $0x1b0] sm:$0xff] %vm330_vm0, %v2246_v25 }
 0x335   : > { %v2304_v49 = vpop.permute.xlu1 %2303 }
 0x336   : > { %v2302_v8 = vpop.permute.xlu0 %2301  ;;  %3369 = vst.msk [vmem:[%s7082_s13 + $0x2b8] sm:$0xff] %vm330_vm0, %v2304_v49 }
 0x337   : > { %3368 = vst.msk [vmem:[%s7082_s13 + $0x2b0] sm:$0xff] %vm330_vm0, %v2302_v8 }
 0x339   : > { %v2760_v23 = vpop.permute.xlu1 %2759 }
 0x33a   : > { %v2758_v10 = vpop.permute.xlu0 %2757  ;;  %3449 = vst.msk [vmem:[%s7082_s13 + $0xf8] sm:$0xff] %vm330_vm0, %v2760_v23 }
 0x33b   : > { %3448 = vst.msk [vmem:[%s7082_s13 + $0xf0] sm:$0xff] %vm330_vm0, %v2758_v10 }
 0x33d   : > { %v2856_v59 = vpop.permute.xlu1 %2855 }
 0x33e   : > { %v2854_v1 = vpop.permute.xlu0 %2853  ;;  %3460 = vst.msk [vmem:[%s7082_s13 + $0x1f8] sm:$0xff] %vm330_vm0, %v2856_v59 }
 0x33f   : > { %3459 = vst.msk [vmem:[%s7082_s13 + $0x1f0] sm:$0xff] %vm330_vm0, %v2854_v1 }
 0x341   : > { %v1728_v6 = vpop.permute.xlu1 %1727 }
 0x342   : > { %v1726_v12 = vpop.permute.xlu0 %1725  ;;  %3279 = vst.msk [vmem:[%s7082_s13 + $0x78] sm:$0xff] %vm330_vm0, %v1728_v6 }
 0x343   : > { %3278 = vst.msk [vmem:[%s7082_s13 + $0x70] sm:$0xff] %vm330_vm0, %v1726_v12 }
 0x345   : > { %v1824_v32 = vpop.permute.xlu1 %1823 }
 0x346   : > { %v1822_v37 = vpop.permute.xlu0 %1821  ;;  %3290 = vst.msk [vmem:[%s7082_s13 + $0x178] sm:$0xff] %vm330_vm0, %v1824_v32 }
 0x347   : > { %3289 = vst.msk [vmem:[%s7082_s13 + $0x170] sm:$0xff] %vm330_vm0, %v1822_v37 }
 0x349   : > { %v1920_v47 = vpop.permute.xlu1 %1919 }
 0x34a   : > { %v1918_v18 = vpop.permute.xlu0 %1917  ;;  %3301 = vst.msk [vmem:[%s7082_s13 + $0x278] sm:$0xff] %vm330_vm0, %v1920_v47 }
 0x34b   : > { %3300 = vst.msk [vmem:[%s7082_s13 + $0x270] sm:$0xff] %vm330_vm0, %v1918_v18 }
 0x34d   : > { %v2952_v17 = vpop.permute.xlu1 %2951 }
 0x34e   : > { %v2950_v38 = vpop.permute.xlu0 %2949  ;;  %3471 = vst.msk [vmem:[%s7082_s13 + $0x2f8] sm:$0xff] %vm330_vm0, %v2952_v17 }
 0x34f   : > { %3470 = vst.msk [vmem:[%s7082_s13 + $0x2f0] sm:$0xff] %vm330_vm0, %v2950_v38 }
 0x350 PF: > { %s7346_s27 = sld [smem:[#allocation13_spill]] }
 0x356   : > { %s18_s18 = sadd.s32 1, %s7346_s27  }
 0x357   : > { %p15_p3 = scmp.ge.s32.totalorder %s18_s18, 4  }
 0x359   :  { %17 = sbr.rel (!%p15_p3) target bundleno = 10 (0xa), region = 143 }
 0x360   :  { %2979 = vsyncpa [#allocation4], 1 }
 0x361   :  { %2981 = vsyncpa [#allocation4 + $0x1], 1 }
 0x362   :  { %2982 = vsyncpa [#allocation6], 1 }
 0x363   :  { %2983 = vsyncpa [#allocation9], 1 }

</bundles_post_ra>
